<compile_context>
chip_gen: v6e
topology: v6e:2x2x1
jax: 0.10.0
libtpu: 0.0.40
codegen_flags: <defaults>
</compile_context>

<pallas_src>
import functools
import numpy as np
import jax
import jax.numpy as jnp
from jax import lax
from jax.experimental import pallas as pl
from jax.experimental.pallas import tpu as pltpu

EPS = 1e-5
_VMEM_LIMIT = 48 * 1024 * 1024     # leave headroom under v7x's 64 MiB per-TC VMEM


def _pick_tile(n, cap=128):
    for t in (512, 256, 128, 64, 32, 16, 8):
        if t <= cap and n % t == 0:
            return t
    return n


def _pick_tap_group(k, cin, max_contract=384):
    best = 1
    for t in range(1, k + 1):
        if k % t == 0 and t * cin <= max_contract:
            best = t
    return best


# ---------------------------------------------------------------------------
# Kernel 1: OctreeGroupNorm (nempty=True) + SiLU, one batch element per grid step
# ---------------------------------------------------------------------------
def _gn_silu_kernel(x_ref, m_ref, w_ref, b_ref, o_ref, *, inv_count, eps):
    x = x_ref[...].astype(jnp.float32)                        # (NPB, C)
    mask = m_ref[...]                                         # (C, C) block-diag group map
    # centered two-pass statistics (avoids E[x^2] - mean^2 cancellation)
    mean = jnp.dot(jnp.sum(x, axis=0, keepdims=True), mask,
                   preferred_element_type=jnp.float32) * inv_count
    xc = x - mean
    var = jnp.dot(jnp.sum(xc * xc, axis=0, keepdims=True), mask,
                  preferred_element_type=jnp.float32) * inv_count
    y = xc * lax.rsqrt(var + eps) * w_ref[...] + b_ref[...]
    o_ref[...] = (y * jax.nn.sigmoid(y)).astype(o_ref.dtype)  # SiLU


def octree_group_norm_silu(x, weight, bias, *, batch_size, groups, eps=EPS):
    n, c = x.shape
    npb = n // batch_size
    cg = c // groups
    gid = np.arange(c) // cg
    mask = jnp.asarray((gid[:, None] == gid[None, :]).astype(np.float32))
    inv_count = 1.0 / (float(npb * cg) + eps)                 # ocnn convention
    kernel = functools.partial(_gn_silu_kernel, inv_count=inv_count, eps=eps)
    return pl.pallas_call(
        kernel,
        out_shape=jax.ShapeDtypeStruct((n, c), jnp.float32),
        grid=(batch_size,),
        in_specs=[
            pl.BlockSpec((npb, c), lambda b: (b, 0)),
            pl.BlockSpec((c, c), lambda b: (0, 0)),
            pl.BlockSpec((1, c), lambda b: (0, 0)),
            pl.BlockSpec((1, c), lambda b: (0, 0)),
        ],
        out_specs=pl.BlockSpec((npb, c), lambda b: (b, 0)),
        compiler_params=pltpu.CompilerParams(
            dimension_semantics=("parallel",),
            vmem_limit_bytes=_VMEM_LIMIT),
    )(x, mask, weight, bias)


# ---------------------------------------------------------------------------
# Kernel 2 (primary): OctreeConv with in-kernel octree2col gather.
# grid = (node tiles,) parallel; all 27 taps processed in-kernel, grouped into
# fat MXU contractions; f32 accumulation in registers; optional fused residual
# epilogue (identity or Conv1x1 shortcut) * skip_scale.
# ---------------------------------------------------------------------------
def _gather_rows(x, idx_col2d, cin):
    # Row gather from the whole VMEM-resident x; indices are pre-sanitized so
    # promise_in_bounds is safe (no per-tap clamp/select passes).
    tn = idx_col2d.shape[0]
    idx_b = jnp.broadcast_to(idx_col2d, (tn, cin))
    return jnp.take_along_axis(x, idx_b, axis=0, mode="promise_in_bounds")


def _conv_accumulate(x_ref, n_ref, w_ref, *, k, cin, cout, tap_group):
    x = x_ref[...]                             # (N_pad, Cin) f32, full gather source
    idx = n_ref[...]                           # (TN, K) int32, pre-remapped
    tn = n_ref.shape[0]
    acc = jnp.zeros((tn, cout), jnp.float32)
    # 27-tap loop fully in-kernel, statically unrolled; taps grouped so each MXU
    # contraction is tap_group*Cin wide.
    for g in range(k // tap_group):
        pieces = []
        for t in range(tap_group):
            tap = g * tap_group + t
            pieces.append(_gather_rows(x, idx[:, tap:tap + 1], cin))
        col = pieces[0] if tap_group == 1 else jnp.concatenate(pieces, axis=1)
        wg = w_ref[pl.ds(g * tap_group * cin, tap_group * cin), :]   # (tg*Cin, Cout) bf16
        acc = acc + jnp.dot(col.astype(jnp.bfloat16), wg,
                            preferred_element_type=jnp.float32)
    return acc


def _conv_plain_kernel(x_ref, n_ref, w_ref, b_ref, o_ref, *, k, cin, cout, tap_group):
    acc = _conv_accumulate(x_ref, n_ref, w_ref, k=k, cin=cin, cout=cout,
                           tap_group=tap_group)
    o_ref[...] = (acc + b_ref[...]).astype(o_ref.dtype)


def _conv_res_id_kernel(x_ref, n_ref, w_ref, b_ref, res_ref, o_ref, *,
                        k, cin, cout, tap_group, skip_scale):
    acc = _conv_accumulate(x_ref, n_ref, w_ref, k=k, cin=cin, cout=cout,
                           tap_group=tap_group)
    h = acc + b_ref[...] + res_ref[...].astype(jnp.float32)
    o_ref[...] = (h * skip_scale).astype(o_ref.dtype)


def _conv_res_1x1_kernel(x_ref, n_ref, w_ref, b_ref, res_ref, scw_ref, scb_ref,
                         o_ref, *, k, cin, cout, tap_group, skip_scale):
    acc = _conv_accumulate(x_ref, n_ref, w_ref, k=k, cin=cin, cout=cout,
                           tap_group=tap_group)
    sc = jnp.dot(res_ref[...].astype(jnp.bfloat16), scw_ref[...],
                 preferred_element_type=jnp.float32) + scb_ref[...]
    o_ref[...] = ((acc + b_ref[...] + sc) * skip_scale).astype(o_ref.dtype)


def _octree_conv_gather(x, neigh, weight, bias, res=None, sc_w=None, sc_b=None,
                        skip_scale=1.0):
    n, cin = x.shape
    k = neigh.shape[1]
    cout = weight.shape[-1]

    # Padded zero row: empty / out-of-range neighbors gather zeros; the remap is
    # done once here (XLA-side), so the kernel does no per-tap masking at all.
    pad = 8
    n_pad = n + pad
    x_pad = jnp.concatenate(
        [x.astype(jnp.float32), jnp.zeros((pad, cin), jnp.float32)], axis=0)
    neigh_s = jnp.where((neigh < 0) | (neigh >= n), jnp.int32(n),
                        neigh).astype(jnp.int32)

    w2 = weight.reshape(k * cin, cout).astype(jnp.bfloat16)
    b2 = bias.reshape(1, cout).astype(jnp.float32)

    tn = _pick_tile(n)
    tg = _pick_tap_group(k, cin)

    in_specs = [
        pl.BlockSpec((n_pad, cin), lambda i: (0, 0)),      # whole gather source in VMEM
        pl.BlockSpec((tn, k), lambda i: (i, 0)),           # this tile's neighbor ids
        pl.BlockSpec((k * cin, cout), lambda i: (0, 0)),   # all 27 taps' weights (bf16)
        pl.BlockSpec((1, cout), lambda i: (0, 0)),         # bias
    ]
    args = [x_pad, neigh_s, w2, b2]
    kw = dict(k=k, cin=cin, cout=cout, tap_group=tg)
    if res is None:
        kernel = functools.partial(_conv_plain_kernel, **kw)
    else:
        in_specs.append(pl.BlockSpec((tn, res.shape[1]), lambda i: (i, 0)))
        args.append(res)
        if sc_w is None:                                   # identity shortcut
            kernel = functools.partial(_conv_res_id_kernel, skip_scale=skip_scale, **kw)
        else:                                              # Conv1x1 shortcut
            in_specs += [pl.BlockSpec((res.shape[1], cout), lambda i: (0, 0)),
                         pl.BlockSpec((1, cout), lambda i: (0, 0))]
            args += [sc_w.astype(jnp.bfloat16),
                     sc_b.reshape(1, cout).astype(jnp.float32)]
            kernel = functools.partial(_conv_res_1x1_kernel, skip_scale=skip_scale, **kw)

    return pl.pallas_call(
        kernel,
        out_shape=jax.ShapeDtypeStruct((n, cout), jnp.float32),
        grid=(n // tn,),
        in_specs=in_specs,
        out_specs=pl.BlockSpec((tn, cout), lambda i: (i, 0)),
        compiler_params=pltpu.CompilerParams(
            dimension_semantics=("parallel",),             # node tiles across TCs (v7x)
            vmem_limit_bytes=_VMEM_LIMIT),
    )(*args)


# ---------------------------------------------------------------------------
# Kernel 2 (fallback, correctness-only): XLA-side octree2col + tiled bf16 matmul
# kernel (+ fused residual).  Only used if the in-kernel gather does not lower.
# ---------------------------------------------------------------------------
def _mm_plain_kernel(col_ref, w_ref, b_ref, o_ref):
    acc = jnp.dot(col_ref[...], w_ref[...], preferred_element_type=jnp.float32)
    o_ref[...] = (acc + b_ref[...]).astype(o_ref.dtype)


def _mm_res_id_kernel(col_ref, w_ref, b_ref, res_ref, o_ref, *, skip_scale):
    acc = jnp.dot(col_ref[...], w_ref[...], preferred_element_type=jnp.float32) + b_ref[...]
    o_ref[...] = ((acc + res_ref[...]) * skip_scale).astype(o_ref.dtype)


def _mm_res_1x1_kernel(col_ref, w_ref, b_ref, res_ref, scw_ref, scb_ref, o_ref, *,
                       skip_scale):
    acc = jnp.dot(col_ref[...], w_ref[...], preferred_element_type=jnp.float32) + b_ref[...]
    sc = jnp.dot(res_ref[...].astype(jnp.bfloat16), scw_ref[...],
                 preferred_element_type=jnp.float32) + scb_ref[...]
    o_ref[...] = ((acc + sc) * skip_scale).astype(o_ref.dtype)


def _octree_conv_im2col(x, neigh, weight, bias, res, sc_w, sc_b, skip_scale):
    # TODO(synk): correctness-only path; materializes col[N, 27*Cin] in HBM
    # (27x the input bytes), strictly worse than the gather path on all chips.
    n, cin = x.shape
    k = neigh.shape[1]
    cout = weight.shape[-1]
    idx = jnp.clip(neigh, 0, n - 1)
    col = jnp.take(x, idx.reshape(-1), axis=0).reshape(n, k, cin)
    col = jnp.where((neigh >= 0)[..., None], col, 0.0)
    col = col.reshape(n, k * cin).astype(jnp.bfloat16)
    w2 = weight.reshape(k * cin, cout).astype(jnp.bfloat16)
    b2 = bias.reshape(1, cout).astype(jnp.float32)

    tn = _pick_tile(n, cap=512)
    in_specs = [pl.BlockSpec((tn, k * cin), lambda i: (i, 0)),
                pl.BlockSpec((k * cin, cout), lambda i: (0, 0)),
                pl.BlockSpec((1, cout), lambda i: (0, 0))]
    args = [col, w2, b2]
    if res is None:
        kernel = _mm_plain_kernel
    else:
        in_specs.append(pl.BlockSpec((tn, res.shape[1]), lambda i: (i, 0)))
        args.append(res)
        if sc_w is None:
            kernel = functools.partial(_mm_res_id_kernel, skip_scale=skip_scale)
        else:
            in_specs += [pl.BlockSpec((res.shape[1], cout), lambda i: (0, 0)),
                         pl.BlockSpec((1, cout), lambda i: (0, 0))]
            args += [sc_w.astype(jnp.bfloat16),
                     sc_b.reshape(1, cout).astype(jnp.float32)]
            kernel = functools.partial(_mm_res_1x1_kernel, skip_scale=skip_scale)

    return pl.pallas_call(
        kernel,
        out_shape=jax.ShapeDtypeStruct((n, cout), jnp.float32),
        grid=(n // tn,),
        in_specs=in_specs,
        out_specs=pl.BlockSpec((tn, cout), lambda i: (i, 0)),
        compiler_params=pltpu.CompilerParams(
            dimension_semantics=("parallel",),
            vmem_limit_bytes=_VMEM_LIMIT),
    )(*args)


# ---------------------------------------------------------------------------
# In-kernel-gather feature probe (runs once, eagerly, on tiny shapes)
# ---------------------------------------------------------------------------
_GATHER_OK = None


def _probe_gather_support():
    # TODO(synk): the broad except silently selects the 27x-HBM-traffic im2col
    # fallback; a lowering regression shows up only as a slowdown, not an error.
    try:
        n, cin, cout, k = 64, 16, 32, 27
        x = jnp.zeros((n, cin), jnp.float32)
        neigh = jnp.zeros((n, k), jnp.int32)
        w = jnp.zeros((k, cin, cout), jnp.float32)
        b = jnp.zeros((cout,), jnp.float32)
        out = _octree_conv_gather(x, neigh, w, b, None, None, None, 1.0)
        jax.block_until_ready(out)
        return True
    except Exception:
        return False


def _gather_in_kernel_ok():
    global _GATHER_OK
    if _GATHER_OK is None:
        _GATHER_OK = _probe_gather_support()
    return _GATHER_OK


def octree_conv(x, neigh, weight, bias, *, res=None, sc_w=None, sc_b=None,
                skip_scale=1.0):
    if _gather_in_kernel_ok():
        return _octree_conv_gather(x, neigh, weight, bias, res, sc_w, sc_b, skip_scale)
    return _octree_conv_im2col(x, neigh, weight, bias, res, sc_w, sc_b, skip_scale)


# ---------------------------------------------------------------------------
# ResnetBlock forward (Pallas-backed): GN1+SiLU -> conv1 -> GN2+SiLU ->
# conv2 fused with (residual [+Conv1x1 shortcut]) * skip_scale.
# ---------------------------------------------------------------------------
def resnet_block_forward(x, neigh, params, *, batch_size, groups, skip_scale=1.0):
    res = x
    h = octree_group_norm_silu(x, params["gn1_w"], params["gn1_b"],
                               batch_size=batch_size, groups=groups)
    h = octree_conv(h, neigh, params["conv1_w"], params["conv1_b"])
    # TODO(synk): fuse GN2+SiLU into conv1's epilogue (needs per-batch stats
    # across node tiles: two-pass or batch-per-tile grid).
    h = octree_group_norm_silu(h, params["gn2_w"], params["gn2_b"],
                               batch_size=batch_size, groups=groups)
    return octree_conv(h, neigh, params["conv2_w"], params["conv2_b"],
                       res=res, sc_w=params.get("sc_w"), sc_b=params.get("sc_b"),
                       skip_scale=skip_scale)


# ---------------------------------------------------------------------------
# Pure numpy reference (same semantics) for a silent correctness check
# ---------------------------------------------------------------------------
def _ref_gn_silu(x, w, b, batch_size, groups, eps=EPS):
    n, c = x.shape
    npb = n // batch_size
    cg = c // groups
    xr = x.reshape(batch_size, npb, groups, cg).astype(np.float32)
    inv_count = 1.0 / (npb * cg + eps)
    mean = xr.sum(axis=(1, 3), keepdims=True) * inv_count
    xc = xr - mean
    var = (xc * xc).sum(axis=(1, 3), keepdims=True) * inv_count
    y = (xc / np.sqrt(var + eps)).reshape(n, c) * w + b
    return y * (1.0 / (1.0 + np.exp(-y)))


def _ref_conv(x, neigh, w, b):
    col = np.where((neigh >= 0)[..., None], x[np.maximum(neigh, 0)], 0.0)
    return col.reshape(x.shape[0], -1) @ w.reshape(-1, w.shape[-1]) + b


def _ref_forward(x, neigh, params, batch_size, groups, skip_scale=1.0):
    p = {k: np.asarray(v, np.float32) for k, v in params.items()}
    xn = np.asarray(x, np.float32)
    nb = np.asarray(neigh)
    h = _ref_gn_silu(xn, p["gn1_w"], p["gn1_b"], batch_size, groups)
    h = _ref_conv(h, nb, p["conv1_w"], p["conv1_b"])
    h = _ref_gn_silu(h, p["gn2_w"], p["gn2_b"], batch_size, groups)
    h = _ref_conv(h, nb, p["conv2_w"], p["conv2_b"])
    sc = xn @ p["sc_w"] + p["sc_b"] if "sc_w" in p else xn
    return (h + sc) * skip_scale


# ---------------------------------------------------------------------------
if __name__ == "__main__":
    B = 2            # octrees in the batch
    NPB = 256        # non-empty nodes per octree (contiguous rows)
    N = B * NPB
    CIN, COUT = 16, 32
    G = 4            # groups for OctreeGroupNorm
    K = 27           # 3x3x3 octree conv neighborhood

    key = jax.random.PRNGKey(0)
    ks = jax.random.split(key, 12)

    x = jax.random.normal(ks[0], (N, CIN), jnp.float32)

    # Synthetic octree neighbor table: neighbors stay within the same octree,
    # ~30% are empty (-1), the center tap (k=13) is the node itself.
    neigh_rows = []
    for b in range(B):
        neigh_rows.append(jax.random.randint(
            jax.random.fold_in(ks[1], b), (NPB, K), b * NPB, (b + 1) * NPB))
    neigh = jnp.concatenate(neigh_rows, axis=0).astype(jnp.int32)
    drop = jax.random.bernoulli(ks[2], 0.3, (N, K))
    neigh = jnp.where(drop, -1, neigh)
    neigh = neigh.at[:, 13].set(jnp.arange(N, dtype=jnp.int32))

    wscale1 = 1.0 / np.sqrt(K * CIN)
    wscale2 = 1.0 / np.sqrt(K * COUT)
    params = {
        "gn1_w": 1.0 + 0.1 * jax.random.normal(ks[3], (1, CIN), jnp.float32),
        "gn1_b": 0.1 * jax.random.normal(ks[4], (1, CIN), jnp.float32),
        "conv1_w": wscale1 * jax.random.normal(ks[5], (K, CIN, COUT), jnp.float32),
        "conv1_b": 0.1 * jax.random.normal(ks[6], (COUT,), jnp.float32),
        "gn2_w": 1.0 + 0.1 * jax.random.normal(ks[7], (1, COUT), jnp.float32),
        "gn2_b": 0.1 * jax.random.normal(ks[8], (1, COUT), jnp.float32),
        "conv2_w": wscale2 * jax.random.normal(ks[9], (K, COUT, COUT), jnp.float32),
        "conv2_b": 0.1 * jax.random.normal(ks[10], (COUT,), jnp.float32),
        # shortcut Conv1x1 (in_channels != out_channels)
        "sc_w": (1.0 / np.sqrt(CIN)) * jax.random.normal(ks[11], (CIN, COUT), jnp.float32),
        "sc_b": jnp.zeros((COUT,), jnp.float32),
    }

    _gather_in_kernel_ok()   # resolve the in-kernel-gather probe outside jit

    fwd = jax.jit(lambda x_, n_, p_: resnet_block_forward(
        x_, n_, p_, batch_size=B, groups=G, skip_scale=1.0))
    out = fwd(x, neigh, params)
    jax.block_until_ready(out)

    ref = _ref_forward(x, neigh, params, B, G, 1.0)
    # bf16 matmul operands (f32 accumulation) across two convs -> loose tolerance
    np.testing.assert_allclose(np.asarray(out), ref, rtol=3e-2, atol=3e-2)

    print("KERNEL_OK")
</pallas_src>

<mosaic_0001>
module attributes {stable_mosaic.version = 11 : i64} {
  func.func @_conv_plain_kernel(%arg0: i32, %arg1: memref<72x16xf32, #tpu.memory_space<vmem>>, %arg2: memref<64x27xi32, #tpu.memory_space<vmem>>, %arg3: memref<432x32xbf16, #tpu.memory_space<vmem>>, %arg4: memref<1x32xf32, #tpu.memory_space<vmem>>, %arg5: memref<64x32xf32, #tpu.memory_space<vmem>>) attributes {dimension_semantics = [#tpu.dimension_semantics<parallel>], iteration_bounds = array<i64: 1>, scalar_prefetch = 0 : i64, scratch_operands = 0 : i64, tpu.core_type = #tpu.core_type<tc>, window_params = [{pipeline_mode = #tpu.pipeline_mode<synchronous>, transform_indices = @transform_0, window_bounds = array<i64: 72, 16>}, {transform_indices = @transform_1, window_bounds = array<i64: 64, 27>}, {pipeline_mode = #tpu.pipeline_mode<synchronous>, transform_indices = @transform_2, window_bounds = array<i64: 432, 32>}, {pipeline_mode = #tpu.pipeline_mode<synchronous>, transform_indices = @transform_3, window_bounds = array<i64: 1, 32>}, {transform_indices = @transform_4, window_bounds = array<i64: 64, 32>}]} {
    %c0 = arith.constant 0 : index
    %c0_0 = arith.constant 0 : index
    %0 = vector.load %arg1[%c0, %c0_0] : memref<72x16xf32, #tpu.memory_space<vmem>>, vector<72x16xf32>
    %c0_1 = arith.constant 0 : index
    %c0_2 = arith.constant 0 : index
    %1 = vector.load %arg2[%c0_1, %c0_2] : memref<64x27xi32, #tpu.memory_space<vmem>>, vector<64x27xi32>
    %cst = arith.constant 0.000000e+00 : f32
    %2 = vector.broadcast %cst : f32 to vector<64x32xf32>
    %3 = vector.extract_strided_slice %1 {offsets = [0, 0], sizes = [64, 1], strides = [1, 1]} : vector<64x27xi32> to vector<64x1xi32>
    %4 = vector.shape_cast %3 : vector<64x1xi32> to vector<64x1xi32>
    %5 = vector.broadcast %4 : vector<64x1xi32> to vector<64x16xi32>
    %6 = vector.shape_cast %5 : vector<64x16xi32> to vector<64x16x1xi32>
    %7 = vector.shape_cast %6 : vector<64x16x1xi32> to vector<64x16xi32>
    %8 = tpu.dynamic_gather %0[%7] in [0] : vector<72x16xf32>, vector<64x16xi32> -> vector<64x16xf32>
    %9 = vector.extract_strided_slice %1 {offsets = [0, 1], sizes = [64, 1], strides = [1, 1]} : vector<64x27xi32> to vector<64x1xi32>
    %10 = vector.shape_cast %9 : vector<64x1xi32> to vector<64x1xi32>
    %11 = vector.broadcast %10 : vector<64x1xi32> to vector<64x16xi32>
    %12 = vector.shape_cast %11 : vector<64x16xi32> to vector<64x16x1xi32>
    %13 = vector.shape_cast %12 : vector<64x16x1xi32> to vector<64x16xi32>
    %14 = tpu.dynamic_gather %0[%13] in [0] : vector<72x16xf32>, vector<64x16xi32> -> vector<64x16xf32>
    %15 = vector.extract_strided_slice %1 {offsets = [0, 2], sizes = [64, 1], strides = [1, 1]} : vector<64x27xi32> to vector<64x1xi32>
    %16 = vector.shape_cast %15 : vector<64x1xi32> to vector<64x1xi32>
    %17 = vector.broadcast %16 : vector<64x1xi32> to vector<64x16xi32>
    %18 = vector.shape_cast %17 : vector<64x16xi32> to vector<64x16x1xi32>
    %19 = vector.shape_cast %18 : vector<64x16x1xi32> to vector<64x16xi32>
    %20 = tpu.dynamic_gather %0[%19] in [0] : vector<72x16xf32>, vector<64x16xi32> -> vector<64x16xf32>
    %21 = vector.extract_strided_slice %1 {offsets = [0, 3], sizes = [64, 1], strides = [1, 1]} : vector<64x27xi32> to vector<64x1xi32>
    %22 = vector.shape_cast %21 : vector<64x1xi32> to vector<64x1xi32>
    %23 = vector.broadcast %22 : vector<64x1xi32> to vector<64x16xi32>
    %24 = vector.shape_cast %23 : vector<64x16xi32> to vector<64x16x1xi32>
    %25 = vector.shape_cast %24 : vector<64x16x1xi32> to vector<64x16xi32>
    %26 = tpu.dynamic_gather %0[%25] in [0] : vector<72x16xf32>, vector<64x16xi32> -> vector<64x16xf32>
    %27 = vector.extract_strided_slice %1 {offsets = [0, 4], sizes = [64, 1], strides = [1, 1]} : vector<64x27xi32> to vector<64x1xi32>
    %28 = vector.shape_cast %27 : vector<64x1xi32> to vector<64x1xi32>
    %29 = vector.broadcast %28 : vector<64x1xi32> to vector<64x16xi32>
    %30 = vector.shape_cast %29 : vector<64x16xi32> to vector<64x16x1xi32>
    %31 = vector.shape_cast %30 : vector<64x16x1xi32> to vector<64x16xi32>
    %32 = tpu.dynamic_gather %0[%31] in [0] : vector<72x16xf32>, vector<64x16xi32> -> vector<64x16xf32>
    %33 = vector.extract_strided_slice %1 {offsets = [0, 5], sizes = [64, 1], strides = [1, 1]} : vector<64x27xi32> to vector<64x1xi32>
    %34 = vector.shape_cast %33 : vector<64x1xi32> to vector<64x1xi32>
    %35 = vector.broadcast %34 : vector<64x1xi32> to vector<64x16xi32>
    %36 = vector.shape_cast %35 : vector<64x16xi32> to vector<64x16x1xi32>
    %37 = vector.shape_cast %36 : vector<64x16x1xi32> to vector<64x16xi32>
    %38 = tpu.dynamic_gather %0[%37] in [0] : vector<72x16xf32>, vector<64x16xi32> -> vector<64x16xf32>
    %39 = vector.extract_strided_slice %1 {offsets = [0, 6], sizes = [64, 1], strides = [1, 1]} : vector<64x27xi32> to vector<64x1xi32>
    %40 = vector.shape_cast %39 : vector<64x1xi32> to vector<64x1xi32>
    %41 = vector.broadcast %40 : vector<64x1xi32> to vector<64x16xi32>
    %42 = vector.shape_cast %41 : vector<64x16xi32> to vector<64x16x1xi32>
    %43 = vector.shape_cast %42 : vector<64x16x1xi32> to vector<64x16xi32>
    %44 = tpu.dynamic_gather %0[%43] in [0] : vector<72x16xf32>, vector<64x16xi32> -> vector<64x16xf32>
    %45 = vector.extract_strided_slice %1 {offsets = [0, 7], sizes = [64, 1], strides = [1, 1]} : vector<64x27xi32> to vector<64x1xi32>
    %46 = vector.shape_cast %45 : vector<64x1xi32> to vector<64x1xi32>
    %47 = vector.broadcast %46 : vector<64x1xi32> to vector<64x16xi32>
    %48 = vector.shape_cast %47 : vector<64x16xi32> to vector<64x16x1xi32>
    %49 = vector.shape_cast %48 : vector<64x16x1xi32> to vector<64x16xi32>
    %50 = tpu.dynamic_gather %0[%49] in [0] : vector<72x16xf32>, vector<64x16xi32> -> vector<64x16xf32>
    %51 = vector.extract_strided_slice %1 {offsets = [0, 8], sizes = [64, 1], strides = [1, 1]} : vector<64x27xi32> to vector<64x1xi32>
    %52 = vector.shape_cast %51 : vector<64x1xi32> to vector<64x1xi32>
    %53 = vector.broadcast %52 : vector<64x1xi32> to vector<64x16xi32>
    %54 = vector.shape_cast %53 : vector<64x16xi32> to vector<64x16x1xi32>
    %55 = vector.shape_cast %54 : vector<64x16x1xi32> to vector<64x16xi32>
    %56 = tpu.dynamic_gather %0[%55] in [0] : vector<72x16xf32>, vector<64x16xi32> -> vector<64x16xf32>
    %57 = tpu.concatenate %8, %14, %20, %26, %32, %38, %44, %50, %56 in 1 : vector<64x16xf32>, vector<64x16xf32>, vector<64x16xf32>, vector<64x16xf32>, vector<64x16xf32>, vector<64x16xf32>, vector<64x16xf32>, vector<64x16xf32>, vector<64x16xf32> -> vector<64x144xf32>
    %c0_3 = arith.constant 0 : index
    %c0_4 = arith.constant 0 : index
    %58 = vector.load %arg3[%c0_3, %c0_4] : memref<432x32xbf16, #tpu.memory_space<vmem>>, vector<144x32xbf16>
    %59 = arith.truncf %57 : vector<64x144xf32> to vector<64x144xbf16>
    %cst_5 = arith.constant dense<0.000000e+00> : vector<64x32xf32>
    %60 = tpu.matmul %59, %58, %cst_5 {dimension_numbers = #tpu.dot_dimension_numbers<[1], [0], [0], [1], [0, 0, 1, 1], [], []>} : vector<64x144xbf16>, vector<144x32xbf16>, vector<64x32xf32> -> vector<64x32xf32>
    %61 = arith.addf %2, %60 : vector<64x32xf32>
    %62 = vector.extract_strided_slice %1 {offsets = [0, 9], sizes = [64, 1], strides = [1, 1]} : vector<64x27xi32> to vector<64x1xi32>
    %63 = vector.shape_cast %62 : vector<64x1xi32> to vector<64x1xi32>
    %64 = vector.broadcast %63 : vector<64x1xi32> to vector<64x16xi32>
    %65 = vector.shape_cast %64 : vector<64x16xi32> to vector<64x16x1xi32>
    %66 = vector.shape_cast %65 : vector<64x16x1xi32> to vector<64x16xi32>
    %67 = tpu.dynamic_gather %0[%66] in [0] : vector<72x16xf32>, vector<64x16xi32> -> vector<64x16xf32>
    %68 = vector.extract_strided_slice %1 {offsets = [0, 10], sizes = [64, 1], strides = [1, 1]} : vector<64x27xi32> to vector<64x1xi32>
    %69 = vector.shape_cast %68 : vector<64x1xi32> to vector<64x1xi32>
    %70 = vector.broadcast %69 : vector<64x1xi32> to vector<64x16xi32>
    %71 = vector.shape_cast %70 : vector<64x16xi32> to vector<64x16x1xi32>
    %72 = vector.shape_cast %71 : vector<64x16x1xi32> to vector<64x16xi32>
    %73 = tpu.dynamic_gather %0[%72] in [0] : vector<72x16xf32>, vector<64x16xi32> -> vector<64x16xf32>
    %74 = vector.extract_strided_slice %1 {offsets = [0, 11], sizes = [64, 1], strides = [1, 1]} : vector<64x27xi32> to vector<64x1xi32>
    %75 = vector.shape_cast %74 : vector<64x1xi32> to vector<64x1xi32>
    %76 = vector.broadcast %75 : vector<64x1xi32> to vector<64x16xi32>
    %77 = vector.shape_cast %76 : vector<64x16xi32> to vector<64x16x1xi32>
    %78 = vector.shape_cast %77 : vector<64x16x1xi32> to vector<64x16xi32>
    %79 = tpu.dynamic_gather %0[%78] in [0] : vector<72x16xf32>, vector<64x16xi32> -> vector<64x16xf32>
    %80 = vector.extract_strided_slice %1 {offsets = [0, 12], sizes = [64, 1], strides = [1, 1]} : vector<64x27xi32> to vector<64x1xi32>
    %81 = vector.shape_cast %80 : vector<64x1xi32> to vector<64x1xi32>
    %82 = vector.broadcast %81 : vector<64x1xi32> to vector<64x16xi32>
    %83 = vector.shape_cast %82 : vector<64x16xi32> to vector<64x16x1xi32>
    %84 = vector.shape_cast %83 : vector<64x16x1xi32> to vector<64x16xi32>
    %85 = tpu.dynamic_gather %0[%84] in [0] : vector<72x16xf32>, vector<64x16xi32> -> vector<64x16xf32>
    %86 = vector.extract_strided_slice %1 {offsets = [0, 13], sizes = [64, 1], strides = [1, 1]} : vector<64x27xi32> to vector<64x1xi32>
    %87 = vector.shape_cast %86 : vector<64x1xi32> to vector<64x1xi32>
    %88 = vector.broadcast %87 : vector<64x1xi32> to vector<64x16xi32>
    %89 = vector.shape_cast %88 : vector<64x16xi32> to vector<64x16x1xi32>
    %90 = vector.shape_cast %89 : vector<64x16x1xi32> to vector<64x16xi32>
    %91 = tpu.dynamic_gather %0[%90] in [0] : vector<72x16xf32>, vector<64x16xi32> -> vector<64x16xf32>
    %92 = vector.extract_strided_slice %1 {offsets = [0, 14], sizes = [64, 1], strides = [1, 1]} : vector<64x27xi32> to vector<64x1xi32>
    %93 = vector.shape_cast %92 : vector<64x1xi32> to vector<64x1xi32>
    %94 = vector.broadcast %93 : vector<64x1xi32> to vector<64x16xi32>
    %95 = vector.shape_cast %94 : vector<64x16xi32> to vector<64x16x1xi32>
    %96 = vector.shape_cast %95 : vector<64x16x1xi32> to vector<64x16xi32>
    %97 = tpu.dynamic_gather %0[%96] in [0] : vector<72x16xf32>, vector<64x16xi32> -> vector<64x16xf32>
    %98 = vector.extract_strided_slice %1 {offsets = [0, 15], sizes = [64, 1], strides = [1, 1]} : vector<64x27xi32> to vector<64x1xi32>
    %99 = vector.shape_cast %98 : vector<64x1xi32> to vector<64x1xi32>
    %100 = vector.broadcast %99 : vector<64x1xi32> to vector<64x16xi32>
    %101 = vector.shape_cast %100 : vector<64x16xi32> to vector<64x16x1xi32>
    %102 = vector.shape_cast %101 : vector<64x16x1xi32> to vector<64x16xi32>
    %103 = tpu.dynamic_gather %0[%102] in [0] : vector<72x16xf32>, vector<64x16xi32> -> vector<64x16xf32>
    %104 = vector.extract_strided_slice %1 {offsets = [0, 16], sizes = [64, 1], strides = [1, 1]} : vector<64x27xi32> to vector<64x1xi32>
    %105 = vector.shape_cast %104 : vector<64x1xi32> to vector<64x1xi32>
    %106 = vector.broadcast %105 : vector<64x1xi32> to vector<64x16xi32>
    %107 = vector.shape_cast %106 : vector<64x16xi32> to vector<64x16x1xi32>
    %108 = vector.shape_cast %107 : vector<64x16x1xi32> to vector<64x16xi32>
    %109 = tpu.dynamic_gather %0[%108] in [0] : vector<72x16xf32>, vector<64x16xi32> -> vector<64x16xf32>
    %110 = vector.extract_strided_slice %1 {offsets = [0, 17], sizes = [64, 1], strides = [1, 1]} : vector<64x27xi32> to vector<64x1xi32>
    %111 = vector.shape_cast %110 : vector<64x1xi32> to vector<64x1xi32>
    %112 = vector.broadcast %111 : vector<64x1xi32> to vector<64x16xi32>
    %113 = vector.shape_cast %112 : vector<64x16xi32> to vector<64x16x1xi32>
    %114 = vector.shape_cast %113 : vector<64x16x1xi32> to vector<64x16xi32>
    %115 = tpu.dynamic_gather %0[%114] in [0] : vector<72x16xf32>, vector<64x16xi32> -> vector<64x16xf32>
    %116 = tpu.concatenate %67, %73, %79, %85, %91, %97, %103, %109, %115 in 1 : vector<64x16xf32>, vector<64x16xf32>, vector<64x16xf32>, vector<64x16xf32>, vector<64x16xf32>, vector<64x16xf32>, vector<64x16xf32>, vector<64x16xf32>, vector<64x16xf32> -> vector<64x144xf32>
    %c144 = arith.constant 144 : index
    %c0_6 = arith.constant 0 : index
    %117 = vector.load %arg3[%c144, %c0_6] : memref<432x32xbf16, #tpu.memory_space<vmem>>, vector<144x32xbf16>
    %118 = arith.truncf %116 : vector<64x144xf32> to vector<64x144xbf16>
    %cst_7 = arith.constant dense<0.000000e+00> : vector<64x32xf32>
    %119 = tpu.matmul %118, %117, %cst_7 {dimension_numbers = #tpu.dot_dimension_numbers<[1], [0], [0], [1], [0, 0, 1, 1], [], []>} : vector<64x144xbf16>, vector<144x32xbf16>, vector<64x32xf32> -> vector<64x32xf32>
    %120 = arith.addf %61, %119 : vector<64x32xf32>
    %121 = vector.extract_strided_slice %1 {offsets = [0, 18], sizes = [64, 1], strides = [1, 1]} : vector<64x27xi32> to vector<64x1xi32>
    %122 = vector.shape_cast %121 : vector<64x1xi32> to vector<64x1xi32>
    %123 = vector.broadcast %122 : vector<64x1xi32> to vector<64x16xi32>
    %124 = vector.shape_cast %123 : vector<64x16xi32> to vector<64x16x1xi32>
    %125 = vector.shape_cast %124 : vector<64x16x1xi32> to vector<64x16xi32>
    %126 = tpu.dynamic_gather %0[%125] in [0] : vector<72x16xf32>, vector<64x16xi32> -> vector<64x16xf32>
    %127 = vector.extract_strided_slice %1 {offsets = [0, 19], sizes = [64, 1], strides = [1, 1]} : vector<64x27xi32> to vector<64x1xi32>
    %128 = vector.shape_cast %127 : vector<64x1xi32> to vector<64x1xi32>
    %129 = vector.broadcast %128 : vector<64x1xi32> to vector<64x16xi32>
    %130 = vector.shape_cast %129 : vector<64x16xi32> to vector<64x16x1xi32>
    %131 = vector.shape_cast %130 : vector<64x16x1xi32> to vector<64x16xi32>
    %132 = tpu.dynamic_gather %0[%131] in [0] : vector<72x16xf32>, vector<64x16xi32> -> vector<64x16xf32>
    %133 = vector.extract_strided_slice %1 {offsets = [0, 20], sizes = [64, 1], strides = [1, 1]} : vector<64x27xi32> to vector<64x1xi32>
    %134 = vector.shape_cast %133 : vector<64x1xi32> to vector<64x1xi32>
    %135 = vector.broadcast %134 : vector<64x1xi32> to vector<64x16xi32>
    %136 = vector.shape_cast %135 : vector<64x16xi32> to vector<64x16x1xi32>
    %137 = vector.shape_cast %136 : vector<64x16x1xi32> to vector<64x16xi32>
    %138 = tpu.dynamic_gather %0[%137] in [0] : vector<72x16xf32>, vector<64x16xi32> -> vector<64x16xf32>
    %139 = vector.extract_strided_slice %1 {offsets = [0, 21], sizes = [64, 1], strides = [1, 1]} : vector<64x27xi32> to vector<64x1xi32>
    %140 = vector.shape_cast %139 : vector<64x1xi32> to vector<64x1xi32>
    %141 = vector.broadcast %140 : vector<64x1xi32> to vector<64x16xi32>
    %142 = vector.shape_cast %141 : vector<64x16xi32> to vector<64x16x1xi32>
    %143 = vector.shape_cast %142 : vector<64x16x1xi32> to vector<64x16xi32>
    %144 = tpu.dynamic_gather %0[%143] in [0] : vector<72x16xf32>, vector<64x16xi32> -> vector<64x16xf32>
    %145 = vector.extract_strided_slice %1 {offsets = [0, 22], sizes = [64, 1], strides = [1, 1]} : vector<64x27xi32> to vector<64x1xi32>
    %146 = vector.shape_cast %145 : vector<64x1xi32> to vector<64x1xi32>
    %147 = vector.broadcast %146 : vector<64x1xi32> to vector<64x16xi32>
    %148 = vector.shape_cast %147 : vector<64x16xi32> to vector<64x16x1xi32>
    %149 = vector.shape_cast %148 : vector<64x16x1xi32> to vector<64x16xi32>
    %150 = tpu.dynamic_gather %0[%149] in [0] : vector<72x16xf32>, vector<64x16xi32> -> vector<64x16xf32>
    %151 = vector.extract_strided_slice %1 {offsets = [0, 23], sizes = [64, 1], strides = [1, 1]} : vector<64x27xi32> to vector<64x1xi32>
    %152 = vector.shape_cast %151 : vector<64x1xi32> to vector<64x1xi32>
    %153 = vector.broadcast %152 : vector<64x1xi32> to vector<64x16xi32>
    %154 = vector.shape_cast %153 : vector<64x16xi32> to vector<64x16x1xi32>
    %155 = vector.shape_cast %154 : vector<64x16x1xi32> to vector<64x16xi32>
    %156 = tpu.dynamic_gather %0[%155] in [0] : vector<72x16xf32>, vector<64x16xi32> -> vector<64x16xf32>
    %157 = vector.extract_strided_slice %1 {offsets = [0, 24], sizes = [64, 1], strides = [1, 1]} : vector<64x27xi32> to vector<64x1xi32>
    %158 = vector.shape_cast %157 : vector<64x1xi32> to vector<64x1xi32>
    %159 = vector.broadcast %158 : vector<64x1xi32> to vector<64x16xi32>
    %160 = vector.shape_cast %159 : vector<64x16xi32> to vector<64x16x1xi32>
    %161 = vector.shape_cast %160 : vector<64x16x1xi32> to vector<64x16xi32>
    %162 = tpu.dynamic_gather %0[%161] in [0] : vector<72x16xf32>, vector<64x16xi32> -> vector<64x16xf32>
    %163 = vector.extract_strided_slice %1 {offsets = [0, 25], sizes = [64, 1], strides = [1, 1]} : vector<64x27xi32> to vector<64x1xi32>
    %164 = vector.shape_cast %163 : vector<64x1xi32> to vector<64x1xi32>
    %165 = vector.broadcast %164 : vector<64x1xi32> to vector<64x16xi32>
    %166 = vector.shape_cast %165 : vector<64x16xi32> to vector<64x16x1xi32>
    %167 = vector.shape_cast %166 : vector<64x16x1xi32> to vector<64x16xi32>
    %168 = tpu.dynamic_gather %0[%167] in [0] : vector<72x16xf32>, vector<64x16xi32> -> vector<64x16xf32>
    %169 = vector.extract_strided_slice %1 {offsets = [0, 26], sizes = [64, 1], strides = [1, 1]} : vector<64x27xi32> to vector<64x1xi32>
    %170 = vector.shape_cast %169 : vector<64x1xi32> to vector<64x1xi32>
    %171 = vector.broadcast %170 : vector<64x1xi32> to vector<64x16xi32>
    %172 = vector.shape_cast %171 : vector<64x16xi32> to vector<64x16x1xi32>
    %173 = vector.shape_cast %172 : vector<64x16x1xi32> to vector<64x16xi32>
    %174 = tpu.dynamic_gather %0[%173] in [0] : vector<72x16xf32>, vector<64x16xi32> -> vector<64x16xf32>
    %175 = tpu.concatenate %126, %132, %138, %144, %150, %156, %162, %168, %174 in 1 : vector<64x16xf32>, vector<64x16xf32>, vector<64x16xf32>, vector<64x16xf32>, vector<64x16xf32>, vector<64x16xf32>, vector<64x16xf32>, vector<64x16xf32>, vector<64x16xf32> -> vector<64x144xf32>
    %c288 = arith.constant 288 : index
    %c0_8 = arith.constant 0 : index
    %176 = vector.load %arg3[%c288, %c0_8] : memref<432x32xbf16, #tpu.memory_space<vmem>>, vector<144x32xbf16>
    %177 = arith.truncf %175 : vector<64x144xf32> to vector<64x144xbf16>
    %cst_9 = arith.constant dense<0.000000e+00> : vector<64x32xf32>
    %178 = tpu.matmul %177, %176, %cst_9 {dimension_numbers = #tpu.dot_dimension_numbers<[1], [0], [0], [1], [0, 0, 1, 1], [], []>} : vector<64x144xbf16>, vector<144x32xbf16>, vector<64x32xf32> -> vector<64x32xf32>
    %179 = arith.addf %120, %178 : vector<64x32xf32>
    %c0_10 = arith.constant 0 : index
    %c0_11 = arith.constant 0 : index
    %180 = vector.load %arg4[%c0_10, %c0_11] : memref<1x32xf32, #tpu.memory_space<vmem>>, vector<1x32xf32>
    %181 = vector.broadcast %180 : vector<1x32xf32> to vector<64x32xf32>
    %182 = arith.addf %179, %181 : vector<64x32xf32>
    %c0_12 = arith.constant 0 : index
    %c0_13 = arith.constant 0 : index
    %183 = vector.load %arg5[%c0_12, %c0_13] : memref<64x32xf32, #tpu.memory_space<vmem>>, vector<64x32xf32>
    tpu.vector_store %arg5[%c0_12, %c0_13], %182 {strides = array<i32>} : memref<64x32xf32, #tpu.memory_space<vmem>>, vector<64x32xf32>,
    return
  }
  func.func @transform_0(%arg0: i32) -> (i32, i32) {
    %c0_i32 = arith.constant 0 : i32
    %c0_i32_0 = arith.constant 0 : i32
    %c0_i32_1 = arith.constant 0 : i32
    return %c0_i32, %c0_i32_0 : i32, i32
  }
  func.func @transform_1(%arg0: i32) -> (i32, i32) {
    %c0_i32 = arith.constant 0 : i32
    %c0_i32_0 = arith.constant 0 : i32
    return %arg0, %c0_i32 : i32, i32
  }
  func.func @transform_2(%arg0: i32) -> (i32, i32) {
    %c0_i32 = arith.constant 0 : i32
    %c0_i32_0 = arith.constant 0 : i32
    %c0_i32_1 = arith.constant 0 : i32
    return %c0_i32, %c0_i32_0 : i32, i32
  }
  func.func @transform_3(%arg0: i32) -> (i32, i32) {
    %c0_i32 = arith.constant 0 : i32
    %c0_i32_0 = arith.constant 0 : i32
    %c0_i32_1 = arith.constant 0 : i32
    return %c0_i32, %c0_i32_0 : i32, i32
  }
  func.func @transform_4(%arg0: i32) -> (i32, i32) {
    %c0_i32 = arith.constant 0 : i32
    %c0_i32_0 = arith.constant 0 : i32
    return %arg0, %c0_i32 : i32, i32
  }
}

module attributes {stable_mosaic.version = 11 : i64} {
  func.func @_gn_silu_kernel(%arg0: i32, %arg1: memref<256x16xf32, #tpu.memory_space<vmem>>, %arg2: memref<16x16xf32, #tpu.memory_space<vmem>>, %arg3: memref<1x16xf32, #tpu.memory_space<vmem>>, %arg4: memref<1x16xf32, #tpu.memory_space<vmem>>, %arg5: memref<256x16xf32, #tpu.memory_space<vmem>>) attributes {dimension_semantics = [#tpu.dimension_semantics<parallel>], iteration_bounds = array<i64: 2>, scalar_prefetch = 0 : i64, scratch_operands = 0 : i64, tpu.core_type = #tpu.core_type<tc>, window_params = [{transform_indices = @transform_0, window_bounds = array<i64: 256, 16>}, {pipeline_mode = #tpu.pipeline_mode<synchronous>, transform_indices = @transform_1, window_bounds = array<i64: 16, 16>}, {pipeline_mode = #tpu.pipeline_mode<synchronous>, transform_indices = @transform_2, window_bounds = array<i64: 1, 16>}, {pipeline_mode = #tpu.pipeline_mode<synchronous>, transform_indices = @transform_3, window_bounds = array<i64: 1, 16>}, {transform_indices = @transform_4, window_bounds = array<i64: 256, 16>}]} {
    %c0 = arith.constant 0 : index
    %c0_0 = arith.constant 0 : index
    %0 = vector.load %arg1[%c0, %c0_0] : memref<256x16xf32, #tpu.memory_space<vmem>>, vector<256x16xf32>
    %c0_1 = arith.constant 0 : index
    %c0_2 = arith.constant 0 : index
    %1 = vector.load %arg2[%c0_1, %c0_2] : memref<16x16xf32, #tpu.memory_space<vmem>>, vector<16x16xf32>
    %cst = arith.constant dense<0.000000e+00> : vector<16xf32>
    %2 = vector.multi_reduction <add>, %0, %cst [0] : vector<256x16xf32> to vector<16xf32>
    %3 = vector.shape_cast %2 : vector<16xf32> to vector<1x16xf32>
    %cst_3 = arith.constant dense<0.000000e+00> : vector<1x16xf32>
    %4 = tpu.matmul %3, %1, %cst_3 {dimension_numbers = #tpu.dot_dimension_numbers<[1], [0], [0], [1], [0, 0, 1, 1], [], []>} : vector<1x16xf32>, vector<16x16xf32>, vector<1x16xf32> -> vector<1x16xf32>
    %cst_4 = arith.constant 9.765625E-4 : f32
    %5 = vector.broadcast %cst_4 : f32 to vector<1x16xf32>
    %6 = arith.mulf %4, %5 : vector<1x16xf32>
    %7 = vector.broadcast %6 : vector<1x16xf32> to vector<256x16xf32>
    %8 = arith.subf %0, %7 : vector<256x16xf32>
    %9 = arith.mulf %8, %8 : vector<256x16xf32>
    %cst_5 = arith.constant dense<0.000000e+00> : vector<16xf32>
    %10 = vector.multi_reduction <add>, %9, %cst_5 [0] : vector<256x16xf32> to vector<16xf32>
    %11 = vector.shape_cast %10 : vector<16xf32> to vector<1x16xf32>
    %cst_6 = arith.constant dense<0.000000e+00> : vector<1x16xf32>
    %12 = tpu.matmul %11, %1, %cst_6 {dimension_numbers = #tpu.dot_dimension_numbers<[1], [0], [0], [1], [0, 0, 1, 1], [], []>} : vector<1x16xf32>, vector<16x16xf32>, vector<1x16xf32> -> vector<1x16xf32>
    %cst_7 = arith.constant 9.765625E-4 : f32
    %13 = vector.broadcast %cst_7 : f32 to vector<1x16xf32>
    %14 = arith.mulf %12, %13 : vector<1x16xf32>
    %cst_8 = arith.constant 9.99999974E-6 : f32
    %15 = vector.broadcast %cst_8 : f32 to vector<1x16xf32>
    %16 = arith.addf %14, %15 : vector<1x16xf32>
    %17 = math.rsqrt %16 : vector<1x16xf32>
    %18 = vector.broadcast %17 : vector<1x16xf32> to vector<256x16xf32>
    %19 = arith.mulf %8, %18 : vector<256x16xf32>
    %c0_9 = arith.constant 0 : index
    %c0_10 = arith.constant 0 : index
    %20 = vector.load %arg3[%c0_9, %c0_10] : memref<1x16xf32, #tpu.memory_space<vmem>>, vector<1x16xf32>
    %21 = vector.broadcast %20 : vector<1x16xf32> to vector<256x16xf32>
    %22 = arith.mulf %19, %21 : vector<256x16xf32>
    %c0_11 = arith.constant 0 : index
    %c0_12 = arith.constant 0 : index
    %23 = vector.load %arg4[%c0_11, %c0_12] : memref<1x16xf32, #tpu.memory_space<vmem>>, vector<1x16xf32>
    %24 = vector.broadcast %23 : vector<1x16xf32> to vector<256x16xf32>
    %25 = arith.addf %22, %24 : vector<256x16xf32>
    %26 = arith.negf %25 : vector<256x16xf32>
    %27 = math.exp %26 : vector<256x16xf32>
    %cst_13 = arith.constant 1.000000e+00 : f32
    %28 = vector.broadcast %cst_13 : f32 to vector<256x16xf32>
    %29 = arith.addf %28, %27 : vector<256x16xf32>
    %30 = arith.divf %28, %29 : vector<256x16xf32>
    %31 = arith.mulf %25, %30 : vector<256x16xf32>
    %c0_14 = arith.constant 0 : index
    %c0_15 = arith.constant 0 : index
    %32 = vector.load %arg5[%c0_14, %c0_15] : memref<256x16xf32, #tpu.memory_space<vmem>>, vector<256x16xf32>
    tpu.vector_store %arg5[%c0_14, %c0_15], %31 {strides = array<i32>} : memref<256x16xf32, #tpu.memory_space<vmem>>, vector<256x16xf32>,
    return
  }
  func.func @transform_0(%arg0: i32) -> (i32, i32) {
    %c0_i32 = arith.constant 0 : i32
    %c0_i32_0 = arith.constant 0 : i32
    return %arg0, %c0_i32 : i32, i32
  }
  func.func @transform_1(%arg0: i32) -> (i32, i32) {
    %c0_i32 = arith.constant 0 : i32
    %c0_i32_0 = arith.constant 0 : i32
    %c0_i32_1 = arith.constant 0 : i32
    return %c0_i32, %c0_i32_0 : i32, i32
  }
  func.func @transform_2(%arg0: i32) -> (i32, i32) {
    %c0_i32 = arith.constant 0 : i32
    %c0_i32_0 = arith.constant 0 : i32
    %c0_i32_1 = arith.constant 0 : i32
    return %c0_i32, %c0_i32_0 : i32, i32
  }
  func.func @transform_3(%arg0: i32) -> (i32, i32) {
    %c0_i32 = arith.constant 0 : i32
    %c0_i32_0 = arith.constant 0 : i32
    %c0_i32_1 = arith.constant 0 : i32
    return %c0_i32, %c0_i32_0 : i32, i32
  }
  func.func @transform_4(%arg0: i32) -> (i32, i32) {
    %c0_i32 = arith.constant 0 : i32
    %c0_i32_0 = arith.constant 0 : i32
    return %arg0, %c0_i32 : i32, i32
  }
}

module attributes {stable_mosaic.version = 11 : i64} {
  func.func @_mm_plain_kernel(%arg0: i32, %arg1: memref<512x432xbf16, #tpu.memory_space<vmem>>, %arg2: memref<432x32xbf16, #tpu.memory_space<vmem>>, %arg3: memref<1x32xf32, #tpu.memory_space<vmem>>, %arg4: memref<512x32xf32, #tpu.memory_space<vmem>>) attributes {dimension_semantics = [#tpu.dimension_semantics<parallel>], iteration_bounds = array<i64: 1>, scalar_prefetch = 0 : i64, scratch_operands = 0 : i64, tpu.core_type = #tpu.core_type<tc>, window_params = [{transform_indices = @transform_0, window_bounds = array<i64: 512, 432>}, {pipeline_mode = #tpu.pipeline_mode<synchronous>, transform_indices = @transform_1, window_bounds = array<i64: 432, 32>}, {pipeline_mode = #tpu.pipeline_mode<synchronous>, transform_indices = @transform_2, window_bounds = array<i64: 1, 32>}, {transform_indices = @transform_3, window_bounds = array<i64: 512, 32>}]} {
    %c0 = arith.constant 0 : index
    %c0_0 = arith.constant 0 : index
    %0 = vector.load %arg1[%c0, %c0_0] : memref<512x432xbf16, #tpu.memory_space<vmem>>, vector<512x432xbf16>
    %c0_1 = arith.constant 0 : index
    %c0_2 = arith.constant 0 : index
    %1 = vector.load %arg2[%c0_1, %c0_2] : memref<432x32xbf16, #tpu.memory_space<vmem>>, vector<432x32xbf16>
    %cst = arith.constant dense<0.000000e+00> : vector<512x32xf32>
    %2 = tpu.matmul %0, %1, %cst {dimension_numbers = #tpu.dot_dimension_numbers<[1], [0], [0], [1], [0, 0, 1, 1], [], []>} : vector<512x432xbf16>, vector<432x32xbf16>, vector<512x32xf32> -> vector<512x32xf32>
    %c0_3 = arith.constant 0 : index
    %c0_4 = arith.constant 0 : index
    %3 = vector.load %arg3[%c0_3, %c0_4] : memref<1x32xf32, #tpu.memory_space<vmem>>, vector<1x32xf32>
    %4 = vector.broadcast %3 : vector<1x32xf32> to vector<512x32xf32>
    %5 = arith.addf %2, %4 : vector<512x32xf32>
    %c0_5 = arith.constant 0 : index
    %c0_6 = arith.constant 0 : index
    %6 = vector.load %arg4[%c0_5, %c0_6] : memref<512x32xf32, #tpu.memory_space<vmem>>, vector<512x32xf32>
    tpu.vector_store %arg4[%c0_5, %c0_6], %5 {strides = array<i32>} : memref<512x32xf32, #tpu.memory_space<vmem>>, vector<512x32xf32>,
    return
  }
  func.func @transform_0(%arg0: i32) -> (i32, i32) {
    %c0_i32 = arith.constant 0 : i32
    %c0_i32_0 = arith.constant 0 : i32
    return %arg0, %c0_i32 : i32, i32
  }
  func.func @transform_1(%arg0: i32) -> (i32, i32) {
    %c0_i32 = arith.constant 0 : i32
    %c0_i32_0 = arith.constant 0 : i32
    %c0_i32_1 = arith.constant 0 : i32
    return %c0_i32, %c0_i32_0 : i32, i32
  }
  func.func @transform_2(%arg0: i32) -> (i32, i32) {
    %c0_i32 = arith.constant 0 : i32
    %c0_i32_0 = arith.constant 0 : i32
    %c0_i32_1 = arith.constant 0 : i32
    return %c0_i32, %c0_i32_0 : i32, i32
  }
  func.func @transform_3(%arg0: i32) -> (i32, i32) {
    %c0_i32 = arith.constant 0 : i32
    %c0_i32_0 = arith.constant 0 : i32
    return %arg0, %c0_i32 : i32, i32
  }
}

module attributes {stable_mosaic.version = 11 : i64} {
  func.func @_gn_silu_kernel(%arg0: i32, %arg1: memref<256x32xf32, #tpu.memory_space<vmem>>, %arg2: memref<32x32xf32, #tpu.memory_space<vmem>>, %arg3: memref<1x32xf32, #tpu.memory_space<vmem>>, %arg4: memref<1x32xf32, #tpu.memory_space<vmem>>, %arg5: memref<256x32xf32, #tpu.memory_space<vmem>>) attributes {dimension_semantics = [#tpu.dimension_semantics<parallel>], iteration_bounds = array<i64: 2>, scalar_prefetch = 0 : i64, scratch_operands = 0 : i64, tpu.core_type = #tpu.core_type<tc>, window_params = [{transform_indices = @transform_0, window_bounds = array<i64: 256, 32>}, {pipeline_mode = #tpu.pipeline_mode<synchronous>, transform_indices = @transform_1, window_bounds = array<i64: 32, 32>}, {pipeline_mode = #tpu.pipeline_mode<synchronous>, transform_indices = @transform_2, window_bounds = array<i64: 1, 32>}, {pipeline_mode = #tpu.pipeline_mode<synchronous>, transform_indices = @transform_3, window_bounds = array<i64: 1, 32>}, {transform_indices = @transform_4, window_bounds = array<i64: 256, 32>}]} {
    %c0 = arith.constant 0 : index
    %c0_0 = arith.constant 0 : index
    %0 = vector.load %arg1[%c0, %c0_0] : memref<256x32xf32, #tpu.memory_space<vmem>>, vector<256x32xf32>
    %c0_1 = arith.constant 0 : index
    %c0_2 = arith.constant 0 : index
    %1 = vector.load %arg2[%c0_1, %c0_2] : memref<32x32xf32, #tpu.memory_space<vmem>>, vector<32x32xf32>
    %cst = arith.constant dense<0.000000e+00> : vector<32xf32>
    %2 = vector.multi_reduction <add>, %0, %cst [0] : vector<256x32xf32> to vector<32xf32>
    %3 = vector.shape_cast %2 : vector<32xf32> to vector<1x32xf32>
    %cst_3 = arith.constant dense<0.000000e+00> : vector<1x32xf32>
    %4 = tpu.matmul %3, %1, %cst_3 {dimension_numbers = #tpu.dot_dimension_numbers<[1], [0], [0], [1], [0, 0, 1, 1], [], []>} : vector<1x32xf32>, vector<32x32xf32>, vector<1x32xf32> -> vector<1x32xf32>
    %cst_4 = arith.constant 4.8828125E-4 : f32
    %5 = vector.broadcast %cst_4 : f32 to vector<1x32xf32>
    %6 = arith.mulf %4, %5 : vector<1x32xf32>
    %7 = vector.broadcast %6 : vector<1x32xf32> to vector<256x32xf32>
    %8 = arith.subf %0, %7 : vector<256x32xf32>
    %9 = arith.mulf %8, %8 : vector<256x32xf32>
    %cst_5 = arith.constant dense<0.000000e+00> : vector<32xf32>
    %10 = vector.multi_reduction <add>, %9, %cst_5 [0] : vector<256x32xf32> to vector<32xf32>
    %11 = vector.shape_cast %10 : vector<32xf32> to vector<1x32xf32>
    %cst_6 = arith.constant dense<0.000000e+00> : vector<1x32xf32>
    %12 = tpu.matmul %11, %1, %cst_6 {dimension_numbers = #tpu.dot_dimension_numbers<[1], [0], [0], [1], [0, 0, 1, 1], [], []>} : vector<1x32xf32>, vector<32x32xf32>, vector<1x32xf32> -> vector<1x32xf32>
    %cst_7 = arith.constant 4.8828125E-4 : f32
    %13 = vector.broadcast %cst_7 : f32 to vector<1x32xf32>
    %14 = arith.mulf %12, %13 : vector<1x32xf32>
    %cst_8 = arith.constant 9.99999974E-6 : f32
    %15 = vector.broadcast %cst_8 : f32 to vector<1x32xf32>
    %16 = arith.addf %14, %15 : vector<1x32xf32>
    %17 = math.rsqrt %16 : vector<1x32xf32>
    %18 = vector.broadcast %17 : vector<1x32xf32> to vector<256x32xf32>
    %19 = arith.mulf %8, %18 : vector<256x32xf32>
    %c0_9 = arith.constant 0 : index
    %c0_10 = arith.constant 0 : index
    %20 = vector.load %arg3[%c0_9, %c0_10] : memref<1x32xf32, #tpu.memory_space<vmem>>, vector<1x32xf32>
    %21 = vector.broadcast %20 : vector<1x32xf32> to vector<256x32xf32>
    %22 = arith.mulf %19, %21 : vector<256x32xf32>
    %c0_11 = arith.constant 0 : index
    %c0_12 = arith.constant 0 : index
    %23 = vector.load %arg4[%c0_11, %c0_12] : memref<1x32xf32, #tpu.memory_space<vmem>>, vector<1x32xf32>
    %24 = vector.broadcast %23 : vector<1x32xf32> to vector<256x32xf32>
    %25 = arith.addf %22, %24 : vector<256x32xf32>
    %26 = arith.negf %25 : vector<256x32xf32>
    %27 = math.exp %26 : vector<256x32xf32>
    %cst_13 = arith.constant 1.000000e+00 : f32
    %28 = vector.broadcast %cst_13 : f32 to vector<256x32xf32>
    %29 = arith.addf %28, %27 : vector<256x32xf32>
    %30 = arith.divf %28, %29 : vector<256x32xf32>
    %31 = arith.mulf %25, %30 : vector<256x32xf32>
    %c0_14 = arith.constant 0 : index
    %c0_15 = arith.constant 0 : index
    %32 = vector.load %arg5[%c0_14, %c0_15] : memref<256x32xf32, #tpu.memory_space<vmem>>, vector<256x32xf32>
    tpu.vector_store %arg5[%c0_14, %c0_15], %31 {strides = array<i32>} : memref<256x32xf32, #tpu.memory_space<vmem>>, vector<256x32xf32>,
    return
  }
  func.func @transform_0(%arg0: i32) -> (i32, i32) {
    %c0_i32 = arith.constant 0 : i32
    %c0_i32_0 = arith.constant 0 : i32
    return %arg0, %c0_i32 : i32, i32
  }
  func.func @transform_1(%arg0: i32) -> (i32, i32) {
    %c0_i32 = arith.constant 0 : i32
    %c0_i32_0 = arith.constant 0 : i32
    %c0_i32_1 = arith.constant 0 : i32
    return %c0_i32, %c0_i32_0 : i32, i32
  }
  func.func @transform_2(%arg0: i32) -> (i32, i32) {
    %c0_i32 = arith.constant 0 : i32
    %c0_i32_0 = arith.constant 0 : i32
    %c0_i32_1 = arith.constant 0 : i32
    return %c0_i32, %c0_i32_0 : i32, i32
  }
  func.func @transform_3(%arg0: i32) -> (i32, i32) {
    %c0_i32 = arith.constant 0 : i32
    %c0_i32_0 = arith.constant 0 : i32
    %c0_i32_1 = arith.constant 0 : i32
    return %c0_i32, %c0_i32_0 : i32, i32
  }
  func.func @transform_4(%arg0: i32) -> (i32, i32) {
    %c0_i32 = arith.constant 0 : i32
    %c0_i32_0 = arith.constant 0 : i32
    return %arg0, %c0_i32 : i32, i32
  }
}

module attributes {stable_mosaic.version = 11 : i64} {
  func.func @_mm_res_1x1_kernel(%arg0: i32, %arg1: memref<512x864xbf16, #tpu.memory_space<vmem>>, %arg2: memref<864x32xbf16, #tpu.memory_space<vmem>>, %arg3: memref<1x32xf32, #tpu.memory_space<vmem>>, %arg4: memref<512x16xf32, #tpu.memory_space<vmem>>, %arg5: memref<16x32xbf16, #tpu.memory_space<vmem>>, %arg6: memref<1x32xf32, #tpu.memory_space<vmem>>, %arg7: memref<512x32xf32, #tpu.memory_space<vmem>>) attributes {dimension_semantics = [#tpu.dimension_semantics<parallel>], iteration_bounds = array<i64: 1>, scalar_prefetch = 0 : i64, scratch_operands = 0 : i64, tpu.core_type = #tpu.core_type<tc>, window_params = [{transform_indices = @transform_0, window_bounds = array<i64: 512, 864>}, {pipeline_mode = #tpu.pipeline_mode<synchronous>, transform_indices = @transform_1, window_bounds = array<i64: 864, 32>}, {pipeline_mode = #tpu.pipeline_mode<synchronous>, transform_indices = @transform_2, window_bounds = array<i64: 1, 32>}, {transform_indices = @transform_3, window_bounds = array<i64: 512, 16>}, {pipeline_mode = #tpu.pipeline_mode<synchronous>, transform_indices = @transform_4, window_bounds = array<i64: 16, 32>}, {pipeline_mode = #tpu.pipeline_mode<synchronous>, transform_indices = @transform_5, window_bounds = array<i64: 1, 32>}, {transform_indices = @transform_6, window_bounds = array<i64: 512, 32>}]} {
    %c0 = arith.constant 0 : index
    %c0_0 = arith.constant 0 : index
    %0 = vector.load %arg1[%c0, %c0_0] : memref<512x864xbf16, #tpu.memory_space<vmem>>, vector<512x864xbf16>
    %c0_1 = arith.constant 0 : index
    %c0_2 = arith.constant 0 : index
    %1 = vector.load %arg2[%c0_1, %c0_2] : memref<864x32xbf16, #tpu.memory_space<vmem>>, vector<864x32xbf16>
    %cst = arith.constant dense<0.000000e+00> : vector<512x32xf32>
    %2 = tpu.matmul %0, %1, %cst {dimension_numbers = #tpu.dot_dimension_numbers<[1], [0], [0], [1], [0, 0, 1, 1], [], []>} : vector<512x864xbf16>, vector<864x32xbf16>, vector<512x32xf32> -> vector<512x32xf32>
    %c0_3 = arith.constant 0 : index
    %c0_4 = arith.constant 0 : index
    %3 = vector.load %arg3[%c0_3, %c0_4] : memref<1x32xf32, #tpu.memory_space<vmem>>, vector<1x32xf32>
    %4 = vector.broadcast %3 : vector<1x32xf32> to vector<512x32xf32>
    %5 = arith.addf %2, %4 : vector<512x32xf32>
    %c0_5 = arith.constant 0 : index
    %c0_6 = arith.constant 0 : index
    %6 = vector.load %arg4[%c0_5, %c0_6] : memref<512x16xf32, #tpu.memory_space<vmem>>, vector<512x16xf32>
    %7 = arith.truncf %6 : vector<512x16xf32> to vector<512x16xbf16>
    %c0_7 = arith.constant 0 : index
    %c0_8 = arith.constant 0 : index
    %8 = vector.load %arg5[%c0_7, %c0_8] : memref<16x32xbf16, #tpu.memory_space<vmem>>, vector<16x32xbf16>
    %cst_9 = arith.constant dense<0.000000e+00> : vector<512x32xf32>
    %9 = tpu.matmul %7, %8, %cst_9 {dimension_numbers = #tpu.dot_dimension_numbers<[1], [0], [0], [1], [0, 0, 1, 1], [], []>} : vector<512x16xbf16>, vector<16x32xbf16>, vector<512x32xf32> -> vector<512x32xf32>
    %c0_10 = arith.constant 0 : index
    %c0_11 = arith.constant 0 : index
    %10 = vector.load %arg6[%c0_10, %c0_11] : memref<1x32xf32, #tpu.memory_space<vmem>>, vector<1x32xf32>
    %11 = vector.broadcast %10 : vector<1x32xf32> to vector<512x32xf32>
    %12 = arith.addf %9, %11 : vector<512x32xf32>
    %13 = arith.addf %5, %12 : vector<512x32xf32>
    %cst_12 = arith.constant 1.000000e+00 : f32
    %14 = vector.broadcast %cst_12 : f32 to vector<512x32xf32>
    %15 = arith.mulf %13, %14 : vector<512x32xf32>
    %c0_13 = arith.constant 0 : index
    %c0_14 = arith.constant 0 : index
    %16 = vector.load %arg7[%c0_13, %c0_14] : memref<512x32xf32, #tpu.memory_space<vmem>>, vector<512x32xf32>
    tpu.vector_store %arg7[%c0_13, %c0_14], %15 {strides = array<i32>} : memref<512x32xf32, #tpu.memory_space<vmem>>, vector<512x32xf32>,
    return
  }
  func.func @transform_0(%arg0: i32) -> (i32, i32) {
    %c0_i32 = arith.constant 0 : i32
    %c0_i32_0 = arith.constant 0 : i32
    return %arg0, %c0_i32 : i32, i32
  }
  func.func @transform_1(%arg0: i32) -> (i32, i32) {
    %c0_i32 = arith.constant 0 : i32
    %c0_i32_0 = arith.constant 0 : i32
    %c0_i32_1 = arith.constant 0 : i32
    return %c0_i32, %c0_i32_0 : i32, i32
  }
  func.func @transform_2(%arg0: i32) -> (i32, i32) {
    %c0_i32 = arith.constant 0 : i32
    %c0_i32_0 = arith.constant 0 : i32
    %c0_i32_1 = arith.constant 0 : i32
    return %c0_i32, %c0_i32_0 : i32, i32
  }
  func.func @transform_3(%arg0: i32) -> (i32, i32) {
    %c0_i32 = arith.constant 0 : i32
    %c0_i32_0 = arith.constant 0 : i32
    return %arg0, %c0_i32 : i32, i32
  }
  func.func @transform_4(%arg0: i32) -> (i32, i32) {
    %c0_i32 = arith.constant 0 : i32
    %c0_i32_0 = arith.constant 0 : i32
    %c0_i32_1 = arith.constant 0 : i32
    return %c0_i32, %c0_i32_0 : i32, i32
  }
  func.func @transform_5(%arg0: i32) -> (i32, i32) {
    %c0_i32 = arith.constant 0 : i32
    %c0_i32_0 = arith.constant 0 : i32
    %c0_i32_1 = arith.constant 0 : i32
    return %c0_i32, %c0_i32_0 : i32, i32
  }
  func.func @transform_6(%arg0: i32) -> (i32, i32) {
    %c0_i32 = arith.constant 0 : i32
    %c0_i32_0 = arith.constant 0 : i32
    return %arg0, %c0_i32 : i32, i32
  }
}

</mosaic_0001>

<bundles_post_ra>
// kernel: _lambda_.4
= control target key start
LH: loop header
LB: loop body
LE: loop exit
PB: predicated region body
PF: predicated region fallthrough
CT: control target
= control target key end

     0   :  { %9 = vsyncpa [#allocation3], 0  ;;  %s2294_s0 = inlined_call_operand.vmem [shape: f32[512,16], index: 0, kind: input, shape index: {}]   ;;  %s2295_s1 = inlined_call_operand.hbm [shape: f32[16,16], index: 1, kind: input, shape index: {}]   ;;  %s2296_s2 = inlined_call_operand.hbm [shape: f32[1,16], index: 2, kind: input, shape index: {}]   ;;  %s2297_s3 = inlined_call_operand.hbm [shape: f32[1,16], index: 3, kind: input, shape index: {}]   ;;  %s2298_s4 = inlined_call_operand.vmem [shape: f32[512,16], index: 4, kind: output, shape index: {}]  }
   0x1   :  { %10 = vsyncpa [#allocation5], 0  ;;  %s1461_s15 = smov 0  }
   0x2 LB: > { %s1429_s16 = smov [#allocation4]   ;;  %s1089_s18 = sadd.s32 4294967295, %s1427_s15   ;;  %s1427_s15 = sphi %s1461_s15, %s16_s15  }
   0x3   : > { %s162_s17 = sshll.u32 %s1429_s16, 4  ;;  %p1091_p0 = scmp.ge.s32.totalorder %s1427_s15, 1  ;;  %s163_s17 = int_to_ptr.vmem [resolvable:$true] %s162_s17 }
   0x4   : > { %p136_p1 = scmp.lt.s32.totalorder %s1427_s15, 3  ;;  %p1471_p2 = scmp.eq.s32.totalorder %s1089_s18, 0 }
   0x5   : > { %s1430_s21 = smov [#allocation2]   ;;  %s1431_s24 = smov [#allocation6]  }
   0x6   : > { %s2303_s19 = scalar_select %p1471_p2, 1, 0 }
   0x7   : > { %p1475_p3 = pnand %p1091_p0, %p136_p1  ;;  %s148_s22 = sshll.u32 %s1430_s21, 4  ;;  %s149_s22 = int_to_ptr.vmem [resolvable:$true] %s148_s22 }
   0x8   : > { %s173_s25 = sshll.u32 %s1431_s24, 4  ;;  %s1346_s26 = scalar_lea.vmem %s163_s17, 16  ;;  %s1487_s25 = int_to_ptr.vmem [resolvable:$true] %s173_s25 }
   0x9   : > { %s2304_s20 = scalar_select %p1475_p3, 1, 0 }
   0xa   : > { %p1174_p4 = pneg %p1475_p3  ;;  %p1347_p7 = scmp.ne.s32.totalorder %s163_s17, %s1346_s26 }
   0xb   : > { %s1353_s27 = scalar_lea.vmem %s163_s17, 32  ;;  %p1354_p10 = scmp.lt.s32.totalorder %s163_s17, %s163_s17 }
   0xc   : > { %p1483_p5 = pnand %p1471_p2, %p1174_p4  ;;  %p1355_p11 = scmp.lt.s32.totalorder %s1353_s27, %s1346_s26 }
   0xe   : > { %p1337_p6 = pneg %p1483_p5  ;;  %p1356_p12 = por %p1355_p11, %p1354_p10 }
  0x10   : > { %p1349_p8 = pnand %p1347_p7, %p1337_p6 }
  0x12   : > { %p1350_p9 = pneg %p1349_p8 }
  0x14   : > { %p1357_p13 = pnand %p1356_p12, %p1350_p9 }
  0x16   : > { %1360 = shalt.err (!%p1357_p13)
}
  0x17   : > { %1180 = dma.hbm_to_vmem [thread:$0]  (!%p1483_p5), %s2296_s2, 16, %s163_s17, [#allocation5]  }
  0x18   : > { %s1372_s30 = scalar_lea.vmem %s149_s22, 256  ;;  %p1380_p7 = scmp.lt.s32.totalorder %s149_s22, %s149_s22 }
  0x19   : > { %p1373_p0 = scmp.ne.s32.totalorder %s149_s22, %s1372_s30  ;;  %p1381_p8 = scmp.lt.s32.totalorder %s1372_s30, %s1372_s30 }
  0x1b   : > { %p1375_p1 = pnand %p1373_p0, %p1337_p6  ;;  %p1382_p2 = por %p1381_p8, %p1380_p7 }
  0x1d   : > { %p1376_p4 = pneg %p1375_p1 }
  0x1f   : > { %p1383_p3 = pnand %p1382_p2, %p1376_p4 }
  0x21   : > { %1386 = shalt.err (!%p1383_p3)
}
  0x22   : > { %s1432_s5 = smov 128   ;;  %s1433_s6 = smov 8  }
  0x23   : > { %1177 = dma.hbm_to_vmem [thread:$0]  (!%p1483_p5), %s2295_s1, 256, %s149_s22, [#allocation3], %s1432_s5, %s1432_s5, %s1433_s6  }
  0x24   : > { %s1398_s9 = scalar_lea.vmem %s1487_s25, 16  ;;  %s1405_s10 = scalar_lea.vmem %s1487_s25, 32 }
  0x25   : > { %p1399_p9 = scmp.ne.s32.totalorder %s1487_s25, %s1398_s9  ;;  %p1406_p3 = scmp.lt.s32.totalorder %s1487_s25, %s1487_s25 }
  0x26   : > { %p1407_p11 = scmp.lt.s32.totalorder %s1405_s10, %s1398_s9 }
  0x27   : > { %p1401_p10 = pnand %p1399_p9, %p1337_p6 }
  0x28   : > { %p1408_p12 = por %p1407_p11, %p1406_p3 }
  0x29   : > { %p1402_p2 = pneg %p1401_p10 }
  0x2b   : > { %p1409_p13 = pnand %p1408_p12, %p1402_p2 }
  0x2d   : > { %1412 = shalt.err (!%p1409_p13)
}
  0x2e   : > { %1183 = dma.hbm_to_vmem [thread:$0]  (!%p1483_p5), %s2297_s3, 16, %s1487_s25, [#allocation5]  }
  0x2f   : > { %p2306_p0 = scmp.ne.s32.totalorder %s2304_s20, 0 }
  0x31   : > { %195 = sbr.rel (%p2306_p0) target bundleno = 724 (0x2d4), region = 36 }
  0x36   : > { %p2307_p6 = scmp.ne.s32.totalorder %s2303_s19, 0 }
  0x38   : > { %1418 = dma.done.wait (%p2307_p6), [#allocation3], 256  }
  0x39   : > { %1420 = vsyncadd (%p2307_p6), [#allocation3], 4294967040 }
  0x3a   : > { %1422 = dma.done.wait (%p2307_p6), [#allocation5], 32  }
  0x3b   : > { %1424 = vsyncadd (%p2307_p6), [#allocation5], 4294967264  ;;  %s1100_s13 = sshll.u32 %s1089_s18, 5  ;;  %v1434_v0 = vmov 0.0   ;;  %vm1435_vm0 = vmmov 0   ;;  %vm275_vm1 = vcmask 130048  }
  0x3c   : > { %1148 = vmatprep.subr.mxu0 %v1434_v0  ;;  %1152 = vmatprep.mubr.msk.f32.mxu0 %vm1435_vm0, %v1434_v0  ;;  %p230_p5 = scmp.lt.s32.totalorder %s1100_s13, 63  ;;  %v274_v1 = vld [vmem:[#allocation2 + $0x8] sm:$0xff]  ;;  %v273_v2 = vld [vmem:[#allocation2] sm:$0xff] }
  0x3d   : > { %1155 = vmatprep.subr.mxu1 %v1434_v0  ;;  %1159 = vmatprep.mubr.msk.f32.mxu1 %vm1435_vm0, %v1434_v0 }
  0x3e   : > { %s2311_s13 = smov (!%p230_p5, %s1100_s13), 63  ;;  %1149 = vmatpush3.msra.mxu0 %v274_v1  ;;  %1156 = vmatpush3.msra.mxu1 %v274_v1 }
  0x3f   : > { %s1101_s14 = sshll.u32 %s2311_s13, 3  ;;  %1150 = vmatprep.subr.mxu0 %v1434_v0  ;;  %1157 = vmatprep.subr.mxu1 %v1434_v0 }
  0x40   : > { %s1541_s19 = scalar_lea.vmem %s2294_s0, %s1101_s14  ;;  %1151 = vmatpush3.msra.mxu0 %v273_v2  ;;  %1158 = vmatpush3.msra.mxu1 %v273_v2  ;;  %s2189_s21 = scalar_lea.vmem %s2298_s4, %s1101_s14 }
  0x41   : > { %v1544_v3 = vld [vmem:[%s1541_s19] sm:$0xff]  ;;  %v1547_v4 = vld [vmem:[%s1541_s19 + $0x8] sm:$0xff]  ;;  %v1550_v5 = vld [vmem:[%s1541_s19 + $0x10] sm:$0xff] }
  0x42   : > { %v1553_v6 = vld [vmem:[%s1541_s19 + $0x18] sm:$0xff]  ;;  %v276_v7 = vsel %vm275_vm1, %v1544_v3, 0.0  ;;  %v277_v8 = vsel %vm275_vm1, %v1547_v4, 0.0  ;;  %v279_v9 = vsel %vm275_vm1, %v1550_v5, 0.0  ;;  %v1562_v10 = vld [vmem:[%s1541_s19 + $0x20] sm:$0xff]  ;;  %v1567_v13 = vld [vmem:[%s1541_s19 + $0x28] sm:$0xff] }
  0x43   : > { %v278_v11 = vadd.f32 %v277_v8, %v276_v7  ;;  %v281_v12 = vsel %vm275_vm1, %v1553_v6, 0.0  ;;  %v283_v15 = vsel %vm275_vm1, %v1562_v10, 0.0  ;;  %v1572_v16 = vld [vmem:[%s1541_s19 + $0x30] sm:$0xff]  ;;  %v285_v18 = vsel %vm275_vm1, %v1567_v13, 0.0  ;;  %v1577_v19 = vld [vmem:[%s1541_s19 + $0x38] sm:$0xff]  ;;  %v1582_v22 = vld [vmem:[%s1541_s19 + $0x40] sm:$0xff] }
  0x44   : > { %v287_v21 = vsel %vm275_vm1, %v1572_v16, 0.0  ;;  %v289_v24 = vsel %vm275_vm1, %v1577_v19, 0.0  ;;  %v1587_v25 = vld [vmem:[%s1541_s19 + $0x48] sm:$0xff]  ;;  %v291_v27 = vsel %vm275_vm1, %v1582_v22, 0.0  ;;  %v1592_v28 = vld [vmem:[%s1541_s19 + $0x50] sm:$0xff]  ;;  %v1597_v31 = vld [vmem:[%s1541_s19 + $0x58] sm:$0xff] }
  0x45   : > { %v280_v14 = vadd.f32 %v279_v9, %v278_v11  ;;  %v293_v30 = vsel %vm275_vm1, %v1587_v25, 0.0  ;;  %v295_v33 = vsel %vm275_vm1, %v1592_v28, 0.0  ;;  %v1602_v34 = vld [vmem:[%s1541_s19 + $0x60] sm:$0xff]  ;;  %v297_v36 = vsel %vm275_vm1, %v1597_v31, 0.0  ;;  %v1607_v37 = vld [vmem:[%s1541_s19 + $0x68] sm:$0xff]  ;;  %v1612_v40 = vld [vmem:[%s1541_s19 + $0x70] sm:$0xff] }
  0x46   : > { %v299_v39 = vsel %vm275_vm1, %v1602_v34, 0.0  ;;  %v301_v42 = vsel %vm275_vm1, %v1607_v37, 0.0  ;;  %v1617_v43 = vld [vmem:[%s1541_s19 + $0x78] sm:$0xff]  ;;  %v303_v45 = vsel %vm275_vm1, %v1612_v40, 0.0  ;;  %v1622_v46 = vld [vmem:[%s1541_s19 + $0x80] sm:$0xff]  ;;  %v1627_v49 = vld [vmem:[%s1541_s19 + $0x88] sm:$0xff] }
  0x47   : > { %v282_v17 = vadd.f32 %v281_v12, %v280_v14  ;;  %v305_v48 = vsel %vm275_vm1, %v1617_v43, 0.0  ;;  %v307_v51 = vsel %vm275_vm1, %v1622_v46, 0.0  ;;  %v1632_v52 = vld [vmem:[%s1541_s19 + $0x90] sm:$0xff]  ;;  %v309_v54 = vsel %vm275_vm1, %v1627_v49, 0.0  ;;  %v1637_v55 = vld [vmem:[%s1541_s19 + $0x98] sm:$0xff]  ;;  %v1642_v58 = vld [vmem:[%s1541_s19 + $0xa0] sm:$0xff] }
  0x48   : > { %v311_v57 = vsel %vm275_vm1, %v1632_v52, 0.0  ;;  %v313_v60 = vsel %vm275_vm1, %v1637_v55, 0.0  ;;  %v1647_v61 = vld [vmem:[%s1541_s19 + $0xa8] sm:$0xff]  ;;  %v315_v63 = vsel %vm275_vm1, %v1642_v58, 0.0  ;;  %v1652_v0 = vld [vmem:[%s1541_s19 + $0xb0] sm:$0xff]  ;;  %v1657_v7 = vld [vmem:[%s1541_s19 + $0xb8] sm:$0xff] }
  0x49   : > { %v284_v20 = vadd.f32 %v283_v15, %v282_v17  ;;  %v317_v2 = vsel %vm275_vm1, %v1647_v61, 0.0  ;;  %v319_v9 = vsel %vm275_vm1, %v1652_v0, 0.0  ;;  %v1662_v11 = vld [vmem:[%s1541_s19 + $0xc0] sm:$0xff]  ;;  %v321_v14 = vsel %vm275_vm1, %v1657_v7, 0.0  ;;  %v1667_v15 = vld [vmem:[%s1541_s19 + $0xc8] sm:$0xff] }
  0x4b   : > { %v286_v23 = vadd.f32 %v285_v18, %v284_v20  ;;  %v323_v18 = vsel %vm275_vm1, %v1662_v11, 0.0  ;;  %v1672_v20 = vld [vmem:[%s1541_s19 + $0xd0] sm:$0xff] }
  0x4d   : > { %v288_v26 = vadd.f32 %v287_v21, %v286_v23  ;;  %v325_v23 = vsel %vm275_vm1, %v1667_v15, 0.0 }
  0x4f   : > { %v290_v29 = vadd.f32 %v289_v24, %v288_v26  ;;  %v1677_v24 = vld [vmem:[%s1541_s19 + $0xd8] sm:$0xff] }
  0x51   : > { %v292_v32 = vadd.f32 %v291_v27, %v290_v29  ;;  %v327_v27 = vsel %vm275_vm1, %v1672_v20, 0.0  ;;  %v1682_v29 = vld [vmem:[%s1541_s19 + $0xe0] sm:$0xff] }
  0x53   : > { %v294_v35 = vadd.f32 %v293_v30, %v292_v32  ;;  %v329_v32 = vsel %vm275_vm1, %v1677_v24, 0.0 }
  0x55   : > { %v296_v38 = vadd.f32 %v295_v33, %v294_v35  ;;  %v1687_v33 = vld [vmem:[%s1541_s19 + $0xe8] sm:$0xff] }
  0x57   : > { %v298_v41 = vadd.f32 %v297_v36, %v296_v38  ;;  %v331_v36 = vsel %vm275_vm1, %v1682_v29, 0.0  ;;  %v1692_v38 = vld [vmem:[%s1541_s19 + $0xf0] sm:$0xff] }
  0x59   : > { %v300_v44 = vadd.f32 %v299_v39, %v298_v41  ;;  %v333_v41 = vsel %vm275_vm1, %v1687_v33, 0.0 }
  0x5b   : > { %v302_v47 = vadd.f32 %v301_v42, %v300_v44  ;;  %v1697_v42 = vld [vmem:[%s1541_s19 + $0xf8] sm:$0xff] }
  0x5d   : > { %v304_v50 = vadd.f32 %v303_v45, %v302_v47  ;;  %v335_v45 = vsel %vm275_vm1, %v1692_v38, 0.0 }
  0x5f   : > { %v306_v53 = vadd.f32 %v305_v48, %v304_v50  ;;  %v337_v48 = vsel %vm275_vm1, %v1697_v42, 0.0 }
  0x61   : > { %v308_v56 = vadd.f32 %v307_v51, %v306_v53 }
  0x63   : > { %v310_v59 = vadd.f32 %v309_v54, %v308_v56 }
  0x65   : > { %v312_v62 = vadd.f32 %v311_v57, %v310_v59 }
  0x67   : > { %v314_v1 = vadd.f32 %v313_v60, %v312_v62  ;;  %v419_v62 = vlaneseq }
  0x69   : > { %v316_v8 = vadd.f32 %v315_v63, %v314_v1  ;;  %v1704_v1 = vshrl.u32 %v419_v62, 7 }
  0x6b   : > { %v318_v12 = vadd.f32 %v317_v2, %v316_v8 }
  0x6d   : > { %v320_v17 = vadd.f32 %v319_v9, %v318_v12  ;;  %v421_v9 = vsub.s32 0, %v1704_v1 }
  0x6f   : > { %v322_v21 = vadd.f32 %v321_v14, %v320_v17 }
  0x71   : > { %v324_v26 = vadd.f32 %v323_v18, %v322_v21 }
  0x73   : > { %v326_v30 = vadd.f32 %v325_v23, %v324_v26 }
  0x75   : > { %v328_v35 = vadd.f32 %v327_v27, %v326_v30 }
  0x77   : > { %v330_v39 = vadd.f32 %v329_v32, %v328_v35 }
  0x79   : > { %v332_v44 = vadd.f32 %v331_v36, %v330_v39 }
  0x7b   : > { %v334_v47 = vadd.f32 %v333_v41, %v332_v44 }
  0x7d   : > { %v336_v50 = vadd.f32 %v335_v45, %v334_v47 }
  0x7f   : > { %v338_v51 = vadd.f32 %v337_v48, %v336_v50 }
  0x81   : > { %v339_v53 = vrot.slane %v338_v51, 4 }
  0x83   : > { %v340_v54 = vadd.f32 %v339_v53, %v338_v51 }
  0x85   : > { %v341_v56 = vrot.slane %v340_v54, 2 }
  0x87   : > { %v342_v57 = vadd.f32 %v341_v56, %v340_v54 }
  0x89   : > { %v343_v59 = vrot.slane %v342_v57, 1 }
  0x8b   : > { %v344_v60 = vadd.f32 %v343_v59, %v342_v57 }
  0x8d   : > { %1153 = vmatmul.mubr.msk.f32.vlgmr.msra.gmra.mxu0 %vm275_vm1, %v344_v60 }
 0x14d   : > { %v414_v63 = vpop.f32.mrf.mxu0 }
 0x14e   : > { %v418_v8 = vmul.f32 0.0009765625, %v414_v63 }
 0x14f   : > { %v1154_v2 = vpop.f32.mrf.mxu0 }
 0x150   : > { %v1709_v12 = vrot.slane %v418_v8, %v421_v9 }
 0x152   : > { %v1713_v14 = vsub.f32 %v1544_v3, %v1709_v12  ;;  %v1717_v17 = vsub.f32 %v1547_v4, %v1709_v12  ;;  %v1721_v18 = vsub.f32 %v1550_v5, %v1709_v12  ;;  %v1725_v21 = vsub.f32 %v1553_v6, %v1709_v12 }
 0x153   : > { %v1733_v3 = vsub.f32 %v1562_v10, %v1709_v12  ;;  %v1739_v5 = vsub.f32 %v1567_v13, %v1709_v12  ;;  %v1747_v35 = vsub.f32 %v1572_v16, %v1709_v12  ;;  %v1754_v13 = vsub.f32 %v1577_v19, %v1709_v12 }
 0x154   : > { %v455_v23 = vmul.f32 %v1713_v14, %v1713_v14  ;;  %v456_v26 = vmul.f32 %v1717_v17, %v1717_v17  ;;  %v457_v4 = vmul.f32 %v1721_v18, %v1721_v18  ;;  %v458_v6 = vmul.f32 %v1725_v21, %v1725_v21 }
 0x155   : > { %v459_v10 = vmul.f32 %v1733_v3, %v1733_v3  ;;  %v460_v41 = vmul.f32 %v1739_v5, %v1739_v5  ;;  %v1761_v16 = vsub.f32 %v1582_v22, %v1709_v12  ;;  %v461_v47 = vmul.f32 %v1747_v35, %v1747_v35 }
 0x156   : > { %v487_v27 = vsel %vm275_vm1, %v455_v23, 0.0  ;;  %v488_v30 = vsel %vm275_vm1, %v456_v26, 0.0  ;;  %v490_v36 = vsel %vm275_vm1, %v457_v4, 0.0  ;;  %v492_v44 = vsel %vm275_vm1, %v458_v6, 0.0 }
 0x157   : > { %v489_v32 = vadd.f32 %v488_v30, %v487_v27  ;;  %v494_v48 = vsel %vm275_vm1, %v459_v10, 0.0  ;;  %v1768_v19 = vsub.f32 %v1587_v25, %v1709_v12  ;;  %v462_v51 = vmul.f32 %v1754_v13, %v1754_v13 }
 0x158   : > { %v496_v53 = vsel %vm275_vm1, %v460_v41, 0.0  ;;  %v1775_v22 = vsub.f32 %v1592_v28, %v1709_v12  ;;  %v463_v56 = vmul.f32 %v1761_v16, %v1761_v16  ;;  %v498_v57 = vsel %vm275_vm1, %v461_v47, 0.0 }
 0x159   : > { %v491_v39 = vadd.f32 %v490_v36, %v489_v32  ;;  %v1782_v25 = vsub.f32 %v1597_v31, %v1709_v12  ;;  %v464_v60 = vmul.f32 %v1768_v19, %v1768_v19  ;;  %v500_v62 = vsel %vm275_vm1, %v462_v51, 0.0 }
 0x15a   : > { %v1789_v28 = vsub.f32 %v1602_v34, %v1709_v12  ;;  %v465_v2 = vmul.f32 %v1775_v22, %v1775_v22  ;;  %v502_v8 = vsel %vm275_vm1, %v463_v56, 0.0  ;;  %v1796_v31 = vsub.f32 %v1607_v37, %v1709_v12 }
 0x15b   : > { %v493_v45 = vadd.f32 %v492_v44, %v491_v39  ;;  %v466_v26 = vmul.f32 %v1782_v25, %v1782_v25  ;;  %v504_v4 = vsel %vm275_vm1, %v464_v60, 0.0  ;;  %v1803_v34 = vsub.f32 %v1612_v40, %v1709_v12 }
 0x15c   : > { %v467_v27 = vmul.f32 %v1789_v28, %v1789_v28  ;;  %v506_v30 = vsel %vm275_vm1, %v465_v2, 0.0  ;;  %v1810_v37 = vsub.f32 %v1617_v43, %v1709_v12  ;;  %v468_v10 = vmul.f32 %v1796_v31, %v1796_v31 }
 0x15d   : > { %v495_v50 = vadd.f32 %v494_v48, %v493_v45  ;;  %v508_v36 = vsel %vm275_vm1, %v466_v26, 0.0  ;;  %v1817_v40 = vsub.f32 %v1622_v46, %v1709_v12  ;;  %v469_v41 = vmul.f32 %v1803_v34, %v1803_v34 }
 0x15e   : > { %v510_v44 = vsel %vm275_vm1, %v467_v27, 0.0  ;;  %v1824_v43 = vsub.f32 %v1627_v49, %v1709_v12  ;;  %v470_v47 = vmul.f32 %v1810_v37, %v1810_v37  ;;  %v512_v48 = vsel %vm275_vm1, %v468_v10, 0.0 }
 0x15f   : > { %v497_v54 = vadd.f32 %v496_v53, %v495_v50  ;;  %v1831_v46 = vsub.f32 %v1632_v52, %v1709_v12  ;;  %v471_v51 = vmul.f32 %v1817_v40, %v1817_v40  ;;  %v514_v53 = vsel %vm275_vm1, %v469_v41, 0.0 }
 0x160   : > { %v1838_v49 = vsub.f32 %v1637_v55, %v1709_v12  ;;  %v472_v56 = vmul.f32 %v1824_v43, %v1824_v43  ;;  %v1845_v52 = vsub.f32 %v1642_v58, %v1709_v12  ;;  %v1852_v55 = vsub.f32 %v1647_v61, %v1709_v12 }
 0x161   : > { %v499_v59 = vadd.f32 %v498_v57, %v497_v54  ;;  %v516_v57 = vsel %vm275_vm1, %v470_v47, 0.0  ;;  %v473_v60 = vmul.f32 %v1831_v46, %v1831_v46  ;;  %v1859_v58 = vsub.f32 %v1652_v0, %v1709_v12 }
 0x162   : > { %v474_v2 = vmul.f32 %v1838_v49, %v1838_v49  ;;  %v475_v26 = vmul.f32 %v1845_v52, %v1845_v52  ;;  %v1866_v61 = vsub.f32 %v1657_v7, %v1709_v12  ;;  %v476_v27 = vmul.f32 %v1852_v55, %v1852_v55 }
 0x163   : > { %v501_v63 = vadd.f32 %v500_v62, %v499_v59  ;;  %v518_v62 = vsel %vm275_vm1, %v471_v51, 0.0  ;;  %v1873_v0 = vsub.f32 %v1662_v11, %v1709_v12  ;;  %v477_v10 = vmul.f32 %v1859_v58, %v1859_v58 }
 0x164   : > { %v1880_v7 = vsub.f32 %v1667_v15, %v1709_v12  ;;  %v478_v41 = vmul.f32 %v1866_v61, %v1866_v61  ;;  %v1887_v11 = vsub.f32 %v1672_v20, %v1709_v12  ;;  %v1894_v15 = vsub.f32 %v1677_v24, %v1709_v12 }
 0x165   : > { %v503_v23 = vadd.f32 %v502_v8, %v501_v63  ;;  %v520_v8 = vsel %vm275_vm1, %v472_v56, 0.0  ;;  %v479_v47 = vmul.f32 %v1873_v0, %v1873_v0  ;;  %v1901_v20 = vsub.f32 %v1682_v29, %v1709_v12 }
 0x166   : > { %v480_v51 = vmul.f32 %v1880_v7, %v1880_v7  ;;  %v481_v56 = vmul.f32 %v1887_v11, %v1887_v11  ;;  %v1908_v24 = vsub.f32 %v1687_v33, %v1709_v12  ;;  %v1915_v29 = vsub.f32 %v1692_v38, %v1709_v12 }
 0x167   : > { %v505_v6 = vadd.f32 %v504_v4, %v503_v23  ;;  %v522_v4 = vsel %vm275_vm1, %v473_v60, 0.0  ;;  %v482_v60 = vmul.f32 %v1894_v15, %v1894_v15  ;;  %v1922_v33 = vsub.f32 %v1697_v42, %v1709_v12 }
 0x168   : > { %v485_v38 = vmul.f32 %v1915_v29, %v1915_v29 }
 0x169   : > { %v507_v32 = vadd.f32 %v506_v30, %v505_v6  ;;  %v524_v30 = vsel %vm275_vm1, %v474_v2, 0.0  ;;  %v483_v2 = vmul.f32 %v1901_v20, %v1901_v20 }
 0x16a   : > { %v546_v42 = vsel %vm275_vm1, %v485_v38, 0.0  ;;  %v1946_v38 = vld [vmem:[#allocation4] ss:$0 sm:$0xff] }
 0x16b   : > { %v509_v39 = vadd.f32 %v508_v36, %v507_v32  ;;  %v526_v36 = vsel %vm275_vm1, %v475_v26, 0.0  ;;  %v484_v26 = vmul.f32 %v1908_v24, %v1908_v24 }
 0x16d   : > { %v511_v45 = vadd.f32 %v510_v44, %v509_v39  ;;  %v528_v44 = vsel %vm275_vm1, %v476_v27, 0.0  ;;  %v542_v27 = vsel %vm275_vm1, %v483_v2, 0.0 }
 0x16f   : > { %v513_v50 = vadd.f32 %v512_v48, %v511_v45  ;;  %v530_v48 = vsel %vm275_vm1, %v477_v10, 0.0  ;;  %v544_v10 = vsel %vm275_vm1, %v484_v26, 0.0 }
 0x171   : > { %v515_v54 = vadd.f32 %v514_v53, %v513_v50  ;;  %v532_v53 = vsel %vm275_vm1, %v478_v41, 0.0 }
 0x173   : > { %v517_v59 = vadd.f32 %v516_v57, %v515_v54  ;;  %v534_v57 = vsel %vm275_vm1, %v479_v47, 0.0 }
 0x175   : > { %v519_v63 = vadd.f32 %v518_v62, %v517_v59  ;;  %v536_v62 = vsel %vm275_vm1, %v480_v51, 0.0 }
 0x177   : > { %v521_v23 = vadd.f32 %v520_v8, %v519_v63  ;;  %v538_v8 = vsel %vm275_vm1, %v481_v56, 0.0 }
 0x179   : > { %v523_v6 = vadd.f32 %v522_v4, %v521_v23  ;;  %v540_v4 = vsel %vm275_vm1, %v482_v60, 0.0 }
 0x17b   : > { %v525_v32 = vadd.f32 %v524_v30, %v523_v6 }
 0x17d   : > { %v527_v39 = vadd.f32 %v526_v36, %v525_v32  ;;  %v486_v32 = vmul.f32 %v1922_v33, %v1922_v33 }
 0x17f   : > { %v529_v45 = vadd.f32 %v528_v44, %v527_v39  ;;  %v548_v39 = vsel %vm275_vm1, %v486_v32, 0.0 }
 0x181   : > { %v531_v50 = vadd.f32 %v530_v48, %v529_v45 }
 0x183   : > { %v533_v54 = vadd.f32 %v532_v53, %v531_v50 }
 0x185   : > { %v535_v59 = vadd.f32 %v534_v57, %v533_v54 }
 0x187   : > { %v537_v63 = vadd.f32 %v536_v62, %v535_v59 }
 0x189   : > { %v539_v23 = vadd.f32 %v538_v8, %v537_v63 }
 0x18b   : > { %v541_v6 = vadd.f32 %v540_v4, %v539_v23 }
 0x18d   : > { %v543_v30 = vadd.f32 %v542_v27, %v541_v6 }
 0x18f   : > { %v545_v36 = vadd.f32 %v544_v10, %v543_v30 }
 0x191   : > { %v547_v12 = vadd.f32 %v546_v42, %v545_v36 }
 0x193   : > { %v549_v41 = vadd.f32 %v548_v39, %v547_v12 }
 0x195   : > { %v550_v44 = vrot.slane %v549_v41, 4 }
 0x197   : > { %v551_v45 = vadd.f32 %v550_v44, %v549_v41 }
 0x199   : > { %v552_v47 = vrot.slane %v551_v45, 2 }
 0x19b   : > { %v553_v48 = vadd.f32 %v552_v47, %v551_v45 }
 0x19d   : > { %v554_v50 = vrot.slane %v553_v48, 1 }
 0x19f   : > { %v555_v51 = vadd.f32 %v554_v50, %v553_v48 }
 0x1a1   : > { %1160 = vmatmul.mubr.msk.f32.vlgmr.msra.gmra.mxu1 %vm275_vm1, %v555_v51 }
 0x261   : > { %v625_v53 = vpop.f32.mrf.mxu1 }
 0x262   : > { %v629_v56 = vmul.f32 0.0009765625, %v625_v53 }
 0x263   : > { %v1161_v54 = vpop.f32.mrf.mxu1 }
 0x264   : > { %v630_v57 = vadd.f32 1e-05, %v629_v56 }
 0x266   : > { %1205 = vrsqrt.f32 %v630_v57 }
 0x273   : > { %v1206_v59 = vpop.eup %1205 }
 0x274   : > { %v635_v60 = vrot.slane %v1206_v59, %v421_v9 }
 0x276   : > { %v636_v62 = vmul.f32 %v635_v60, %v1713_v14  ;;  %v637_v63 = vmul.f32 %v635_v60, %v1717_v17  ;;  %v638_v2 = vmul.f32 %v635_v60, %v1721_v18  ;;  %v639_v8 = vmul.f32 %v635_v60, %v1725_v21 }
 0x277   : > { %v640_v23 = vmul.f32 %v635_v60, %v1733_v3  ;;  %v641_v26 = vmul.f32 %v635_v60, %v1739_v5  ;;  %v642_v4 = vmul.f32 %v635_v60, %v1747_v35  ;;  %v643_v6 = vmul.f32 %v635_v60, %v1754_v13 }
 0x278   : > { %v644_v1 = vmul.f32 %v635_v60, %v1761_v16  ;;  %v645_v9 = vmul.f32 %v635_v60, %v1768_v19  ;;  %v646_v14 = vmul.f32 %v635_v60, %v1775_v22  ;;  %v647_v17 = vmul.f32 %v635_v60, %v1782_v25 }
 0x279   : > { %v648_v18 = vmul.f32 %v635_v60, %v1789_v28  ;;  %v649_v21 = vmul.f32 %v635_v60, %v1796_v31  ;;  %v650_v3 = vmul.f32 %v635_v60, %v1803_v34  ;;  %v651_v5 = vmul.f32 %v635_v60, %v1810_v37  ;;  %v1966_v34 = vld [vmem:[#allocation6] ss:$0 sm:$0xff] }
 0x27a   : > { %v652_v35 = vmul.f32 %v635_v60, %v1817_v40  ;;  %v675_v13 = vmul.f32 %v1946_v38, %v636_v62  ;;  %v676_v16 = vmul.f32 %v1946_v38, %v637_v63  ;;  %v677_v19 = vmul.f32 %v1946_v38, %v638_v2 }
 0x27b   : > { %v653_v22 = vmul.f32 %v635_v60, %v1824_v43  ;;  %v654_v25 = vmul.f32 %v635_v60, %v1831_v46  ;;  %v1963_v28 = vmul.f32 %v635_v60, %v1838_v49  ;;  %v678_v31 = vmul.f32 %v1946_v38, %v639_v8 }
 0x27c   : > { %v1969_v37 = vmul.f32 %v635_v60, %v1845_v52  ;;  %v1972_v40 = vmul.f32 %v635_v60, %v1852_v55  ;;  %v1975_v27 = vmul.f32 %v635_v60, %v1859_v58  ;;  %v679_v43 = vmul.f32 %v1946_v38, %v640_v23 }
 0x27d   : > { %v1979_v46 = vmul.f32 %v635_v60, %v1866_v61  ;;  %v1982_v49 = vmul.f32 %v635_v60, %v1873_v0  ;;  %v1985_v30 = vmul.f32 %v635_v60, %v1880_v7  ;;  %v680_v52 = vmul.f32 %v1946_v38, %v641_v26 }
 0x27e   : > { %v681_v32 = vmul.f32 %v1946_v38, %v642_v4  ;;  %v1990_v55 = vadd.f32 %v1966_v34, %v675_v13  ;;  %v1993_v58 = vadd.f32 %v1966_v34, %v676_v16  ;;  %v1996_v10 = vadd.f32 %v1966_v34, %v677_v19 }
 0x27f   : > { %v1999_v61 = vmul.f32 %v635_v60, %v1887_v11  ;;  %v2002_v0 = vmul.f32 %v635_v60, %v1894_v15  ;;  %v682_v7 = vmul.f32 %v1946_v38, %v643_v6  ;;  %v2006_v36 = vadd.f32 %v1966_v34, %v678_v31 }
 0x280   : > { %v2009_v42 = vmul.f32 %v635_v60, %v1901_v20  ;;  %v2012_v12 = vmul.f32 %v635_v60, %v1908_v24  ;;  %v683_v39 = vmul.f32 %v1946_v38, %v644_v1  ;;  %v2016_v41 = vadd.f32 %v1966_v34, %v679_v43 }
 0x281   : > { %v2019_v11 = vmul.f32 %v635_v60, %v1915_v29  ;;  %v684_v15 = vmul.f32 %v1946_v38, %v645_v9  ;;  %v685_v44 = vmul.f32 %v1946_v38, %v646_v14  ;;  %v2024_v45 = vadd.f32 %v1966_v34, %v680_v52 }
 0x282   : > { %v2027_v20 = vadd.f32 %v1966_v34, %v681_v32  ;;  %v1108_v24 = vmul.f32 -1.442695, %v1990_v55  ;;  %v1109_v47 = vmul.f32 -1.442695, %v1993_v58  ;;  %v1110_v48 = vmul.f32 -1.442695, %v1996_v10 }
 0x283   : > { %v2033_v50 = vmul.f32 %v635_v60, %v1922_v33  ;;  %v686_v29 = vmul.f32 %v1946_v38, %v647_v17  ;;  %v2037_v51 = vadd.f32 %v1966_v34, %v682_v7  ;;  %v1111_v53 = vmul.f32 -1.442695, %v2006_v36 }
 0x284   : > { %v687_v54 = vmul.f32 %v1946_v38, %v648_v18  ;;  %v2042_v56 = vadd.f32 %v1966_v34, %v683_v39  ;;  %1207 = vpow2.f32 %v1108_v24  ;;  %v1112_v57 = vmul.f32 -1.442695, %v2016_v41 }
 0x285   : > { %v688_v59 = vmul.f32 %v1946_v38, %v649_v21  ;;  %v2047_v33 = vadd.f32 %v1966_v34, %v684_v15  ;;  %1209 = vpow2.f32 %v1109_v47  ;;  %v1113_v60 = vmul.f32 -1.442695, %v2024_v45 }
 0x286   : > { %v689_v62 = vmul.f32 %v1946_v38, %v650_v3  ;;  %v2052_v63 = vadd.f32 %v1966_v34, %v685_v44  ;;  %1211 = vpow2.f32 %v1110_v48  ;;  %v1114_v2 = vmul.f32 -1.442695, %v2027_v20 }
 0x287   : > { %v690_v8 = vmul.f32 %v1946_v38, %v651_v5  ;;  %v2057_v23 = vadd.f32 %v1966_v34, %v686_v29  ;;  %1213 = vpow2.f32 %v1111_v53  ;;  %v1115_v26 = vmul.f32 -1.442695, %v2037_v51 }
 0x288   : > { %v691_v4 = vmul.f32 %v1946_v38, %v652_v35  ;;  %v2062_v6 = vadd.f32 %v1966_v34, %v687_v54  ;;  %1215 = vpow2.f32 %v1112_v57  ;;  %v1116_v1 = vmul.f32 -1.442695, %v2042_v56 }
 0x289   : > { %v692_v9 = vmul.f32 %v1946_v38, %v653_v22  ;;  %v2067_v14 = vadd.f32 %v1966_v34, %v688_v59  ;;  %1217 = vpow2.f32 %v1113_v60  ;;  %v1117_v17 = vmul.f32 -1.442695, %v2047_v33 }
 0x28a   : > { %v693_v18 = vmul.f32 %v1946_v38, %v654_v25  ;;  %v2072_v21 = vadd.f32 %v1966_v34, %v689_v62  ;;  %1219 = vpow2.f32 %v1114_v2  ;;  %v1118_v3 = vmul.f32 -1.442695, %v2052_v63 }
 0x28b   : > { %v694_v5 = vmul.f32 %v1946_v38, %v1963_v28  ;;  %v2078_v35 = vadd.f32 %v1966_v34, %v690_v8  ;;  %1221 = vpow2.f32 %v1115_v26  ;;  %v1119_v13 = vmul.f32 -1.442695, %v2057_v23 }
 0x28c   : > { %v695_v16 = vmul.f32 %v1946_v38, %v1969_v37  ;;  %v2084_v19 = vadd.f32 %v1966_v34, %v691_v4  ;;  %1223 = vpow2.f32 %v1116_v1  ;;  %v1120_v22 = vmul.f32 -1.442695, %v2062_v6 }
 0x28d   : > { %v696_v25 = vmul.f32 %v1946_v38, %v1972_v40  ;;  %v2090_v28 = vadd.f32 %v1966_v34, %v692_v9  ;;  %1225 = vpow2.f32 %v1117_v17  ;;  %v1121_v31 = vmul.f32 -1.442695, %v2067_v14 }
 0x28e   : > { %v697_v43 = vmul.f32 %v1946_v38, %v1975_v27  ;;  %v2096_v37 = vadd.f32 %v1966_v34, %v693_v18  ;;  %1227 = vpow2.f32 %v1118_v3  ;;  %v1122_v52 = vmul.f32 -1.442695, %v2072_v21 }
 0x28f   : > { %v698_v32 = vmul.f32 %v1946_v38, %v1979_v46  ;;  %v2102_v40 = vadd.f32 %v1966_v34, %v694_v5  ;;  %1229 = vpow2.f32 %v1119_v13  ;;  %v1123_v7 = vmul.f32 -1.442695, %v2078_v35 }
 0x290   : > { %v699_v39 = vmul.f32 %v1946_v38, %v1982_v49  ;;  %v2108_v27 = vadd.f32 %v1966_v34, %v695_v16  ;;  %1231 = vpow2.f32 %v1120_v22  ;;  %v1124_v15 = vmul.f32 -1.442695, %v2084_v19 }
 0x291   : > { %v2111_v44 = vpop.eup %1207  ;;  %v700_v46 = vmul.f32 %v1946_v38, %v1985_v30  ;;  %v2116_v24 = vadd.f32 %v1966_v34, %v696_v25  ;;  %1233 = vpow2.f32 %v1121_v31  ;;  %v1125_v47 = vmul.f32 -1.442695, %v2090_v28 }
 0x292   : > { %v1210_v48 = vpop.eup %1209  ;;  %v701_v49 = vmul.f32 %v1946_v38, %v1999_v61  ;;  %v2122_v29 = vadd.f32 %v1966_v34, %v697_v43  ;;  %1235 = vpow2.f32 %v1122_v52  ;;  %v1126_v53 = vmul.f32 -1.442695, %v2096_v37 }
 0x293   : > { %v1212_v54 = vpop.eup %1211  ;;  %v702_v30 = vmul.f32 %v1946_v38, %v2002_v0  ;;  %v2128_v57 = vadd.f32 %v1966_v34, %v698_v32  ;;  %1237 = vpow2.f32 %v1123_v7  ;;  %v1127_v59 = vmul.f32 -1.442695, %v2102_v40 }
 0x294   : > { %v1214_v60 = vpop.eup %1213  ;;  %v703_v61 = vmul.f32 %v1946_v38, %v2009_v42  ;;  %v2134_v62 = vadd.f32 %v1966_v34, %v699_v39  ;;  %1239 = vpow2.f32 %v1124_v15  ;;  %v1128_v2 = vmul.f32 -1.442695, %v2108_v27 }
 0x295   : > { %v1216_v8 = vpop.eup %1215  ;;  %v704_v0 = vmul.f32 %v1946_v38, %v2012_v12  ;;  %v2140_v26 = vadd.f32 %v1966_v34, %v700_v46  ;;  %1241 = vpow2.f32 %v1125_v47  ;;  %v1129_v4 = vmul.f32 -1.442695, %v2116_v24 }
 0x296   : > { %v1218_v1 = vpop.eup %1217  ;;  %v705_v42 = vmul.f32 %v1946_v38, %v2019_v11  ;;  %v2146_v9 = vadd.f32 %v1966_v34, %v701_v49  ;;  %1243 = vpow2.f32 %v1126_v53  ;;  %v1130_v17 = vmul.f32 -1.442695, %v2122_v29 }
 0x297   : > { %v1220_v18 = vpop.eup %1219  ;;  %v706_v12 = vmul.f32 %v1946_v38, %v2033_v50  ;;  %v2152_v3 = vadd.f32 %v1966_v34, %v702_v30  ;;  %1245 = vpow2.f32 %v1127_v59  ;;  %v1131_v5 = vmul.f32 -1.442695, %v2128_v57 }
 0x298   : > { %v1222_v13 = vpop.eup %1221  ;;  %v2156_v16 = vadd.f32 %v1966_v34, %v703_v61  ;;  %1247 = vpow2.f32 %v1128_v2  ;;  %v1132_v11 = vmul.f32 -1.442695, %v2134_v62  ;;  %v2160_v25 = vadd.f32 %v1966_v34, %v704_v0 }
 0x299   : > { %v1224_v22 = vpop.eup %1223  ;;  %1249 = vpow2.f32 %v1129_v4  ;;  %v1133_v38 = vmul.f32 -1.442695, %v2140_v26  ;;  %v2164_v31 = vadd.f32 %v1966_v34, %v705_v42  ;;  %v1134_v43 = vmul.f32 -1.442695, %v2146_v9 }
 0x29a   : > { %v1226_v50 = vpop.eup %1225  ;;  %1251 = vpow2.f32 %v1130_v17  ;;  %v2168_v32 = vadd.f32 %v1966_v34, %v706_v12  ;;  %v1135_v7 = vmul.f32 -1.442695, %v2152_v3  ;;  %v1136_v15 = vmul.f32 -1.442695, %v2156_v16 }
 0x29b   : > { %v1228_v52 = vpop.eup %1227  ;;  %1253 = vpow2.f32 %v1131_v5  ;;  %v1137_v47 = vmul.f32 -1.442695, %v2160_v25  ;;  %v1138_v53 = vmul.f32 -1.442695, %v2164_v31  ;;  %v842_v61 = vadd.f32 1.0, %v2111_v44 }
 0x29c   : > { %2308 = vst [vmem:[#allocation9_spill] sm:$0xff] %v2168_v32  ;;  %v1230_v39 = vpop.eup %1229  ;;  %1255 = vpow2.f32 %v1132_v11  ;;  %v1139_v34 = vmul.f32 -1.442695, %v2168_v32  ;;  %v843_v0 = vadd.f32 1.0, %v1210_v48  ;;  %v844_v42 = vadd.f32 1.0, %v1212_v54 }
 0x29d   : > { %v1232_v46 = vpop.eup %1231  ;;  %1257 = vpow2.f32 %v1133_v38  ;;  %v845_v12 = vadd.f32 1.0, %v1214_v60  ;;  %v846_v11 = vadd.f32 1.0, %v1216_v8  ;;  %v848_v32 = vadd.f32 1.0, %v1220_v18 }
 0x29e   : > { %v1234_v49 = vpop.eup %1233  ;;  %1259 = vpow2.f32 %v1134_v43  ;;  %v847_v43 = vadd.f32 1.0, %v1218_v1  ;;  %v849_v44 = vadd.f32 1.0, %v1222_v13  ;;  %v850_v48 = vadd.f32 1.0, %v1224_v22 }
 0x29f   : > { %v1236_v30 = vpop.eup %1235  ;;  %1261 = vpow2.f32 %v1135_v7  ;;  %v851_v54 = vadd.f32 1.0, %v1226_v50  ;;  %v852_v60 = vadd.f32 1.0, %v1228_v52  ;;  %v855_v13 = vadd.f32 1.0, %v1234_v49 }
 0x2a0   : > { %v1238_v59 = vpop.eup %1237  ;;  %1263 = vpow2.f32 %v1136_v15  ;;  %v856_v22 = vadd.f32 1.0, %v1236_v30 }
 0x2a1   : > { %v1240_v2 = vpop.eup %1239  ;;  %1265 = vpow2.f32 %v1137_v47 }
 0x2a2   : > { %v1242_v4 = vpop.eup %1241  ;;  %1267 = vpow2.f32 %v1138_v53 }
 0x2a3   : > { %v1244_v17 = vpop.eup %1243  ;;  %1269 = vpow2.f32 %v1139_v34 }
 0x2a4   : > { %v1246_v5 = vpop.eup %1245  ;;  %1271 = vrcp.f32 %v842_v61  ;;  %v853_v61 = vadd.f32 1.0, %v1230_v39  ;;  %v860_v30 = vadd.f32 1.0, %v1244_v17 }
 0x2a5   : > { %v1248_v38 = vpop.eup %1247  ;;  %1273 = vrcp.f32 %v843_v0  ;;  %v854_v0 = vadd.f32 1.0, %v1232_v46  ;;  %v859_v46 = vadd.f32 1.0, %v1242_v4 }
 0x2a6   : > { %v1250_v7 = vpop.eup %1249  ;;  %1275 = vrcp.f32 %v844_v42 }
 0x2a7   : > { %v1252_v15 = vpop.eup %1251  ;;  %1277 = vrcp.f32 %v845_v12  ;;  %v857_v12 = vadd.f32 1.0, %v1238_v59  ;;  %v863_v17 = vadd.f32 1.0, %v1250_v7 }
 0x2a8   : > { %v1254_v47 = vpop.eup %1253  ;;  %1279 = vrcp.f32 %v846_v11 }
 0x2a9   : > { %v1256_v53 = vpop.eup %1255  ;;  %1281 = vrcp.f32 %v847_v43  ;;  %v861_v43 = vadd.f32 1.0, %v1246_v5  ;;  %v864_v5 = vadd.f32 1.0, %v1252_v15 }
 0x2aa   : > { %v1258_v34 = vpop.eup %1257  ;;  %1283 = vrcp.f32 %v848_v32  ;;  %v858_v32 = vadd.f32 1.0, %v1240_v2  ;;  %v866_v7 = vadd.f32 1.0, %v1256_v53 }
 0x2ab   : > { %v1260_v8 = vpop.eup %1259  ;;  %1285 = vrcp.f32 %v849_v44  ;;  %v867_v15 = vadd.f32 1.0, %v1258_v34 }
 0x2ac   : > { %v1262_v1 = vpop.eup %1261  ;;  %1287 = vrcp.f32 %v850_v48  ;;  %v862_v48 = vadd.f32 1.0, %v1248_v38  ;;  %v865_v38 = vadd.f32 1.0, %v1254_v47  ;;  %v868_v47 = vadd.f32 1.0, %v1260_v8 }
 0x2ad   : > { %v2176_v18 = vpop.eup %1263  ;;  %1289 = vrcp.f32 %v851_v54  ;;  %v869_v53 = vadd.f32 1.0, %v1262_v1 }
 0x2ae   : > { %v2178_v42 = vpop.eup %1265  ;;  %1291 = vrcp.f32 %v852_v60  ;;  %v870_v34 = vadd.f32 1.0, %v2176_v18 }
 0x2af   : > { %v2180_v50 = vpop.eup %1267  ;;  %1293 = vrcp.f32 %v853_v61 }
 0x2b0   : > { %v2182_v52 = vpop.eup %1269  ;;  %1295 = vrcp.f32 %v854_v0 }
 0x2b1   : > { %v1272_v39 = vpop.eup %1271  ;;  %1297 = vrcp.f32 %v855_v13 }
 0x2b2   : > { %v1274_v49 = vpop.eup %1273  ;;  %1299 = vrcp.f32 %v856_v22  ;;  %v938_v59 = vmul.f32 %v1272_v39, %v1990_v55  ;;  %v872_v39 = vadd.f32 1.0, %v2180_v50 }
 0x2b3   : > { %v1276_v11 = vpop.eup %1275  ;;  %1301 = vrcp.f32 %v857_v12  ;;  %v939_v2 = vmul.f32 %v1274_v49, %v1993_v58 }
 0x2b4   : > { %v1278_v44 = vpop.eup %1277  ;;  %1303 = vrcp.f32 %v858_v32  ;;  %v940_v54 = vmul.f32 %v1276_v11, %v1996_v10  ;;  %970 = vst.msk [vmem:[%s2189_s21] sm:$0xff] %vm275_vm1, %v938_v59  ;;  %v871_v32 = vadd.f32 1.0, %v2178_v42 }
 0x2b5   : > { %v1280_v4 = vpop.eup %1279  ;;  %1305 = vrcp.f32 %v859_v46  ;;  %v941_v60 = vmul.f32 %v1278_v44, %v2006_v36  ;;  %971 = vst.msk [vmem:[%s2189_s21 + $0x8] sm:$0xff] %vm275_vm1, %v939_v2  ;;  %v873_v46 = vadd.f32 1.0, %v2182_v52 }
 0x2b6   : > { %v1282_v55 = vpop.eup %1281  ;;  %1307 = vrcp.f32 %v860_v30  ;;  %v942_v58 = vmul.f32 %v1280_v4, %v2016_v41  ;;  %972 = vst.msk [vmem:[%s2189_s21 + $0x10] sm:$0xff] %vm275_vm1, %v940_v54 }
 0x2b7   : > { %v1284_v10 = vpop.eup %1283  ;;  %1309 = vrcp.f32 %v861_v43  ;;  %v943_v61 = vmul.f32 %v1282_v55, %v2024_v45  ;;  %973 = vst.msk [vmem:[%s2189_s21 + $0x18] sm:$0xff] %vm275_vm1, %v941_v60 }
 0x2b8   : > { %v1286_v36 = vpop.eup %1285  ;;  %1311 = vrcp.f32 %v862_v48  ;;  %v944_v0 = vmul.f32 %v1284_v10, %v2027_v20  ;;  %974 = vst.msk [vmem:[%s2189_s21 + $0x20] sm:$0xff] %vm275_vm1, %v942_v58 }
 0x2b9   : > { %v1288_v41 = vpop.eup %1287  ;;  %1313 = vrcp.f32 %v863_v17  ;;  %v945_v13 = vmul.f32 %v1286_v36, %v2037_v51  ;;  %975 = vst.msk [vmem:[%s2189_s21 + $0x28] sm:$0xff] %vm275_vm1, %v943_v61 }
 0x2ba   : > { %v1290_v45 = vpop.eup %1289  ;;  %1315 = vrcp.f32 %v864_v5  ;;  %v946_v22 = vmul.f32 %v1288_v41, %v2042_v56  ;;  %976 = vst.msk [vmem:[%s2189_s21 + $0x30] sm:$0xff] %vm275_vm1, %v944_v0 }
 0x2bb   : > { %v1292_v20 = vpop.eup %1291  ;;  %1317 = vrcp.f32 %v865_v38  ;;  %v947_v12 = vmul.f32 %v1290_v45, %v2047_v33  ;;  %977 = vst.msk [vmem:[%s2189_s21 + $0x38] sm:$0xff] %vm275_vm1, %v945_v13  ;;  %v2309_v38 = vld [vmem:[#allocation9_spill] sm:$0xff] }
 0x2bc   : > { %v1294_v51 = vpop.eup %1293  ;;  %1319 = vrcp.f32 %v866_v7  ;;  %v948_v8 = vmul.f32 %v1292_v20, %v2052_v63  ;;  %978 = vst.msk [vmem:[%s2189_s21 + $0x40] sm:$0xff] %vm275_vm1, %v946_v22 }
 0x2bd   : > { %v1296_v56 = vpop.eup %1295  ;;  %1321 = vrcp.f32 %v867_v15  ;;  %v949_v1 = vmul.f32 %v1294_v51, %v2057_v23  ;;  %979 = vst.msk [vmem:[%s2189_s21 + $0x48] sm:$0xff] %vm275_vm1, %v947_v12 }
 0x2be   : > { %v1298_v33 = vpop.eup %1297  ;;  %1323 = vrcp.f32 %v868_v47  ;;  %v950_v18 = vmul.f32 %v1296_v56, %v2062_v6  ;;  %980 = vst.msk [vmem:[%s2189_s21 + $0x50] sm:$0xff] %vm275_vm1, %v948_v8 }
 0x2bf   : > { %v1300_v63 = vpop.eup %1299  ;;  %1325 = vrcp.f32 %v869_v53  ;;  %v951_v42 = vmul.f32 %v1298_v33, %v2067_v14  ;;  %981 = vst.msk [vmem:[%s2189_s21 + $0x58] sm:$0xff] %vm275_vm1, %v949_v1 }
 0x2c0   : > { %v1302_v23 = vpop.eup %1301  ;;  %1327 = vrcp.f32 %v870_v34  ;;  %v952_v50 = vmul.f32 %v1300_v63, %v2072_v21  ;;  %982 = vst.msk [vmem:[%s2189_s21 + $0x60] sm:$0xff] %vm275_vm1, %v950_v18 }
 0x2c1   : > { %v1304_v6 = vpop.eup %1303  ;;  %1329 = vrcp.f32 %v871_v32  ;;  %v953_v49 = vmul.f32 %v1302_v23, %v2078_v35  ;;  %983 = vst.msk [vmem:[%s2189_s21 + $0x68] sm:$0xff] %vm275_vm1, %v951_v42 }
 0x2c2   : > { %v1306_v52 = vpop.eup %1305  ;;  %1331 = vrcp.f32 %v872_v39  ;;  %v954_v14 = vmul.f32 %v1304_v6, %v2084_v19  ;;  %984 = vst.msk [vmem:[%s2189_s21 + $0x70] sm:$0xff] %vm275_vm1, %v952_v50 }
 0x2c3   : > { %v1308_v30 = vpop.eup %1307  ;;  %1333 = vrcp.f32 %v873_v46  ;;  %v955_v21 = vmul.f32 %v1306_v52, %v2090_v28  ;;  %985 = vst.msk [vmem:[%s2189_s21 + $0x78] sm:$0xff] %vm275_vm1, %v953_v49 }
 0x2c4   : > { %v1310_v59 = vpop.eup %1309  ;;  %v956_v35 = vmul.f32 %v1308_v30, %v2096_v37  ;;  %986 = vst.msk [vmem:[%s2189_s21 + $0x80] sm:$0xff] %vm275_vm1, %v954_v14 }
 0x2c5   : > { %v1312_v11 = vpop.eup %1311  ;;  %v957_v43 = vmul.f32 %v1310_v59, %v2102_v40  ;;  %987 = vst.msk [vmem:[%s2189_s21 + $0x88] sm:$0xff] %vm275_vm1, %v955_v21 }
 0x2c6   : > { %v1314_v19 = vpop.eup %1313  ;;  %v958_v2 = vmul.f32 %v1312_v11, %v2108_v27  ;;  %988 = vst.msk [vmem:[%s2189_s21 + $0x90] sm:$0xff] %vm275_vm1, %v956_v35 }
 0x2c7   : > { %v1316_v28 = vpop.eup %1315  ;;  %v959_v44 = vmul.f32 %v1314_v19, %v2116_v24  ;;  %989 = vst.msk [vmem:[%s2189_s21 + $0x98] sm:$0xff] %vm275_vm1, %v957_v43 }
 0x2c8   : > { %v1318_v37 = vpop.eup %1317  ;;  %v960_v48 = vmul.f32 %v1316_v28, %v2122_v29  ;;  %990 = vst.msk [vmem:[%s2189_s21 + $0xa0] sm:$0xff] %vm275_vm1, %v958_v2 }
 0x2c9   : > { %v1320_v40 = vpop.eup %1319  ;;  %v961_v54 = vmul.f32 %v1318_v37, %v2128_v57  ;;  %991 = vst.msk [vmem:[%s2189_s21 + $0xa8] sm:$0xff] %vm275_vm1, %v959_v44 }
 0x2ca   : > { %v1322_v27 = vpop.eup %1321  ;;  %v962_v4 = vmul.f32 %v1320_v40, %v2134_v62  ;;  %992 = vst.msk [vmem:[%s2189_s21 + $0xb0] sm:$0xff] %vm275_vm1, %v960_v48 }
 0x2cb   : > { %v1324_v24 = vpop.eup %1323  ;;  %v963_v17 = vmul.f32 %v1322_v27, %v2140_v26  ;;  %993 = vst.msk [vmem:[%s2189_s21 + $0xb8] sm:$0xff] %vm275_vm1, %v961_v54 }
 0x2cc   : > { %v1326_v29 = vpop.eup %1325  ;;  %v964_v60 = vmul.f32 %v1324_v24, %v2146_v9  ;;  %994 = vst.msk [vmem:[%s2189_s21 + $0xc0] sm:$0xff] %vm275_vm1, %v962_v4 }
 0x2cd   : > { %v1328_v57 = vpop.eup %1327  ;;  %v965_v62 = vmul.f32 %v1326_v29, %v2152_v3  ;;  %995 = vst.msk [vmem:[%s2189_s21 + $0xc8] sm:$0xff] %vm275_vm1, %v963_v17 }
 0x2ce   : > { %v1330_v55 = vpop.eup %1329  ;;  %v966_v5 = vmul.f32 %v1328_v57, %v2156_v16  ;;  %996 = vst.msk [vmem:[%s2189_s21 + $0xd0] sm:$0xff] %vm275_vm1, %v964_v60 }
 0x2cf   : > { %v1332_v26 = vpop.eup %1331  ;;  %v967_v58 = vmul.f32 %v1330_v55, %v2160_v25  ;;  %997 = vst.msk [vmem:[%s2189_s21 + $0xd8] sm:$0xff] %vm275_vm1, %v965_v62 }
 0x2d0   : > { %v1334_v9 = vpop.eup %1333  ;;  %v968_v10 = vmul.f32 %v1332_v26, %v2164_v31  ;;  %998 = vst.msk [vmem:[%s2189_s21 + $0xe0] sm:$0xff] %vm275_vm1, %v966_v5 }
 0x2d1   : > { %v969_v61 = vmul.f32 %v1334_v9, %v2309_v38  ;;  %999 = vst.msk [vmem:[%s2189_s21 + $0xe8] sm:$0xff] %vm275_vm1, %v967_v58 }
 0x2d2   : > { %1000 = vst.msk [vmem:[%s2189_s21 + $0xf0] sm:$0xff] %vm275_vm1, %v968_v10 }
 0x2d3   : > { %1001 = vst.msk [vmem:[%s2189_s21 + $0xf8] sm:$0xff] %vm275_vm1, %v969_v61 }
 0x2d4 PF: > { %s16_s15 = sadd.s32 1, %s1427_s15  }
 0x2d5   : > { %p13_p1 = scmp.ge.s32.totalorder %s16_s15, 4  }
 0x2d7   :  { %15 = sbr.rel (!%p13_p1) target bundleno = 2 (0x2), region = 79 }
 0x2dc   :  { %1024 = vsyncpa [#allocation3], 1 }
 0x2dd   :  { %1026 = vsyncpa [#allocation3 + $0x1], 1 }
 0x2de   :  { %1027 = vsyncpa [#allocation5], 1 }

// kernel: _lambda_.6
= control target key start
LH: loop header
LB: loop body
LE: loop exit
PB: predicated region body
PF: predicated region fallthrough
CT: control target
= control target key end

     0   :  { %s1274_s15 = smov 0   ;;  %s2063_s0 = inlined_call_operand.vmem [shape: f32[512,32], index: 0, kind: input, shape index: {}]   ;;  %s2064_s1 = inlined_call_operand.vmem [shape: f32[32,32], index: 1, kind: input, shape index: {}]   ;;  %s2065_s2 = inlined_call_operand.vmem [shape: f32[1,32], index: 2, kind: input, shape index: {}]   ;;  %s2066_s3 = inlined_call_operand.vmem [shape: f32[1,32], index: 3, kind: input, shape index: {}]   ;;  %s2067_s4 = inlined_call_operand.vmem [shape: f32[512,32], index: 4, kind: output, shape index: {}]  }
   0x1 LB: > { %s1020_s16 = sadd.s32 4294967295, %s1245_s15   ;;  %p1024_p0 = scmp.ge.s32.totalorder %s1245_s15, 1  ;;  %s1245_s15 = sphi %s1274_s15, %s14_s15  }
   0x2   : > { %p163_p1 = scmp.lt.s32.totalorder %s1245_s15, 3 }
   0x4   : > { %p164_p2 = pnand %p1024_p0, %p163_p1 }
   0x6   : > { %167 = sbr.rel (%p164_p2) target bundleno = 676 (0x2a4), region = 36 }
   0xb   : > { %v236_v0 = vld [vmem:[%s2064_s1 + $0x18] sm:$0xff]  ;;  %s1025_s19 = sshll.u32 %s1020_s16, 5  ;;  %v1247_v1 = vmov 0.0   ;;  %v235_v2 = vld [vmem:[%s2064_s1 + $0x10] sm:$0xff]  ;;  %vm1248_vm0 = vmmov 0   ;;  %v234_v3 = vld [vmem:[%s2064_s1 + $0x8] sm:$0xff] }
   0xc   : > { %1077 = vmatprep.subr.mxu0 %v1247_v1  ;;  %1085 = vmatprep.mubr.msk.f32.mxu0 %vm1248_vm0, %v1247_v1  ;;  %p190_p3 = scmp.lt.s32.totalorder %s1025_s19, 63  ;;  %v233_v4 = vld [vmem:[%s2064_s1] sm:$0xff]  ;;  %vm237_vm1 = vcmask 261120  }
   0xd   : > { %1078 = vmatpush3.msra.mxu0 %v236_v0  ;;  %1088 = vmatprep.subr.mxu1 %v1247_v1 }
   0xe   : > { %1079 = vmatprep.subr.mxu0 %v1247_v1  ;;  %s2072_s19 = smov (!%p190_p3, %s1025_s19), 63  ;;  %1089 = vmatpush3.msra.mxu1 %v236_v0 }
   0xf   : > { %1080 = vmatpush3.msra.mxu0 %v235_v2  ;;  %1090 = vmatprep.subr.mxu1 %v1247_v1  ;;  %s1026_s26 = sshll.u32 %s2072_s19, 3 }
  0x10   : > { %1081 = vmatprep.subr.mxu0 %v1247_v1  ;;  %1091 = vmatpush3.msra.mxu1 %v235_v2  ;;  %s1303_s29 = scalar_lea.vmem %s2063_s0, %s1026_s26  ;;  %s1958_s10 = scalar_lea.vmem %s2067_s4, %s1026_s26 }
  0x11   : > { %1082 = vmatpush3.msra.mxu0 %v234_v3  ;;  %1092 = vmatprep.subr.mxu1 %v1247_v1  ;;  %v1306_v5 = vld [vmem:[%s1303_s29] sm:$0xff]  ;;  %v1309_v6 = vld [vmem:[%s1303_s29 + $0x8] sm:$0xff]  ;;  %v1312_v7 = vld [vmem:[%s1303_s29 + $0x10] sm:$0xff] }
  0x12   : > { %1083 = vmatprep.subr.mxu0 %v1247_v1  ;;  %1093 = vmatpush3.msra.mxu1 %v234_v3  ;;  %v1315_v8 = vld [vmem:[%s1303_s29 + $0x18] sm:$0xff]  ;;  %v238_v9 = vsel %vm237_vm1, %v1306_v5, 0.0  ;;  %v239_v10 = vsel %vm237_vm1, %v1309_v6, 0.0  ;;  %v241_v11 = vsel %vm237_vm1, %v1312_v7, 0.0  ;;  %v1324_v12 = vld [vmem:[%s1303_s29 + $0x20] sm:$0xff]  ;;  %v1330_v15 = vld [vmem:[%s1303_s29 + $0x28] sm:$0xff] }
  0x13   : > { %1084 = vmatpush3.msra.mxu0 %v233_v4  ;;  %1094 = vmatprep.subr.mxu1 %v1247_v1  ;;  %v240_v13 = vadd.f32 %v239_v10, %v238_v9  ;;  %v243_v14 = vsel %vm237_vm1, %v1315_v8, 0.0  ;;  %v245_v17 = vsel %vm237_vm1, %v1324_v12, 0.0  ;;  %v1335_v18 = vld [vmem:[%s1303_s29 + $0x30] sm:$0xff]  ;;  %v247_v20 = vsel %vm237_vm1, %v1330_v15, 0.0  ;;  %v1340_v21 = vld [vmem:[%s1303_s29 + $0x38] sm:$0xff]  ;;  %v1345_v24 = vld [vmem:[%s1303_s29 + $0x40] sm:$0xff] }
  0x14   : > { %1095 = vmatpush3.msra.mxu1 %v233_v4  ;;  %1096 = vmatprep.mubr.msk.f32.mxu1 %vm1248_vm0, %v1247_v1  ;;  %v249_v23 = vsel %vm237_vm1, %v1335_v18, 0.0  ;;  %v251_v26 = vsel %vm237_vm1, %v1340_v21, 0.0  ;;  %v1350_v27 = vld [vmem:[%s1303_s29 + $0x48] sm:$0xff]  ;;  %v253_v29 = vsel %vm237_vm1, %v1345_v24, 0.0  ;;  %v1355_v30 = vld [vmem:[%s1303_s29 + $0x50] sm:$0xff]  ;;  %v1360_v33 = vld [vmem:[%s1303_s29 + $0x58] sm:$0xff] }
  0x15   : > { %v242_v16 = vadd.f32 %v241_v11, %v240_v13  ;;  %v255_v32 = vsel %vm237_vm1, %v1350_v27, 0.0  ;;  %v257_v35 = vsel %vm237_vm1, %v1355_v30, 0.0  ;;  %v1365_v36 = vld [vmem:[%s1303_s29 + $0x60] sm:$0xff]  ;;  %v259_v38 = vsel %vm237_vm1, %v1360_v33, 0.0  ;;  %v1370_v39 = vld [vmem:[%s1303_s29 + $0x68] sm:$0xff]  ;;  %v1375_v42 = vld [vmem:[%s1303_s29 + $0x70] sm:$0xff] }
  0x16   : > { %v261_v41 = vsel %vm237_vm1, %v1365_v36, 0.0  ;;  %v263_v44 = vsel %vm237_vm1, %v1370_v39, 0.0  ;;  %v1380_v45 = vld [vmem:[%s1303_s29 + $0x78] sm:$0xff]  ;;  %v265_v47 = vsel %vm237_vm1, %v1375_v42, 0.0  ;;  %v1385_v48 = vld [vmem:[%s1303_s29 + $0x80] sm:$0xff]  ;;  %v1390_v51 = vld [vmem:[%s1303_s29 + $0x88] sm:$0xff] }
  0x17   : > { %v244_v19 = vadd.f32 %v243_v14, %v242_v16  ;;  %v267_v50 = vsel %vm237_vm1, %v1380_v45, 0.0  ;;  %v269_v53 = vsel %vm237_vm1, %v1385_v48, 0.0  ;;  %v1395_v54 = vld [vmem:[%s1303_s29 + $0x90] sm:$0xff]  ;;  %v271_v56 = vsel %vm237_vm1, %v1390_v51, 0.0  ;;  %v1400_v57 = vld [vmem:[%s1303_s29 + $0x98] sm:$0xff]  ;;  %v1405_v60 = vld [vmem:[%s1303_s29 + $0xa0] sm:$0xff] }
  0x18   : > { %v273_v59 = vsel %vm237_vm1, %v1395_v54, 0.0  ;;  %v275_v62 = vsel %vm237_vm1, %v1400_v57, 0.0  ;;  %v1410_v63 = vld [vmem:[%s1303_s29 + $0xa8] sm:$0xff]  ;;  %v277_v1 = vsel %vm237_vm1, %v1405_v60, 0.0  ;;  %v1415_v2 = vld [vmem:[%s1303_s29 + $0xb0] sm:$0xff]  ;;  %v1420_v9 = vld [vmem:[%s1303_s29 + $0xb8] sm:$0xff] }
  0x19   : > { %v246_v22 = vadd.f32 %v245_v17, %v244_v19  ;;  %v279_v4 = vsel %vm237_vm1, %v1410_v63, 0.0  ;;  %v281_v11 = vsel %vm237_vm1, %v1415_v2, 0.0  ;;  %v1425_v13 = vld [vmem:[%s1303_s29 + $0xc0] sm:$0xff]  ;;  %v283_v16 = vsel %vm237_vm1, %v1420_v9, 0.0  ;;  %v1430_v17 = vld [vmem:[%s1303_s29 + $0xc8] sm:$0xff] }
  0x1b   : > { %v248_v25 = vadd.f32 %v247_v20, %v246_v22  ;;  %v285_v20 = vsel %vm237_vm1, %v1425_v13, 0.0  ;;  %v1435_v22 = vld [vmem:[%s1303_s29 + $0xd0] sm:$0xff] }
  0x1d   : > { %v250_v28 = vadd.f32 %v249_v23, %v248_v25  ;;  %v287_v25 = vsel %vm237_vm1, %v1430_v17, 0.0 }
  0x1f   : > { %v252_v31 = vadd.f32 %v251_v26, %v250_v28  ;;  %v1440_v26 = vld [vmem:[%s1303_s29 + $0xd8] sm:$0xff] }
  0x21   : > { %v254_v34 = vadd.f32 %v253_v29, %v252_v31  ;;  %v289_v29 = vsel %vm237_vm1, %v1435_v22, 0.0  ;;  %v1445_v31 = vld [vmem:[%s1303_s29 + $0xe0] sm:$0xff] }
  0x23   : > { %v256_v37 = vadd.f32 %v255_v32, %v254_v34  ;;  %v291_v34 = vsel %vm237_vm1, %v1440_v26, 0.0 }
  0x25   : > { %v258_v40 = vadd.f32 %v257_v35, %v256_v37  ;;  %v1450_v35 = vld [vmem:[%s1303_s29 + $0xe8] sm:$0xff] }
  0x27   : > { %v260_v43 = vadd.f32 %v259_v38, %v258_v40  ;;  %v293_v38 = vsel %vm237_vm1, %v1445_v31, 0.0  ;;  %v1455_v40 = vld [vmem:[%s1303_s29 + $0xf0] sm:$0xff] }
  0x29   : > { %v262_v46 = vadd.f32 %v261_v41, %v260_v43  ;;  %v295_v43 = vsel %vm237_vm1, %v1450_v35, 0.0 }
  0x2b   : > { %v264_v49 = vadd.f32 %v263_v44, %v262_v46  ;;  %v1460_v44 = vld [vmem:[%s1303_s29 + $0xf8] sm:$0xff] }
  0x2d   : > { %v266_v52 = vadd.f32 %v265_v47, %v264_v49  ;;  %v297_v47 = vsel %vm237_vm1, %v1455_v40, 0.0 }
  0x2f   : > { %v268_v55 = vadd.f32 %v267_v50, %v266_v52  ;;  %v299_v50 = vsel %vm237_vm1, %v1460_v44, 0.0 }
  0x31   : > { %v270_v58 = vadd.f32 %v269_v53, %v268_v55 }
  0x33   : > { %v272_v61 = vadd.f32 %v271_v56, %v270_v58 }
  0x35   : > { %v274_v0 = vadd.f32 %v273_v59, %v272_v61 }
  0x37   : > { %v276_v3 = vadd.f32 %v275_v62, %v274_v0  ;;  %v381_v0 = vlaneseq }
  0x39   : > { %v278_v10 = vadd.f32 %v277_v1, %v276_v3  ;;  %v1467_v3 = vshrl.u32 %v381_v0, 7 }
  0x3b   : > { %v280_v14 = vadd.f32 %v279_v4, %v278_v10 }
  0x3d   : > { %v282_v19 = vadd.f32 %v281_v11, %v280_v14  ;;  %v383_v11 = vsub.s32 0, %v1467_v3  ;;  %v1712_v3 = vld [vmem:[%s2065_s2] ss:$0 sm:$0xff] }
  0x3f   : > { %v284_v23 = vadd.f32 %v283_v16, %v282_v19 }
  0x41   : > { %v286_v28 = vadd.f32 %v285_v20, %v284_v23 }
  0x43   : > { %v288_v32 = vadd.f32 %v287_v25, %v286_v28 }
  0x45   : > { %v290_v37 = vadd.f32 %v289_v29, %v288_v32 }
  0x47   : > { %v292_v41 = vadd.f32 %v291_v34, %v290_v37 }
  0x49   : > { %v294_v46 = vadd.f32 %v293_v38, %v292_v41 }
  0x4b   : > { %v296_v49 = vadd.f32 %v295_v43, %v294_v46 }
  0x4d   : > { %v298_v52 = vadd.f32 %v297_v47, %v296_v49 }
  0x4f   : > { %v300_v53 = vadd.f32 %v299_v50, %v298_v52 }
  0x51   : > { %v301_v55 = vrot.slane %v300_v53, 4 }
  0x53   : > { %v302_v56 = vadd.f32 %v301_v55, %v300_v53 }
  0x55   : > { %v303_v58 = vrot.slane %v302_v56, 2 }
  0x57   : > { %v304_v59 = vadd.f32 %v303_v58, %v302_v56 }
  0x59   : > { %v305_v61 = vrot.slane %v304_v59, 1 }
  0x5b   : > { %v306_v62 = vadd.f32 %v305_v61, %v304_v59 }
  0x5d   : > { %1086 = vmatmul.mubr.msk.f32.vlgmr.msra.gmra.mxu0 %vm237_vm1, %v306_v62 }
 0x11d   : > { %v376_v1 = vpop.f32.mrf.mxu0 }
 0x11e   : > { %v380_v10 = vmul.f32 0.00048828125, %v376_v1 }
 0x11f   : > { %v1087_v4 = vpop.f32.mrf.mxu0 }
 0x120   : > { %v1472_v14 = vrot.slane %v380_v10, %v383_v11 }
 0x122   : > { %v1476_v16 = vsub.f32 %v1306_v5, %v1472_v14  ;;  %v1480_v19 = vsub.f32 %v1309_v6, %v1472_v14  ;;  %v1484_v20 = vsub.f32 %v1312_v7, %v1472_v14  ;;  %v1488_v23 = vsub.f32 %v1315_v8, %v1472_v14 }
 0x123   : > { %v1496_v5 = vsub.f32 %v1324_v12, %v1472_v14  ;;  %v1502_v7 = vsub.f32 %v1330_v15, %v1472_v14  ;;  %v1510_v37 = vsub.f32 %v1335_v18, %v1472_v14  ;;  %v1517_v15 = vsub.f32 %v1340_v21, %v1472_v14 }
 0x124   : > { %v417_v25 = vmul.f32 %v1476_v16, %v1476_v16  ;;  %v418_v28 = vmul.f32 %v1480_v19, %v1480_v19  ;;  %v419_v6 = vmul.f32 %v1484_v20, %v1484_v20  ;;  %v420_v8 = vmul.f32 %v1488_v23, %v1488_v23 }
 0x125   : > { %v421_v12 = vmul.f32 %v1496_v5, %v1496_v5  ;;  %v422_v43 = vmul.f32 %v1502_v7, %v1502_v7  ;;  %v1524_v18 = vsub.f32 %v1345_v24, %v1472_v14  ;;  %v423_v49 = vmul.f32 %v1510_v37, %v1510_v37 }
 0x126   : > { %v449_v29 = vsel %vm237_vm1, %v417_v25, 0.0  ;;  %v450_v32 = vsel %vm237_vm1, %v418_v28, 0.0  ;;  %v452_v38 = vsel %vm237_vm1, %v419_v6, 0.0  ;;  %v454_v46 = vsel %vm237_vm1, %v420_v8, 0.0 }
 0x127   : > { %v451_v34 = vadd.f32 %v450_v32, %v449_v29  ;;  %v456_v50 = vsel %vm237_vm1, %v421_v12, 0.0  ;;  %v1531_v21 = vsub.f32 %v1350_v27, %v1472_v14  ;;  %v424_v53 = vmul.f32 %v1517_v15, %v1517_v15 }
 0x128   : > { %v458_v55 = vsel %vm237_vm1, %v422_v43, 0.0  ;;  %v1538_v24 = vsub.f32 %v1355_v30, %v1472_v14  ;;  %v425_v58 = vmul.f32 %v1524_v18, %v1524_v18  ;;  %v460_v59 = vsel %vm237_vm1, %v423_v49, 0.0 }
 0x129   : > { %v453_v41 = vadd.f32 %v452_v38, %v451_v34  ;;  %v1545_v27 = vsub.f32 %v1360_v33, %v1472_v14  ;;  %v426_v62 = vmul.f32 %v1531_v21, %v1531_v21  ;;  %v462_v0 = vsel %vm237_vm1, %v424_v53, 0.0 }
 0x12a   : > { %v1552_v30 = vsub.f32 %v1365_v36, %v1472_v14  ;;  %v427_v4 = vmul.f32 %v1538_v24, %v1538_v24  ;;  %v464_v10 = vsel %vm237_vm1, %v425_v58, 0.0  ;;  %v1559_v33 = vsub.f32 %v1370_v39, %v1472_v14 }
 0x12b   : > { %v455_v47 = vadd.f32 %v454_v46, %v453_v41  ;;  %v428_v28 = vmul.f32 %v1545_v27, %v1545_v27  ;;  %v466_v6 = vsel %vm237_vm1, %v426_v62, 0.0  ;;  %v1566_v36 = vsub.f32 %v1375_v42, %v1472_v14 }
 0x12c   : > { %v429_v29 = vmul.f32 %v1552_v30, %v1552_v30  ;;  %v468_v32 = vsel %vm237_vm1, %v427_v4, 0.0  ;;  %v1573_v39 = vsub.f32 %v1380_v45, %v1472_v14  ;;  %v430_v12 = vmul.f32 %v1559_v33, %v1559_v33 }
 0x12d   : > { %v457_v52 = vadd.f32 %v456_v50, %v455_v47  ;;  %v470_v38 = vsel %vm237_vm1, %v428_v28, 0.0  ;;  %v1580_v42 = vsub.f32 %v1385_v48, %v1472_v14  ;;  %v431_v43 = vmul.f32 %v1566_v36, %v1566_v36 }
 0x12e   : > { %v472_v46 = vsel %vm237_vm1, %v429_v29, 0.0  ;;  %v1587_v45 = vsub.f32 %v1390_v51, %v1472_v14  ;;  %v432_v49 = vmul.f32 %v1573_v39, %v1573_v39  ;;  %v474_v50 = vsel %vm237_vm1, %v430_v12, 0.0 }
 0x12f   : > { %v459_v56 = vadd.f32 %v458_v55, %v457_v52  ;;  %v1594_v48 = vsub.f32 %v1395_v54, %v1472_v14  ;;  %v433_v53 = vmul.f32 %v1580_v42, %v1580_v42  ;;  %v476_v55 = vsel %vm237_vm1, %v431_v43, 0.0 }
 0x130   : > { %v1601_v51 = vsub.f32 %v1400_v57, %v1472_v14  ;;  %v434_v58 = vmul.f32 %v1587_v45, %v1587_v45  ;;  %v1608_v54 = vsub.f32 %v1405_v60, %v1472_v14  ;;  %v1615_v57 = vsub.f32 %v1410_v63, %v1472_v14 }
 0x131   : > { %v461_v61 = vadd.f32 %v460_v59, %v459_v56  ;;  %v478_v59 = vsel %vm237_vm1, %v432_v49, 0.0  ;;  %v435_v62 = vmul.f32 %v1594_v48, %v1594_v48  ;;  %v1622_v60 = vsub.f32 %v1415_v2, %v1472_v14 }
 0x132   : > { %v436_v4 = vmul.f32 %v1601_v51, %v1601_v51  ;;  %v437_v28 = vmul.f32 %v1608_v54, %v1608_v54  ;;  %v1629_v63 = vsub.f32 %v1420_v9, %v1472_v14  ;;  %v438_v29 = vmul.f32 %v1615_v57, %v1615_v57 }
 0x133   : > { %v463_v1 = vadd.f32 %v462_v0, %v461_v61  ;;  %v480_v0 = vsel %vm237_vm1, %v433_v53, 0.0  ;;  %v1636_v2 = vsub.f32 %v1425_v13, %v1472_v14  ;;  %v439_v12 = vmul.f32 %v1622_v60, %v1622_v60 }
 0x134   : > { %v1643_v9 = vsub.f32 %v1430_v17, %v1472_v14  ;;  %v440_v43 = vmul.f32 %v1629_v63, %v1629_v63  ;;  %v1650_v13 = vsub.f32 %v1435_v22, %v1472_v14  ;;  %v1657_v17 = vsub.f32 %v1440_v26, %v1472_v14 }
 0x135   : > { %v465_v25 = vadd.f32 %v464_v10, %v463_v1  ;;  %v482_v10 = vsel %vm237_vm1, %v434_v58, 0.0  ;;  %v441_v49 = vmul.f32 %v1636_v2, %v1636_v2  ;;  %v1664_v22 = vsub.f32 %v1445_v31, %v1472_v14 }
 0x136   : > { %v442_v53 = vmul.f32 %v1643_v9, %v1643_v9  ;;  %v443_v58 = vmul.f32 %v1650_v13, %v1650_v13  ;;  %v1671_v26 = vsub.f32 %v1450_v35, %v1472_v14  ;;  %v1678_v31 = vsub.f32 %v1455_v40, %v1472_v14 }
 0x137   : > { %v467_v8 = vadd.f32 %v466_v6, %v465_v25  ;;  %v484_v6 = vsel %vm237_vm1, %v435_v62, 0.0  ;;  %v444_v62 = vmul.f32 %v1657_v17, %v1657_v17  ;;  %v1685_v35 = vsub.f32 %v1460_v44, %v1472_v14 }
 0x138   : > { %v447_v40 = vmul.f32 %v1678_v31, %v1678_v31 }
 0x139   : > { %v469_v34 = vadd.f32 %v468_v32, %v467_v8  ;;  %v486_v32 = vsel %vm237_vm1, %v436_v4, 0.0  ;;  %v445_v4 = vmul.f32 %v1664_v22, %v1664_v22 }
 0x13a   : > { %v508_v44 = vsel %vm237_vm1, %v447_v40, 0.0 }
 0x13b   : > { %v471_v41 = vadd.f32 %v470_v38, %v469_v34  ;;  %v488_v38 = vsel %vm237_vm1, %v437_v28, 0.0  ;;  %v446_v28 = vmul.f32 %v1671_v26, %v1671_v26 }
 0x13d   : > { %v473_v47 = vadd.f32 %v472_v46, %v471_v41  ;;  %v490_v46 = vsel %vm237_vm1, %v438_v29, 0.0  ;;  %v504_v29 = vsel %vm237_vm1, %v445_v4, 0.0 }
 0x13f   : > { %v475_v52 = vadd.f32 %v474_v50, %v473_v47  ;;  %v492_v50 = vsel %vm237_vm1, %v439_v12, 0.0  ;;  %v506_v12 = vsel %vm237_vm1, %v446_v28, 0.0 }
 0x141   : > { %v477_v56 = vadd.f32 %v476_v55, %v475_v52  ;;  %v494_v55 = vsel %vm237_vm1, %v440_v43, 0.0 }
 0x143   : > { %v479_v61 = vadd.f32 %v478_v59, %v477_v56  ;;  %v496_v59 = vsel %vm237_vm1, %v441_v49, 0.0 }
 0x145   : > { %v481_v1 = vadd.f32 %v480_v0, %v479_v61  ;;  %v498_v0 = vsel %vm237_vm1, %v442_v53, 0.0 }
 0x147   : > { %v483_v25 = vadd.f32 %v482_v10, %v481_v1  ;;  %v500_v10 = vsel %vm237_vm1, %v443_v58, 0.0 }
 0x149   : > { %v485_v8 = vadd.f32 %v484_v6, %v483_v25  ;;  %v502_v6 = vsel %vm237_vm1, %v444_v62, 0.0 }
 0x14b   : > { %v487_v34 = vadd.f32 %v486_v32, %v485_v8 }
 0x14d   : > { %v489_v41 = vadd.f32 %v488_v38, %v487_v34  ;;  %v448_v34 = vmul.f32 %v1685_v35, %v1685_v35 }
 0x14f   : > { %v491_v47 = vadd.f32 %v490_v46, %v489_v41  ;;  %v510_v41 = vsel %vm237_vm1, %v448_v34, 0.0 }
 0x151   : > { %v493_v52 = vadd.f32 %v492_v50, %v491_v47 }
 0x153   : > { %v495_v56 = vadd.f32 %v494_v55, %v493_v52 }
 0x155   : > { %v497_v61 = vadd.f32 %v496_v59, %v495_v56 }
 0x157   : > { %v499_v1 = vadd.f32 %v498_v0, %v497_v61 }
 0x159   : > { %v501_v25 = vadd.f32 %v500_v10, %v499_v1 }
 0x15b   : > { %v503_v8 = vadd.f32 %v502_v6, %v501_v25 }
 0x15d   : > { %v505_v32 = vadd.f32 %v504_v29, %v503_v8 }
 0x15f   : > { %v507_v38 = vadd.f32 %v506_v12, %v505_v32 }
 0x161   : > { %v509_v14 = vadd.f32 %v508_v44, %v507_v38 }
 0x163   : > { %v511_v43 = vadd.f32 %v510_v41, %v509_v14 }
 0x165   : > { %v512_v46 = vrot.slane %v511_v43, 4 }
 0x167   : > { %v513_v47 = vadd.f32 %v512_v46, %v511_v43 }
 0x169   : > { %v514_v49 = vrot.slane %v513_v47, 2 }
 0x16b   : > { %v515_v50 = vadd.f32 %v514_v49, %v513_v47 }
 0x16d   : > { %v516_v52 = vrot.slane %v515_v50, 1 }
 0x16f   : > { %v517_v53 = vadd.f32 %v516_v52, %v515_v50 }
 0x171   : > { %1097 = vmatmul.mubr.msk.f32.vlgmr.msra.gmra.mxu1 %vm237_vm1, %v517_v53 }
 0x231   : > { %v587_v55 = vpop.f32.mrf.mxu1 }
 0x232   : > { %v591_v58 = vmul.f32 0.00048828125, %v587_v55 }
 0x233   : > { %v1098_v56 = vpop.f32.mrf.mxu1 }
 0x234   : > { %v592_v59 = vadd.f32 1e-05, %v591_v58 }
 0x236   : > { %1109 = vrsqrt.f32 %v592_v59 }
 0x243   : > { %v1110_v61 = vpop.eup %1109 }
 0x244   : > { %v597_v62 = vrot.slane %v1110_v61, %v383_v11 }
 0x246   : > { %v598_v0 = vmul.f32 %v597_v62, %v1476_v16  ;;  %v599_v1 = vmul.f32 %v597_v62, %v1480_v19  ;;  %v600_v4 = vmul.f32 %v597_v62, %v1484_v20  ;;  %v601_v10 = vmul.f32 %v597_v62, %v1488_v23 }
 0x247   : > { %v602_v25 = vmul.f32 %v597_v62, %v1496_v5  ;;  %v603_v28 = vmul.f32 %v597_v62, %v1502_v7  ;;  %v604_v6 = vmul.f32 %v597_v62, %v1510_v37  ;;  %v605_v8 = vmul.f32 %v597_v62, %v1517_v15 }
 0x248   : > { %v606_v11 = vmul.f32 %v597_v62, %v1524_v18  ;;  %v607_v16 = vmul.f32 %v597_v62, %v1531_v21  ;;  %v608_v19 = vmul.f32 %v597_v62, %v1538_v24  ;;  %v609_v20 = vmul.f32 %v597_v62, %v1545_v27 }
 0x249   : > { %v610_v23 = vmul.f32 %v597_v62, %v1552_v30  ;;  %v611_v5 = vmul.f32 %v597_v62, %v1559_v33  ;;  %v612_v7 = vmul.f32 %v597_v62, %v1566_v36  ;;  %v613_v37 = vmul.f32 %v597_v62, %v1573_v39  ;;  %v1735_v36 = vld [vmem:[%s2066_s3] ss:$0 sm:$0xff] }
 0x24a   : > { %v614_v15 = vmul.f32 %v597_v62, %v1580_v42  ;;  %v637_v40 = vmul.f32 %v1712_v3, %v598_v0  ;;  %v638_v18 = vmul.f32 %v1712_v3, %v599_v1  ;;  %v639_v21 = vmul.f32 %v1712_v3, %v600_v4 }
 0x24b   : > { %v615_v24 = vmul.f32 %v597_v62, %v1587_v45  ;;  %v616_v27 = vmul.f32 %v597_v62, %v1594_v48  ;;  %v1729_v30 = vmul.f32 %v597_v62, %v1601_v51  ;;  %v640_v33 = vmul.f32 %v1712_v3, %v601_v10 }
 0x24c   : > { %v1738_v39 = vmul.f32 %v597_v62, %v1608_v54  ;;  %v1741_v42 = vmul.f32 %v597_v62, %v1615_v57  ;;  %v1744_v45 = vmul.f32 %v597_v62, %v1622_v60  ;;  %v641_v48 = vmul.f32 %v1712_v3, %v602_v25 }
 0x24d   : > { %v1748_v51 = vmul.f32 %v597_v62, %v1629_v63  ;;  %v1751_v29 = vmul.f32 %v597_v62, %v1636_v2  ;;  %v1754_v32 = vmul.f32 %v597_v62, %v1643_v9  ;;  %v642_v54 = vmul.f32 %v1712_v3, %v603_v28 }
 0x24e   : > { %v643_v34 = vmul.f32 %v1712_v3, %v604_v6  ;;  %v1759_v57 = vadd.f32 %v1735_v36, %v637_v40  ;;  %v1762_v60 = vadd.f32 %v1735_v36, %v638_v18  ;;  %v1765_v12 = vadd.f32 %v1735_v36, %v639_v21 }
 0x24f   : > { %v1768_v63 = vmul.f32 %v597_v62, %v1650_v13  ;;  %v1771_v2 = vmul.f32 %v597_v62, %v1657_v17  ;;  %v644_v9 = vmul.f32 %v1712_v3, %v605_v8  ;;  %v1775_v38 = vadd.f32 %v1735_v36, %v640_v33 }
 0x250   : > { %v1778_v44 = vmul.f32 %v597_v62, %v1664_v22  ;;  %v1781_v14 = vmul.f32 %v597_v62, %v1671_v26  ;;  %v645_v41 = vmul.f32 %v1712_v3, %v606_v11  ;;  %v1785_v43 = vadd.f32 %v1735_v36, %v641_v48 }
 0x251   : > { %v1788_v13 = vmul.f32 %v597_v62, %v1678_v31  ;;  %v646_v17 = vmul.f32 %v1712_v3, %v607_v16  ;;  %v647_v46 = vmul.f32 %v1712_v3, %v608_v19  ;;  %v1793_v47 = vadd.f32 %v1735_v36, %v642_v54 }
 0x252   : > { %v1796_v22 = vadd.f32 %v1735_v36, %v643_v34  ;;  %v1033_v26 = vmul.f32 -1.442695, %v1759_v57  ;;  %v1034_v49 = vmul.f32 -1.442695, %v1762_v60  ;;  %v1035_v50 = vmul.f32 -1.442695, %v1765_v12 }
 0x253   : > { %v1802_v52 = vmul.f32 %v597_v62, %v1685_v35  ;;  %v648_v31 = vmul.f32 %v1712_v3, %v609_v20  ;;  %v1806_v53 = vadd.f32 %v1735_v36, %v644_v9  ;;  %v1036_v55 = vmul.f32 -1.442695, %v1775_v38 }
 0x254   : > { %v649_v56 = vmul.f32 %v1712_v3, %v610_v23  ;;  %v1811_v58 = vadd.f32 %v1735_v36, %v645_v41  ;;  %1111 = vpow2.f32 %v1033_v26  ;;  %v1037_v59 = vmul.f32 -1.442695, %v1785_v43 }
 0x255   : > { %v650_v61 = vmul.f32 %v1712_v3, %v611_v5  ;;  %v1816_v35 = vadd.f32 %v1735_v36, %v646_v17  ;;  %1113 = vpow2.f32 %v1034_v49  ;;  %v1038_v62 = vmul.f32 -1.442695, %v1793_v47 }
 0x256   : > { %v651_v0 = vmul.f32 %v1712_v3, %v612_v7  ;;  %v1821_v1 = vadd.f32 %v1735_v36, %v647_v46  ;;  %1115 = vpow2.f32 %v1035_v50  ;;  %v1039_v4 = vmul.f32 -1.442695, %v1796_v22 }
 0x257   : > { %v652_v10 = vmul.f32 %v1712_v3, %v613_v37  ;;  %v1826_v25 = vadd.f32 %v1735_v36, %v648_v31  ;;  %1117 = vpow2.f32 %v1036_v55  ;;  %v1040_v28 = vmul.f32 -1.442695, %v1806_v53 }
 0x258   : > { %v653_v6 = vmul.f32 %v1712_v3, %v614_v15  ;;  %v1831_v8 = vadd.f32 %v1735_v36, %v649_v56  ;;  %1119 = vpow2.f32 %v1037_v59  ;;  %v1041_v11 = vmul.f32 -1.442695, %v1811_v58 }
 0x259   : > { %v654_v16 = vmul.f32 %v1712_v3, %v615_v24  ;;  %v1836_v19 = vadd.f32 %v1735_v36, %v650_v61  ;;  %1121 = vpow2.f32 %v1038_v62  ;;  %v1042_v20 = vmul.f32 -1.442695, %v1816_v35 }
 0x25a   : > { %v655_v23 = vmul.f32 %v1712_v3, %v616_v27  ;;  %v1841_v5 = vadd.f32 %v1735_v36, %v651_v0  ;;  %1123 = vpow2.f32 %v1039_v4  ;;  %v1043_v7 = vmul.f32 -1.442695, %v1821_v1 }
 0x25b   : > { %v656_v37 = vmul.f32 %v1712_v3, %v1729_v30  ;;  %v1847_v15 = vadd.f32 %v1735_v36, %v652_v10  ;;  %1125 = vpow2.f32 %v1040_v28  ;;  %v1044_v40 = vmul.f32 -1.442695, %v1826_v25 }
 0x25c   : > { %v657_v18 = vmul.f32 %v1712_v3, %v1738_v39  ;;  %v1853_v21 = vadd.f32 %v1735_v36, %v653_v6  ;;  %1127 = vpow2.f32 %v1041_v11  ;;  %v1045_v24 = vmul.f32 -1.442695, %v1831_v8 }
 0x25d   : > { %v658_v27 = vmul.f32 %v1712_v3, %v1741_v42  ;;  %v1859_v30 = vadd.f32 %v1735_v36, %v654_v16  ;;  %1129 = vpow2.f32 %v1042_v20  ;;  %v1046_v33 = vmul.f32 -1.442695, %v1836_v19 }
 0x25e   : > { %v659_v48 = vmul.f32 %v1712_v3, %v1744_v45  ;;  %v1865_v39 = vadd.f32 %v1735_v36, %v655_v23  ;;  %1131 = vpow2.f32 %v1043_v7  ;;  %v1047_v54 = vmul.f32 -1.442695, %v1841_v5 }
 0x25f   : > { %v660_v34 = vmul.f32 %v1712_v3, %v1748_v51  ;;  %v1871_v42 = vadd.f32 %v1735_v36, %v656_v37  ;;  %1133 = vpow2.f32 %v1044_v40  ;;  %v1048_v9 = vmul.f32 -1.442695, %v1847_v15 }
 0x260   : > { %v661_v41 = vmul.f32 %v1712_v3, %v1751_v29  ;;  %v1877_v45 = vadd.f32 %v1735_v36, %v657_v18  ;;  %1135 = vpow2.f32 %v1045_v24  ;;  %v1049_v17 = vmul.f32 -1.442695, %v1853_v21 }
 0x261   : > { %v1880_v46 = vpop.eup %1111  ;;  %v662_v51 = vmul.f32 %v1712_v3, %v1754_v32  ;;  %v1885_v26 = vadd.f32 %v1735_v36, %v658_v27  ;;  %1137 = vpow2.f32 %v1046_v33  ;;  %v1050_v49 = vmul.f32 -1.442695, %v1859_v30 }
 0x262   : > { %v1114_v50 = vpop.eup %1113  ;;  %v663_v29 = vmul.f32 %v1712_v3, %v1768_v63  ;;  %v1891_v31 = vadd.f32 %v1735_v36, %v659_v48  ;;  %1139 = vpow2.f32 %v1047_v54  ;;  %v1051_v55 = vmul.f32 -1.442695, %v1865_v39 }
 0x263   : > { %v1116_v56 = vpop.eup %1115  ;;  %v664_v32 = vmul.f32 %v1712_v3, %v1771_v2  ;;  %v1897_v59 = vadd.f32 %v1735_v36, %v660_v34  ;;  %1141 = vpow2.f32 %v1048_v9  ;;  %v1052_v61 = vmul.f32 -1.442695, %v1871_v42 }
 0x264   : > { %v1118_v62 = vpop.eup %1117  ;;  %v665_v63 = vmul.f32 %v1712_v3, %v1778_v44  ;;  %v1903_v0 = vadd.f32 %v1735_v36, %v661_v41  ;;  %1143 = vpow2.f32 %v1049_v17  ;;  %v1053_v4 = vmul.f32 -1.442695, %v1877_v45 }
 0x265   : > { %v1120_v10 = vpop.eup %1119  ;;  %v666_v2 = vmul.f32 %v1712_v3, %v1781_v14  ;;  %v1909_v28 = vadd.f32 %v1735_v36, %v662_v51  ;;  %1145 = vpow2.f32 %v1050_v49  ;;  %v1054_v6 = vmul.f32 -1.442695, %v1885_v26 }
 0x266   : > { %v1122_v11 = vpop.eup %1121  ;;  %v667_v44 = vmul.f32 %v1712_v3, %v1788_v13  ;;  %v1915_v16 = vadd.f32 %v1735_v36, %v663_v29  ;;  %1147 = vpow2.f32 %v1051_v55  ;;  %v1055_v20 = vmul.f32 -1.442695, %v1891_v31 }
 0x267   : > { %v1124_v23 = vpop.eup %1123  ;;  %v668_v14 = vmul.f32 %v1712_v3, %v1802_v52  ;;  %v1921_v7 = vadd.f32 %v1735_v36, %v664_v32  ;;  %1149 = vpow2.f32 %v1052_v61  ;;  %v1056_v37 = vmul.f32 -1.442695, %v1897_v59 }
 0x268   : > { %v1126_v40 = vpop.eup %1125  ;;  %v1925_v18 = vadd.f32 %v1735_v36, %v665_v63  ;;  %1151 = vpow2.f32 %v1053_v4  ;;  %v1057_v13 = vmul.f32 -1.442695, %v1903_v0  ;;  %v1929_v27 = vadd.f32 %v1735_v36, %v666_v2 }
 0x269   : > { %v1128_v24 = vpop.eup %1127  ;;  %1153 = vpow2.f32 %v1054_v6  ;;  %v1058_v3 = vmul.f32 -1.442695, %v1909_v28  ;;  %v1933_v33 = vadd.f32 %v1735_v36, %v667_v44  ;;  %v1059_v48 = vmul.f32 -1.442695, %v1915_v16 }
 0x26a   : > { %v1130_v52 = vpop.eup %1129  ;;  %1155 = vpow2.f32 %v1055_v20  ;;  %v1937_v34 = vadd.f32 %v1735_v36, %v668_v14  ;;  %v1060_v9 = vmul.f32 -1.442695, %v1921_v7  ;;  %v1061_v17 = vmul.f32 -1.442695, %v1925_v18 }
 0x26b   : > { %v1132_v54 = vpop.eup %1131  ;;  %1157 = vpow2.f32 %v1056_v37  ;;  %v1062_v49 = vmul.f32 -1.442695, %v1929_v27  ;;  %v1063_v55 = vmul.f32 -1.442695, %v1933_v33  ;;  %v804_v63 = vadd.f32 1.0, %v1880_v46 }
 0x26c   : > { %2069 = vst [vmem:[#allocation2_spill] sm:$0xff] %v1937_v34  ;;  %v1134_v41 = vpop.eup %1133  ;;  %1159 = vpow2.f32 %v1057_v13  ;;  %v1064_v36 = vmul.f32 -1.442695, %v1937_v34  ;;  %v805_v2 = vadd.f32 1.0, %v1114_v50  ;;  %v806_v44 = vadd.f32 1.0, %v1116_v56 }
 0x26d   : > { %v1136_v51 = vpop.eup %1135  ;;  %1161 = vpow2.f32 %v1058_v3  ;;  %v807_v14 = vadd.f32 1.0, %v1118_v62  ;;  %v808_v13 = vadd.f32 1.0, %v1120_v10  ;;  %v810_v34 = vadd.f32 1.0, %v1124_v23 }
 0x26e   : > { %v1138_v29 = vpop.eup %1137  ;;  %1163 = vpow2.f32 %v1059_v48  ;;  %v809_v48 = vadd.f32 1.0, %v1122_v11  ;;  %v811_v46 = vadd.f32 1.0, %v1126_v40  ;;  %v812_v50 = vadd.f32 1.0, %v1128_v24 }
 0x26f   : > { %v1140_v32 = vpop.eup %1139  ;;  %1165 = vpow2.f32 %v1060_v9  ;;  %v813_v56 = vadd.f32 1.0, %v1130_v52  ;;  %v814_v62 = vadd.f32 1.0, %v1132_v54  ;;  %v817_v40 = vadd.f32 1.0, %v1138_v29 }
 0x270   : > { %v1142_v61 = vpop.eup %1141  ;;  %1167 = vpow2.f32 %v1061_v17  ;;  %v818_v24 = vadd.f32 1.0, %v1140_v32 }
 0x271   : > { %v1144_v4 = vpop.eup %1143  ;;  %1169 = vpow2.f32 %v1062_v49 }
 0x272   : > { %v1146_v6 = vpop.eup %1145  ;;  %1171 = vpow2.f32 %v1063_v55 }
 0x273   : > { %v1148_v20 = vpop.eup %1147  ;;  %1173 = vpow2.f32 %v1064_v36 }
 0x274   : > { %v1150_v37 = vpop.eup %1149  ;;  %1175 = vrcp.f32 %v804_v63  ;;  %v815_v63 = vadd.f32 1.0, %v1134_v41  ;;  %v822_v32 = vadd.f32 1.0, %v1148_v20 }
 0x275   : > { %v1152_v3 = vpop.eup %1151  ;;  %1177 = vrcp.f32 %v805_v2  ;;  %v816_v2 = vadd.f32 1.0, %v1136_v51  ;;  %v821_v51 = vadd.f32 1.0, %v1146_v6 }
 0x276   : > { %v1154_v9 = vpop.eup %1153  ;;  %1179 = vrcp.f32 %v806_v44 }
 0x277   : > { %v1156_v17 = vpop.eup %1155  ;;  %1181 = vrcp.f32 %v807_v14  ;;  %v819_v14 = vadd.f32 1.0, %v1142_v61  ;;  %v825_v20 = vadd.f32 1.0, %v1154_v9 }
 0x278   : > { %v1158_v49 = vpop.eup %1157  ;;  %1183 = vrcp.f32 %v808_v13 }
 0x279   : > { %v1160_v55 = vpop.eup %1159  ;;  %1185 = vrcp.f32 %v809_v48  ;;  %v823_v48 = vadd.f32 1.0, %v1150_v37  ;;  %v826_v37 = vadd.f32 1.0, %v1156_v17 }
 0x27a   : > { %v1162_v36 = vpop.eup %1161  ;;  %1187 = vrcp.f32 %v810_v34  ;;  %v820_v34 = vadd.f32 1.0, %v1144_v4  ;;  %v828_v9 = vadd.f32 1.0, %v1160_v55 }
 0x27b   : > { %v1164_v10 = vpop.eup %1163  ;;  %1189 = vrcp.f32 %v811_v46  ;;  %v829_v17 = vadd.f32 1.0, %v1162_v36 }
 0x27c   : > { %v1166_v11 = vpop.eup %1165  ;;  %1191 = vrcp.f32 %v812_v50  ;;  %v824_v50 = vadd.f32 1.0, %v1152_v3  ;;  %v827_v3 = vadd.f32 1.0, %v1158_v49  ;;  %v830_v49 = vadd.f32 1.0, %v1164_v10 }
 0x27d   : > { %v1945_v23 = vpop.eup %1167  ;;  %1193 = vrcp.f32 %v813_v56  ;;  %v831_v55 = vadd.f32 1.0, %v1166_v11 }
 0x27e   : > { %v1947_v44 = vpop.eup %1169  ;;  %1195 = vrcp.f32 %v814_v62  ;;  %v832_v36 = vadd.f32 1.0, %v1945_v23 }
 0x27f   : > { %v1949_v52 = vpop.eup %1171  ;;  %1197 = vrcp.f32 %v815_v63 }
 0x280   : > { %v1951_v54 = vpop.eup %1173  ;;  %1199 = vrcp.f32 %v816_v2 }
 0x281   : > { %v1176_v41 = vpop.eup %1175  ;;  %1201 = vrcp.f32 %v817_v40 }
 0x282   : > { %v1178_v29 = vpop.eup %1177  ;;  %1203 = vrcp.f32 %v818_v24  ;;  %v900_v61 = vmul.f32 %v1176_v41, %v1759_v57  ;;  %v834_v41 = vadd.f32 1.0, %v1949_v52 }
 0x283   : > { %v1180_v13 = vpop.eup %1179  ;;  %1205 = vrcp.f32 %v819_v14  ;;  %v901_v4 = vmul.f32 %v1178_v29, %v1762_v60 }
 0x284   : > { %v1182_v46 = vpop.eup %1181  ;;  %1207 = vrcp.f32 %v820_v34  ;;  %v902_v56 = vmul.f32 %v1180_v13, %v1765_v12  ;;  %932 = vst.msk [vmem:[%s1958_s10] sm:$0xff] %vm237_vm1, %v900_v61  ;;  %v833_v34 = vadd.f32 1.0, %v1947_v44 }
 0x285   : > { %v1184_v6 = vpop.eup %1183  ;;  %1209 = vrcp.f32 %v821_v51  ;;  %v903_v62 = vmul.f32 %v1182_v46, %v1775_v38  ;;  %933 = vst.msk [vmem:[%s1958_s10 + $0x8] sm:$0xff] %vm237_vm1, %v901_v4  ;;  %v835_v51 = vadd.f32 1.0, %v1951_v54 }
 0x286   : > { %v1186_v57 = vpop.eup %1185  ;;  %1211 = vrcp.f32 %v822_v32  ;;  %v904_v60 = vmul.f32 %v1184_v6, %v1785_v43  ;;  %934 = vst.msk [vmem:[%s1958_s10 + $0x10] sm:$0xff] %vm237_vm1, %v902_v56 }
 0x287   : > { %v1188_v12 = vpop.eup %1187  ;;  %1213 = vrcp.f32 %v823_v48  ;;  %v905_v63 = vmul.f32 %v1186_v57, %v1793_v47  ;;  %935 = vst.msk [vmem:[%s1958_s10 + $0x18] sm:$0xff] %vm237_vm1, %v903_v62 }
 0x288   : > { %v1190_v38 = vpop.eup %1189  ;;  %1215 = vrcp.f32 %v824_v50  ;;  %v906_v2 = vmul.f32 %v1188_v12, %v1796_v22  ;;  %936 = vst.msk [vmem:[%s1958_s10 + $0x20] sm:$0xff] %vm237_vm1, %v904_v60 }
 0x289   : > { %v1192_v43 = vpop.eup %1191  ;;  %1217 = vrcp.f32 %v825_v20  ;;  %v907_v40 = vmul.f32 %v1190_v38, %v1806_v53  ;;  %937 = vst.msk [vmem:[%s1958_s10 + $0x28] sm:$0xff] %vm237_vm1, %v905_v63 }
 0x28a   : > { %v1194_v47 = vpop.eup %1193  ;;  %1219 = vrcp.f32 %v826_v37  ;;  %v908_v24 = vmul.f32 %v1192_v43, %v1811_v58  ;;  %938 = vst.msk [vmem:[%s1958_s10 + $0x30] sm:$0xff] %vm237_vm1, %v906_v2 }
 0x28b   : > { %v1196_v22 = vpop.eup %1195  ;;  %1221 = vrcp.f32 %v827_v3  ;;  %v909_v14 = vmul.f32 %v1194_v47, %v1816_v35  ;;  %939 = vst.msk [vmem:[%s1958_s10 + $0x38] sm:$0xff] %vm237_vm1, %v907_v40  ;;  %v2070_v3 = vld [vmem:[#allocation2_spill] sm:$0xff] }
 0x28c   : > { %v1198_v53 = vpop.eup %1197  ;;  %1223 = vrcp.f32 %v828_v9  ;;  %v910_v10 = vmul.f32 %v1196_v22, %v1821_v1  ;;  %940 = vst.msk [vmem:[%s1958_s10 + $0x40] sm:$0xff] %vm237_vm1, %v908_v24 }
 0x28d   : > { %v1200_v58 = vpop.eup %1199  ;;  %1225 = vrcp.f32 %v829_v17  ;;  %v911_v11 = vmul.f32 %v1198_v53, %v1826_v25  ;;  %941 = vst.msk [vmem:[%s1958_s10 + $0x48] sm:$0xff] %vm237_vm1, %v909_v14 }
 0x28e   : > { %v1202_v35 = vpop.eup %1201  ;;  %1227 = vrcp.f32 %v830_v49  ;;  %v912_v23 = vmul.f32 %v1200_v58, %v1831_v8  ;;  %942 = vst.msk [vmem:[%s1958_s10 + $0x50] sm:$0xff] %vm237_vm1, %v910_v10 }
 0x28f   : > { %v1204_v1 = vpop.eup %1203  ;;  %1229 = vrcp.f32 %v831_v55  ;;  %v913_v44 = vmul.f32 %v1202_v35, %v1836_v19  ;;  %943 = vst.msk [vmem:[%s1958_s10 + $0x58] sm:$0xff] %vm237_vm1, %v911_v11 }
 0x290   : > { %v1206_v25 = vpop.eup %1205  ;;  %1231 = vrcp.f32 %v832_v36  ;;  %v914_v52 = vmul.f32 %v1204_v1, %v1841_v5  ;;  %944 = vst.msk [vmem:[%s1958_s10 + $0x60] sm:$0xff] %vm237_vm1, %v912_v23 }
 0x291   : > { %v1208_v8 = vpop.eup %1207  ;;  %1233 = vrcp.f32 %v833_v34  ;;  %v915_v29 = vmul.f32 %v1206_v25, %v1847_v15  ;;  %945 = vst.msk [vmem:[%s1958_s10 + $0x68] sm:$0xff] %vm237_vm1, %v913_v44 }
 0x292   : > { %v1210_v54 = vpop.eup %1209  ;;  %1235 = vrcp.f32 %v834_v41  ;;  %v916_v19 = vmul.f32 %v1208_v8, %v1853_v21  ;;  %946 = vst.msk [vmem:[%s1958_s10 + $0x70] sm:$0xff] %vm237_vm1, %v914_v52 }
 0x293   : > { %v1212_v32 = vpop.eup %1211  ;;  %1237 = vrcp.f32 %v835_v51  ;;  %v917_v5 = vmul.f32 %v1210_v54, %v1859_v30  ;;  %947 = vst.msk [vmem:[%s1958_s10 + $0x78] sm:$0xff] %vm237_vm1, %v915_v29 }
 0x294   : > { %v1214_v61 = vpop.eup %1213  ;;  %v918_v15 = vmul.f32 %v1212_v32, %v1865_v39  ;;  %948 = vst.msk [vmem:[%s1958_s10 + $0x80] sm:$0xff] %vm237_vm1, %v916_v19 }
 0x295   : > { %v1216_v13 = vpop.eup %1215  ;;  %v919_v48 = vmul.f32 %v1214_v61, %v1871_v42  ;;  %949 = vst.msk [vmem:[%s1958_s10 + $0x88] sm:$0xff] %vm237_vm1, %v917_v5 }
 0x296   : > { %v1218_v21 = vpop.eup %1217  ;;  %v920_v4 = vmul.f32 %v1216_v13, %v1877_v45  ;;  %950 = vst.msk [vmem:[%s1958_s10 + $0x90] sm:$0xff] %vm237_vm1, %v918_v15 }
 0x297   : > { %v1220_v30 = vpop.eup %1219  ;;  %v921_v46 = vmul.f32 %v1218_v21, %v1885_v26  ;;  %951 = vst.msk [vmem:[%s1958_s10 + $0x98] sm:$0xff] %vm237_vm1, %v919_v48 }
 0x298   : > { %v1222_v39 = vpop.eup %1221  ;;  %v922_v50 = vmul.f32 %v1220_v30, %v1891_v31  ;;  %952 = vst.msk [vmem:[%s1958_s10 + $0xa0] sm:$0xff] %vm237_vm1, %v920_v4 }
 0x299   : > { %v1224_v42 = vpop.eup %1223  ;;  %v923_v56 = vmul.f32 %v1222_v39, %v1897_v59  ;;  %953 = vst.msk [vmem:[%s1958_s10 + $0xa8] sm:$0xff] %vm237_vm1, %v921_v46 }
 0x29a   : > { %v1226_v45 = vpop.eup %1225  ;;  %v924_v6 = vmul.f32 %v1224_v42, %v1903_v0  ;;  %954 = vst.msk [vmem:[%s1958_s10 + $0xb0] sm:$0xff] %vm237_vm1, %v922_v50 }
 0x29b   : > { %v1228_v26 = vpop.eup %1227  ;;  %v925_v20 = vmul.f32 %v1226_v45, %v1909_v28  ;;  %955 = vst.msk [vmem:[%s1958_s10 + $0xb8] sm:$0xff] %vm237_vm1, %v923_v56 }
 0x29c   : > { %v1230_v31 = vpop.eup %1229  ;;  %v926_v62 = vmul.f32 %v1228_v26, %v1915_v16  ;;  %956 = vst.msk [vmem:[%s1958_s10 + $0xc0] sm:$0xff] %vm237_vm1, %v924_v6 }
 0x29d   : > { %v1232_v59 = vpop.eup %1231  ;;  %v927_v0 = vmul.f32 %v1230_v31, %v1921_v7  ;;  %957 = vst.msk [vmem:[%s1958_s10 + $0xc8] sm:$0xff] %vm237_vm1, %v925_v20 }
 0x29e   : > { %v1234_v57 = vpop.eup %1233  ;;  %v928_v37 = vmul.f32 %v1232_v59, %v1925_v18  ;;  %958 = vst.msk [vmem:[%s1958_s10 + $0xd0] sm:$0xff] %vm237_vm1, %v926_v62 }
 0x29f   : > { %v1236_v28 = vpop.eup %1235  ;;  %v929_v60 = vmul.f32 %v1234_v57, %v1929_v27  ;;  %959 = vst.msk [vmem:[%s1958_s10 + $0xd8] sm:$0xff] %vm237_vm1, %v927_v0 }
 0x2a0   : > { %v1238_v16 = vpop.eup %1237  ;;  %v930_v12 = vmul.f32 %v1236_v28, %v1933_v33  ;;  %960 = vst.msk [vmem:[%s1958_s10 + $0xe0] sm:$0xff] %vm237_vm1, %v928_v37 }
 0x2a1   : > { %v931_v63 = vmul.f32 %v1238_v16, %v2070_v3  ;;  %961 = vst.msk [vmem:[%s1958_s10 + $0xe8] sm:$0xff] %vm237_vm1, %v929_v60 }
 0x2a2   : > { %962 = vst.msk [vmem:[%s1958_s10 + $0xf0] sm:$0xff] %vm237_vm1, %v930_v12 }
 0x2a3   : > { %963 = vst.msk [vmem:[%s1958_s10 + $0xf8] sm:$0xff] %vm237_vm1, %v931_v63 }
 0x2a4 PF: > { %s14_s15 = sadd.s32 1, %s1245_s15  }
 0x2a5   : > { %p11_p4 = scmp.ge.s32.totalorder %s14_s15, 4  }
 0x2a7   :  { %13 = sbr.rel (!%p11_p4) target bundleno = 1 (0x1), region = 66 }

// kernel: _lambda_.5
= control target key start
LH: loop header
LB: loop body
LE: loop exit
PB: predicated region body
PF: predicated region fallthrough
CT: control target
= control target key end

     0   :  { %v2115_v0 = vmov 0   ;;  %vm974_vm0 = vcmask 392192   ;;  %vm1649_vm1 = vcmask 261120   ;;  %s3018_s1 = inlined_call_operand.vmem [shape: bf16[432,32], index: 1, kind: input, shape index: {}]   ;;  %s3019_s0 = inlined_call_operand.vmem [shape: bf16[512,432], index: 0, kind: input, shape index: {}]   ;;  %s3020_s2 = inlined_call_operand.vmem [shape: f32[1,32], index: 2, kind: input, shape index: {}]   ;;  %s3021_s3 = inlined_call_operand.vmem [shape: f32[512,32], index: 3, kind: output, shape index: {}]  }
   0x1   :  { %1071 = vmatprep.subr.bf16.mxu0 %v2115_v0  ;;  %v1907_v1 = vld [vmem:[%s3018_s1 + $0x38] sm:$0xff]   ;;  %1360 = vmatprep.subr.bf16.mxu1 %v2115_v0  ;;  %v1908_v2 = vld [vmem:[%s3018_s1 + $0x30] sm:$0xff]   ;;  %v1909_v4 = vld [vmem:[%s3018_s1 + $0x28] sm:$0xff]  }
   0x2   :  { %1072 = vmatpush1.bf16.msra.mxu0 %v1907_v1  ;;  %v1912_v3 = vld [vmem:[%s3018_s1 + $0xb8] sm:$0xff]   ;;  %v1914_v5 = vld [vmem:[%s3018_s1 + $0xb0] sm:$0xff]   ;;  %v1910_v6 = vld [vmem:[%s3018_s1 + $0x20] sm:$0xff]  }
   0x3   :  { %1073 = vmatprep.subr.bf16.mxu0 %v2115_v0  ;;  %1361 = vmatpush1.bf16.msra.mxu1 %v1912_v3  ;;  %v1916_v7 = vld [vmem:[%s3018_s1 + $0xa8] sm:$0xff]   ;;  %v1911_v8 = vld [vmem:[%s3018_s1 + $0x18] sm:$0xff]   ;;  %v1918_v9 = vld [vmem:[%s3018_s1 + $0xa0] sm:$0xff]  }
   0x4   :  { %1362 = vmatprep.subr.bf16.mxu1 %v2115_v0  ;;  %v1913_v10 = vld [vmem:[%s3018_s1 + $0x10] sm:$0xff]   ;;  %v1920_v11 = vld [vmem:[%s3018_s1 + $0x98] sm:$0xff]   ;;  %v1915_v12 = vld [vmem:[%s3018_s1 + $0x8] sm:$0xff]  }
   0x5   :  { %v1922_v13 = vld [vmem:[%s3018_s1 + $0x90] sm:$0xff]   ;;  %v1917_v14 = vld [vmem:[%s3018_s1] sm:$0xff]   ;;  %v1924_v15 = vld [vmem:[%s3018_s1 + $0x88] sm:$0xff]  }
   0x6   :  { %1074 = vmatpush1.bf16.msra.mxu0 %v1908_v2  ;;  %v1935_v16 = vld [vmem:[%s3019_s0 + $0xc] ss:$16 sps:$4 sm:$0xff]   ;;  %v1939_v17 = vld [vmem:[%s3019_s0 + $0x4] ss:$16 sps:$4 sm:$0xff]   ;;  %v1933_v27 = vld [vmem:[%s3019_s0 + $0x8] ss:$16 sps:$4 sm:$0xff]  }
   0x7   :  { %1075 = vmatprep.subr.bf16.mxu0 %v2115_v0  ;;  %1363 = vmatpush1.bf16.msra.mxu1 %v1914_v5  ;;  %v1919_v18 = vld [vmem:[%s3018_s1 + $0x78] sm:$0xff]   ;;  %v1926_v19 = vld [vmem:[%s3018_s1 + $0x80] sm:$0xff]   ;;  %v1921_v20 = vld [vmem:[%s3018_s1 + $0x70] sm:$0xff]  }
   0x8   :  { %1364 = vmatprep.subr.bf16.mxu1 %v2115_v0  ;;  %1874 = vmatprep.mubr.msk.bf16.mxu1 %vm974_vm0, %v1935_v16  ;;  %v1928_v21 = vld [vmem:[%s3018_s1 + $0xd0] sm:$0xff]   ;;  %v1923_v22 = vld [vmem:[%s3018_s1 + $0x68] sm:$0xff]   ;;  %v1925_v24 = vld [vmem:[%s3018_s1 + $0x60] sm:$0xff]  }
   0x9   :  { %1103 = vmatprep.mubr.bf16.mxu0 %v1939_v17  ;;  %v1930_v23 = vld [vmem:[%s3018_s1 + $0xc8] sm:$0xff]   ;;  %v1932_v25 = vld [vmem:[%s3018_s1 + $0xc0] sm:$0xff]   ;;  %v1927_v26 = vld [vmem:[%s3018_s1 + $0x58] sm:$0xff]  }
   0xa   :  { %1076 = vmatpush1.bf16.msra.mxu0 %v1909_v4  ;;  %v1940_v28 = vld [vmem:[%s3019_s0 + $0x2c] ss:$16 sps:$4 sm:$0xff]   ;;  %v1929_v29 = vld [vmem:[%s3018_s1 + $0x50] sm:$0xff]   ;;  %v1942_v31 = vld [vmem:[%s3019_s0 + $0x28] ss:$16 sps:$4 sm:$0xff]  }
   0xb   :  { %1077 = vmatprep.subr.bf16.mxu0 %v2115_v0  ;;  %1365 = vmatpush1.bf16.msra.mxu1 %v1916_v7  ;;  %v1931_v30 = vld [vmem:[%s3018_s1 + $0x48] sm:$0xff]   ;;  %v1936_v33 = vld [vmem:[%s3018_s1 + $0x40] sm:$0xff]  }
   0xc   :  { %1366 = vmatprep.subr.bf16.mxu1 %v2115_v0  ;;  %v1946_v32 = vld [vmem:[%s3019_s0 + $0x4c] ss:$16 sps:$4 sm:$0xff]   ;;  %v1937_v34 = vld [vmem:[%s3019_s0] ss:$16 sps:$4 sm:$0xff]   ;;  %v1943_v35 = vld [vmem:[%s3019_s0 + $0x24] ss:$16 sps:$4 sm:$0xff]  }
   0xd   :  { %v1948_v36 = vld [vmem:[%s3019_s0 + $0x48] ss:$16 sps:$4 sm:$0xff]   ;;  %v1952_v37 = vld [vmem:[%s3019_s0 + $0x6c] ss:$16 sps:$4 sm:$0xff]   ;;  %v1945_v38 = vld [vmem:[%s3019_s0 + $0x20] ss:$16 sps:$4 sm:$0xff]  }
   0xe   :  { %1078 = vmatpush1.bf16.msra.mxu0 %v1910_v6  ;;  %v1949_v39 = vld [vmem:[%s3019_s0 + $0x44] ss:$16 sps:$4 sm:$0xff]   ;;  %v1954_v40 = vld [vmem:[%s3019_s0 + $0x68] ss:$16 sps:$4 sm:$0xff]   ;;  %v1958_v41 = vld [vmem:[%s3019_s0 + $0x8c] ss:$16 sps:$4 sm:$0xff]  }
   0xf   :  { %1079 = vmatprep.subr.bf16.mxu0 %v2115_v0  ;;  %1367 = vmatpush1.bf16.msra.mxu1 %v1918_v9  ;;  %v1951_v42 = vld [vmem:[%s3019_s0 + $0x40] ss:$16 sps:$4 sm:$0xff]   ;;  %v1955_v43 = vld [vmem:[%s3019_s0 + $0x64] ss:$16 sps:$4 sm:$0xff]   ;;  %v1960_v44 = vld [vmem:[%s3019_s0 + $0x88] ss:$16 sps:$4 sm:$0xff]  }
  0x10   :  { %1368 = vmatprep.subr.bf16.mxu1 %v2115_v0  ;;  %v1964_v45 = vld [vmem:[%s3019_s0 + $0xac] ss:$16 sps:$4 sm:$0xff]   ;;  %v1957_v46 = vld [vmem:[%s3019_s0 + $0x60] ss:$16 sps:$4 sm:$0xff]   ;;  %v1961_v47 = vld [vmem:[%s3019_s0 + $0x84] ss:$16 sps:$4 sm:$0xff]  }
  0x11   :  { %v1966_v48 = vld [vmem:[%s3019_s0 + $0xa8] ss:$16 sps:$4 sm:$0xff]   ;;  %v1970_v49 = vld [vmem:[%s3019_s0 + $0xcc] ss:$16 sps:$4 sm:$0xff]   ;;  %v1963_v50 = vld [vmem:[%s3019_s0 + $0x80] ss:$16 sps:$4 sm:$0xff]  }
  0x12   :  { %1080 = vmatpush1.bf16.msra.mxu0 %v1911_v8  ;;  %v1967_v51 = vld [vmem:[%s3019_s0 + $0xa4] ss:$16 sps:$4 sm:$0xff]   ;;  %v1972_v52 = vld [vmem:[%s3019_s0 + $0xc8] ss:$16 sps:$4 sm:$0xff]   ;;  %v1976_v53 = vld [vmem:[%s3019_s0 + $0xec] ss:$16 sps:$4 sm:$0xff]  }
  0x13   :  { %1081 = vmatprep.subr.bf16.mxu0 %v2115_v0  ;;  %1369 = vmatpush1.bf16.msra.mxu1 %v1920_v11  ;;  %v1969_v54 = vld [vmem:[%s3019_s0 + $0xa0] ss:$16 sps:$4 sm:$0xff]   ;;  %v1973_v55 = vld [vmem:[%s3019_s0 + $0xc4] ss:$16 sps:$4 sm:$0xff]   ;;  %v1978_v56 = vld [vmem:[%s3019_s0 + $0xe8] ss:$16 sps:$4 sm:$0xff]  }
  0x14   :  { %1370 = vmatprep.subr.bf16.mxu1 %v2115_v0  ;;  %v1982_v57 = vld [vmem:[%s3019_s0 + $0x10c] ss:$16 sps:$4 sm:$0xff]   ;;  %v1975_v58 = vld [vmem:[%s3019_s0 + $0xc0] ss:$16 sps:$4 sm:$0xff]   ;;  %v1979_v59 = vld [vmem:[%s3019_s0 + $0xe4] ss:$16 sps:$4 sm:$0xff]  }
  0x15   :  { %v1984_v60 = vld [vmem:[%s3019_s0 + $0x108] ss:$16 sps:$4 sm:$0xff]   ;;  %v1988_v61 = vld [vmem:[%s3019_s0 + $0x12c] ss:$16 sps:$4 sm:$0xff]   ;;  %v1981_v62 = vld [vmem:[%s3019_s0 + $0xe0] ss:$16 sps:$4 sm:$0xff]  }
  0x16   :  { %1082 = vmatpush1.bf16.msra.mxu0 %v1913_v10  ;;  %v1985_v63 = vld [vmem:[%s3019_s0 + $0x104] ss:$16 sps:$4 sm:$0xff]   ;;  %v1994_v1 = vld [vmem:[%s3019_s0 + $0x14c] ss:$16 sps:$4 sm:$0xff]   ;;  %v1987_v2 = vld [vmem:[%s3019_s0 + $0x100] ss:$16 sps:$4 sm:$0xff]  }
  0x17   :  { %1083 = vmatprep.subr.bf16.mxu0 %v2115_v0  ;;  %1371 = vmatpush1.bf16.msra.mxu1 %v1922_v13  ;;  %v1991_v3 = vld [vmem:[%s3019_s0 + $0x124] ss:$16 sps:$4 sm:$0xff]   ;;  %v1996_v4 = vld [vmem:[%s3019_s0 + $0x148] ss:$16 sps:$4 sm:$0xff]   ;;  %v2000_v5 = vld [vmem:[%s3019_s0 + $0x16c] ss:$16 sps:$4 sm:$0xff]  }
  0x18   :  { %1372 = vmatprep.subr.bf16.mxu1 %v2115_v0  ;;  %v1993_v6 = vld [vmem:[%s3019_s0 + $0x120] ss:$16 sps:$4 sm:$0xff]   ;;  %v1997_v7 = vld [vmem:[%s3019_s0 + $0x144] ss:$16 sps:$4 sm:$0xff]   ;;  %v2002_v8 = vld [vmem:[%s3019_s0 + $0x168] ss:$16 sps:$4 sm:$0xff]  }
  0x19   :  { %v2006_v9 = vld [vmem:[%s3019_s0 + $0x18c] ss:$16 sps:$4 sm:$0xff]   ;;  %v1999_v10 = vld [vmem:[%s3019_s0 + $0x140] ss:$16 sps:$4 sm:$0xff]   ;;  %v2003_v11 = vld [vmem:[%s3019_s0 + $0x164] ss:$16 sps:$4 sm:$0xff]  }
  0x1a   :  { %1084 = vmatpush1.bf16.msra.mxu0 %v1915_v12  ;;  %v2008_v12 = vld [vmem:[%s3019_s0 + $0x188] ss:$16 sps:$4 sm:$0xff]   ;;  %v2012_v13 = vld [vmem:[%s3019_s0 + $0x1ac] ss:$16 sps:$4 sm:$0xff]  }
  0x1b   :  { %1085 = vmatprep.subr.bf16.mxu0 %v2115_v0  ;;  %1373 = vmatpush1.bf16.msra.mxu1 %v1924_v15  ;;  %v2009_v15 = vld [vmem:[%s3019_s0 + $0x184] ss:$16 sps:$4 sm:$0xff]   ;;  %v2014_v16 = vld [vmem:[%s3019_s0 + $0x1a8] ss:$16 sps:$4 sm:$0xff]   ;;  %v2018_v17 = vld [vmem:[%s3019_s0 + $0x1cc] ss:$16 sps:$4 sm:$0xff]  }
  0x1c   :  { %1374 = vmatprep.subr.bf16.mxu1 %v2115_v0 }
  0x1e   :  { %1086 = vmatpush1.bf16.msra.mxu0 %v1917_v14  ;;  %v2005_v14 = vld [vmem:[%s3019_s0 + $0x160] ss:$16 sps:$4 sm:$0xff]  }
  0x1f   :  { %1087 = vmatprep.subr.bf16.mxu0 %v2115_v0  ;;  %1375 = vmatpush1.bf16.msra.mxu1 %v1926_v19  ;;  %v2015_v19 = vld [vmem:[%s3019_s0 + $0x1a4] ss:$16 sps:$4 sm:$0xff]  }
  0x20   :  { %1386 = vmatprep.subr.bf16.mxu1 %v2115_v0 }
  0x22   :  { %1088 = vmatpush2.bf16.msra.mxu0 %v1919_v18  ;;  %v2011_v18 = vld [vmem:[%s3019_s0 + $0x180] ss:$16 sps:$4 sm:$0xff]  }
  0x23   :  { %1089 = vmatprep.subr.bf16.mxu0 %v2115_v0  ;;  %1387 = vmatpush2.bf16.msra.mxu1 %v1928_v21  ;;  %v2024_v21 = vld [vmem:[%s3019_s0 + $0x1ec] ss:$16 sps:$4 sm:$0xff]  }
  0x24   :  { %1388 = vmatprep.subr.bf16.mxu1 %v2115_v0 }
  0x26   :  { %1090 = vmatpush2.bf16.msra.mxu0 %v1921_v20  ;;  %v2020_v20 = vld [vmem:[%s3019_s0 + $0x1c8] ss:$16 sps:$4 sm:$0xff]  }
  0x27   :  { %1091 = vmatprep.subr.bf16.mxu0 %v2115_v0  ;;  %1389 = vmatpush2.bf16.msra.mxu1 %v1930_v23  ;;  %v2021_v23 = vld [vmem:[%s3019_s0 + $0x1c4] ss:$16 sps:$4 sm:$0xff]  }
  0x28   :  { %1390 = vmatprep.subr.bf16.mxu1 %v2115_v0 }
  0x2a   :  { %1092 = vmatpush2.bf16.msra.mxu0 %v1923_v22  ;;  %v2017_v22 = vld [vmem:[%s3019_s0 + $0x1a0] ss:$16 sps:$4 sm:$0xff]  }
  0x2b   :  { %1093 = vmatprep.subr.bf16.mxu0 %v2115_v0  ;;  %1391 = vmatpush2.bf16.msra.mxu1 %v1932_v25  ;;  %v2030_v25 = vld [vmem:[%s3019_s0 + $0x20c] ss:$16 sps:$4 sm:$0xff]  }
  0x2e   :  { %1094 = vmatpush2.bf16.msra.mxu0 %v1925_v24  ;;  %1393 = vmatmul.mubr.bf16.vlgmr.msra.gmra.mxu1 %v1933_v27  ;;  %v2026_v24 = vld [vmem:[%s3019_s0 + $0x1e8] ss:$16 sps:$4 sm:$0xff]   ;;  %v2027_v27 = vld [vmem:[%s3019_s0 + $0x1e4] ss:$16 sps:$4 sm:$0xff]  }
  0x2f   :  { %1095 = vmatprep.subr.bf16.mxu0 %v2115_v0  ;;  %1875 = vmatprep.mubr.msk.bf16.mxu1 %vm974_vm0, %v1940_v28  ;;  %v2032_v28 = vld [vmem:[%s3019_s0 + $0x208] ss:$16 sps:$4 sm:$0xff]  }
  0x32   :  { %1096 = vmatpush2.bf16.msra.mxu0 %v1927_v26  ;;  %v2023_v26 = vld [vmem:[%s3019_s0 + $0x1c0] ss:$16 sps:$4 sm:$0xff]  }
  0x33   :  { %1097 = vmatprep.subr.bf16.mxu0 %v2115_v0 }
  0x36   :  { %1098 = vmatpush2.bf16.msra.mxu0 %v1929_v29  ;;  %1401 = vmatmul.mubr.bf16.gmra.mxu1 %v1942_v31  ;;  %v2036_v29 = vld [vmem:[%s3019_s0 + $0x22c] ss:$16 sps:$4 sm:$0xff]   ;;  %v2033_v31 = vld [vmem:[%s3019_s0 + $0x204] ss:$16 sps:$4 sm:$0xff]  }
  0x37   :  { %1099 = vmatprep.subr.bf16.mxu0 %v2115_v0  ;;  %1876 = vmatprep.mubr.msk.bf16.mxu1 %vm974_vm0, %v1946_v32  ;;  %v2038_v32 = vld [vmem:[%s3019_s0 + $0x228] ss:$16 sps:$4 sm:$0xff]  }
  0x3a   :  { %1100 = vmatpush2.bf16.msra.mxu0 %v1931_v30  ;;  %v2029_v30 = vld [vmem:[%s3019_s0 + $0x1e0] ss:$16 sps:$4 sm:$0xff]  }
  0x3b   :  { %1101 = vmatprep.subr.bf16.mxu0 %v2115_v0  ;;  %v1990_v0 = vld [vmem:[%s3019_s0 + $0x128] ss:$16 sps:$4 sm:$0xff]  }
  0x3e   :  { %1102 = vmatpush2.bf16.msra.mxu0 %v1936_v33  ;;  %1409 = vmatmul.mubr.bf16.gmra.mxu1 %v1948_v36  ;;  %v2042_v33 = vld [vmem:[%s3019_s0 + $0x24c] ss:$16 sps:$4 sm:$0xff]   ;;  %v2044_v36 = vld [vmem:[%s3019_s0 + $0x248] ss:$16 sps:$4 sm:$0xff]  }
  0x3f   :  { %1877 = vmatprep.mubr.msk.bf16.mxu1 %vm974_vm0, %v1952_v37  ;;  %v2048_v37 = vld [vmem:[%s3019_s0 + $0x26c] ss:$16 sps:$4 sm:$0xff]  }
  0x41   :  { %1104 = vmatmul.mubr.bf16.vlgmr.msra.gmra.mxu0 %v1937_v34  ;;  %v2035_v34 = vld [vmem:[%s3019_s0 + $0x200] ss:$16 sps:$4 sm:$0xff]  }
  0x42   :  { %1111 = vmatprep.mubr.bf16.mxu0 %v1943_v35  ;;  %v2039_v35 = vld [vmem:[%s3019_s0 + $0x224] ss:$16 sps:$4 sm:$0xff]  }
  0x46   :  { %1417 = vmatmul.mubr.bf16.gmra.mxu1 %v1954_v40  ;;  %v2050_v40 = vld [vmem:[%s3019_s0 + $0x268] ss:$16 sps:$4 sm:$0xff]  }
  0x47   :  { %1878 = vmatprep.mubr.msk.bf16.mxu1 %vm974_vm0, %v1958_v41  ;;  %v2054_v41 = vld [vmem:[%s3019_s0 + $0x28c] ss:$16 sps:$4 sm:$0xff]  }
  0x49   :  { %1112 = vmatmul.mubr.bf16.gmra.mxu0 %v1945_v38  ;;  %v2041_v38 = vld [vmem:[%s3019_s0 + $0x220] ss:$16 sps:$4 sm:$0xff]  }
  0x4a   :  { %1119 = vmatprep.mubr.bf16.mxu0 %v1949_v39  ;;  %v2045_v39 = vld [vmem:[%s3019_s0 + $0x244] ss:$16 sps:$4 sm:$0xff]  }
  0x4e   :  { %1425 = vmatmul.mubr.bf16.gmra.mxu1 %v1960_v44  ;;  %v2056_v44 = vld [vmem:[%s3019_s0 + $0x288] ss:$16 sps:$4 sm:$0xff]  }
  0x4f   :  { %1879 = vmatprep.mubr.msk.bf16.mxu1 %vm974_vm0, %v1964_v45  ;;  %v2060_v45 = vld [vmem:[%s3019_s0 + $0x2ac] ss:$16 sps:$4 sm:$0xff]  }
  0x51   :  { %1120 = vmatmul.mubr.bf16.gmra.mxu0 %v1951_v42  ;;  %v2047_v42 = vld [vmem:[%s3019_s0 + $0x240] ss:$16 sps:$4 sm:$0xff]  }
  0x52   :  { %1127 = vmatprep.mubr.bf16.mxu0 %v1955_v43  ;;  %v2051_v43 = vld [vmem:[%s3019_s0 + $0x264] ss:$16 sps:$4 sm:$0xff]  }
  0x56   :  { %1433 = vmatmul.mubr.bf16.gmra.mxu1 %v1966_v48  ;;  %v2062_v48 = vld [vmem:[%s3019_s0 + $0x2a8] ss:$16 sps:$4 sm:$0xff]  }
  0x57   :  { %1880 = vmatprep.mubr.msk.bf16.mxu1 %vm974_vm0, %v1970_v49  ;;  %v2066_v49 = vld [vmem:[%s3019_s0 + $0x2cc] ss:$16 sps:$4 sm:$0xff]  }
  0x59   :  { %1128 = vmatmul.mubr.bf16.gmra.mxu0 %v1957_v46  ;;  %v2053_v46 = vld [vmem:[%s3019_s0 + $0x260] ss:$16 sps:$4 sm:$0xff]  }
  0x5a   :  { %1135 = vmatprep.mubr.bf16.mxu0 %v1961_v47  ;;  %v2057_v47 = vld [vmem:[%s3019_s0 + $0x284] ss:$16 sps:$4 sm:$0xff]  }
  0x5e   :  { %1441 = vmatmul.mubr.bf16.gmra.mxu1 %v1972_v52  ;;  %v2068_v52 = vld [vmem:[%s3019_s0 + $0x2c8] ss:$16 sps:$4 sm:$0xff]  }
  0x5f   :  { %1881 = vmatprep.mubr.msk.bf16.mxu1 %vm974_vm0, %v1976_v53  ;;  %v2072_v53 = vld [vmem:[%s3019_s0 + $0x2ec] ss:$16 sps:$4 sm:$0xff]  }
  0x61   :  { %1136 = vmatmul.mubr.bf16.gmra.mxu0 %v1963_v50  ;;  %v2059_v50 = vld [vmem:[%s3019_s0 + $0x280] ss:$16 sps:$4 sm:$0xff]  }
  0x62   :  { %1143 = vmatprep.mubr.bf16.mxu0 %v1967_v51  ;;  %v2063_v51 = vld [vmem:[%s3019_s0 + $0x2a4] ss:$16 sps:$4 sm:$0xff]  }
  0x66   :  { %1449 = vmatmul.mubr.bf16.gmra.mxu1 %v1978_v56  ;;  %v2074_v56 = vld [vmem:[%s3019_s0 + $0x2e8] ss:$16 sps:$4 sm:$0xff]  }
  0x67   :  { %1882 = vmatprep.mubr.msk.bf16.mxu1 %vm974_vm0, %v1982_v57  ;;  %v2078_v57 = vld [vmem:[%s3019_s0 + $0x30c] ss:$16 sps:$4 sm:$0xff]  }
  0x69   :  { %1144 = vmatmul.mubr.bf16.gmra.mxu0 %v1969_v54  ;;  %v2065_v54 = vld [vmem:[%s3019_s0 + $0x2a0] ss:$16 sps:$4 sm:$0xff]  }
  0x6a   :  { %1151 = vmatprep.mubr.bf16.mxu0 %v1973_v55  ;;  %v2069_v55 = vld [vmem:[%s3019_s0 + $0x2c4] ss:$16 sps:$4 sm:$0xff]  }
  0x6e   :  { %1457 = vmatmul.mubr.bf16.gmra.mxu1 %v1984_v60  ;;  %v2080_v60 = vld [vmem:[%s3019_s0 + $0x308] ss:$16 sps:$4 sm:$0xff]  }
  0x6f   :  { %1883 = vmatprep.mubr.msk.bf16.mxu1 %vm974_vm0, %v1988_v61  ;;  %v2083_v61 = vld [vmem:[%s3019_s0 + $0x32c] ss:$16 sps:$4 sm:$0xff]  }
  0x71   :  { %1152 = vmatmul.mubr.bf16.gmra.mxu0 %v1975_v58  ;;  %v2071_v58 = vld [vmem:[%s3019_s0 + $0x2c0] ss:$16 sps:$4 sm:$0xff]  }
  0x72   :  { %1159 = vmatprep.mubr.bf16.mxu0 %v1979_v59  ;;  %v2075_v59 = vld [vmem:[%s3019_s0 + $0x2e4] ss:$16 sps:$4 sm:$0xff]  }
  0x76   :  { %1465 = vmatmul.mubr.bf16.gmra.mxu1 %v1990_v0  ;;  %v118_v0 = vld [vmem:[%s3019_s0 + $0x338] sm:$0xff] }
  0x77   :  { %1884 = vmatprep.mubr.msk.bf16.mxu1 %vm974_vm0, %v1994_v1 }
  0x79   :  { %1160 = vmatmul.mubr.bf16.gmra.mxu0 %v1981_v62 }
  0x7a   :  { %1167 = vmatprep.mubr.bf16.mxu0 %v1985_v63  ;;  %v116_v63 = vld [vmem:[%s3019_s0 + $0x328] sm:$0xff] }
  0x7e   :  { %1473 = vmatmul.mubr.bf16.gmra.mxu1 %v1996_v4 }
  0x7f   :  { %1885 = vmatprep.mubr.msk.bf16.mxu1 %vm974_vm0, %v2000_v5  ;;  %v1821_v5 = vcombine.low %v116_v63, %v118_v0  ;;  %v123_v63 = vld [vmem:[%s3019_s0 + $0x360] sm:$0xff]  ;;  %v125_v0 = vld [vmem:[%s3019_s0 + $0x370] sm:$0xff] }
  0x81   :  { %1168 = vmatmul.mubr.bf16.gmra.mxu0 %v1987_v2  ;;  %v2077_v2 = vld [vmem:[%s3019_s0 + $0x2e0] ss:$16 sps:$4 sm:$0xff]  }
  0x82   :  { %1175 = vmatprep.mubr.bf16.mxu0 %v1991_v3  ;;  %v2081_v3 = vld [vmem:[%s3019_s0 + $0x304] ss:$16 sps:$4 sm:$0xff]  }
  0x86   :  { %1481 = vmatmul.mubr.bf16.gmra.mxu1 %v2002_v8  ;;  %v111_v8 = vld [vmem:[%s3019_s0 + $0x300] sm:$0xff] }
  0x87   :  { %1886 = vmatprep.mubr.msk.bf16.mxu1 %vm974_vm0, %v2006_v9  ;;  %v113_v9 = vld [vmem:[%s3019_s0 + $0x310] sm:$0xff] }
  0x89   :  { %1176 = vmatmul.mubr.bf16.gmra.mxu0 %v1993_v6  ;;  %v2087_v6 = vld [vmem:[%s3019_s0 + $0x34c] ss:$16 sps:$4 sm:$0xff]  }
  0x8a   :  { %1183 = vmatprep.mubr.bf16.mxu0 %v1997_v7 }
  0x8e   :  { %1489 = vmatmul.mubr.bf16.gmra.mxu1 %v2008_v12  ;;  %v122_v12 = vld [vmem:[%s3019_s0 + $0x358] sm:$0xff] }
  0x8f   :  { %1887 = vmatprep.mubr.msk.bf16.mxu1 %vm974_vm0, %v2012_v13 }
  0x91   :  { %1184 = vmatmul.mubr.bf16.gmra.mxu0 %v1999_v10 }
  0x92   :  { %1191 = vmatprep.mubr.bf16.mxu0 %v2003_v11  ;;  %v120_v11 = vld [vmem:[%s3019_s0 + $0x348] sm:$0xff] }
  0x96   :  { %1497 = vmatmul.mubr.bf16.gmra.mxu1 %v2014_v16 }
  0x97   :  { %1888 = vmatprep.mubr.msk.bf16.mxu1 %vm974_vm0, %v2018_v17  ;;  %v1825_v17 = vcombine.low %v120_v11, %v122_v12 }
  0x99   :  { %1192 = vmatmul.mubr.bf16.gmra.mxu0 %v2005_v14  ;;  %v1815_v14 = vcombine.low %v111_v8, %v113_v9  ;;  %v1827_v8 = vcombine.low %v123_v63, %v125_v0 }
  0x9a   :  { %1199 = vmatprep.mubr.bf16.mxu0 %v2009_v15  ;;  %v2085_v15 = vld [vmem:[%s3019_s0 + $0x324] ss:$16 sps:$4 sm:$0xff]  }
  0x9e   :  { %1505 = vmatmul.mubr.bf16.gmra.mxu1 %v2020_v20 }
  0x9f   :  { %1889 = vmatprep.mubr.msk.bf16.mxu1 %vm974_vm0, %v2024_v21 }
  0xa1   :  { %1200 = vmatmul.mubr.bf16.gmra.mxu0 %v2011_v18  ;;  %v2598_v18 = vld [vmem:[%s3020_s2] ss:$0 sm:$0xff] }
  0xa2   :  { %1207 = vmatprep.mubr.bf16.mxu0 %v2015_v19  ;;  %v2091_v19 = vld [vmem:[%s3019_s0 + $0x36c] ss:$16 sps:$4 sm:$0xff]  }
  0xa6   :  { %1513 = vmatmul.mubr.bf16.gmra.mxu1 %v2026_v24  ;;  %v117_v24 = vld [vmem:[%s3019_s0 + $0x330] sm:$0xff] }
  0xa7   :  { %1890 = vmatprep.mubr.msk.bf16.mxu1 %vm974_vm0, %v2030_v25 }
  0xa9   :  { %1208 = vmatmul.mubr.bf16.gmra.mxu0 %v2017_v22 }
  0xaa   :  { %1215 = vmatprep.mubr.bf16.mxu0 %v2021_v23  ;;  %v115_v23 = vld [vmem:[%s3019_s0 + $0x320] sm:$0xff] }
  0xae   :  { %1521 = vmatmul.mubr.bf16.gmra.mxu1 %v2032_v28  ;;  %v126_v28 = vld [vmem:[%s3019_s0 + $0x378] sm:$0xff] }
  0xaf   :  { %1891 = vmatprep.mubr.msk.bf16.mxu1 %vm974_vm0, %v2036_v29 }
  0xb1   :  { %1216 = vmatmul.mubr.bf16.gmra.mxu0 %v2023_v26 }
  0xb2   :  { %1223 = vmatprep.mubr.bf16.mxu0 %v2027_v27  ;;  %v124_v27 = vld [vmem:[%s3019_s0 + $0x368] sm:$0xff] }
  0xb6   :  { %1529 = vmatmul.mubr.bf16.gmra.mxu1 %v2038_v32  ;;  %v1819_v32 = vcombine.low %v115_v23, %v117_v24  ;;  %v138_v23 = vld [vmem:[%s3019_s0 + $0x3d8] sm:$0xff] }
  0xb7   :  { %1892 = vmatprep.mubr.msk.bf16.mxu1 %vm974_vm0, %v2042_v33 }
  0xb9   :  { %1224 = vmatmul.mubr.bf16.gmra.mxu0 %v2029_v30 }
  0xba   :  { %1231 = vmatprep.mubr.bf16.mxu0 %v2033_v31 }
  0xbe   :  { %1537 = vmatmul.mubr.bf16.gmra.mxu1 %v2044_v36  ;;  %v1829_v36 = vcombine.low %v124_v27, %v126_v28  ;;  %v2097_v27 = vld [vmem:[%s3019_s0 + $0x380] ss:$16 sps:$4 sm:$0xff]  }
  0xbf   :  { %1893 = vmatprep.mubr.msk.bf16.mxu1 %vm974_vm0, %v2048_v37 }
  0xc1   :  { %1232 = vmatmul.mubr.bf16.gmra.mxu0 %v2035_v34  ;;  %v2089_v34 = vld [vmem:[%s3019_s0 + $0x344] ss:$16 sps:$4 sm:$0xff]  }
  0xc2   :  { %1239 = vmatprep.mubr.bf16.mxu0 %v2039_v35 }
  0xc6   :  { %1545 = vmatmul.mubr.bf16.gmra.mxu1 %v2050_v40 }
  0xc7   :  { %1894 = vmatprep.mubr.msk.bf16.mxu1 %vm974_vm0, %v2054_v41 }
  0xc9   :  { %1240 = vmatmul.mubr.bf16.gmra.mxu0 %v2041_v38  ;;  %v2095_v38 = vld [vmem:[%s3019_s0 + $0x38c] ss:$16 sps:$4 sm:$0xff]  }
  0xca   :  { %1247 = vmatprep.mubr.bf16.mxu0 %v2045_v39 }
  0xce   :  { %1553 = vmatmul.mubr.bf16.gmra.mxu1 %v2056_v44  ;;  %v121_v44 = vld [vmem:[%s3019_s0 + $0x350] sm:$0xff] }
  0xcf   :  { %1895 = vmatprep.mubr.msk.bf16.mxu1 %vm974_vm0, %v2060_v45 }
  0xd1   :  { %1248 = vmatmul.mubr.bf16.gmra.mxu0 %v2047_v42 }
  0xd2   :  { %1255 = vmatprep.mubr.bf16.mxu0 %v2051_v43  ;;  %v119_v43 = vld [vmem:[%s3019_s0 + $0x340] sm:$0xff] }
  0xd6   :  { %1561 = vmatmul.mubr.bf16.gmra.mxu1 %v2062_v48  ;;  %v130_v48 = vld [vmem:[%s3019_s0 + $0x398] sm:$0xff] }
  0xd7   :  { %1896 = vmatprep.mubr.msk.bf16.mxu1 %vm974_vm0, %v2066_v49 }
  0xd9   :  { %1256 = vmatmul.mubr.bf16.gmra.mxu0 %v2053_v46 }
  0xda   :  { %1263 = vmatprep.mubr.bf16.mxu0 %v2057_v47  ;;  %v128_v47 = vld [vmem:[%s3019_s0 + $0x388] sm:$0xff] }
  0xde   :  { %1569 = vmatmul.mubr.bf16.gmra.mxu1 %v2068_v52  ;;  %v1823_v52 = vcombine.low %v119_v43, %v121_v44 }
  0xdf   :  { %1897 = vmatprep.mubr.msk.bf16.mxu1 %vm974_vm0, %v2072_v53 }
  0xe1   :  { %1264 = vmatmul.mubr.bf16.gmra.mxu0 %v2059_v50 }
  0xe2   :  { %1271 = vmatprep.mubr.bf16.mxu0 %v2063_v51 }
  0xe6   :  { %1577 = vmatmul.mubr.bf16.gmra.mxu1 %v2074_v56  ;;  %v1833_v56 = vcombine.low %v128_v47, %v130_v48  ;;  %v2109_v47 = vld [vmem:[%s3019_s0 + $0x3c4] ss:$16 sps:$4 sm:$0xff]  }
  0xe7   :  { %1898 = vmatprep.mubr.msk.bf16.mxu1 %vm974_vm0, %v2078_v57 }
  0xe9   :  { %1272 = vmatmul.mubr.bf16.gmra.mxu0 %v2065_v54  ;;  %v2093_v54 = vld [vmem:[%s3019_s0 + $0x364] ss:$16 sps:$4 sm:$0xff]  }
  0xea   :  { %1279 = vmatprep.mubr.bf16.mxu0 %v2069_v55 }
  0xee   :  { %v1394_v62 = vpop.f32.mrf.mxu1  ;;  %1585 = vmatmul.mubr.bf16.gmra.mxu1 %v2080_v60 }
  0xef   :  { %1899 = vmatprep.mubr.msk.bf16.mxu1 %vm974_vm0, %v2083_v61 }
  0xf0   :  { %v1396_v1 = vpop.f32.mrf.mxu1 }
  0xf1   :  { %1280 = vmatmul.mubr.bf16.gmra.mxu0 %v2071_v58  ;;  %v2100_v58 = vld [vmem:[%s3019_s0 + $0x3ac] ss:$16 sps:$4 sm:$0xff]  }
  0xf2   :  { %1287 = vmatprep.mubr.bf16.mxu0 %v2075_v59  ;;  %v1397_v4 = vpop.f32.mrf.mxu1 }
  0xf4   :  { %v1399_v7 = vpop.f32.mrf.mxu1 }
  0xf6   :  { %v1402_v10 = vpop.f32.mrf.mxu1  ;;  %1593 = vmatmul.mubr.bf16.gmra.mxu1 %v1821_v5 }
  0xf7   :  { %1900 = vmatprep.mubr.msk.bf16.mxu1 %vm974_vm0, %v2087_v6 }
  0xf8   :  { %v1404_v13 = vpop.f32.mrf.mxu1 }
  0xf9   :  { %1288 = vmatmul.mubr.bf16.gmra.mxu0 %v2077_v2 }
  0xfa   :  { %1295 = vmatprep.mubr.bf16.mxu0 %v2081_v3  ;;  %v1405_v16 = vpop.f32.mrf.mxu1  ;;  %v132_v3 = vld [vmem:[%s3019_s0 + $0x3a8] sm:$0xff] }
  0xfc   :  { %v1407_v20 = vpop.f32.mrf.mxu1 }
  0xfe   :  { %v1410_v25 = vpop.f32.mrf.mxu1  ;;  %1601 = vmatmul.mubr.bf16.gmra.mxu1 %v1825_v17 }
  0xff   :  { %1901 = vmatprep.mubr.msk.bf16.mxu1 %vm974_vm0, %v2091_v19 }
 0x100   :  { %v1412_v30 = vpop.f32.mrf.mxu1 }
 0x101   :  { %v1105_v21 = vpop.f32.mrf.mxu0  ;;  %1296 = vmatmul.mubr.bf16.gmra.mxu0 %v1815_v14  ;;  %v2105_v14 = vld [vmem:[%s3019_s0 + $0x3cc] ss:$16 sps:$4 sm:$0xff]  }
 0x102   :  { %v1106_v22 = vadd.f32 %v2598_v18, %v1105_v21  ;;  %1303 = vmatprep.mubr.bf16.mxu0 %v2085_v15  ;;  %v1413_v35 = vpop.f32.mrf.mxu1 }
 0x103   :  { %v1107_v26 = vpop.f32.mrf.mxu0 }
 0x104   :  { %v1395_v29 = vadd.f32 %v1394_v62, %v1106_v22  ;;  %v1415_v40 = vpop.f32.mrf.mxu1  ;;  %v136_v22 = vld [vmem:[%s3019_s0 + $0x3c8] sm:$0xff] }
 0x105   :  { %v1108_v31 = vpop.f32.mrf.mxu0  ;;  %v140_v40 = vld [vmem:[%s3019_s0 + $0x3e8] sm:$0xff] }
 0x106   :  { %1650 = vst.msk [vmem:[%s3021_s3] sm:$0xff] %vm1649_vm1, %v1395_v29  ;;  %v1109_v33 = vadd.f32 %v2598_v18, %v1108_v31  ;;  %v1418_v45 = vpop.f32.mrf.mxu1  ;;  %1609 = vmatmul.mubr.bf16.gmra.mxu1 %v1829_v36  ;;  %v2104_v29 = vld [vmem:[%s3019_s0 + $0x3a4] ss:$16 sps:$4 sm:$0xff]   ;;  %v1841_v31 = vcombine.low %v136_v22, %v138_v23 }
 0x107   :  { %v1110_v37 = vpop.f32.mrf.mxu0  ;;  %1902 = vmatprep.mubr.msk.bf16.mxu1 %vm974_vm0, %v2095_v38 }
 0x108   :  { %v1398_v39 = vadd.f32 %v1397_v4, %v1109_v33  ;;  %v1420_v50 = vpop.f32.mrf.mxu1  ;;  %v134_v4 = vld [vmem:[%s3019_s0 + $0x3b8] sm:$0xff] }
 0x109   :  { %v1113_v41 = vpop.f32.mrf.mxu0  ;;  %1304 = vmatmul.mubr.bf16.gmra.mxu0 %v1819_v32  ;;  %v1837_v12 = vcombine.low %v132_v3, %v134_v4  ;;  %v2110_v33 = vld [vmem:[%s3019_s0 + $0x3ec] ss:$16 sps:$4 sm:$0xff]  }
 0x10a   :  { %1651 = vst.msk [vmem:[%s3021_s3 + $0x8] sm:$0xff] %vm1649_vm1, %v1398_v39  ;;  %v1114_v42 = vadd.f32 %v2598_v18, %v1113_v41  ;;  %1311 = vmatprep.mubr.bf16.mxu0 %v2089_v34  ;;  %v1421_v55 = vpop.f32.mrf.mxu1  ;;  %v142_v41 = vld [vmem:[%s3019_s0 + $0x3f8] sm:$0xff] }
 0x10b   :  { %v1115_v46 = vpop.f32.mrf.mxu0 }
 0x10c   :  { %v1403_v49 = vadd.f32 %v1402_v10, %v1114_v42  ;;  %v1423_v60 = vpop.f32.mrf.mxu1  ;;  %v2099_v10 = vld [vmem:[%s3019_s0 + $0x384] ss:$16 sps:$4 sm:$0xff]  }
 0x10d   :  { %v1116_v51 = vpop.f32.mrf.mxu0  ;;  %v2107_v60 = vld [vmem:[%s3019_s0 + $0x3c0] ss:$16 sps:$4 sm:$0xff]  }
 0x10e   :  { %1652 = vst.msk [vmem:[%s3021_s3 + $0x10] sm:$0xff] %vm1649_vm1, %v1403_v49  ;;  %v1117_v53 = vadd.f32 %v2598_v18, %v1116_v51  ;;  %v1426_v1 = vpop.f32.mrf.mxu1  ;;  %1617 = vmatmul.mubr.bf16.gmra.mxu1 %v1833_v56  ;;  %v1845_v49 = vcombine.low %v140_v40, %v142_v41 }
 0x10f   :  { %v1118_v57 = vpop.f32.mrf.mxu0  ;;  %1903 = vmatprep.mubr.msk.bf16.mxu1 %vm974_vm0, %v2100_v58 }
 0x110   :  { %v1406_v59 = vadd.f32 %v1405_v16, %v1117_v53  ;;  %v1428_v6 = vpop.f32.mrf.mxu1 }
 0x111   :  { %v1121_v61 = vpop.f32.mrf.mxu0  ;;  %1312 = vmatmul.mubr.bf16.gmra.mxu0 %v1823_v52 }
 0x112   :  { %1653 = vst.msk [vmem:[%s3021_s3 + $0x18] sm:$0xff] %vm1649_vm1, %v1406_v59  ;;  %v1122_v62 = vadd.f32 %v2598_v18, %v1121_v61  ;;  %1319 = vmatprep.mubr.bf16.mxu0 %v2093_v54  ;;  %v1429_v11 = vpop.f32.mrf.mxu1 }
 0x113   :  { %v1123_v2 = vpop.f32.mrf.mxu0 }
 0x114   :  { %v1411_v5 = vadd.f32 %v1410_v25, %v1122_v62  ;;  %v1431_v16 = vpop.f32.mrf.mxu1  ;;  %v2114_v62 = vld [vmem:[%s3019_s0 + $0x3e4] ss:$16 sps:$4 sm:$0xff]  }
 0x115   :  { %v1124_v7 = vpop.f32.mrf.mxu0 }
 0x116   :  { %1654 = vst.msk [vmem:[%s3021_s3 + $0x20] sm:$0xff] %vm1649_vm1, %v1411_v5  ;;  %v1125_v9 = vadd.f32 %v2598_v18, %v1124_v7  ;;  %v1434_v20 = vpop.f32.mrf.mxu1  ;;  %1625 = vmatmul.mubr.bf16.gmra.mxu1 %v1837_v12 }
 0x117   :  { %v1126_v13 = vpop.f32.mrf.mxu0  ;;  %1904 = vmatprep.mubr.msk.bf16.mxu1 %vm974_vm0, %v2105_v14 }
 0x118   :  { %v1414_v15 = vadd.f32 %v1413_v35, %v1125_v9  ;;  %v1436_v25 = vpop.f32.mrf.mxu1 }
 0x119   :  { %v1129_v17 = vpop.f32.mrf.mxu0  ;;  %1320 = vmatmul.mubr.bf16.gmra.mxu0 %v1827_v8 }
 0x11a   :  { %1655 = vst.msk [vmem:[%s3021_s3 + $0x28] sm:$0xff] %vm1649_vm1, %v1414_v15  ;;  %v1130_v19 = vadd.f32 %v2598_v18, %v1129_v17  ;;  %1327 = vmatprep.mubr.bf16.mxu0 %v2099_v10  ;;  %v1437_v30 = vpop.f32.mrf.mxu1  ;;  %v2112_v10 = vld [vmem:[%s3019_s0 + $0x3e0] ss:$16 sps:$4 sm:$0xff]  }
 0x11b   :  { %v1131_v21 = vpop.f32.mrf.mxu0 }
 0x11c   :  { %v1419_v24 = vadd.f32 %v1418_v45, %v1130_v19  ;;  %v1439_v35 = vpop.f32.mrf.mxu1  ;;  %v2102_v45 = vld [vmem:[%s3019_s0 + $0x3a0] ss:$16 sps:$4 sm:$0xff]  }
 0x11d   :  { %v1132_v26 = vpop.f32.mrf.mxu0 }
 0x11e   :  { %1656 = vst.msk [vmem:[%s3021_s3 + $0x30] sm:$0xff] %vm1649_vm1, %v1419_v24  ;;  %v1133_v28 = vadd.f32 %v2598_v18, %v1132_v26  ;;  %v1442_v38 = vpop.f32.mrf.mxu1  ;;  %1633 = vmatmul.mubr.bf16.gmra.mxu1 %v1841_v31 }
 0x11f   :  { %v1134_v32 = vpop.f32.mrf.mxu0  ;;  %1905 = vmatprep.mubr.msk.bf16.mxu1 %vm974_vm0, %v2110_v33 }
 0x120   :  { %v1422_v34 = vadd.f32 %v1421_v55, %v1133_v28  ;;  %v1444_v43 = vpop.f32.mrf.mxu1 }
 0x121   :  { %v1137_v36 = vpop.f32.mrf.mxu0  ;;  %1328 = vmatmul.mubr.bf16.gmra.mxu0 %v2097_v27 }
 0x122   :  { %1657 = vst.msk [vmem:[%s3021_s3 + $0x38] sm:$0xff] %vm1649_vm1, %v1422_v34  ;;  %v1138_v37 = vadd.f32 %v2598_v18, %v1137_v36  ;;  %1335 = vmatprep.mubr.bf16.mxu0 %v2104_v29  ;;  %v1445_v48 = vpop.f32.mrf.mxu1 }
 0x123   :  { %v1139_v39 = vpop.f32.mrf.mxu0 }
 0x124   :  { %v1427_v42 = vadd.f32 %v1426_v1, %v1138_v37  ;;  %v1447_v52 = vpop.f32.mrf.mxu1 }
 0x125   :  { %v1140_v44 = vpop.f32.mrf.mxu0 }
 0x126   :  { %1658 = vst.msk [vmem:[%s3021_s3 + $0x40] sm:$0xff] %vm1649_vm1, %v1427_v42  ;;  %v1141_v46 = vadd.f32 %v2598_v18, %v1140_v44  ;;  %v1450_v55 = vpop.f32.mrf.mxu1  ;;  %1641 = vmatmul.mubr.bf16.gmra.mxu1 %v1845_v49 }
 0x127   :  { %v1142_v50 = vpop.f32.mrf.mxu0 }
 0x128   :  { %v1430_v51 = vadd.f32 %v1429_v11, %v1141_v46  ;;  %v1452_v58 = vpop.f32.mrf.mxu1 }
 0x129   :  { %v1145_v53 = vpop.f32.mrf.mxu0  ;;  %1336 = vmatmul.mubr.bf16.gmra.mxu0 %v2102_v45 }
 0x12a   :  { %1659 = vst.msk [vmem:[%s3021_s3 + $0x48] sm:$0xff] %vm1649_vm1, %v1430_v51  ;;  %v1146_v54 = vadd.f32 %v2598_v18, %v1145_v53  ;;  %1343 = vmatprep.mubr.bf16.mxu0 %v2109_v47  ;;  %v1453_v63 = vpop.f32.mrf.mxu1 }
 0x12b   :  { %v1147_v56 = vpop.f32.mrf.mxu0 }
 0x12c   :  { %v1435_v57 = vadd.f32 %v1434_v20, %v1146_v54  ;;  %v1455_v2 = vpop.f32.mrf.mxu1 }
 0x12d   :  { %v1148_v59 = vpop.f32.mrf.mxu0 }
 0x12e   :  { %1660 = vst.msk [vmem:[%s3021_s3 + $0x50] sm:$0xff] %vm1649_vm1, %v1435_v57  ;;  %v1149_v61 = vadd.f32 %v2598_v18, %v1148_v59  ;;  %v1458_v5 = vpop.f32.mrf.mxu1 }
 0x12f   :  { %v1150_v0 = vpop.f32.mrf.mxu0 }
 0x130   :  { %v1438_v1 = vadd.f32 %v1437_v30, %v1149_v61  ;;  %v1460_v8 = vpop.f32.mrf.mxu1 }
 0x131   :  { %v1153_v3 = vpop.f32.mrf.mxu0  ;;  %1344 = vmatmul.mubr.bf16.gmra.mxu0 %v2107_v60 }
 0x132   :  { %1661 = vst.msk [vmem:[%s3021_s3 + $0x58] sm:$0xff] %vm1649_vm1, %v1438_v1  ;;  %v1154_v4 = vadd.f32 %v2598_v18, %v1153_v3  ;;  %1351 = vmatprep.mubr.bf16.mxu0 %v2114_v62  ;;  %v1461_v12 = vpop.f32.mrf.mxu1 }
 0x133   :  { %v1155_v6 = vpop.f32.mrf.mxu0 }
 0x134   :  { %v1443_v7 = vadd.f32 %v1442_v38, %v1154_v4  ;;  %v1463_v15 = vpop.f32.mrf.mxu1 }
 0x135   :  { %v1156_v9 = vpop.f32.mrf.mxu0 }
 0x136   :  { %1662 = vst.msk [vmem:[%s3021_s3 + $0x60] sm:$0xff] %vm1649_vm1, %v1443_v7  ;;  %v1157_v11 = vadd.f32 %v2598_v18, %v1156_v9  ;;  %v1466_v19 = vpop.f32.mrf.mxu1 }
 0x137   :  { %v1158_v13 = vpop.f32.mrf.mxu0 }
 0x138   :  { %v1446_v14 = vadd.f32 %v1445_v48, %v1157_v11  ;;  %v1468_v22 = vpop.f32.mrf.mxu1 }
 0x139   :  { %v1161_v16 = vpop.f32.mrf.mxu0  ;;  %1352 = vmatmul.mubr.bf16.gmra.mxu0 %v2112_v10 }
 0x13a   :  { %1663 = vst.msk [vmem:[%s3021_s3 + $0x68] sm:$0xff] %vm1649_vm1, %v1446_v14  ;;  %v1162_v17 = vadd.f32 %v2598_v18, %v1161_v16  ;;  %v1469_v25 = vpop.f32.mrf.mxu1 }
 0x13b   :  { %v1163_v20 = vpop.f32.mrf.mxu0 }
 0x13c   :  { %v1451_v21 = vadd.f32 %v1450_v55, %v1162_v17  ;;  %v1471_v28 = vpop.f32.mrf.mxu1 }
 0x13d   :  { %v1164_v23 = vpop.f32.mrf.mxu0 }
 0x13e   :  { %1664 = vst.msk [vmem:[%s3021_s3 + $0x70] sm:$0xff] %vm1649_vm1, %v1451_v21  ;;  %v1165_v24 = vadd.f32 %v2598_v18, %v1164_v23  ;;  %v1474_v31 = vpop.f32.mrf.mxu1 }
 0x13f   :  { %v1166_v26 = vpop.f32.mrf.mxu0 }
 0x140   :  { %v1454_v27 = vadd.f32 %v1453_v63, %v1165_v24  ;;  %v1476_v34 = vpop.f32.mrf.mxu1 }
 0x141   :  { %v1169_v29 = vpop.f32.mrf.mxu0 }
 0x142   :  { %1665 = vst.msk [vmem:[%s3021_s3 + $0x78] sm:$0xff] %vm1649_vm1, %v1454_v27  ;;  %v1170_v30 = vadd.f32 %v2598_v18, %v1169_v29  ;;  %v1477_v37 = vpop.f32.mrf.mxu1 }
 0x143   :  { %v1171_v32 = vpop.f32.mrf.mxu0 }
 0x144   :  { %v1459_v33 = vadd.f32 %v1458_v5, %v1170_v30  ;;  %v1479_v40 = vpop.f32.mrf.mxu1 }
 0x145   :  { %v1172_v35 = vpop.f32.mrf.mxu0 }
 0x146   :  { %1666 = vst.msk [vmem:[%s3021_s3 + $0x80] sm:$0xff] %vm1649_vm1, %v1459_v33  ;;  %v1173_v36 = vadd.f32 %v2598_v18, %v1172_v35  ;;  %v1482_v43 = vpop.f32.mrf.mxu1 }
 0x147   :  { %v1174_v38 = vpop.f32.mrf.mxu0 }
 0x148   :  { %v1462_v39 = vadd.f32 %v1461_v12, %v1173_v36  ;;  %v1484_v46 = vpop.f32.mrf.mxu1 }
 0x149   :  { %v1177_v41 = vpop.f32.mrf.mxu0 }
 0x14a   :  { %1667 = vst.msk [vmem:[%s3021_s3 + $0x88] sm:$0xff] %vm1649_vm1, %v1462_v39  ;;  %v1178_v42 = vadd.f32 %v2598_v18, %v1177_v41  ;;  %v1485_v49 = vpop.f32.mrf.mxu1 }
 0x14b   :  { %v1179_v44 = vpop.f32.mrf.mxu0 }
 0x14c   :  { %v1467_v45 = vadd.f32 %v1466_v19, %v1178_v42  ;;  %v1487_v52 = vpop.f32.mrf.mxu1 }
 0x14d   :  { %v1180_v47 = vpop.f32.mrf.mxu0 }
 0x14e   :  { %1668 = vst.msk [vmem:[%s3021_s3 + $0x90] sm:$0xff] %vm1649_vm1, %v1467_v45  ;;  %v1181_v48 = vadd.f32 %v2598_v18, %v1180_v47  ;;  %v1490_v55 = vpop.f32.mrf.mxu1 }
 0x14f   :  { %v1182_v50 = vpop.f32.mrf.mxu0 }
 0x150   :  { %v1470_v51 = vadd.f32 %v1469_v25, %v1181_v48  ;;  %v1492_v58 = vpop.f32.mrf.mxu1 }
 0x151   :  { %v1185_v53 = vpop.f32.mrf.mxu0 }
 0x152   :  { %1669 = vst.msk [vmem:[%s3021_s3 + $0x98] sm:$0xff] %vm1649_vm1, %v1470_v51  ;;  %v1186_v54 = vadd.f32 %v2598_v18, %v1185_v53  ;;  %v1493_v61 = vpop.f32.mrf.mxu1 }
 0x153   :  { %v1187_v56 = vpop.f32.mrf.mxu0 }
 0x154   :  { %v1475_v57 = vadd.f32 %v1474_v31, %v1186_v54  ;;  %v1495_v0 = vpop.f32.mrf.mxu1 }
 0x155   :  { %v1188_v59 = vpop.f32.mrf.mxu0 }
 0x156   :  { %1670 = vst.msk [vmem:[%s3021_s3 + $0xa0] sm:$0xff] %vm1649_vm1, %v1475_v57  ;;  %v1189_v60 = vadd.f32 %v2598_v18, %v1188_v59  ;;  %v1498_v3 = vpop.f32.mrf.mxu1 }
 0x157   :  { %v1190_v62 = vpop.f32.mrf.mxu0 }
 0x158   :  { %v1478_v63 = vadd.f32 %v1477_v37, %v1189_v60  ;;  %v1500_v6 = vpop.f32.mrf.mxu1 }
 0x159   :  { %v1193_v1 = vpop.f32.mrf.mxu0 }
 0x15a   :  { %1671 = vst.msk [vmem:[%s3021_s3 + $0xa8] sm:$0xff] %vm1649_vm1, %v1478_v63  ;;  %v1194_v2 = vadd.f32 %v2598_v18, %v1193_v1  ;;  %v1501_v9 = vpop.f32.mrf.mxu1 }
 0x15b   :  { %v1195_v4 = vpop.f32.mrf.mxu0 }
 0x15c   :  { %v1483_v5 = vadd.f32 %v1482_v43, %v1194_v2  ;;  %v1503_v12 = vpop.f32.mrf.mxu1 }
 0x15d   :  { %v1196_v7 = vpop.f32.mrf.mxu0 }
 0x15e   :  { %1672 = vst.msk [vmem:[%s3021_s3 + $0xb0] sm:$0xff] %vm1649_vm1, %v1483_v5  ;;  %v1197_v8 = vadd.f32 %v2598_v18, %v1196_v7  ;;  %v1506_v15 = vpop.f32.mrf.mxu1 }
 0x15f   :  { %v1198_v10 = vpop.f32.mrf.mxu0 }
 0x160   :  { %v1486_v11 = vadd.f32 %v1485_v49, %v1197_v8  ;;  %v1508_v19 = vpop.f32.mrf.mxu1 }
 0x161   :  { %v1201_v13 = vpop.f32.mrf.mxu0 }
 0x162   :  { %1673 = vst.msk [vmem:[%s3021_s3 + $0xb8] sm:$0xff] %vm1649_vm1, %v1486_v11  ;;  %v1202_v14 = vadd.f32 %v2598_v18, %v1201_v13  ;;  %v1509_v22 = vpop.f32.mrf.mxu1 }
 0x163   :  { %v1203_v16 = vpop.f32.mrf.mxu0 }
 0x164   :  { %v1491_v17 = vadd.f32 %v1490_v55, %v1202_v14  ;;  %v1511_v25 = vpop.f32.mrf.mxu1 }
 0x165   :  { %v1204_v20 = vpop.f32.mrf.mxu0 }
 0x166   :  { %1674 = vst.msk [vmem:[%s3021_s3 + $0xc0] sm:$0xff] %vm1649_vm1, %v1491_v17  ;;  %v1205_v21 = vadd.f32 %v2598_v18, %v1204_v20  ;;  %v1514_v28 = vpop.f32.mrf.mxu1 }
 0x167   :  { %v1206_v23 = vpop.f32.mrf.mxu0 }
 0x168   :  { %v1494_v24 = vadd.f32 %v1493_v61, %v1205_v21  ;;  %v1516_v31 = vpop.f32.mrf.mxu1 }
 0x169   :  { %v1209_v26 = vpop.f32.mrf.mxu0 }
 0x16a   :  { %1675 = vst.msk [vmem:[%s3021_s3 + $0xc8] sm:$0xff] %vm1649_vm1, %v1494_v24  ;;  %v1210_v27 = vadd.f32 %v2598_v18, %v1209_v26  ;;  %v1517_v34 = vpop.f32.mrf.mxu1 }
 0x16b   :  { %v1211_v29 = vpop.f32.mrf.mxu0 }
 0x16c   :  { %v1499_v30 = vadd.f32 %v1498_v3, %v1210_v27  ;;  %v1519_v37 = vpop.f32.mrf.mxu1 }
 0x16d   :  { %v1212_v32 = vpop.f32.mrf.mxu0 }
 0x16e   :  { %1676 = vst.msk [vmem:[%s3021_s3 + $0xd0] sm:$0xff] %vm1649_vm1, %v1499_v30  ;;  %v1213_v33 = vadd.f32 %v2598_v18, %v1212_v32  ;;  %v1522_v40 = vpop.f32.mrf.mxu1 }
 0x16f   :  { %v1214_v35 = vpop.f32.mrf.mxu0 }
 0x170   :  { %v1502_v36 = vadd.f32 %v1501_v9, %v1213_v33  ;;  %v1524_v43 = vpop.f32.mrf.mxu1 }
 0x171   :  { %v1217_v38 = vpop.f32.mrf.mxu0 }
 0x172   :  { %1677 = vst.msk [vmem:[%s3021_s3 + $0xd8] sm:$0xff] %vm1649_vm1, %v1502_v36  ;;  %v1218_v39 = vadd.f32 %v2598_v18, %v1217_v38  ;;  %v1525_v46 = vpop.f32.mrf.mxu1 }
 0x173   :  { %v1219_v41 = vpop.f32.mrf.mxu0 }
 0x174   :  { %v1507_v42 = vadd.f32 %v1506_v15, %v1218_v39  ;;  %v1527_v49 = vpop.f32.mrf.mxu1 }
 0x175   :  { %v1220_v44 = vpop.f32.mrf.mxu0 }
 0x176   :  { %1678 = vst.msk [vmem:[%s3021_s3 + $0xe0] sm:$0xff] %vm1649_vm1, %v1507_v42  ;;  %v1221_v45 = vadd.f32 %v2598_v18, %v1220_v44  ;;  %v1530_v52 = vpop.f32.mrf.mxu1 }
 0x177   :  { %v1222_v47 = vpop.f32.mrf.mxu0 }
 0x178   :  { %v1510_v48 = vadd.f32 %v1509_v22, %v1221_v45  ;;  %v1532_v55 = vpop.f32.mrf.mxu1 }
 0x179   :  { %v1225_v50 = vpop.f32.mrf.mxu0 }
 0x17a   :  { %1679 = vst.msk [vmem:[%s3021_s3 + $0xe8] sm:$0xff] %vm1649_vm1, %v1510_v48  ;;  %v1226_v51 = vadd.f32 %v2598_v18, %v1225_v50  ;;  %v1533_v58 = vpop.f32.mrf.mxu1 }
 0x17b   :  { %v1227_v53 = vpop.f32.mrf.mxu0 }
 0x17c   :  { %v1515_v54 = vadd.f32 %v1514_v28, %v1226_v51  ;;  %v1535_v61 = vpop.f32.mrf.mxu1 }
 0x17d   :  { %v1228_v56 = vpop.f32.mrf.mxu0 }
 0x17e   :  { %1680 = vst.msk [vmem:[%s3021_s3 + $0xf0] sm:$0xff] %vm1649_vm1, %v1515_v54  ;;  %v1229_v57 = vadd.f32 %v2598_v18, %v1228_v56  ;;  %v1538_v0 = vpop.f32.mrf.mxu1 }
 0x17f   :  { %v1230_v59 = vpop.f32.mrf.mxu0 }
 0x180   :  { %v1518_v60 = vadd.f32 %v1517_v34, %v1229_v57  ;;  %v1540_v3 = vpop.f32.mrf.mxu1 }
 0x181   :  { %v1233_v62 = vpop.f32.mrf.mxu0 }
 0x182   :  { %1681 = vst.msk [vmem:[%s3021_s3 + $0xf8] sm:$0xff] %vm1649_vm1, %v1518_v60  ;;  %v1234_v63 = vadd.f32 %v2598_v18, %v1233_v62  ;;  %v1541_v6 = vpop.f32.mrf.mxu1 }
 0x183   :  { %v1235_v1 = vpop.f32.mrf.mxu0 }
 0x184   :  { %v1523_v2 = vadd.f32 %v1522_v40, %v1234_v63  ;;  %v1543_v9 = vpop.f32.mrf.mxu1 }
 0x185   :  { %v1236_v4 = vpop.f32.mrf.mxu0 }
 0x186   :  { %1682 = vst.msk [vmem:[%s3021_s3 + $0x100] sm:$0xff] %vm1649_vm1, %v1523_v2  ;;  %v1237_v5 = vadd.f32 %v2598_v18, %v1236_v4  ;;  %v1546_v12 = vpop.f32.mrf.mxu1 }
 0x187   :  { %v1238_v7 = vpop.f32.mrf.mxu0 }
 0x188   :  { %v1526_v8 = vadd.f32 %v1525_v46, %v1237_v5  ;;  %v1548_v15 = vpop.f32.mrf.mxu1 }
 0x189   :  { %v1241_v10 = vpop.f32.mrf.mxu0 }
 0x18a   :  { %1683 = vst.msk [vmem:[%s3021_s3 + $0x108] sm:$0xff] %vm1649_vm1, %v1526_v8  ;;  %v1242_v11 = vadd.f32 %v2598_v18, %v1241_v10  ;;  %v1549_v19 = vpop.f32.mrf.mxu1 }
 0x18b   :  { %v1243_v13 = vpop.f32.mrf.mxu0 }
 0x18c   :  { %v1531_v14 = vadd.f32 %v1530_v52, %v1242_v11  ;;  %v1551_v22 = vpop.f32.mrf.mxu1 }
 0x18d   :  { %v1244_v16 = vpop.f32.mrf.mxu0 }
 0x18e   :  { %1684 = vst.msk [vmem:[%s3021_s3 + $0x110] sm:$0xff] %vm1649_vm1, %v1531_v14  ;;  %v1245_v17 = vadd.f32 %v2598_v18, %v1244_v16  ;;  %v1554_v25 = vpop.f32.mrf.mxu1 }
 0x18f   :  { %v1246_v20 = vpop.f32.mrf.mxu0 }
 0x190   :  { %v1534_v21 = vadd.f32 %v1533_v58, %v1245_v17  ;;  %v1556_v28 = vpop.f32.mrf.mxu1 }
 0x191   :  { %v1249_v23 = vpop.f32.mrf.mxu0 }
 0x192   :  { %1685 = vst.msk [vmem:[%s3021_s3 + $0x118] sm:$0xff] %vm1649_vm1, %v1534_v21  ;;  %v1250_v24 = vadd.f32 %v2598_v18, %v1249_v23  ;;  %v1557_v31 = vpop.f32.mrf.mxu1 }
 0x193   :  { %v1251_v26 = vpop.f32.mrf.mxu0 }
 0x194   :  { %v1539_v27 = vadd.f32 %v1538_v0, %v1250_v24  ;;  %v1559_v34 = vpop.f32.mrf.mxu1 }
 0x195   :  { %v1252_v29 = vpop.f32.mrf.mxu0 }
 0x196   :  { %1686 = vst.msk [vmem:[%s3021_s3 + $0x120] sm:$0xff] %vm1649_vm1, %v1539_v27  ;;  %v1253_v30 = vadd.f32 %v2598_v18, %v1252_v29  ;;  %v1562_v37 = vpop.f32.mrf.mxu1 }
 0x197   :  { %v1254_v32 = vpop.f32.mrf.mxu0 }
 0x198   :  { %v1542_v33 = vadd.f32 %v1541_v6, %v1253_v30  ;;  %v1564_v40 = vpop.f32.mrf.mxu1 }
 0x199   :  { %v1257_v35 = vpop.f32.mrf.mxu0 }
 0x19a   :  { %1687 = vst.msk [vmem:[%s3021_s3 + $0x128] sm:$0xff] %vm1649_vm1, %v1542_v33  ;;  %v1258_v36 = vadd.f32 %v2598_v18, %v1257_v35  ;;  %v1565_v43 = vpop.f32.mrf.mxu1 }
 0x19b   :  { %v1259_v38 = vpop.f32.mrf.mxu0 }
 0x19c   :  { %v1547_v39 = vadd.f32 %v1546_v12, %v1258_v36  ;;  %v1567_v46 = vpop.f32.mrf.mxu1 }
 0x19d   :  { %v1260_v41 = vpop.f32.mrf.mxu0 }
 0x19e   :  { %1688 = vst.msk [vmem:[%s3021_s3 + $0x130] sm:$0xff] %vm1649_vm1, %v1547_v39  ;;  %v1261_v42 = vadd.f32 %v2598_v18, %v1260_v41  ;;  %v1570_v49 = vpop.f32.mrf.mxu1 }
 0x19f   :  { %v1262_v44 = vpop.f32.mrf.mxu0 }
 0x1a0   :  { %v1550_v45 = vadd.f32 %v1549_v19, %v1261_v42  ;;  %v1572_v52 = vpop.f32.mrf.mxu1 }
 0x1a1   :  { %v1265_v47 = vpop.f32.mrf.mxu0 }
 0x1a2   :  { %1689 = vst.msk [vmem:[%s3021_s3 + $0x138] sm:$0xff] %vm1649_vm1, %v1550_v45  ;;  %v1266_v48 = vadd.f32 %v2598_v18, %v1265_v47  ;;  %v1573_v55 = vpop.f32.mrf.mxu1 }
 0x1a3   :  { %v1267_v50 = vpop.f32.mrf.mxu0 }
 0x1a4   :  { %v1555_v51 = vadd.f32 %v1554_v25, %v1266_v48  ;;  %v1575_v58 = vpop.f32.mrf.mxu1 }
 0x1a5   :  { %v1268_v53 = vpop.f32.mrf.mxu0 }
 0x1a6   :  { %1690 = vst.msk [vmem:[%s3021_s3 + $0x140] sm:$0xff] %vm1649_vm1, %v1555_v51  ;;  %v1269_v54 = vadd.f32 %v2598_v18, %v1268_v53  ;;  %v1578_v61 = vpop.f32.mrf.mxu1 }
 0x1a7   :  { %v1270_v56 = vpop.f32.mrf.mxu0 }
 0x1a8   :  { %v1558_v57 = vadd.f32 %v1557_v31, %v1269_v54  ;;  %v1580_v0 = vpop.f32.mrf.mxu1 }
 0x1a9   :  { %v1273_v59 = vpop.f32.mrf.mxu0 }
 0x1aa   :  { %1691 = vst.msk [vmem:[%s3021_s3 + $0x148] sm:$0xff] %vm1649_vm1, %v1558_v57  ;;  %v1274_v60 = vadd.f32 %v2598_v18, %v1273_v59  ;;  %v1581_v3 = vpop.f32.mrf.mxu1 }
 0x1ab   :  { %v1275_v62 = vpop.f32.mrf.mxu0 }
 0x1ac   :  { %v1563_v63 = vadd.f32 %v1562_v37, %v1274_v60  ;;  %v1583_v6 = vpop.f32.mrf.mxu1 }
 0x1ad   :  { %v1276_v1 = vpop.f32.mrf.mxu0 }
 0x1ae   :  { %1692 = vst.msk [vmem:[%s3021_s3 + $0x150] sm:$0xff] %vm1649_vm1, %v1563_v63  ;;  %v1277_v2 = vadd.f32 %v2598_v18, %v1276_v1  ;;  %v1586_v9 = vpop.f32.mrf.mxu1 }
 0x1af   :  { %v1278_v4 = vpop.f32.mrf.mxu0 }
 0x1b0   :  { %v1566_v5 = vadd.f32 %v1565_v43, %v1277_v2  ;;  %v1588_v12 = vpop.f32.mrf.mxu1 }
 0x1b1   :  { %v1281_v7 = vpop.f32.mrf.mxu0 }
 0x1b2   :  { %1693 = vst.msk [vmem:[%s3021_s3 + $0x158] sm:$0xff] %vm1649_vm1, %v1566_v5  ;;  %v1282_v8 = vadd.f32 %v2598_v18, %v1281_v7  ;;  %v1589_v15 = vpop.f32.mrf.mxu1 }
 0x1b3   :  { %v1283_v10 = vpop.f32.mrf.mxu0 }
 0x1b4   :  { %v1571_v11 = vadd.f32 %v1570_v49, %v1282_v8  ;;  %v1591_v19 = vpop.f32.mrf.mxu1 }
 0x1b5   :  { %v1284_v13 = vpop.f32.mrf.mxu0 }
 0x1b6   :  { %1694 = vst.msk [vmem:[%s3021_s3 + $0x160] sm:$0xff] %vm1649_vm1, %v1571_v11  ;;  %v1285_v14 = vadd.f32 %v2598_v18, %v1284_v13  ;;  %v1594_v22 = vpop.f32.mrf.mxu1 }
 0x1b7   :  { %v1286_v16 = vpop.f32.mrf.mxu0 }
 0x1b8   :  { %v1574_v17 = vadd.f32 %v1573_v55, %v1285_v14  ;;  %v1596_v25 = vpop.f32.mrf.mxu1 }
 0x1b9   :  { %v1289_v20 = vpop.f32.mrf.mxu0 }
 0x1ba   :  { %1695 = vst.msk [vmem:[%s3021_s3 + $0x168] sm:$0xff] %vm1649_vm1, %v1574_v17  ;;  %v1290_v21 = vadd.f32 %v2598_v18, %v1289_v20  ;;  %v1597_v28 = vpop.f32.mrf.mxu1 }
 0x1bb   :  { %v1291_v23 = vpop.f32.mrf.mxu0 }
 0x1bc   :  { %v1579_v24 = vadd.f32 %v1578_v61, %v1290_v21  ;;  %v1599_v31 = vpop.f32.mrf.mxu1 }
 0x1bd   :  { %v1292_v26 = vpop.f32.mrf.mxu0 }
 0x1be   :  { %1696 = vst.msk [vmem:[%s3021_s3 + $0x170] sm:$0xff] %vm1649_vm1, %v1579_v24  ;;  %v1293_v27 = vadd.f32 %v2598_v18, %v1292_v26  ;;  %v1602_v34 = vpop.f32.mrf.mxu1 }
 0x1bf   :  { %v1294_v29 = vpop.f32.mrf.mxu0 }
 0x1c0   :  { %v1582_v30 = vadd.f32 %v1581_v3, %v1293_v27  ;;  %v1604_v37 = vpop.f32.mrf.mxu1 }
 0x1c1   :  { %v1297_v32 = vpop.f32.mrf.mxu0 }
 0x1c2   :  { %1697 = vst.msk [vmem:[%s3021_s3 + $0x178] sm:$0xff] %vm1649_vm1, %v1582_v30  ;;  %v1298_v33 = vadd.f32 %v2598_v18, %v1297_v32  ;;  %v1605_v40 = vpop.f32.mrf.mxu1 }
 0x1c3   :  { %v1299_v35 = vpop.f32.mrf.mxu0 }
 0x1c4   :  { %v1587_v36 = vadd.f32 %v1586_v9, %v1298_v33  ;;  %v1607_v43 = vpop.f32.mrf.mxu1 }
 0x1c5   :  { %v1300_v38 = vpop.f32.mrf.mxu0 }
 0x1c6   :  { %1698 = vst.msk [vmem:[%s3021_s3 + $0x180] sm:$0xff] %vm1649_vm1, %v1587_v36  ;;  %v1301_v39 = vadd.f32 %v2598_v18, %v1300_v38  ;;  %v1610_v46 = vpop.f32.mrf.mxu1 }
 0x1c7   :  { %v1302_v41 = vpop.f32.mrf.mxu0 }
 0x1c8   :  { %v1590_v42 = vadd.f32 %v1589_v15, %v1301_v39  ;;  %v1612_v49 = vpop.f32.mrf.mxu1 }
 0x1c9   :  { %v1305_v44 = vpop.f32.mrf.mxu0 }
 0x1ca   :  { %1699 = vst.msk [vmem:[%s3021_s3 + $0x188] sm:$0xff] %vm1649_vm1, %v1590_v42  ;;  %v1306_v45 = vadd.f32 %v2598_v18, %v1305_v44  ;;  %v1613_v52 = vpop.f32.mrf.mxu1 }
 0x1cb   :  { %v1307_v47 = vpop.f32.mrf.mxu0 }
 0x1cc   :  { %v1595_v48 = vadd.f32 %v1594_v22, %v1306_v45  ;;  %v1615_v55 = vpop.f32.mrf.mxu1 }
 0x1cd   :  { %v1308_v50 = vpop.f32.mrf.mxu0 }
 0x1ce   :  { %1700 = vst.msk [vmem:[%s3021_s3 + $0x190] sm:$0xff] %vm1649_vm1, %v1595_v48  ;;  %v1309_v51 = vadd.f32 %v2598_v18, %v1308_v50  ;;  %v1618_v58 = vpop.f32.mrf.mxu1 }
 0x1cf   :  { %v1310_v53 = vpop.f32.mrf.mxu0 }
 0x1d0   :  { %v1598_v54 = vadd.f32 %v1597_v28, %v1309_v51  ;;  %v1620_v61 = vpop.f32.mrf.mxu1 }
 0x1d1   :  { %v1313_v56 = vpop.f32.mrf.mxu0 }
 0x1d2   :  { %1701 = vst.msk [vmem:[%s3021_s3 + $0x198] sm:$0xff] %vm1649_vm1, %v1598_v54  ;;  %v1314_v57 = vadd.f32 %v2598_v18, %v1313_v56  ;;  %v1621_v0 = vpop.f32.mrf.mxu1 }
 0x1d3   :  { %v1315_v59 = vpop.f32.mrf.mxu0 }
 0x1d4   :  { %v1603_v60 = vadd.f32 %v1602_v34, %v1314_v57  ;;  %v1623_v3 = vpop.f32.mrf.mxu1 }
 0x1d5   :  { %v1316_v62 = vpop.f32.mrf.mxu0 }
 0x1d6   :  { %1702 = vst.msk [vmem:[%s3021_s3 + $0x1a0] sm:$0xff] %vm1649_vm1, %v1603_v60  ;;  %v1317_v63 = vadd.f32 %v2598_v18, %v1316_v62  ;;  %v1626_v6 = vpop.f32.mrf.mxu1 }
 0x1d7   :  { %v1318_v1 = vpop.f32.mrf.mxu0 }
 0x1d8   :  { %v1606_v2 = vadd.f32 %v1605_v40, %v1317_v63  ;;  %v1628_v9 = vpop.f32.mrf.mxu1 }
 0x1d9   :  { %v1321_v4 = vpop.f32.mrf.mxu0 }
 0x1da   :  { %1703 = vst.msk [vmem:[%s3021_s3 + $0x1a8] sm:$0xff] %vm1649_vm1, %v1606_v2  ;;  %v1322_v5 = vadd.f32 %v2598_v18, %v1321_v4  ;;  %v1629_v12 = vpop.f32.mrf.mxu1 }
 0x1db   :  { %v1323_v7 = vpop.f32.mrf.mxu0 }
 0x1dc   :  { %v1611_v8 = vadd.f32 %v1610_v46, %v1322_v5  ;;  %v1631_v15 = vpop.f32.mrf.mxu1 }
 0x1dd   :  { %v1324_v10 = vpop.f32.mrf.mxu0 }
 0x1de   :  { %1704 = vst.msk [vmem:[%s3021_s3 + $0x1b0] sm:$0xff] %vm1649_vm1, %v1611_v8  ;;  %v1325_v11 = vadd.f32 %v2598_v18, %v1324_v10  ;;  %v1634_v19 = vpop.f32.mrf.mxu1 }
 0x1df   :  { %v1326_v13 = vpop.f32.mrf.mxu0 }
 0x1e0   :  { %v1614_v14 = vadd.f32 %v1613_v52, %v1325_v11  ;;  %v1636_v22 = vpop.f32.mrf.mxu1 }
 0x1e1   :  { %v1329_v16 = vpop.f32.mrf.mxu0 }
 0x1e2   :  { %1705 = vst.msk [vmem:[%s3021_s3 + $0x1b8] sm:$0xff] %vm1649_vm1, %v1614_v14  ;;  %v1330_v17 = vadd.f32 %v2598_v18, %v1329_v16  ;;  %v1637_v25 = vpop.f32.mrf.mxu1 }
 0x1e3   :  { %v1331_v20 = vpop.f32.mrf.mxu0 }
 0x1e4   :  { %v1619_v21 = vadd.f32 %v1618_v58, %v1330_v17  ;;  %v1639_v28 = vpop.f32.mrf.mxu1 }
 0x1e5   :  { %v1332_v23 = vpop.f32.mrf.mxu0 }
 0x1e6   :  { %1706 = vst.msk [vmem:[%s3021_s3 + $0x1c0] sm:$0xff] %vm1649_vm1, %v1619_v21  ;;  %v1333_v24 = vadd.f32 %v2598_v18, %v1332_v23  ;;  %v1642_v31 = vpop.f32.mrf.mxu1 }
 0x1e7   :  { %v1334_v26 = vpop.f32.mrf.mxu0 }
 0x1e8   :  { %v1622_v27 = vadd.f32 %v1621_v0, %v1333_v24  ;;  %v1644_v34 = vpop.f32.mrf.mxu1 }
 0x1e9   :  { %v1337_v29 = vpop.f32.mrf.mxu0 }
 0x1ea   :  { %1707 = vst.msk [vmem:[%s3021_s3 + $0x1c8] sm:$0xff] %vm1649_vm1, %v1622_v27  ;;  %v1338_v30 = vadd.f32 %v2598_v18, %v1337_v29  ;;  %v1645_v37 = vpop.f32.mrf.mxu1 }
 0x1eb   :  { %v1339_v32 = vpop.f32.mrf.mxu0 }
 0x1ec   :  { %v1627_v33 = vadd.f32 %v1626_v6, %v1338_v30  ;;  %v1647_v40 = vpop.f32.mrf.mxu1 }
 0x1ed   :  { %v1340_v35 = vpop.f32.mrf.mxu0 }
 0x1ee   :  { %1708 = vst.msk [vmem:[%s3021_s3 + $0x1d0] sm:$0xff] %vm1649_vm1, %v1627_v33  ;;  %v1341_v36 = vadd.f32 %v2598_v18, %v1340_v35 }
 0x1ef   :  { %v1342_v38 = vpop.f32.mrf.mxu0 }
 0x1f0   :  { %v1630_v39 = vadd.f32 %v1629_v12, %v1341_v36 }
 0x1f1   :  { %v1345_v41 = vpop.f32.mrf.mxu0 }
 0x1f2   :  { %1709 = vst.msk [vmem:[%s3021_s3 + $0x1d8] sm:$0xff] %vm1649_vm1, %v1630_v39  ;;  %v1346_v42 = vadd.f32 %v2598_v18, %v1345_v41 }
 0x1f3   :  { %v1347_v43 = vpop.f32.mrf.mxu0 }
 0x1f4   :  { %v1635_v44 = vadd.f32 %v1634_v19, %v1346_v42 }
 0x1f5   :  { %v1348_v45 = vpop.f32.mrf.mxu0 }
 0x1f6   :  { %1710 = vst.msk [vmem:[%s3021_s3 + $0x1e0] sm:$0xff] %vm1649_vm1, %v1635_v44  ;;  %v1349_v46 = vadd.f32 %v2598_v18, %v1348_v45 }
 0x1f7   :  { %v1350_v47 = vpop.f32.mrf.mxu0 }
 0x1f8   :  { %v1638_v48 = vadd.f32 %v1637_v25, %v1349_v46 }
 0x1f9   :  { %v1353_v49 = vpop.f32.mrf.mxu0 }
 0x1fa   :  { %1711 = vst.msk [vmem:[%s3021_s3 + $0x1e8] sm:$0xff] %vm1649_vm1, %v1638_v48  ;;  %v1354_v50 = vadd.f32 %v2598_v18, %v1353_v49 }
 0x1fb   :  { %v1355_v51 = vpop.f32.mrf.mxu0 }
 0x1fc   :  { %v1643_v52 = vadd.f32 %v1642_v31, %v1354_v50 }
 0x1fd   :  { %v1356_v53 = vpop.f32.mrf.mxu0 }
 0x1fe   :  { %1712 = vst.msk [vmem:[%s3021_s3 + $0x1f0] sm:$0xff] %vm1649_vm1, %v1643_v52  ;;  %v1357_v54 = vadd.f32 %v2598_v18, %v1356_v53 }
 0x1ff   :  { %v1358_v55 = vpop.f32.mrf.mxu0 }
 0x200   :  { %v1646_v56 = vadd.f32 %v1645_v37, %v1357_v54 }
 0x202   :  { %1713 = vst.msk [vmem:[%s3021_s3 + $0x1f8] sm:$0xff] %vm1649_vm1, %v1646_v56 }

// kernel: _lambda_.7
= control target key start
LH: loop header
LB: loop body
LE: loop exit
PB: predicated region body
PF: predicated region fallthrough
CT: control target
= control target key end

     0   :  { %v4657_v0 = vmov 0   ;;  %vm1839_vm0 = vcmask 785408   ;;  %vm3203_vm1 = vcmask 130048   ;;  %vm3653_vm2 = vcmask 261120   ;;  %s6753_s1 = inlined_call_operand.vmem [shape: bf16[864,32], index: 1, kind: input, shape index: {}]   ;;  %s6754_s0 = inlined_call_operand.vmem [shape: bf16[512,864], index: 0, kind: input, shape index: {}]   ;;  %s6755_s4 = inlined_call_operand.vmem [shape: bf16[16,32], index: 4, kind: input, shape index: {}]   ;;  %s6756_s2 = inlined_call_operand.vmem [shape: f32[1,32], index: 2, kind: input, shape index: {}]   ;;  %s6757_s3 = inlined_call_operand.vmem [shape: f32[512,16], index: 3, kind: input, shape index: {}]   ;;  %s6758_s5 = inlined_call_operand.vmem [shape: f32[1,32], index: 5, kind: input, shape index: {}]   ;;  %s6759_s6 = inlined_call_operand.vmem [shape: f32[512,32], index: 6, kind: output, shape index: {}]  }
   0x1   :  { %1936 = vmatprep.subr.bf16.mxu0 %v4657_v0  ;;  %2225 = vmatprep.subr.bf16.mxu1 %v4657_v0  ;;  %v4281_v1 = vld [vmem:[%s6753_s1 + $0x38] sm:$0xff]   ;;  %v4283_v3 = vld [vmem:[%s6753_s1 + $0x30] sm:$0xff]   ;;  %v4285_v5 = vld [vmem:[%s6753_s1 + $0x28] sm:$0xff]  }
   0x2   :  { %v4282_v2 = vld [vmem:[%s6753_s1 + $0xb8] sm:$0xff]   ;;  %1937 = vmatpush1.bf16.msra.mxu0 %v4281_v1  ;;  %v4284_v4 = vld [vmem:[%s6753_s1 + $0xb0] sm:$0xff]   ;;  %v4286_v6 = vld [vmem:[%s6753_s1 + $0xa8] sm:$0xff]  }
   0x3   :  { %2226 = vmatpush1.bf16.msra.mxu1 %v4282_v2  ;;  %1938 = vmatprep.subr.bf16.mxu0 %v4657_v0  ;;  %v4287_v7 = vld [vmem:[%s6753_s1 + $0x20] sm:$0xff]   ;;  %v4289_v9 = vld [vmem:[%s6753_s1 + $0x18] sm:$0xff]   ;;  %v4291_v11 = vld [vmem:[%s6753_s1 + $0x10] sm:$0xff]  }
   0x4   :  { %2227 = vmatprep.subr.bf16.mxu1 %v4657_v0  ;;  %v4288_v8 = vld [vmem:[%s6753_s1 + $0xa0] sm:$0xff]   ;;  %v4290_v10 = vld [vmem:[%s6753_s1 + $0x98] sm:$0xff]   ;;  %v4292_v12 = vld [vmem:[%s6753_s1 + $0x90] sm:$0xff]  }
   0x5   :  { %v4293_v13 = vld [vmem:[%s6753_s1 + $0x8] sm:$0xff]   ;;  %v4295_v15 = vld [vmem:[%s6753_s1] sm:$0xff]   ;;  %v4297_v17 = vld [vmem:[%s6753_s1 + $0x78] sm:$0xff]  }
   0x6   :  { %1939 = vmatpush1.bf16.msra.mxu0 %v4283_v3  ;;  %v4294_v14 = vld [vmem:[%s6753_s1 + $0x88] sm:$0xff]   ;;  %v4296_v16 = vld [vmem:[%s6753_s1 + $0x80] sm:$0xff]   ;;  %v4298_v18 = vld [vmem:[%s6753_s1 + $0xf8] sm:$0xff]  }
   0x7   :  { %2228 = vmatpush1.bf16.msra.mxu1 %v4284_v4  ;;  %1940 = vmatprep.subr.bf16.mxu0 %v4657_v0  ;;  %v4315_v19 = vld [vmem:[%s6754_s0 + $0x4] ss:$28 sps:$4 sm:$0xff]   ;;  %v4299_v20 = vld [vmem:[%s6753_s1 + $0x70] sm:$0xff]   ;;  %v4318_v21 = vld [vmem:[%s6754_s0 + $0xc] ss:$28 sps:$4 sm:$0xff]  }
   0x8   :  { %2229 = vmatprep.subr.bf16.mxu1 %v4657_v0  ;;  %v4300_v22 = vld [vmem:[%s6753_s1 + $0xf0] sm:$0xff]   ;;  %1968 = vmatprep.mubr.bf16.mxu0 %v4315_v19  ;;  %v4301_v23 = vld [vmem:[%s6753_s1 + $0x68] sm:$0xff]   ;;  %v4303_v25 = vld [vmem:[%s6753_s1 + $0x60] sm:$0xff]  }
   0x9   :  { %2257 = vmatprep.mubr.bf16.mxu1 %v4318_v21  ;;  %v4302_v24 = vld [vmem:[%s6753_s1 + $0xe8] sm:$0xff]   ;;  %v4304_v26 = vld [vmem:[%s6753_s1 + $0xe0] sm:$0xff]   ;;  %v4305_v27 = vld [vmem:[%s6753_s1 + $0x58] sm:$0xff]  }
   0xa   :  { %1941 = vmatpush1.bf16.msra.mxu0 %v4285_v5  ;;  %v4306_v28 = vld [vmem:[%s6753_s1 + $0xd8] sm:$0xff]   ;;  %v4307_v29 = vld [vmem:[%s6753_s1 + $0x50] sm:$0xff]   ;;  %v4309_v31 = vld [vmem:[%s6753_s1 + $0x48] sm:$0xff]  }
   0xb   :  { %2230 = vmatpush1.bf16.msra.mxu1 %v4286_v6  ;;  %1942 = vmatprep.subr.bf16.mxu0 %v4657_v0  ;;  %v4308_v30 = vld [vmem:[%s6753_s1 + $0xd0] sm:$0xff]   ;;  %v4310_v32 = vld [vmem:[%s6753_s1 + $0xc8] sm:$0xff]   ;;  %v4311_v33 = vld [vmem:[%s6753_s1 + $0x40] sm:$0xff]  }
   0xc   :  { %2231 = vmatprep.subr.bf16.mxu1 %v4657_v0  ;;  %v4312_v34 = vld [vmem:[%s6753_s1 + $0xc0] sm:$0xff]   ;;  %v4319_v35 = vld [vmem:[%s6753_s1 + $0x1a8] sm:$0xff]   ;;  %v4320_v38 = vld [vmem:[%s6753_s1 + $0x138] sm:$0xff]  }
   0xd   :  { %v4313_v36 = vld [vmem:[%s6754_s0] ss:$28 sps:$4 sm:$0xff]   ;;  %v4316_v37 = vld [vmem:[%s6754_s0 + $0x8] ss:$28 sps:$4 sm:$0xff]   ;;  %v4333_v42 = vld [vmem:[%s6753_s1 + $0x130] sm:$0xff]  }
   0xe   :  { %1943 = vmatpush1.bf16.msra.mxu0 %v4287_v7  ;;  %v4321_v39 = vld [vmem:[%s6754_s0 + $0x3c] ss:$28 sps:$4 sm:$0xff]   ;;  %v4323_v40 = vld [vmem:[%s6754_s0 + $0x44] ss:$28 sps:$4 sm:$0xff]   ;;  %v4327_v45 = vld [vmem:[%s6754_s0 + $0x74] ss:$28 sps:$4 sm:$0xff]  }
   0xf   :  { %2232 = vmatpush1.bf16.msra.mxu1 %v4288_v8  ;;  %1944 = vmatprep.subr.bf16.mxu0 %v4657_v0  ;;  %v4353_v41 = vld [vmem:[%s6753_s1 + $0x1a0] sm:$0xff]   ;;  %v4325_v43 = vld [vmem:[%s6754_s0 + $0x38] ss:$28 sps:$4 sm:$0xff]   ;;  %v4346_v48 = vld [vmem:[%s6753_s1 + $0x128] sm:$0xff]  }
  0x10   :  { %2233 = vmatprep.subr.bf16.mxu1 %v4657_v0  ;;  %v4326_v44 = vld [vmem:[%s6754_s0 + $0x40] ss:$28 sps:$4 sm:$0xff]   ;;  %v4331_v50 = vld [vmem:[%s6754_s0 + $0x70] ss:$28 sps:$4 sm:$0xff]   ;;  %v4332_v51 = vld [vmem:[%s6754_s0 + $0x78] ss:$28 sps:$4 sm:$0xff]  }
  0x11   :  { %v4329_v46 = vld [vmem:[%s6754_s0 + $0x7c] ss:$28 sps:$4 sm:$0xff]   ;;  %v4360_v49 = vld [vmem:[%s6753_s1 + $0x120] sm:$0xff]   ;;  %v4334_v52 = vld [vmem:[%s6754_s0 + $0xac] ss:$28 sps:$4 sm:$0xff]  }
  0x12   :  { %1945 = vmatpush1.bf16.msra.mxu0 %v4289_v9  ;;  %v4387_v47 = vld [vmem:[%s6753_s1 + $0x198] sm:$0xff]   ;;  %v4336_v53 = vld [vmem:[%s6754_s0 + $0xb4] ss:$28 sps:$4 sm:$0xff]   ;;  %v4338_v56 = vld [vmem:[%s6754_s0 + $0xa8] ss:$28 sps:$4 sm:$0xff]  }
  0x13   :  { %2234 = vmatpush1.bf16.msra.mxu1 %v4290_v10  ;;  %1946 = vmatprep.subr.bf16.mxu0 %v4657_v0  ;;  %v4373_v54 = vld [vmem:[%s6753_s1 + $0x118] sm:$0xff]   ;;  %v4386_v55 = vld [vmem:[%s6753_s1 + $0x110] sm:$0xff]   ;;  %v4340_v58 = vld [vmem:[%s6754_s0 + $0xe4] ss:$28 sps:$4 sm:$0xff]  }
  0x14   :  { %2235 = vmatprep.subr.bf16.mxu1 %v4657_v0  ;;  %v4339_v57 = vld [vmem:[%s6754_s0 + $0xb0] ss:$28 sps:$4 sm:$0xff]   ;;  %v4413_v62 = vld [vmem:[%s6753_s1 + $0x100] sm:$0xff]   ;;  %v4347_v2 = vld [vmem:[%s6754_s0 + $0x11c] ss:$28 sps:$4 sm:$0xff]  }
  0x15   :  { %v4342_v59 = vld [vmem:[%s6754_s0 + $0xec] ss:$28 sps:$4 sm:$0xff]   ;;  %v4426_v61 = vld [vmem:[%s6753_s1 + $0x190] sm:$0xff]   ;;  %v4344_v63 = vld [vmem:[%s6754_s0 + $0xe0] ss:$28 sps:$4 sm:$0xff]  }
  0x16   :  { %1947 = vmatpush1.bf16.msra.mxu0 %v4291_v11  ;;  %v4400_v60 = vld [vmem:[%s6753_s1 + $0x108] sm:$0xff]   ;;  %v4349_v3 = vld [vmem:[%s6754_s0 + $0x124] ss:$28 sps:$4 sm:$0xff]   ;;  %v4427_v4 = vld [vmem:[%s6753_s1 + $0x178] sm:$0xff]  }
  0x17   :  { %2236 = vmatpush1.bf16.msra.mxu1 %v4292_v12  ;;  %1948 = vmatprep.subr.bf16.mxu0 %v4657_v0  ;;  %v4345_v1 = vld [vmem:[%s6754_s0 + $0xe8] ss:$28 sps:$4 sm:$0xff]   ;;  %v4440_v5 = vld [vmem:[%s6753_s1 + $0x170] sm:$0xff]   ;;  %v4352_v7 = vld [vmem:[%s6754_s0 + $0x120] ss:$28 sps:$4 sm:$0xff]  }
  0x18   :  { %2237 = vmatprep.subr.bf16.mxu1 %v4657_v0  ;;  %v4351_v6 = vld [vmem:[%s6754_s0 + $0x118] ss:$28 sps:$4 sm:$0xff]   ;;  %v4453_v10 = vld [vmem:[%s6753_s1 + $0x168] sm:$0xff]   ;;  %v4367_v19 = vld [vmem:[%s6754_s0 + $0x1c4] ss:$28 sps:$4 sm:$0xff]  }
  0x19   :  { %v4354_v8 = vld [vmem:[%s6754_s0 + $0x154] ss:$28 sps:$4 sm:$0xff]   ;;  %v4356_v9 = vld [vmem:[%s6754_s0 + $0x15c] ss:$28 sps:$4 sm:$0xff]   ;;  %v4460_v11 = vld [vmem:[%s6753_s1 + $0x188] sm:$0xff]  }
  0x1a   :  { %1949 = vmatpush1.bf16.msra.mxu0 %v4293_v13  ;;  %v4358_v12 = vld [vmem:[%s6754_s0 + $0x150] ss:$28 sps:$4 sm:$0xff]   ;;  %v4359_v13 = vld [vmem:[%s6754_s0 + $0x158] ss:$28 sps:$4 sm:$0xff]   ;;  %v4371_v21 = vld [vmem:[%s6754_s0 + $0x1c0] ss:$28 sps:$4 sm:$0xff]  }
  0x1b   :  { %2238 = vmatpush1.bf16.msra.mxu1 %v4294_v14  ;;  %1950 = vmatprep.subr.bf16.mxu0 %v4657_v0  ;;  %v4361_v14 = vld [vmem:[%s6754_s0 + $0x18c] ss:$28 sps:$4 sm:$0xff]  }
  0x1c   :  { %2239 = vmatprep.subr.bf16.mxu1 %v4657_v0 }
  0x1e   :  { %1951 = vmatpush1.bf16.msra.mxu0 %v4295_v15  ;;  %v4363_v15 = vld [vmem:[%s6754_s0 + $0x194] ss:$28 sps:$4 sm:$0xff]  }
  0x1f   :  { %2240 = vmatpush1.bf16.msra.mxu1 %v4296_v16  ;;  %1952 = vmatprep.subr.bf16.mxu0 %v4657_v0  ;;  %v4467_v16 = vld [vmem:[%s6753_s1 + $0x160] sm:$0xff]  }
  0x20   :  { %2241 = vmatprep.subr.bf16.mxu1 %v4657_v0 }
  0x22   :  { %1953 = vmatpush2.bf16.msra.mxu0 %v4297_v17  ;;  %v4365_v17 = vld [vmem:[%s6754_s0 + $0x188] ss:$28 sps:$4 sm:$0xff]  }
  0x23   :  { %2242 = vmatpush2.bf16.msra.mxu1 %v4298_v18  ;;  %1954 = vmatprep.subr.bf16.mxu0 %v4657_v0  ;;  %v4366_v18 = vld [vmem:[%s6754_s0 + $0x190] ss:$28 sps:$4 sm:$0xff]  }
  0x24   :  { %2243 = vmatprep.subr.bf16.mxu1 %v4657_v0 }
  0x26   :  { %1955 = vmatpush2.bf16.msra.mxu0 %v4299_v20  ;;  %v4369_v20 = vld [vmem:[%s6754_s0 + $0x1cc] ss:$28 sps:$4 sm:$0xff]  }
  0x27   :  { %2244 = vmatpush2.bf16.msra.mxu1 %v4300_v22  ;;  %1956 = vmatprep.subr.bf16.mxu0 %v4657_v0  ;;  %v4372_v22 = vld [vmem:[%s6754_s0 + $0x1c8] ss:$28 sps:$4 sm:$0xff]  }
  0x28   :  { %2245 = vmatprep.subr.bf16.mxu1 %v4657_v0 }
  0x2a   :  { %1957 = vmatpush2.bf16.msra.mxu0 %v4301_v23  ;;  %v4374_v23 = vld [vmem:[%s6754_s0 + $0x1fc] ss:$28 sps:$4 sm:$0xff]  }
  0x2b   :  { %2246 = vmatpush2.bf16.msra.mxu1 %v4302_v24  ;;  %1958 = vmatprep.subr.bf16.mxu0 %v4657_v0  ;;  %v4376_v24 = vld [vmem:[%s6754_s0 + $0x204] ss:$28 sps:$4 sm:$0xff]  }
  0x2c   :  { %2247 = vmatprep.subr.bf16.mxu1 %v4657_v0 }
  0x2e   :  { %1959 = vmatpush2.bf16.msra.mxu0 %v4303_v25  ;;  %v4378_v25 = vld [vmem:[%s6754_s0 + $0x1f8] ss:$28 sps:$4 sm:$0xff]  }
  0x2f   :  { %2248 = vmatpush2.bf16.msra.mxu1 %v4304_v26  ;;  %1960 = vmatprep.subr.bf16.mxu0 %v4657_v0  ;;  %v4379_v26 = vld [vmem:[%s6754_s0 + $0x200] ss:$28 sps:$4 sm:$0xff]  }
  0x30   :  { %2249 = vmatprep.subr.bf16.mxu1 %v4657_v0 }
  0x32   :  { %1961 = vmatpush2.bf16.msra.mxu0 %v4305_v27  ;;  %v4380_v27 = vld [vmem:[%s6754_s0 + $0x234] ss:$28 sps:$4 sm:$0xff]  }
  0x33   :  { %2250 = vmatpush2.bf16.msra.mxu1 %v4306_v28  ;;  %1962 = vmatprep.subr.bf16.mxu0 %v4657_v0  ;;  %v4480_v28 = vld [vmem:[%s6753_s1 + $0x158] sm:$0xff]  }
  0x34   :  { %2251 = vmatprep.subr.bf16.mxu1 %v4657_v0 }
  0x36   :  { %1963 = vmatpush2.bf16.msra.mxu0 %v4307_v29  ;;  %v4382_v29 = vld [vmem:[%s6754_s0 + $0x23c] ss:$28 sps:$4 sm:$0xff]  }
  0x37   :  { %2252 = vmatpush2.bf16.msra.mxu1 %v4308_v30  ;;  %1964 = vmatprep.subr.bf16.mxu0 %v4657_v0  ;;  %v4384_v30 = vld [vmem:[%s6754_s0 + $0x230] ss:$28 sps:$4 sm:$0xff]  }
  0x38   :  { %2253 = vmatprep.subr.bf16.mxu1 %v4657_v0 }
  0x3a   :  { %1965 = vmatpush2.bf16.msra.mxu0 %v4309_v31  ;;  %v4385_v31 = vld [vmem:[%s6754_s0 + $0x238] ss:$28 sps:$4 sm:$0xff]  }
  0x3b   :  { %2254 = vmatpush2.bf16.msra.mxu1 %v4310_v32  ;;  %1966 = vmatprep.subr.bf16.mxu0 %v4657_v0  ;;  %v4388_v32 = vld [vmem:[%s6754_s0 + $0x26c] ss:$28 sps:$4 sm:$0xff]  }
  0x3c   :  { %2255 = vmatprep.subr.bf16.mxu1 %v4657_v0 }
  0x3e   :  { %1967 = vmatpush2.bf16.msra.mxu0 %v4311_v33  ;;  %v4390_v33 = vld [vmem:[%s6754_s0 + $0x274] ss:$28 sps:$4 sm:$0xff]  }
  0x3f   :  { %2256 = vmatpush2.bf16.msra.mxu1 %v4312_v34  ;;  %2514 = vmatprep.subr.bf16.mxu0 %v4657_v0  ;;  %v4392_v34 = vld [vmem:[%s6754_s0 + $0x268] ss:$28 sps:$4 sm:$0xff]  }
  0x40   :  { %4138 = vmatprep.subr.bf16.mxu1 %v4319_v35 }
  0x41   :  { %1969 = vmatmul.mubr.bf16.vlgmr.msra.gmra.mxu0 %v4313_v36  ;;  %v4394_v36 = vld [vmem:[%s6754_s0 + $0x2a4] ss:$28 sps:$4 sm:$0xff]  }
  0x42   :  { %2258 = vmatmul.mubr.bf16.vlgmr.msra.gmra.mxu1 %v4316_v37  ;;  %2515 = vmatpush1.bf16.msra.mxu0 %v4320_v38  ;;  %v4493_v37 = vld [vmem:[%s6753_s1 + $0x150] sm:$0xff]   ;;  %v4396_v38 = vld [vmem:[%s6754_s0 + $0x2ac] ss:$28 sps:$4 sm:$0xff]  }
  0x43   :  { %4139 = vmatpush3.bf16.msra.mxu1 %v4319_v35  ;;  %1976 = vmatprep.mubr.bf16.mxu0 %v4321_v39  ;;  %v4393_v35 = vld [vmem:[%s6754_s0 + $0x270] ss:$28 sps:$4 sm:$0xff]   ;;  %v4494_v39 = vld [vmem:[%s6753_s1 + $0x180] sm:$0xff]  }
  0x44   :  { %2265 = vmatprep.mubr.bf16.mxu1 %v4323_v40  ;;  %2516 = vmatprep.subr.bf16.mxu0 %v4657_v0  ;;  %v4398_v40 = vld [vmem:[%s6754_s0 + $0x2a0] ss:$28 sps:$4 sm:$0xff]  }
  0x45   :  { %4140 = vmatprep.subr.bf16.mxu1 %v4353_v41 }
  0x46   :  { %2517 = vmatpush1.bf16.msra.mxu0 %v4333_v42  ;;  %v4401_v42 = vld [vmem:[%s6754_s0 + $0x2dc] ss:$28 sps:$4 sm:$0xff]  }
  0x47   :  { %2518 = vmatprep.subr.bf16.mxu0 %v4657_v0  ;;  %4141 = vmatpush3.bf16.msra.mxu1 %v4353_v41  ;;  %v4399_v41 = vld [vmem:[%s6754_s0 + $0x2a8] ss:$28 sps:$4 sm:$0xff]  }
  0x48   :  { %4142 = vmatprep.subr.bf16.mxu1 %v4387_v47 }
  0x49   :  { %1977 = vmatmul.mubr.bf16.gmra.mxu0 %v4325_v43  ;;  %v4403_v43 = vld [vmem:[%s6754_s0 + $0x2e4] ss:$28 sps:$4 sm:$0xff]  }
  0x4a   :  { %2266 = vmatmul.mubr.bf16.gmra.mxu1 %v4326_v44  ;;  %1984 = vmatprep.mubr.bf16.mxu0 %v4327_v45  ;;  %v4405_v44 = vld [vmem:[%s6754_s0 + $0x2d8] ss:$28 sps:$4 sm:$0xff]   ;;  %v4406_v45 = vld [vmem:[%s6754_s0 + $0x2e0] ss:$28 sps:$4 sm:$0xff]  }
  0x4b   :  { %2273 = vmatprep.mubr.bf16.mxu1 %v4329_v46  ;;  %2519 = vmatpush1.bf16.msra.mxu0 %v4346_v48  ;;  %v4407_v46 = vld [vmem:[%s6754_s0 + $0x314] ss:$28 sps:$4 sm:$0xff]   ;;  %v4409_v48 = vld [vmem:[%s6754_s0 + $0x31c] ss:$28 sps:$4 sm:$0xff]  }
  0x4c   :  { %2520 = vmatprep.subr.bf16.mxu0 %v4657_v0  ;;  %4143 = vmatpush3.bf16.msra.mxu1 %v4387_v47  ;;  %v4507_v47 = vld [vmem:[%s6753_s1 + $0x148] sm:$0xff]  }
  0x4d   :  { %4144 = vmatprep.subr.bf16.mxu1 %v4426_v61 }
  0x4f   :  { %2521 = vmatpush1.bf16.msra.mxu0 %v4360_v49  ;;  %v4411_v49 = vld [vmem:[%s6754_s0 + $0x310] ss:$28 sps:$4 sm:$0xff]  }
  0x50   :  { %2522 = vmatprep.subr.bf16.mxu0 %v4657_v0  ;;  %4145 = vmatpush3.bf16.msra.mxu1 %v4426_v61  ;;  %v4432_v61 = vld [vmem:[%s6754_s0 + $0x3b8] ss:$28 sps:$4 sm:$0xff]  }
  0x51   :  { %1985 = vmatmul.mubr.bf16.gmra.mxu0 %v4331_v50  ;;  %4146 = vmatprep.subr.bf16.mxu1 %v4460_v11  ;;  %v4412_v50 = vld [vmem:[%s6754_s0 + $0x318] ss:$28 sps:$4 sm:$0xff]  }
  0x52   :  { %2274 = vmatmul.mubr.bf16.gmra.mxu1 %v4332_v51  ;;  %1992 = vmatprep.mubr.bf16.mxu0 %v4334_v52  ;;  %v4414_v51 = vld [vmem:[%s6754_s0 + $0x34c] ss:$28 sps:$4 sm:$0xff]   ;;  %v4520_v52 = vld [vmem:[%s6753_s1 + $0x140] sm:$0xff]  }
  0x53   :  { %2281 = vmatprep.mubr.bf16.mxu1 %v4336_v53  ;;  %2523 = vmatpush1.bf16.msra.mxu0 %v4373_v54  ;;  %v4418_v53 = vld [vmem:[%s6754_s0 + $0x348] ss:$28 sps:$4 sm:$0xff]   ;;  %v4419_v54 = vld [vmem:[%s6754_s0 + $0x350] ss:$28 sps:$4 sm:$0xff]  }
  0x54   :  { %2524 = vmatprep.subr.bf16.mxu0 %v4657_v0  ;;  %4147 = vmatpush3.bf16.msra.mxu1 %v4460_v11  ;;  %v4451_v11 = vld [vmem:[%s6754_s0 + $0x460] ss:$28 sps:$4 sm:$0xff]  }
  0x55   :  { %4148 = vmatprep.subr.bf16.mxu1 %v4494_v39 }
  0x57   :  { %2525 = vmatpush1.bf16.msra.mxu0 %v4386_v55  ;;  %v4420_v55 = vld [vmem:[%s6754_s0 + $0x384] ss:$28 sps:$4 sm:$0xff]  }
  0x58   :  { %2526 = vmatprep.subr.bf16.mxu0 %v4657_v0  ;;  %4149 = vmatpush3.bf16.msra.mxu1 %v4494_v39  ;;  %v4485_v39 = vld [vmem:[%s6754_s0 + $0x578] ss:$28 sps:$4 sm:$0xff]  }
  0x59   :  { %1993 = vmatmul.mubr.bf16.gmra.mxu0 %v4338_v56  ;;  %v4422_v56 = vld [vmem:[%s6754_s0 + $0x38c] ss:$28 sps:$4 sm:$0xff]  }
  0x5a   :  { %2282 = vmatmul.mubr.bf16.gmra.mxu1 %v4339_v57  ;;  %2000 = vmatprep.mubr.bf16.mxu0 %v4340_v58  ;;  %v4424_v57 = vld [vmem:[%s6754_s0 + $0x380] ss:$28 sps:$4 sm:$0xff]   ;;  %v4425_v58 = vld [vmem:[%s6754_s0 + $0x388] ss:$28 sps:$4 sm:$0xff]  }
  0x5b   :  { %2289 = vmatprep.mubr.bf16.mxu1 %v4342_v59  ;;  %2527 = vmatpush1.bf16.msra.mxu0 %v4400_v60  ;;  %v4428_v59 = vld [vmem:[%s6754_s0 + $0x3bc] ss:$28 sps:$4 sm:$0xff]   ;;  %v4430_v60 = vld [vmem:[%s6754_s0 + $0x3c4] ss:$28 sps:$4 sm:$0xff]  }
  0x5c   :  { %2528 = vmatprep.subr.bf16.mxu0 %v4657_v0 }
  0x5f   :  { %2529 = vmatpush1.bf16.msra.mxu0 %v4413_v62  ;;  %v5119_v62 = vld [vmem:[%s6755_s4] sm:$0xff]  }
  0x60   :  { %2530 = vmatprep.subr.bf16.mxu0 %v4657_v0  ;;  %4214 = vmatprep.subr.bf16.mxu1 %v5119_v62 }
  0x61   :  { %2001 = vmatmul.mubr.bf16.gmra.mxu0 %v4344_v63  ;;  %v4433_v63 = vld [vmem:[%s6754_s0 + $0x3c0] ss:$28 sps:$4 sm:$0xff]  }
  0x62   :  { %2290 = vmatmul.mubr.bf16.gmra.mxu1 %v4345_v1  ;;  %2008 = vmatprep.mubr.bf16.mxu0 %v4347_v2  ;;  %v4434_v1 = vld [vmem:[%s6754_s0 + $0x3f4] ss:$28 sps:$4 sm:$0xff]   ;;  %v4436_v2 = vld [vmem:[%s6754_s0 + $0x3fc] ss:$28 sps:$4 sm:$0xff]  }
  0x63   :  { %2297 = vmatprep.mubr.bf16.mxu1 %v4349_v3  ;;  %2531 = vmatpush2.bf16.msra.mxu0 %v4427_v4  ;;  %v4438_v3 = vld [vmem:[%s6754_s0 + $0x3f0] ss:$28 sps:$4 sm:$0xff]   ;;  %v4439_v4 = vld [vmem:[%s6754_s0 + $0x3f8] ss:$28 sps:$4 sm:$0xff]  }
  0x64   :  { %2532 = vmatprep.subr.bf16.mxu0 %v4657_v0 }
  0x67   :  { %2533 = vmatpush2.bf16.msra.mxu0 %v4440_v5  ;;  %v4441_v5 = vld [vmem:[%s6754_s0 + $0x42c] ss:$28 sps:$4 sm:$0xff]  }
  0x68   :  { %2534 = vmatprep.subr.bf16.mxu0 %v4657_v0 }
  0x69   :  { %2009 = vmatmul.mubr.bf16.gmra.mxu0 %v4351_v6  ;;  %v4443_v6 = vld [vmem:[%s6754_s0 + $0x434] ss:$28 sps:$4 sm:$0xff]  }
  0x6a   :  { %2298 = vmatmul.mubr.bf16.gmra.mxu1 %v4352_v7  ;;  %2016 = vmatprep.mubr.bf16.mxu0 %v4354_v8  ;;  %v4445_v7 = vld [vmem:[%s6754_s0 + $0x428] ss:$28 sps:$4 sm:$0xff]   ;;  %v4446_v8 = vld [vmem:[%s6754_s0 + $0x430] ss:$28 sps:$4 sm:$0xff]  }
  0x6b   :  { %2305 = vmatprep.mubr.bf16.mxu1 %v4356_v9  ;;  %2535 = vmatpush2.bf16.msra.mxu0 %v4453_v10  ;;  %v4447_v9 = vld [vmem:[%s6754_s0 + $0x464] ss:$28 sps:$4 sm:$0xff]   ;;  %v4449_v10 = vld [vmem:[%s6754_s0 + $0x46c] ss:$28 sps:$4 sm:$0xff]  }
  0x6c   :  { %2536 = vmatprep.subr.bf16.mxu0 %v4657_v0 }
  0x6f   :  { %2537 = vmatpush2.bf16.msra.mxu0 %v4467_v16  ;;  %v4459_v16 = vld [vmem:[%s6754_s0 + $0x4a0] ss:$28 sps:$4 sm:$0xff]  }
  0x70   :  { %2538 = vmatprep.subr.bf16.mxu0 %v4657_v0 }
  0x71   :  { %2017 = vmatmul.mubr.bf16.gmra.mxu0 %v4358_v12  ;;  %v4452_v12 = vld [vmem:[%s6754_s0 + $0x468] ss:$28 sps:$4 sm:$0xff]  }
  0x72   :  { %2306 = vmatmul.mubr.bf16.gmra.mxu1 %v4359_v13  ;;  %2024 = vmatprep.mubr.bf16.mxu0 %v4361_v14  ;;  %v4454_v13 = vld [vmem:[%s6754_s0 + $0x49c] ss:$28 sps:$4 sm:$0xff]   ;;  %v4456_v14 = vld [vmem:[%s6754_s0 + $0x4a4] ss:$28 sps:$4 sm:$0xff]  }
  0x73   :  { %2313 = vmatprep.mubr.bf16.mxu1 %v4363_v15  ;;  %2539 = vmatpush2.bf16.msra.mxu0 %v4480_v28  ;;  %v4458_v15 = vld [vmem:[%s6754_s0 + $0x498] ss:$28 sps:$4 sm:$0xff]   ;;  %v4479_v28 = vld [vmem:[%s6754_s0 + $0x548] ss:$28 sps:$4 sm:$0xff]  }
  0x74   :  { %2540 = vmatprep.subr.bf16.mxu0 %v4657_v0 }
  0x77   :  { %2541 = vmatpush2.bf16.msra.mxu0 %v4493_v37 }
  0x78   :  { %2542 = vmatprep.subr.bf16.mxu0 %v4657_v0 }
  0x79   :  { %2025 = vmatmul.mubr.bf16.gmra.mxu0 %v4365_v17  ;;  %v4461_v17 = vld [vmem:[%s6754_s0 + $0x4d4] ss:$28 sps:$4 sm:$0xff]  }
  0x7a   :  { %2314 = vmatmul.mubr.bf16.gmra.mxu1 %v4366_v18  ;;  %2032 = vmatprep.mubr.bf16.mxu0 %v4367_v19  ;;  %v4463_v18 = vld [vmem:[%s6754_s0 + $0x4dc] ss:$28 sps:$4 sm:$0xff]   ;;  %v4465_v19 = vld [vmem:[%s6754_s0 + $0x4d0] ss:$28 sps:$4 sm:$0xff]  }
  0x7b   :  { %2321 = vmatprep.mubr.bf16.mxu1 %v4369_v20  ;;  %2543 = vmatpush2.bf16.msra.mxu0 %v4507_v47  ;;  %v4466_v20 = vld [vmem:[%s6754_s0 + $0x4d8] ss:$28 sps:$4 sm:$0xff]  }
  0x7c   :  { %2544 = vmatprep.subr.bf16.mxu0 %v4657_v0  ;;  %v4416_v0 = vld [vmem:[%s6754_s0 + $0x354] ss:$28 sps:$4 sm:$0xff]  }
  0x7f   :  { %2545 = vmatpush2.bf16.msra.mxu0 %v4520_v52 }
  0x81   :  { %2033 = vmatmul.mubr.bf16.gmra.mxu0 %v4371_v21  ;;  %v4468_v21 = vld [vmem:[%s6754_s0 + $0x50c] ss:$28 sps:$4 sm:$0xff]  }
  0x82   :  { %2322 = vmatmul.mubr.bf16.gmra.mxu1 %v4372_v22  ;;  %2040 = vmatprep.mubr.bf16.mxu0 %v4374_v23  ;;  %v4470_v22 = vld [vmem:[%s6754_s0 + $0x514] ss:$28 sps:$4 sm:$0xff]   ;;  %v4472_v23 = vld [vmem:[%s6754_s0 + $0x508] ss:$28 sps:$4 sm:$0xff]  }
  0x83   :  { %2329 = vmatprep.mubr.bf16.mxu1 %v4376_v24  ;;  %v4473_v24 = vld [vmem:[%s6754_s0 + $0x510] ss:$28 sps:$4 sm:$0xff]  }
  0x89   :  { %2041 = vmatmul.mubr.bf16.gmra.mxu0 %v4378_v25  ;;  %v4474_v25 = vld [vmem:[%s6754_s0 + $0x544] ss:$28 sps:$4 sm:$0xff]  }
  0x8a   :  { %2330 = vmatmul.mubr.bf16.gmra.mxu1 %v4379_v26  ;;  %2048 = vmatprep.mubr.bf16.mxu0 %v4380_v27  ;;  %v4476_v26 = vld [vmem:[%s6754_s0 + $0x54c] ss:$28 sps:$4 sm:$0xff]   ;;  %v4478_v27 = vld [vmem:[%s6754_s0 + $0x540] ss:$28 sps:$4 sm:$0xff]  }
  0x8b   :  { %2337 = vmatprep.mubr.bf16.mxu1 %v4382_v29  ;;  %v4481_v29 = vld [vmem:[%s6754_s0 + $0x57c] ss:$28 sps:$4 sm:$0xff]  }
  0x91   :  { %2049 = vmatmul.mubr.bf16.gmra.mxu0 %v4384_v30  ;;  %v5215_v30 = vld [vmem:[%s6756_s2] ss:$0 sm:$0xff] }
  0x92   :  { %2338 = vmatmul.mubr.bf16.gmra.mxu1 %v4385_v31  ;;  %2056 = vmatprep.mubr.bf16.mxu0 %v4388_v32  ;;  %v4483_v31 = vld [vmem:[%s6754_s0 + $0x584] ss:$28 sps:$4 sm:$0xff]  }
  0x93   :  { %2345 = vmatprep.mubr.bf16.mxu1 %v4390_v33 }
  0x99   :  { %2057 = vmatmul.mubr.bf16.gmra.mxu0 %v4392_v34 }
  0x9a   :  { %2346 = vmatmul.mubr.bf16.gmra.mxu1 %v4393_v35  ;;  %2064 = vmatprep.mubr.bf16.mxu0 %v4394_v36 }
  0x9b   :  { %2353 = vmatprep.mubr.bf16.mxu1 %v4396_v38 }
  0xa1   :  { %2065 = vmatmul.mubr.bf16.gmra.mxu0 %v4398_v40 }
  0xa2   :  { %2354 = vmatmul.mubr.bf16.gmra.mxu1 %v4399_v41  ;;  %2072 = vmatprep.mubr.bf16.mxu0 %v4401_v42  ;;  %v4486_v42 = vld [vmem:[%s6754_s0 + $0x580] ss:$28 sps:$4 sm:$0xff]  }
  0xa3   :  { %2361 = vmatprep.mubr.bf16.mxu1 %v4403_v43  ;;  %v4487_v43 = vld [vmem:[%s6754_s0 + $0x5b4] ss:$28 sps:$4 sm:$0xff]  }
  0xa9   :  { %2073 = vmatmul.mubr.bf16.gmra.mxu0 %v4405_v44 }
  0xaa   :  { %2362 = vmatmul.mubr.bf16.gmra.mxu1 %v4406_v45  ;;  %2080 = vmatprep.mubr.bf16.mxu0 %v4407_v46  ;;  %v4489_v45 = vld [vmem:[%s6754_s0 + $0x5bc] ss:$28 sps:$4 sm:$0xff]  }
  0xab   :  { %2369 = vmatprep.mubr.bf16.mxu1 %v4409_v48 }
  0xb1   :  { %2081 = vmatmul.mubr.bf16.gmra.mxu0 %v4411_v49 }
  0xb2   :  { %2370 = vmatmul.mubr.bf16.gmra.mxu1 %v4412_v50  ;;  %2088 = vmatprep.mubr.bf16.mxu0 %v4414_v51 }
  0xb3   :  { %2377 = vmatprep.mubr.bf16.mxu1 %v4416_v0 }
  0xb9   :  { %2089 = vmatmul.mubr.bf16.gmra.mxu0 %v4418_v53 }
  0xba   :  { %2378 = vmatmul.mubr.bf16.gmra.mxu1 %v4419_v54  ;;  %2096 = vmatprep.mubr.bf16.mxu0 %v4420_v55  ;;  %v4491_v54 = vld [vmem:[%s6754_s0 + $0x5b0] ss:$28 sps:$4 sm:$0xff]  }
  0xbb   :  { %2385 = vmatprep.mubr.bf16.mxu1 %v4422_v56 }
  0xc1   :  { %2097 = vmatmul.mubr.bf16.gmra.mxu0 %v4424_v57  ;;  %v4492_v57 = vld [vmem:[%s6754_s0 + $0x5b8] ss:$28 sps:$4 sm:$0xff]  }
  0xc2   :  { %2386 = vmatmul.mubr.bf16.gmra.mxu1 %v4425_v58  ;;  %2104 = vmatprep.mubr.bf16.mxu0 %v4428_v59  ;;  %v4495_v58 = vld [vmem:[%s6754_s0 + $0x5ec] ss:$28 sps:$4 sm:$0xff]  }
  0xc3   :  { %2393 = vmatprep.mubr.bf16.mxu1 %v4430_v60  ;;  %v4497_v60 = vld [vmem:[%s6754_s0 + $0x5f4] ss:$28 sps:$4 sm:$0xff]  }
  0xc9   :  { %2105 = vmatmul.mubr.bf16.gmra.mxu0 %v4432_v61 }
  0xca   :  { %2394 = vmatmul.mubr.bf16.gmra.mxu1 %v4433_v63  ;;  %2112 = vmatprep.mubr.bf16.mxu0 %v4434_v1 }
  0xcb   :  { %2401 = vmatprep.mubr.bf16.mxu1 %v4436_v2 }
  0xd1   :  { %2113 = vmatmul.mubr.bf16.gmra.mxu0 %v4438_v3 }
  0xd2   :  { %2402 = vmatmul.mubr.bf16.gmra.mxu1 %v4439_v4  ;;  %2120 = vmatprep.mubr.bf16.mxu0 %v4441_v5 }
  0xd3   :  { %2409 = vmatprep.mubr.bf16.mxu1 %v4443_v6 }
  0xd9   :  { %2121 = vmatmul.mubr.bf16.gmra.mxu0 %v4445_v7 }
  0xda   :  { %2410 = vmatmul.mubr.bf16.gmra.mxu1 %v4446_v8  ;;  %2128 = vmatprep.mubr.bf16.mxu0 %v4447_v9  ;;  %v4499_v8 = vld [vmem:[%s6754_s0 + $0x5e8] ss:$28 sps:$4 sm:$0xff]  }
  0xdb   :  { %2417 = vmatprep.mubr.bf16.mxu1 %v4449_v10 }
  0xe1   :  { %2129 = vmatmul.mubr.bf16.gmra.mxu0 %v4451_v11  ;;  %v4500_v11 = vld [vmem:[%s6754_s0 + $0x5f0] ss:$28 sps:$4 sm:$0xff]  }
  0xe2   :  { %2418 = vmatmul.mubr.bf16.gmra.mxu1 %v4452_v12  ;;  %2136 = vmatprep.mubr.bf16.mxu0 %v4454_v13  ;;  %v4503_v12 = vld [vmem:[%s6754_s0 + $0x624] ss:$28 sps:$4 sm:$0xff]  }
  0xe3   :  { %2425 = vmatprep.mubr.bf16.mxu1 %v4456_v14  ;;  %v4506_v14 = vld [vmem:[%s6754_s0 + $0x62c] ss:$28 sps:$4 sm:$0xff]  }
  0xe9   :  { %2137 = vmatmul.mubr.bf16.gmra.mxu0 %v4458_v15 }
  0xea   :  { %2426 = vmatmul.mubr.bf16.gmra.mxu1 %v4459_v16  ;;  %2144 = vmatprep.mubr.bf16.mxu0 %v4461_v17 }
  0xeb   :  { %2433 = vmatprep.mubr.bf16.mxu1 %v4463_v18 }
  0xf1   :  { %2145 = vmatmul.mubr.bf16.gmra.mxu0 %v4465_v19 }
  0xf2   :  { %2434 = vmatmul.mubr.bf16.gmra.mxu1 %v4466_v20  ;;  %2152 = vmatprep.mubr.bf16.mxu0 %v4468_v21 }
  0xf3   :  { %2441 = vmatprep.mubr.bf16.mxu1 %v4470_v22 }
  0xf9   :  { %2153 = vmatmul.mubr.bf16.gmra.mxu0 %v4472_v23 }
  0xfa   :  { %2442 = vmatmul.mubr.bf16.gmra.mxu1 %v4473_v24  ;;  %2160 = vmatprep.mubr.bf16.mxu0 %v4474_v25  ;;  %v4501_v24 = vld [vmem:[%s6754_s0 + $0x620] ss:$28 sps:$4 sm:$0xff]  }
  0xfb   :  { %2449 = vmatprep.mubr.bf16.mxu1 %v4476_v26 }
 0x101   :  { %v1970_v32 = vpop.f32.mrf.mxu0  ;;  %2161 = vmatmul.mubr.bf16.gmra.mxu0 %v4478_v27  ;;  %v4504_v27 = vld [vmem:[%s6754_s0 + $0x628] ss:$28 sps:$4 sm:$0xff]  }
 0x102   :  { %v1971_v33 = vadd.f32 %v5215_v30, %v1970_v32  ;;  %v2259_v34 = vpop.f32.mrf.mxu1  ;;  %2450 = vmatmul.mubr.bf16.gmra.mxu1 %v4479_v28  ;;  %2168 = vmatprep.mubr.bf16.mxu0 %v4481_v29  ;;  %v4510_v28 = vld [vmem:[%s6754_s0 + $0x65c] ss:$28 sps:$4 sm:$0xff]  }
 0x103   :  { %v1972_v35 = vpop.f32.mrf.mxu0  ;;  %2457 = vmatprep.mubr.bf16.mxu1 %v4483_v31  ;;  %v4513_v31 = vld [vmem:[%s6754_s0 + $0x664] ss:$28 sps:$4 sm:$0xff]  }
 0x104   :  { %v5221_v36 = vadd.f32 %v2259_v34, %v1971_v33  ;;  %v2261_v37 = vpop.f32.mrf.mxu1 }
 0x105   :  { %v1973_v38 = vpop.f32.mrf.mxu0 }
 0x106   :  { %v1974_v40 = vadd.f32 %v5215_v30, %v1973_v38  ;;  %v2262_v41 = vpop.f32.mrf.mxu1 }
 0x107   :  { %v1975_v44 = vpop.f32.mrf.mxu0 }
 0x108   :  { %v5236_v46 = vadd.f32 %v2262_v41, %v1974_v40  ;;  %v2264_v47 = vpop.f32.mrf.mxu1 }
 0x109   :  { %v1978_v48 = vpop.f32.mrf.mxu0  ;;  %2169 = vmatmul.mubr.bf16.gmra.mxu0 %v4485_v39  ;;  %v4516_v47 = vld [vmem:[%s6754_s0 + $0x694] ss:$28 sps:$4 sm:$0xff]  }
 0x10a   :  { %v1979_v49 = vadd.f32 %v5215_v30, %v1978_v48  ;;  %v2267_v50 = vpop.f32.mrf.mxu1  ;;  %2458 = vmatmul.mubr.bf16.gmra.mxu1 %v4486_v42  ;;  %2176 = vmatprep.mubr.bf16.mxu0 %v4487_v43  ;;  %v4508_v42 = vld [vmem:[%s6754_s0 + $0x658] ss:$28 sps:$4 sm:$0xff]  }
 0x10b   :  { %v1980_v51 = vpop.f32.mrf.mxu0  ;;  %2465 = vmatprep.mubr.bf16.mxu1 %v4489_v45  ;;  %v4511_v45 = vld [vmem:[%s6754_s0 + $0x660] ss:$28 sps:$4 sm:$0xff]  }
 0x10c   :  { %v5239_v0 = vadd.f32 %v2267_v50, %v1979_v49  ;;  %v2269_v52 = vpop.f32.mrf.mxu1  ;;  %v4519_v49 = vld [vmem:[%s6754_s0 + $0x69c] ss:$28 sps:$4 sm:$0xff]  }
 0x10d   :  { %v1981_v53 = vpop.f32.mrf.mxu0 }
 0x10e   :  { %v1982_v55 = vadd.f32 %v5215_v30, %v1981_v53  ;;  %v2270_v56 = vpop.f32.mrf.mxu1 }
 0x10f   :  { %v1983_v59 = vpop.f32.mrf.mxu0 }
 0x110   :  { %v5254_v61 = vadd.f32 %v2270_v56, %v1982_v55  ;;  %v2272_v63 = vpop.f32.mrf.mxu1  ;;  %v4514_v59 = vld [vmem:[%s6754_s0 + $0x690] ss:$28 sps:$4 sm:$0xff]  }
 0x111   :  { %v1986_v1 = vpop.f32.mrf.mxu0  ;;  %2177 = vmatmul.mubr.bf16.gmra.mxu0 %v4491_v54 }
 0x112   :  { %v1987_v2 = vadd.f32 %v5215_v30, %v1986_v1  ;;  %v2275_v3 = vpop.f32.mrf.mxu1  ;;  %2466 = vmatmul.mubr.bf16.gmra.mxu1 %v4492_v57  ;;  %2184 = vmatprep.mubr.bf16.mxu0 %v4495_v58  ;;  %v4517_v1 = vld [vmem:[%s6754_s0 + $0x698] ss:$28 sps:$4 sm:$0xff]  }
 0x113   :  { %v1988_v4 = vpop.f32.mrf.mxu0  ;;  %2473 = vmatprep.mubr.bf16.mxu1 %v4497_v60 }
 0x114   :  { %v5257_v5 = vadd.f32 %v2275_v3, %v1987_v2  ;;  %v2277_v6 = vpop.f32.mrf.mxu1  ;;  %v4523_v2 = vld [vmem:[%s6754_s0 + $0x6cc] ss:$28 sps:$4 sm:$0xff]   ;;  %v4526_v4 = vld [vmem:[%s6754_s0 + $0x6d4] ss:$28 sps:$4 sm:$0xff]  }
 0x115   :  { %v1989_v7 = vpop.f32.mrf.mxu0 }
 0x116   :  { %v1990_v9 = vadd.f32 %v5215_v30, %v1989_v7  ;;  %v2278_v10 = vpop.f32.mrf.mxu1 }
 0x117   :  { %v1991_v13 = vpop.f32.mrf.mxu0 }
 0x118   :  { %v5272_v15 = vadd.f32 %v2278_v10, %v1990_v9  ;;  %v2280_v16 = vpop.f32.mrf.mxu1 }
 0x119   :  { %v1994_v17 = vpop.f32.mrf.mxu0  ;;  %2185 = vmatmul.mubr.bf16.gmra.mxu0 %v4499_v8  ;;  %v4521_v16 = vld [vmem:[%s6754_s0 + $0x6c8] ss:$28 sps:$4 sm:$0xff]  }
 0x11a   :  { %v1995_v18 = vadd.f32 %v5215_v30, %v1994_v17  ;;  %v2283_v19 = vpop.f32.mrf.mxu1  ;;  %2474 = vmatmul.mubr.bf16.gmra.mxu1 %v4500_v11  ;;  %2192 = vmatprep.mubr.bf16.mxu0 %v4503_v12 }
 0x11b   :  { %v1996_v20 = vpop.f32.mrf.mxu0  ;;  %2481 = vmatprep.mubr.bf16.mxu1 %v4506_v14 }
 0x11c   :  { %v5275_v21 = vadd.f32 %v2283_v19, %v1995_v18  ;;  %v2285_v22 = vpop.f32.mrf.mxu1  ;;  %v4524_v19 = vld [vmem:[%s6754_s0 + $0x6d0] ss:$28 sps:$4 sm:$0xff]  }
 0x11d   :  { %v1997_v23 = vpop.f32.mrf.mxu0  ;;  %v4529_v20 = vld [vmem:[%s6754_s0 + $0x14] ss:$28 sps:$4 sm:$0xff]  }
 0x11e   :  { %v1998_v25 = vadd.f32 %v5215_v30, %v1997_v23  ;;  %v2286_v26 = vpop.f32.mrf.mxu1  ;;  %v4530_v23 = vld [vmem:[%s6754_s0 + $0x18] ss:$28 sps:$4 sm:$0xff]  }
 0x11f   :  { %v1999_v29 = vpop.f32.mrf.mxu0 }
 0x120   :  { %v5290_v32 = vadd.f32 %v2286_v26, %v1998_v25  ;;  %v2288_v33 = vpop.f32.mrf.mxu1 }
 0x121   :  { %v2002_v34 = vpop.f32.mrf.mxu0  ;;  %2193 = vmatmul.mubr.bf16.gmra.mxu0 %v4501_v24 }
 0x122   :  { %v2003_v35 = vadd.f32 %v5215_v30, %v2002_v34  ;;  %v2291_v37 = vpop.f32.mrf.mxu1  ;;  %2482 = vmatmul.mubr.bf16.gmra.mxu1 %v4504_v27  ;;  %2200 = vmatprep.mubr.bf16.mxu0 %v4510_v28 }
 0x123   :  { %v2004_v38 = vpop.f32.mrf.mxu0  ;;  %2489 = vmatprep.mubr.bf16.mxu1 %v4513_v31 }
 0x124   :  { %v5293_v39 = vadd.f32 %v2291_v37, %v2003_v35  ;;  %v2293_v40 = vpop.f32.mrf.mxu1  ;;  %v4527_v35 = vld [vmem:[%s6754_s0 + $0x10] ss:$28 sps:$4 sm:$0xff]  }
 0x125   :  { %v2005_v41 = vpop.f32.mrf.mxu0  ;;  %v4531_v40 = vld [vmem:[%s6754_s0 + $0x50] ss:$28 sps:$4 sm:$0xff]  }
 0x126   :  { %v2006_v43 = vadd.f32 %v5215_v30, %v2005_v41  ;;  %v2294_v44 = vpop.f32.mrf.mxu1  ;;  %v4535_v41 = vld [vmem:[%s6754_s0 + $0x4c] ss:$28 sps:$4 sm:$0xff]  }
 0x127   :  { %v2007_v48 = vpop.f32.mrf.mxu0 }
 0x128   :  { %v5308_v50 = vadd.f32 %v2294_v44, %v2006_v43  ;;  %v2296_v51 = vpop.f32.mrf.mxu1  ;;  %v4536_v43 = vld [vmem:[%s6754_s0 + $0x88] ss:$28 sps:$4 sm:$0xff]  }
 0x129   :  { %v2010_v52 = vpop.f32.mrf.mxu0  ;;  %2201 = vmatmul.mubr.bf16.gmra.mxu0 %v4508_v42 }
 0x12a   :  { %v2011_v53 = vadd.f32 %v5215_v30, %v2010_v52  ;;  %v2299_v54 = vpop.f32.mrf.mxu1  ;;  %2490 = vmatmul.mubr.bf16.gmra.mxu1 %v4511_v45  ;;  %2208 = vmatprep.mubr.bf16.mxu0 %v4516_v47 }
 0x12b   :  { %v2012_v55 = vpop.f32.mrf.mxu0  ;;  %2497 = vmatprep.mubr.bf16.mxu1 %v4519_v49 }
 0x12c   :  { %v5311_v56 = vadd.f32 %v2299_v54, %v2011_v53  ;;  %v2301_v57 = vpop.f32.mrf.mxu1  ;;  %v4533_v55 = vld [vmem:[%s6754_s0 + $0x48] ss:$28 sps:$4 sm:$0xff]  }
 0x12d   :  { %v2013_v58 = vpop.f32.mrf.mxu0 }
 0x12e   :  { %v2014_v60 = vadd.f32 %v5215_v30, %v2013_v58  ;;  %v2302_v63 = vpop.f32.mrf.mxu1 }
 0x12f   :  { %v2015_v3 = vpop.f32.mrf.mxu0 }
 0x130   :  { %v5326_v6 = vadd.f32 %v2302_v63, %v2014_v60  ;;  %v2304_v7 = vpop.f32.mrf.mxu1  ;;  %v4541_v63 = vld [vmem:[%s6754_s0 + $0xf8] ss:$28 sps:$4 sm:$0xff]  }
 0x131   :  { %v2018_v8 = vpop.f32.mrf.mxu0  ;;  %2209 = vmatmul.mubr.bf16.gmra.mxu0 %v4514_v59  ;;  %v4537_v59 = vld [vmem:[%s6754_s0 + $0xc0] ss:$28 sps:$4 sm:$0xff]  }
 0x132   :  { %v2019_v9 = vadd.f32 %v5215_v30, %v2018_v8  ;;  %v2307_v10 = vpop.f32.mrf.mxu1  ;;  %2498 = vmatmul.mubr.bf16.gmra.mxu1 %v4517_v1  ;;  %2216 = vmatprep.mubr.bf16.mxu0 %v4523_v2 }
 0x133   :  { %v2020_v11 = vpop.f32.mrf.mxu0  ;;  %2505 = vmatprep.mubr.bf16.mxu1 %v4526_v4 }
 0x134   :  { %v5329_v12 = vadd.f32 %v2307_v10, %v2019_v9  ;;  %v2309_v13 = vpop.f32.mrf.mxu1 }
 0x135   :  { %v2021_v14 = vpop.f32.mrf.mxu0  ;;  %v4538_v13 = vld [vmem:[%s6754_s0 + $0x80] ss:$28 sps:$4 sm:$0xff]  }
 0x136   :  { %v2022_v17 = vadd.f32 %v5215_v30, %v2021_v14  ;;  %v2310_v18 = vpop.f32.mrf.mxu1 }
 0x137   :  { %v2023_v22 = vpop.f32.mrf.mxu0 }
 0x138   :  { %v5344_v24 = vadd.f32 %v2310_v18, %v2022_v17  ;;  %v2312_v25 = vpop.f32.mrf.mxu1  ;;  %v4542_v17 = vld [vmem:[%s6754_s0 + $0x130] ss:$28 sps:$4 sm:$0xff]   ;;  %v4545_v18 = vld [vmem:[%s6754_s0 + $0xbc] ss:$28 sps:$4 sm:$0xff]  }
 0x139   :  { %v2026_v26 = vpop.f32.mrf.mxu0  ;;  %2217 = vmatmul.mubr.bf16.gmra.mxu0 %v4521_v16 }
 0x13a   :  { %v2027_v27 = vadd.f32 %v5215_v30, %v2026_v26  ;;  %v2315_v28 = vpop.f32.mrf.mxu1  ;;  %2506 = vmatmul.mubr.bf16.gmra.mxu1 %v4524_v19  ;;  %2546 = vmatprep.mubr.bf16.mxu0 %v4529_v20  ;;  %v4546_v20 = vld [vmem:[%s6754_s0 + $0x168] ss:$28 sps:$4 sm:$0xff]  }
 0x13b   :  { %v2028_v29 = vpop.f32.mrf.mxu0  ;;  %4150 = vmatprep.mubr.msk.bf16.mxu1 %vm1839_vm0, %v4530_v23 }
 0x13c   :  { %v5348_v31 = vadd.f32 %v2315_v28, %v2027_v27  ;;  %v2317_v33 = vpop.f32.mrf.mxu1 }
 0x13d   :  { %v2029_v34 = vpop.f32.mrf.mxu0 }
 0x13e   :  { %v2030_v37 = vadd.f32 %v5215_v30, %v2029_v34  ;;  %v2318_v38 = vpop.f32.mrf.mxu1 }
 0x13f   :  { %v2031_v42 = vpop.f32.mrf.mxu0 }
 0x140   :  { %v5363_v44 = vadd.f32 %v2318_v38, %v2030_v37  ;;  %v2320_v45 = vpop.f32.mrf.mxu1 }
 0x141   :  { %v2034_v47 = vpop.f32.mrf.mxu0  ;;  %2547 = vmatmul.mubr.bf16.vlgmr.msra.gmra.mxu0 %v4527_v35  ;;  %v4543_v35 = vld [vmem:[%s6754_s0 + $0xb8] ss:$28 sps:$4 sm:$0xff]  }
 0x142   :  { %v2035_v48 = vadd.f32 %v5215_v30, %v2034_v47  ;;  %v2323_v49 = vpop.f32.mrf.mxu1  ;;  %4151 = vmatmul.mubr.msk.bf16.vlgmr.msra.gmra.mxu1 %vm1839_vm0, %v4531_v40  ;;  %2554 = vmatprep.mubr.bf16.mxu0 %v4535_v41  ;;  %v4547_v40 = vld [vmem:[%s6754_s0 + $0x1a0] ss:$28 sps:$4 sm:$0xff]   ;;  %v4550_v41 = vld [vmem:[%s6754_s0 + $0xf4] ss:$28 sps:$4 sm:$0xff]  }
 0x143   :  { %4215 = vmatpush3.bf16.msra.mxu1 %v5119_v62  ;;  %v2036_v51 = vpop.f32.mrf.mxu0  ;;  %4154 = vmatprep.mubr.msk.bf16.mxu1 %vm1839_vm0, %v4536_v43  ;;  %v4540_v62 = vld [vmem:[%s6754_s0 + $0x84] ss:$28 sps:$4 sm:$0xff]   ;;  %v4551_v43 = vld [vmem:[%s6754_s0 + $0x1d8] ss:$28 sps:$4 sm:$0xff]  }
 0x144   :  { %v5369_v52 = vadd.f32 %v2323_v49, %v2035_v48  ;;  %v2325_v53 = vpop.f32.mrf.mxu1 }
 0x145   :  { %v2037_v54 = vpop.f32.mrf.mxu0 }
 0x146   :  { %v2038_v57 = vadd.f32 %v5215_v30, %v2037_v54  ;;  %v2326_v58 = vpop.f32.mrf.mxu1 }
 0x147   :  { %v2039_v60 = vpop.f32.mrf.mxu0 }
 0x148   :  { %v5384_v1 = vadd.f32 %v2326_v58, %v2038_v57  ;;  %v2328_v2 = vpop.f32.mrf.mxu1  ;;  %v4548_v58 = vld [vmem:[%s6754_s0 + $0xf0] ss:$28 sps:$4 sm:$0xff]  }
 0x149   :  { %v2042_v3 = vpop.f32.mrf.mxu0  ;;  %2555 = vmatmul.mubr.bf16.gmra.mxu0 %v4533_v55  ;;  %v4552_v60 = vld [vmem:[%s6754_s0 + $0x210] ss:$28 sps:$4 sm:$0xff]  }
 0x14a   :  { %v2043_v4 = vadd.f32 %v5215_v30, %v2042_v3  ;;  %v2331_v7 = vpop.f32.mrf.mxu1  ;;  %4155 = vmatmul.mubr.msk.bf16.gmra.mxu1 %vm1839_vm0, %v4537_v59  ;;  %2562 = vmatprep.mubr.bf16.mxu0 %v4540_v62  ;;  %v4556_v3 = vld [vmem:[%s6754_s0 + $0x248] ss:$28 sps:$4 sm:$0xff]  }
 0x14b   :  { %v2044_v8 = vpop.f32.mrf.mxu0  ;;  %4158 = vmatprep.mubr.msk.bf16.mxu1 %vm1839_vm0, %v4541_v63  ;;  %v4555_v63 = vld [vmem:[%s6754_s0 + $0x12c] ss:$28 sps:$4 sm:$0xff]  }
 0x14c   :  { %v5389_v9 = vadd.f32 %v2331_v7, %v2043_v4  ;;  %v2333_v10 = vpop.f32.mrf.mxu1 }
 0x14d   :  { %v2045_v11 = vpop.f32.mrf.mxu0 }
 0x14e   :  { %v2046_v14 = vadd.f32 %v5215_v30, %v2045_v11  ;;  %v2334_v16 = vpop.f32.mrf.mxu1 }
 0x14f   :  { %v2047_v19 = vpop.f32.mrf.mxu0 }
 0x150   :  { %v5404_v22 = vadd.f32 %v2334_v16, %v2046_v14  ;;  %v2336_v23 = vpop.f32.mrf.mxu1 }
 0x151   :  { %v2050_v25 = vpop.f32.mrf.mxu0  ;;  %2563 = vmatmul.mubr.bf16.gmra.mxu0 %v4538_v13  ;;  %v4557_v23 = vld [vmem:[%s6754_s0 + $0x280] ss:$28 sps:$4 sm:$0xff]  }
 0x152   :  { %v2051_v26 = vadd.f32 %v5215_v30, %v2050_v25  ;;  %v2339_v27 = vpop.f32.mrf.mxu1  ;;  %4159 = vmatmul.mubr.msk.bf16.gmra.mxu1 %vm1839_vm0, %v4542_v17  ;;  %2570 = vmatprep.mubr.bf16.mxu0 %v4545_v18  ;;  %v4553_v18 = vld [vmem:[%s6754_s0 + $0x128] ss:$28 sps:$4 sm:$0xff]  }
 0x153   :  { %v2052_v28 = vpop.f32.mrf.mxu0  ;;  %4162 = vmatprep.mubr.msk.bf16.mxu1 %vm1839_vm0, %v4546_v20  ;;  %v4560_v25 = vld [vmem:[%s6754_s0 + $0x164] ss:$28 sps:$4 sm:$0xff]  }
 0x154   :  { %v5409_v29 = vadd.f32 %v2339_v27, %v2051_v26  ;;  %v2341_v33 = vpop.f32.mrf.mxu1  ;;  %v4561_v27 = vld [vmem:[%s6754_s0 + $0x2b8] ss:$28 sps:$4 sm:$0xff]  }
 0x155   :  { %v2053_v34 = vpop.f32.mrf.mxu0 }
 0x156   :  { %v2054_v37 = vadd.f32 %v5215_v30, %v2053_v34  ;;  %v2342_v38 = vpop.f32.mrf.mxu1 }
 0x157   :  { %v2055_v42 = vpop.f32.mrf.mxu0 }
 0x158   :  { %v5424_v45 = vadd.f32 %v2342_v38, %v2054_v37  ;;  %v2344_v47 = vpop.f32.mrf.mxu1 }
 0x159   :  { %v2058_v48 = vpop.f32.mrf.mxu0  ;;  %2571 = vmatmul.mubr.bf16.gmra.mxu0 %v4543_v35 }
 0x15a   :  { %v2059_v49 = vadd.f32 %v5215_v30, %v2058_v48  ;;  %v2347_v51 = vpop.f32.mrf.mxu1  ;;  %4163 = vmatmul.mubr.msk.bf16.gmra.mxu1 %vm1839_vm0, %v4547_v40  ;;  %2578 = vmatprep.mubr.bf16.mxu0 %v4550_v41 }
 0x15b   :  { %v2060_v53 = vpop.f32.mrf.mxu0  ;;  %4166 = vmatprep.mubr.msk.bf16.mxu1 %vm1839_vm0, %v4551_v43  ;;  %v4558_v43 = vld [vmem:[%s6754_s0 + $0x160] ss:$28 sps:$4 sm:$0xff]  }
 0x15c   :  { %v5429_v54 = vadd.f32 %v2347_v51, %v2059_v49  ;;  %v2349_v55 = vpop.f32.mrf.mxu1  ;;  %v4562_v49 = vld [vmem:[%s6754_s0 + $0x2f0] ss:$28 sps:$4 sm:$0xff]   ;;  %v4565_v51 = vld [vmem:[%s6754_s0 + $0x19c] ss:$28 sps:$4 sm:$0xff]  }
 0x15d   :  { %v2061_v57 = vpop.f32.mrf.mxu0  ;;  %v4566_v55 = vld [vmem:[%s6754_s0 + $0x328] ss:$28 sps:$4 sm:$0xff]  }
 0x15e   :  { %v2062_v59 = vadd.f32 %v5215_v30, %v2061_v57  ;;  %v2350_v62 = vpop.f32.mrf.mxu1 }
 0x15f   :  { %v2063_v2 = vpop.f32.mrf.mxu0 }
 0x160   :  { %v5444_v4 = vadd.f32 %v2350_v62, %v2062_v59  ;;  %v2352_v7 = vpop.f32.mrf.mxu1 }
 0x161   :  { %v2066_v8 = vpop.f32.mrf.mxu0  ;;  %2579 = vmatmul.mubr.bf16.gmra.mxu0 %v4548_v58 }
 0x162   :  { %v2067_v10 = vadd.f32 %v5215_v30, %v2066_v8  ;;  %v2355_v11 = vpop.f32.mrf.mxu1  ;;  %4167 = vmatmul.mubr.msk.bf16.gmra.mxu1 %vm1839_vm0, %v4552_v60  ;;  %2586 = vmatprep.mubr.bf16.mxu0 %v4555_v63  ;;  %v4563_v8 = vld [vmem:[%s6754_s0 + $0x198] ss:$28 sps:$4 sm:$0xff]  }
 0x163   :  { %v2068_v13 = vpop.f32.mrf.mxu0  ;;  %4170 = vmatprep.mubr.msk.bf16.mxu1 %vm1839_vm0, %v4556_v3 }
 0x164   :  { %v5449_v14 = vadd.f32 %v2355_v11, %v2067_v10  ;;  %v2357_v16 = vpop.f32.mrf.mxu1  ;;  %v4567_v13 = vld [vmem:[%s6754_s0 + $0x360] ss:$28 sps:$4 sm:$0xff]  }
 0x165   :  { %v2069_v17 = vpop.f32.mrf.mxu0  ;;  %v4570_v16 = vld [vmem:[%s6754_s0 + $0x1d4] ss:$28 sps:$4 sm:$0xff]  }
 0x166   :  { %v2070_v19 = vadd.f32 %v5215_v30, %v2069_v17  ;;  %v2358_v20 = vpop.f32.mrf.mxu1 }
 0x167   :  { %v2071_v26 = vpop.f32.mrf.mxu0 }
 0x168   :  { %v5464_v28 = vadd.f32 %v2358_v20, %v2070_v19  ;;  %v2360_v33 = vpop.f32.mrf.mxu1 }
 0x169   :  { %v2074_v34 = vpop.f32.mrf.mxu0  ;;  %2587 = vmatmul.mubr.bf16.gmra.mxu0 %v4553_v18  ;;  %v4571_v18 = vld [vmem:[%s6754_s0 + $0x398] ss:$28 sps:$4 sm:$0xff]  }
 0x16a   :  { %v2075_v35 = vadd.f32 %v5215_v30, %v2074_v34  ;;  %v2363_v37 = vpop.f32.mrf.mxu1  ;;  %4171 = vmatmul.mubr.msk.bf16.gmra.mxu1 %vm1839_vm0, %v4557_v23  ;;  %2594 = vmatprep.mubr.bf16.mxu0 %v4560_v25 }
 0x16b   :  { %v2076_v38 = vpop.f32.mrf.mxu0  ;;  %4174 = vmatprep.mubr.msk.bf16.mxu1 %vm1839_vm0, %v4561_v27 }
 0x16c   :  { %v5469_v40 = vadd.f32 %v2363_v37, %v2075_v35  ;;  %v2365_v41 = vpop.f32.mrf.mxu1  ;;  %v4568_v37 = vld [vmem:[%s6754_s0 + $0x1d0] ss:$28 sps:$4 sm:$0xff]  }
 0x16d   :  { %v2077_v42 = vpop.f32.mrf.mxu0 }
 0x16e   :  { %v2078_v47 = vadd.f32 %v5215_v30, %v2077_v42  ;;  %v2366_v48 = vpop.f32.mrf.mxu1  ;;  %v4572_v42 = vld [vmem:[%s6754_s0 + $0x3d0] ss:$28 sps:$4 sm:$0xff]  }
 0x16f   :  { %v2079_v53 = vpop.f32.mrf.mxu0 }
 0x170   :  { %v5484_v57 = vadd.f32 %v2366_v48, %v2078_v47  ;;  %v2368_v58 = vpop.f32.mrf.mxu1  ;;  %v4576_v48 = vld [vmem:[%s6754_s0 + $0x408] ss:$28 sps:$4 sm:$0xff]  }
 0x171   :  { %v2082_v59 = vpop.f32.mrf.mxu0  ;;  %2595 = vmatmul.mubr.bf16.gmra.mxu0 %v4558_v43  ;;  %v4575_v43 = vld [vmem:[%s6754_s0 + $0x20c] ss:$28 sps:$4 sm:$0xff]  }
 0x172   :  { %v2083_v62 = vadd.f32 %v5215_v30, %v2082_v59  ;;  %v2371_v60 = vpop.f32.mrf.mxu1  ;;  %4175 = vmatmul.mubr.msk.bf16.gmra.mxu1 %vm1839_vm0, %v4562_v49  ;;  %2602 = vmatprep.mubr.bf16.mxu0 %v4565_v51 }
 0x173   :  { %v2084_v63 = vpop.f32.mrf.mxu0  ;;  %4178 = vmatprep.mubr.msk.bf16.mxu1 %vm1839_vm0, %v4566_v55 }
 0x174   :  { %v5489_v2 = vadd.f32 %v2371_v60, %v2083_v62  ;;  %v2373_v3 = vpop.f32.mrf.mxu1 }
 0x175   :  { %v2085_v7 = vpop.f32.mrf.mxu0  ;;  %v4573_v3 = vld [vmem:[%s6754_s0 + $0x208] ss:$28 sps:$4 sm:$0xff]  }
 0x176   :  { %v2086_v10 = vadd.f32 %v5215_v30, %v2085_v7  ;;  %v2374_v11 = vpop.f32.mrf.mxu1 }
 0x177   :  { %v2087_v17 = vpop.f32.mrf.mxu0 }
 0x178   :  { %v5504_v19 = vadd.f32 %v2374_v11, %v2086_v10  ;;  %v2376_v20 = vpop.f32.mrf.mxu1  ;;  %v4577_v10 = vld [vmem:[%s6754_s0 + $0x440] ss:$28 sps:$4 sm:$0xff]  }
 0x179   :  { %v2090_v23 = vpop.f32.mrf.mxu0  ;;  %2603 = vmatmul.mubr.bf16.gmra.mxu0 %v4563_v8  ;;  %v4580_v11 = vld [vmem:[%s6754_s0 + $0x244] ss:$28 sps:$4 sm:$0xff]  }
 0x17a   :  { %v2091_v25 = vadd.f32 %v5215_v30, %v2090_v23  ;;  %v2379_v26 = vpop.f32.mrf.mxu1  ;;  %4179 = vmatmul.mubr.msk.bf16.gmra.mxu1 %vm1839_vm0, %v4567_v13  ;;  %2610 = vmatprep.mubr.bf16.mxu0 %v4570_v16  ;;  %v4581_v16 = vld [vmem:[%s6754_s0 + $0x478] ss:$28 sps:$4 sm:$0xff]  }
 0x17b   :  { %v2092_v27 = vpop.f32.mrf.mxu0  ;;  %4182 = vmatprep.mubr.msk.bf16.mxu1 %vm1839_vm0, %v4571_v18 }
 0x17c   :  { %v5509_v33 = vadd.f32 %v2379_v26, %v2091_v25  ;;  %v2381_v34 = vpop.f32.mrf.mxu1 }
 0x17d   :  { %v2093_v35 = vpop.f32.mrf.mxu0 }
 0x17e   :  { %v2094_v38 = vadd.f32 %v5215_v30, %v2093_v35  ;;  %v2382_v41 = vpop.f32.mrf.mxu1 }
 0x17f   :  { %v2095_v47 = vpop.f32.mrf.mxu0 }
 0x180   :  { %v5524_v49 = vadd.f32 %v2382_v41, %v2094_v38  ;;  %v2384_v51 = vpop.f32.mrf.mxu1 }
 0x181   :  { %v2098_v53 = vpop.f32.mrf.mxu0  ;;  %2611 = vmatmul.mubr.bf16.gmra.mxu0 %v4568_v37  ;;  %v4578_v37 = vld [vmem:[%s6754_s0 + $0x240] ss:$28 sps:$4 sm:$0xff]  }
 0x182   :  { %v2099_v55 = vadd.f32 %v5215_v30, %v2098_v53  ;;  %v2387_v58 = vpop.f32.mrf.mxu1  ;;  %4183 = vmatmul.mubr.msk.bf16.gmra.mxu1 %vm1839_vm0, %v4572_v42  ;;  %2618 = vmatprep.mubr.bf16.mxu0 %v4575_v43  ;;  %v4582_v42 = vld [vmem:[%s6754_s0 + $0x4b0] ss:$28 sps:$4 sm:$0xff]   ;;  %v4585_v43 = vld [vmem:[%s6754_s0 + $0x27c] ss:$28 sps:$4 sm:$0xff]  }
 0x183   :  { %v2100_v59 = vpop.f32.mrf.mxu0  ;;  %4186 = vmatprep.mubr.msk.bf16.mxu1 %vm1839_vm0, %v4576_v48  ;;  %v4586_v48 = vld [vmem:[%s6754_s0 + $0x4e8] ss:$28 sps:$4 sm:$0xff]  }
 0x184   :  { %v5529_v62 = vadd.f32 %v2387_v58, %v2099_v55  ;;  %v2389_v60 = vpop.f32.mrf.mxu1 }
 0x185   :  { %v2101_v63 = vpop.f32.mrf.mxu0 }
 0x186   :  { %v2102_v7 = vadd.f32 %v5215_v30, %v2101_v63  ;;  %v2390_v8 = vpop.f32.mrf.mxu1 }
 0x187   :  { %v2103_v13 = vpop.f32.mrf.mxu0 }
 0x188   :  { %v5544_v17 = vadd.f32 %v2390_v8, %v2102_v7  ;;  %v2392_v18 = vpop.f32.mrf.mxu1  ;;  %v4583_v8 = vld [vmem:[%s6754_s0 + $0x278] ss:$28 sps:$4 sm:$0xff]   ;;  %v4587_v13 = vld [vmem:[%s6754_s0 + $0x520] ss:$28 sps:$4 sm:$0xff]  }
 0x189   :  { %v2106_v20 = vpop.f32.mrf.mxu0  ;;  %2619 = vmatmul.mubr.bf16.gmra.mxu0 %v4573_v3 }
 0x18a   :  { %v2107_v23 = vadd.f32 %v5215_v30, %v2106_v20  ;;  %v2395_v25 = vpop.f32.mrf.mxu1  ;;  %4187 = vmatmul.mubr.msk.bf16.gmra.mxu1 %vm1839_vm0, %v4577_v10  ;;  %2626 = vmatprep.mubr.bf16.mxu0 %v4580_v11  ;;  %v4591_v20 = vld [vmem:[%s6754_s0 + $0x558] ss:$28 sps:$4 sm:$0xff]  }
 0x18b   :  { %v2108_v26 = vpop.f32.mrf.mxu0  ;;  %4190 = vmatprep.mubr.msk.bf16.mxu1 %vm1839_vm0, %v4581_v16  ;;  %v4590_v16 = vld [vmem:[%s6754_s0 + $0x2b4] ss:$28 sps:$4 sm:$0xff]  }
 0x18c   :  { %v5549_v27 = vadd.f32 %v2395_v25, %v2107_v23  ;;  %v2397_v34 = vpop.f32.mrf.mxu1 }
 0x18d   :  { %v2109_v35 = vpop.f32.mrf.mxu0 }
 0x18e   :  { %v2110_v38 = vadd.f32 %v5215_v30, %v2109_v35  ;;  %v2398_v41 = vpop.f32.mrf.mxu1 }
 0x18f   :  { %v2111_v47 = vpop.f32.mrf.mxu0 }
 0x190   :  { %v5564_v51 = vadd.f32 %v2398_v41, %v2110_v38  ;;  %v2400_v53 = vpop.f32.mrf.mxu1 }
 0x191   :  { %v2114_v55 = vpop.f32.mrf.mxu0  ;;  %2627 = vmatmul.mubr.bf16.gmra.mxu0 %v4578_v37  ;;  %v4592_v53 = vld [vmem:[%s6754_s0 + $0x590] ss:$28 sps:$4 sm:$0xff]  }
 0x192   :  { %6760 = vst [vmem:[#allocation2_spill] sm:$0xff] %v5564_v51  ;;  %v2115_v58 = vadd.f32 %v5215_v30, %v2114_v55  ;;  %v2403_v59 = vpop.f32.mrf.mxu1  ;;  %4191 = vmatmul.mubr.msk.bf16.gmra.mxu1 %vm1839_vm0, %v4582_v42  ;;  %2634 = vmatprep.mubr.bf16.mxu0 %v4585_v43  ;;  %v4588_v43 = vld [vmem:[%s6754_s0 + $0x2b0] ss:$28 sps:$4 sm:$0xff]  }
 0x193   :  { %v2116_v60 = vpop.f32.mrf.mxu0  ;;  %4194 = vmatprep.mubr.msk.bf16.mxu1 %vm1839_vm0, %v4586_v48  ;;  %v4595_v55 = vld [vmem:[%s6754_s0 + $0x2ec] ss:$28 sps:$4 sm:$0xff]  }
 0x194   :  { %v5569_v63 = vadd.f32 %v2403_v59, %v2115_v58  ;;  %v2405_v3 = vpop.f32.mrf.mxu1  ;;  %v4596_v59 = vld [vmem:[%s6754_s0 + $0x5c8] ss:$28 sps:$4 sm:$0xff]  }
 0x195   :  { %v2117_v7 = vpop.f32.mrf.mxu0 }
 0x196   :  { %6761 = vst [vmem:[#allocation3_spill] sm:$0xff] %v5569_v63  ;;  %v2118_v10 = vadd.f32 %v5215_v30, %v2117_v7  ;;  %v2406_v11 = vpop.f32.mrf.mxu1 }
 0x197   :  { %v2119_v18 = vpop.f32.mrf.mxu0 }
 0x198   :  { %v5584_v23 = vadd.f32 %v2406_v11, %v2118_v10  ;;  %v2408_v25 = vpop.f32.mrf.mxu1 }
 0x199   :  { %v2122_v26 = vpop.f32.mrf.mxu0  ;;  %2635 = vmatmul.mubr.bf16.gmra.mxu0 %v4583_v8 }
 0x19a   :  { %6762 = vst [vmem:[#allocation4_spill] sm:$0xff] %v5584_v23  ;;  %v2123_v34 = vadd.f32 %v5215_v30, %v2122_v26  ;;  %v2411_v35 = vpop.f32.mrf.mxu1  ;;  %4195 = vmatmul.mubr.msk.bf16.gmra.mxu1 %vm1839_vm0, %v4587_v13  ;;  %2642 = vmatprep.mubr.bf16.mxu0 %v4590_v16 }
 0x19b   :  { %v2124_v37 = vpop.f32.mrf.mxu0  ;;  %4198 = vmatprep.mubr.msk.bf16.mxu1 %vm1839_vm0, %v4591_v20  ;;  %v4593_v20 = vld [vmem:[%s6754_s0 + $0x2e8] ss:$28 sps:$4 sm:$0xff]  }
 0x19c   :  { %v5589_v38 = vadd.f32 %v2411_v35, %v2123_v34  ;;  %v2413_v41 = vpop.f32.mrf.mxu1  ;;  %v4597_v34 = vld [vmem:[%s6754_s0 + $0x600] ss:$28 sps:$4 sm:$0xff]  }
 0x19d   :  { %v2125_v42 = vpop.f32.mrf.mxu0  ;;  %v4600_v35 = vld [vmem:[%s6754_s0 + $0x324] ss:$28 sps:$4 sm:$0xff]   ;;  %v4601_v41 = vld [vmem:[%s6754_s0 + $0x638] ss:$28 sps:$4 sm:$0xff]  }
 0x19e   :  { %6763 = vst [vmem:[#allocation5_spill] sm:$0xff] %v5589_v38  ;;  %v2126_v47 = vadd.f32 %v5215_v30, %v2125_v42  ;;  %v2414_v48 = vpop.f32.mrf.mxu1 }
 0x19f   :  { %v2127_v58 = vpop.f32.mrf.mxu0 }
 0x1a0   :  { %v5604_v60 = vadd.f32 %v2414_v48, %v2126_v47  ;;  %v2416_v3 = vpop.f32.mrf.mxu1 }
 0x1a1   :  { %v2130_v7 = vpop.f32.mrf.mxu0  ;;  %2643 = vmatmul.mubr.bf16.gmra.mxu0 %v4588_v43 }
 0x1a2   :  { %6764 = vst [vmem:[#allocation6_spill] sm:$0xff] %v5604_v60  ;;  %v2131_v8 = vadd.f32 %v5215_v30, %v2130_v7  ;;  %v2419_v10 = vpop.f32.mrf.mxu1  ;;  %4199 = vmatmul.mubr.msk.bf16.gmra.mxu1 %vm1839_vm0, %v4592_v53  ;;  %2650 = vmatprep.mubr.bf16.mxu0 %v4595_v55  ;;  %v4598_v7 = vld [vmem:[%s6754_s0 + $0x320] ss:$28 sps:$4 sm:$0xff]  }
 0x1a3   :  { %v2132_v11 = vpop.f32.mrf.mxu0  ;;  %4202 = vmatprep.mubr.msk.bf16.mxu1 %vm1839_vm0, %v4596_v59 }
 0x1a4   :  { %v5609_v13 = vadd.f32 %v2419_v10, %v2131_v8  ;;  %v2421_v16 = vpop.f32.mrf.mxu1  ;;  %v4602_v11 = vld [vmem:[%s6754_s0 + $0x670] ss:$28 sps:$4 sm:$0xff]  }
 0x1a5   :  { %v2133_v18 = vpop.f32.mrf.mxu0  ;;  %v4605_v16 = vld [vmem:[%s6754_s0 + $0x35c] ss:$28 sps:$4 sm:$0xff]  }
 0x1a6   :  { %6765 = vst [vmem:[#allocation7_spill] sm:$0xff] %v5609_v13  ;;  %v2134_v25 = vadd.f32 %v5215_v30, %v2133_v18  ;;  %v2422_v26 = vpop.f32.mrf.mxu1 }
 0x1a7   :  { %v2135_v37 = vpop.f32.mrf.mxu0 }
 0x1a8   :  { %v5624_v42 = vadd.f32 %v2422_v26, %v2134_v25  ;;  %v2424_v43 = vpop.f32.mrf.mxu1 }
 0x1a9   :  { %v2138_v47 = vpop.f32.mrf.mxu0  ;;  %2651 = vmatmul.mubr.bf16.gmra.mxu0 %v4593_v20  ;;  %v4606_v20 = vld [vmem:[%s6754_s0 + $0x6a8] ss:$28 sps:$4 sm:$0xff]  }
 0x1aa   :  { %6766 = vst [vmem:[#allocation8_spill] sm:$0xff] %v5624_v42  ;;  %v2139_v48 = vadd.f32 %v5215_v30, %v2138_v47  ;;  %v2427_v53 = vpop.f32.mrf.mxu1  ;;  %4203 = vmatmul.mubr.msk.bf16.gmra.mxu1 %vm1839_vm0, %v4597_v34  ;;  %2658 = vmatprep.mubr.bf16.mxu0 %v4600_v35 }
 0x1ab   :  { %v2140_v55 = vpop.f32.mrf.mxu0  ;;  %4206 = vmatprep.mubr.msk.bf16.mxu1 %vm1839_vm0, %v4601_v41 }
 0x1ac   :  { %v5629_v58 = vadd.f32 %v2427_v53, %v2139_v48  ;;  %v2429_v59 = vpop.f32.mrf.mxu1  ;;  %v3092_v48 = vld [vmem:[%s6757_s3] sm:$0xff]  ;;  %v3093_v53 = vld [vmem:[%s6757_s3 + $0x8] sm:$0xff] }
 0x1ad   :  { %v2141_v3 = vpop.f32.mrf.mxu0  ;;  %v4603_v59 = vld [vmem:[%s6754_s0 + $0x358] ss:$28 sps:$4 sm:$0xff]  }
 0x1ae   :  { %6767 = vst [vmem:[#allocation9_spill] sm:$0xff] %v5629_v58  ;;  %v2142_v8 = vadd.f32 %v5215_v30, %v2141_v3  ;;  %v2430_v10 = vpop.f32.mrf.mxu1 }
 0x1af   :  { %v2143_v18 = vpop.f32.mrf.mxu0 }
 0x1b0   :  { %v5644_v25 = vadd.f32 %v2430_v10, %v2142_v8  ;;  %v2432_v26 = vpop.f32.mrf.mxu1  ;;  %v4607_v8 = vld [vmem:[%s6754_s0 + $0x6e0] ss:$28 sps:$4 sm:$0xff]   ;;  %v4610_v10 = vld [vmem:[%s6754_s0 + $0x394] ss:$28 sps:$4 sm:$0xff]  }
 0x1b1   :  { %v2146_v34 = vpop.f32.mrf.mxu0  ;;  %2659 = vmatmul.mubr.bf16.gmra.mxu0 %v4598_v7 }
 0x1b2   :  { %6768 = vst [vmem:[#allocation10_spill] sm:$0xff] %v5644_v25  ;;  %v2147_v35 = vadd.f32 %v5215_v30, %v2146_v34  ;;  %v2435_v37 = vpop.f32.mrf.mxu1  ;;  %4207 = vmatmul.mubr.msk.bf16.gmra.mxu1 %vm1839_vm0, %v4602_v11  ;;  %2666 = vmatprep.mubr.bf16.mxu0 %v4605_v16  ;;  %v3156_v16 = vpack.c.bf16 %v3093_v53, %v3092_v48 }
 0x1b3   :  { %v2148_v41 = vpop.f32.mrf.mxu0  ;;  %4210 = vmatprep.mubr.msk.bf16.mxu1 %vm1839_vm0, %v4606_v20 }
 0x1b4   :  { %v5649_v43 = vadd.f32 %v2435_v37, %v2147_v35  ;;  %v2437_v47 = vpop.f32.mrf.mxu1  ;;  %v3094_v41 = vld [vmem:[%s6757_s3 + $0x10] sm:$0xff] }
 0x1b5   :  { %v2149_v55 = vpop.f32.mrf.mxu0  ;;  %v3095_v47 = vld [vmem:[%s6757_s3 + $0x18] sm:$0xff] }
 0x1b6   :  { %6769 = vst [vmem:[#allocation11_spill] sm:$0xff] %v5649_v43  ;;  %v2150_v3 = vadd.f32 %v5215_v30, %v2149_v55  ;;  %v2438_v7 = vpop.f32.mrf.mxu1  ;;  %v3096_v55 = vld [vmem:[%s6757_s3 + $0x20] sm:$0xff] }
 0x1b7   :  { %v2151_v11 = vpop.f32.mrf.mxu0 }
 0x1b8   :  { %v5667_v18 = vadd.f32 %v2438_v7, %v2150_v3  ;;  %v2440_v20 = vpop.f32.mrf.mxu1  ;;  %v4608_v7 = vld [vmem:[%s6754_s0 + $0x390] ss:$28 sps:$4 sm:$0xff]   ;;  %v3157_v11 = vpack.c.bf16 %v3095_v47, %v3094_v41  ;;  %v3099_v47 = vld [vmem:[%s6757_s3 + $0x38] sm:$0xff] }
 0x1b9   :  { %v2154_v26 = vpop.f32.mrf.mxu0  ;;  %2667 = vmatmul.mubr.bf16.gmra.mxu0 %v4603_v59  ;;  %v3097_v59 = vld [vmem:[%s6757_s3 + $0x28] sm:$0xff]  ;;  %v3098_v41 = vld [vmem:[%s6757_s3 + $0x30] sm:$0xff] }
 0x1ba   :  { %6770 = vst [vmem:[#allocation12_spill] sm:$0xff] %v5667_v18  ;;  %v2155_v34 = vadd.f32 %v5215_v30, %v2154_v26  ;;  %v2443_v35 = vpop.f32.mrf.mxu1  ;;  %4211 = vmatmul.mubr.msk.bf16.gmra.mxu1 %vm1839_vm0, %v4607_v8  ;;  %2674 = vmatprep.mubr.bf16.mxu0 %v4610_v10  ;;  %v3158_v26 = vpack.c.bf16 %v3097_v59, %v3096_v55 }
 0x1bb   :  { %v2156_v37 = vpop.f32.mrf.mxu0  ;;  %4216 = vmatprep.mubr.msk.bf16.mxu1 %vm3203_vm1, %v3156_v16  ;;  %v4613_v16 = vld [vmem:[%s6754_s0 + $0x3cc] ss:$28 sps:$4 sm:$0xff]  }
 0x1bc   :  { %v5678_v48 = vadd.f32 %v2443_v35, %v2155_v34  ;;  %v2445_v53 = vpop.f32.mrf.mxu1 }
 0x1bd   :  { %v2157_v3 = vpop.f32.mrf.mxu0 }
 0x1be   :  { %6771 = vst [vmem:[#allocation13_spill] sm:$0xff] %v5678_v48  ;;  %v2158_v8 = vadd.f32 %v5215_v30, %v2157_v3  ;;  %v2446_v10 = vpop.f32.mrf.mxu1 }
 0x1bf   :  { %v2159_v20 = vpop.f32.mrf.mxu0 }
 0x1c0   :  { %v5693_v34 = vadd.f32 %v2446_v10, %v2158_v8  ;;  %v2448_v35 = vpop.f32.mrf.mxu1  ;;  %v3101_v8 = vld [vmem:[%s6757_s3 + $0x48] sm:$0xff] }
 0x1c1   :  { %v2162_v37 = vpop.f32.mrf.mxu0  ;;  %2675 = vmatmul.mubr.bf16.gmra.mxu0 %v4608_v7  ;;  %v3100_v7 = vld [vmem:[%s6757_s3 + $0x40] sm:$0xff] }
 0x1c2   :  { %6772 = vst [vmem:[#allocation14_spill] sm:$0xff] %v5693_v34  ;;  %v2163_v53 = vadd.f32 %v5215_v30, %v2162_v37  ;;  %v2451_v18 = vpop.f32.mrf.mxu1  ;;  %4217 = vmatmul.mubr.msk.bf16.vlgmr.msra.gmra.mxu1 %vm3203_vm1, %v3157_v11  ;;  %2682 = vmatprep.mubr.bf16.mxu0 %v4613_v16  ;;  %v4611_v11 = vld [vmem:[%s6754_s0 + $0x3c8] ss:$28 sps:$4 sm:$0xff]   ;;  %v3160_v37 = vpack.c.bf16 %v3101_v8, %v3100_v7  ;;  %v3103_v7 = vld [vmem:[%s6757_s3 + $0x58] sm:$0xff] }
 0x1c3   :  { %v2164_v3 = vpop.f32.mrf.mxu0  ;;  %4220 = vmatprep.mubr.msk.bf16.mxu1 %vm3203_vm1, %v3158_v26  ;;  %v3159_v26 = vpack.c.bf16 %v3099_v47, %v3098_v41  ;;  %v3102_v47 = vld [vmem:[%s6757_s3 + $0x50] sm:$0xff] }
 0x1c4   :  { %v5704_v55 = vadd.f32 %v2451_v18, %v2163_v53  ;;  %v2453_v59 = vpop.f32.mrf.mxu1  ;;  %v4616_v18 = vld [vmem:[%s6754_s0 + $0x404] ss:$28 sps:$4 sm:$0xff]  }
 0x1c5   :  { %v2165_v10 = vpop.f32.mrf.mxu0 }
 0x1c6   :  { %6773 = vst [vmem:[#allocation15_spill] sm:$0xff] %v5704_v55  ;;  %v2166_v16 = vadd.f32 %v5215_v30, %v2165_v10  ;;  %v2454_v20 = vpop.f32.mrf.mxu1  ;;  %v5724_v55 = vld [vmem:[%s6756_s2] ss:$0 sm:$0xff] }
 0x1c7   :  { %v2167_v35 = vpop.f32.mrf.mxu0 }
 0x1c8   :  { %v5719_v53 = vadd.f32 %v2454_v20, %v2166_v16  ;;  %v2456_v3 = vpop.f32.mrf.mxu1  ;;  %v3104_v16 = vld [vmem:[%s6757_s3 + $0x60] sm:$0xff]  ;;  %v3105_v20 = vld [vmem:[%s6757_s3 + $0x68] sm:$0xff] }
 0x1c9   :  { %v2170_v59 = vpop.f32.mrf.mxu0  ;;  %2683 = vmatmul.mubr.bf16.gmra.mxu0 %v4611_v11  ;;  %v3161_v3 = vpack.c.bf16 %v3103_v7, %v3102_v47  ;;  %v3106_v47 = vld [vmem:[%s6757_s3 + $0x70] sm:$0xff]  ;;  %v3107_v7 = vld [vmem:[%s6757_s3 + $0x78] sm:$0xff] }
 0x1ca   :  { %6774 = vst [vmem:[#allocation16_spill] sm:$0xff] %v5719_v53  ;;  %v2171_v30 = vadd.f32 %v5724_v55, %v2170_v59  ;;  %v2459_v10 = vpop.f32.mrf.mxu1  ;;  %4221 = vmatmul.mubr.msk.bf16.gmra.mxu1 %vm3203_vm1, %v3159_v26  ;;  %2690 = vmatprep.mubr.bf16.mxu0 %v4616_v18  ;;  %v4614_v18 = vld [vmem:[%s6754_s0 + $0x400] ss:$28 sps:$4 sm:$0xff]  }
 0x1cb   :  { %v2172_v41 = vpop.f32.mrf.mxu0  ;;  %4224 = vmatprep.mubr.msk.bf16.mxu1 %vm3203_vm1, %v3160_v37  ;;  %v4619_v59 = vld [vmem:[%s6754_s0 + $0x43c] ss:$28 sps:$4 sm:$0xff]  }
 0x1cc   :  { %v5735_v8 = vadd.f32 %v2459_v10, %v2171_v30  ;;  %v2461_v11 = vpop.f32.mrf.mxu1  ;;  %v3162_v10 = vpack.c.bf16 %v3105_v20, %v3104_v16 }
 0x1cd   :  { %v2173_v26 = vpop.f32.mrf.mxu0 }
 0x1ce   :  { %6775 = vst [vmem:[#allocation17_spill] sm:$0xff] %v5735_v8  ;;  %v2174_v35 = vadd.f32 %v5724_v55, %v2173_v26  ;;  %v2462_v37 = vpop.f32.mrf.mxu1 }
 0x1cf   :  { %v2175_v30 = vpop.f32.mrf.mxu0 }
 0x1d0   :  { %v5750_v41 = vadd.f32 %v2462_v37, %v2174_v35  ;;  %v2464_v11 = vpop.f32.mrf.mxu1  ;;  %v4617_v37 = vld [vmem:[%s6754_s0 + $0x438] ss:$28 sps:$4 sm:$0xff]   ;;  %v3163_v30 = vpack.c.bf16 %v3107_v7, %v3106_v47 }
 0x1d1   :  { %v2178_v53 = vpop.f32.mrf.mxu0  ;;  %2691 = vmatmul.mubr.bf16.gmra.mxu0 %v4614_v18  ;;  %v3109_v18 = vld [vmem:[%s6757_s3 + $0x88] sm:$0xff]  ;;  %v3110_v47 = vld [vmem:[%s6757_s3 + $0x90] sm:$0xff]  ;;  %v3111_v7 = vld [vmem:[%s6757_s3 + $0x98] sm:$0xff] }
 0x1d2   :  { %6776 = vst [vmem:[#allocation18_spill] sm:$0xff] %v5750_v41  ;;  %v2179_v8 = vadd.f32 %v5724_v55, %v2178_v53  ;;  %v2467_v34 = vpop.f32.mrf.mxu1  ;;  %4225 = vmatmul.mubr.msk.bf16.gmra.mxu1 %vm3203_vm1, %v3161_v3  ;;  %2698 = vmatprep.mubr.bf16.mxu0 %v4619_v59  ;;  %v3108_v53 = vld [vmem:[%s6757_s3 + $0x80] sm:$0xff] }
 0x1d3   :  { %v2180_v26 = vpop.f32.mrf.mxu0  ;;  %4228 = vmatprep.mubr.msk.bf16.mxu1 %vm3203_vm1, %v3162_v10  ;;  %v3164_v10 = vpack.c.bf16 %v3109_v18, %v3108_v53 }
 0x1d4   :  { %v5761_v16 = vadd.f32 %v2467_v34, %v2179_v8  ;;  %v2469_v20 = vpop.f32.mrf.mxu1  ;;  %v4622_v34 = vld [vmem:[%s6754_s0 + $0x474] ss:$28 sps:$4 sm:$0xff]  }
 0x1d5   :  { %v2181_v35 = vpop.f32.mrf.mxu0 }
 0x1d6   :  { %6777 = vst [vmem:[#allocation19_spill] sm:$0xff] %v5761_v16  ;;  %v2182_v3 = vadd.f32 %v5724_v55, %v2181_v35  ;;  %v2470_v59 = vpop.f32.mrf.mxu1 }
 0x1d7   :  { %v2183_v8 = vpop.f32.mrf.mxu0 }
 0x1d8   :  { %v5776_v11 = vadd.f32 %v2470_v59, %v2182_v3  ;;  %v2472_v26 = vpop.f32.mrf.mxu1  ;;  %v3113_v3 = vld [vmem:[%s6757_s3 + $0xa8] sm:$0xff] }
 0x1d9   :  { %v2186_v20 = vpop.f32.mrf.mxu0  ;;  %2699 = vmatmul.mubr.bf16.gmra.mxu0 %v4617_v37  ;;  %v3112_v37 = vld [vmem:[%s6757_s3 + $0xa0] sm:$0xff] }
 0x1da   :  { %6778 = vst [vmem:[#allocation20_spill] sm:$0xff] %v5776_v11  ;;  %v2187_v16 = vadd.f32 %v5724_v55, %v2186_v20  ;;  %v2475_v41 = vpop.f32.mrf.mxu1  ;;  %4229 = vmatmul.mubr.msk.bf16.gmra.mxu1 %vm3203_vm1, %v3163_v30  ;;  %2706 = vmatprep.mubr.bf16.mxu0 %v4622_v34  ;;  %v4620_v30 = vld [vmem:[%s6754_s0 + $0x470] ss:$28 sps:$4 sm:$0xff]   ;;  %v3166_v26 = vpack.c.bf16 %v3113_v3, %v3112_v37 }
 0x1db   :  { %v2188_v35 = vpop.f32.mrf.mxu0  ;;  %4232 = vmatprep.mubr.msk.bf16.mxu1 %vm3203_vm1, %v3164_v10  ;;  %v3165_v10 = vpack.c.bf16 %v3111_v7, %v3110_v47  ;;  %v3114_v47 = vld [vmem:[%s6757_s3 + $0xb0] sm:$0xff]  ;;  %v3115_v7 = vld [vmem:[%s6757_s3 + $0xb8] sm:$0xff] }
 0x1dc   :  { %v5787_v53 = vadd.f32 %v2475_v41, %v2187_v16  ;;  %v2477_v18 = vpop.f32.mrf.mxu1  ;;  %v4625_v41 = vld [vmem:[%s6754_s0 + $0x4ac] ss:$28 sps:$4 sm:$0xff]  }
 0x1dd   :  { %v2189_v59 = vpop.f32.mrf.mxu0 }
 0x1de   :  { %6779 = vst [vmem:[#allocation21_spill] sm:$0xff] %v5787_v53  ;;  %v2190_v34 = vadd.f32 %v5724_v55, %v2189_v59  ;;  %v2478_v8 = vpop.f32.mrf.mxu1 }
 0x1df   :  { %v2191_v16 = vpop.f32.mrf.mxu0 }
 0x1e0   :  { %v5802_v20 = vadd.f32 %v2478_v8, %v2190_v34  ;;  %v2480_v35 = vpop.f32.mrf.mxu1  ;;  %v3117_v34 = vld [vmem:[%s6757_s3 + $0xc8] sm:$0xff] }
 0x1e1   :  { %v2194_v18 = vpop.f32.mrf.mxu0  ;;  %2707 = vmatmul.mubr.bf16.gmra.mxu0 %v4620_v30  ;;  %v3116_v30 = vld [vmem:[%s6757_s3 + $0xc0] sm:$0xff] }
 0x1e2   :  { %6780 = vst [vmem:[#allocation22_spill] sm:$0xff] %v5802_v20  ;;  %v2195_v11 = vadd.f32 %v5724_v55, %v2194_v18  ;;  %v2483_v53 = vpop.f32.mrf.mxu1  ;;  %4233 = vmatmul.mubr.msk.bf16.gmra.mxu1 %vm3203_vm1, %v3165_v10  ;;  %2714 = vmatprep.mubr.bf16.mxu0 %v4625_v41  ;;  %v4623_v10 = vld [vmem:[%s6754_s0 + $0x4a8] ss:$28 sps:$4 sm:$0xff]   ;;  %v3168_v35 = vpack.c.bf16 %v3117_v34, %v3116_v30 }
 0x1e3   :  { %v2196_v59 = vpop.f32.mrf.mxu0  ;;  %4236 = vmatprep.mubr.msk.bf16.mxu1 %vm3203_vm1, %v3166_v26  ;;  %v3167_v26 = vpack.c.bf16 %v3115_v7, %v3114_v47  ;;  %v3118_v47 = vld [vmem:[%s6757_s3 + $0xd0] sm:$0xff]  ;;  %v3119_v7 = vld [vmem:[%s6757_s3 + $0xd8] sm:$0xff] }
 0x1e4   :  { %v5813_v37 = vadd.f32 %v2483_v53, %v2195_v11  ;;  %v2485_v3 = vpop.f32.mrf.mxu1  ;;  %v4628_v11 = vld [vmem:[%s6754_s0 + $0x4e4] ss:$28 sps:$4 sm:$0xff]  }
 0x1e5   :  { %v2197_v8 = vpop.f32.mrf.mxu0 }
 0x1e6   :  { %6781 = vst [vmem:[#allocation23_spill] sm:$0xff] %v5813_v37  ;;  %v2198_v41 = vadd.f32 %v5724_v55, %v2197_v8  ;;  %v2486_v16 = vpop.f32.mrf.mxu1 }
 0x1e7   :  { %v2199_v53 = vpop.f32.mrf.mxu0 }
 0x1e8   :  { %v5828_v18 = vadd.f32 %v2486_v16, %v2198_v41  ;;  %v2488_v59 = vpop.f32.mrf.mxu1  ;;  %v3121_v41 = vld [vmem:[%s6757_s3 + $0xe8] sm:$0xff] }
 0x1e9   :  { %v2202_v3 = vpop.f32.mrf.mxu0  ;;  %2715 = vmatmul.mubr.bf16.gmra.mxu0 %v4623_v10  ;;  %v3120_v10 = vld [vmem:[%s6757_s3 + $0xe0] sm:$0xff] }
 0x1ea   :  { %6782 = vst [vmem:[#allocation24_spill] sm:$0xff] %v5828_v18  ;;  %v2203_v37 = vadd.f32 %v5724_v55, %v2202_v3  ;;  %v2491_v20 = vpop.f32.mrf.mxu1  ;;  %4237 = vmatmul.mubr.msk.bf16.gmra.mxu1 %vm3203_vm1, %v3167_v26  ;;  %2722 = vmatprep.mubr.bf16.mxu0 %v4628_v11  ;;  %v4626_v26 = vld [vmem:[%s6754_s0 + $0x4e0] ss:$28 sps:$4 sm:$0xff]   ;;  %v3170_v59 = vpack.c.bf16 %v3121_v41, %v3120_v10 }
 0x1eb   :  { %v2204_v8 = vpop.f32.mrf.mxu0  ;;  %4240 = vmatprep.mubr.msk.bf16.mxu1 %vm3203_vm1, %v3168_v35  ;;  %v3169_v35 = vpack.c.bf16 %v3119_v7, %v3118_v47  ;;  %v3122_v47 = vld [vmem:[%s6757_s3 + $0xf0] sm:$0xff]  ;;  %v3123_v7 = vld [vmem:[%s6757_s3 + $0xf8] sm:$0xff] }
 0x1ec   :  { %v5839_v30 = vadd.f32 %v2491_v20, %v2203_v37  ;;  %v2493_v34 = vpop.f32.mrf.mxu1  ;;  %v4631_v20 = vld [vmem:[%s6754_s0 + $0x51c] ss:$28 sps:$4 sm:$0xff]  }
 0x1ed   :  { %v2205_v16 = vpop.f32.mrf.mxu0 }
 0x1ee   :  { %6783 = vst [vmem:[#allocation25_spill] sm:$0xff] %v5839_v30  ;;  %v2206_v11 = vadd.f32 %v5724_v55, %v2205_v16  ;;  %v2494_v53 = vpop.f32.mrf.mxu1 }
 0x1ef   :  { %v2207_v37 = vpop.f32.mrf.mxu0 }
 0x1f0   :  { %v5854_v3 = vadd.f32 %v2494_v53, %v2206_v11  ;;  %v2496_v8 = vpop.f32.mrf.mxu1  ;;  %v3125_v11 = vld [vmem:[%s6757_s3 + $0x108] sm:$0xff] }
 0x1f1   :  { %v2210_v34 = vpop.f32.mrf.mxu0  ;;  %2723 = vmatmul.mubr.bf16.gmra.mxu0 %v4626_v26  ;;  %v3124_v26 = vld [vmem:[%s6757_s3 + $0x100] sm:$0xff] }
 0x1f2   :  { %6784 = vst [vmem:[#allocation26_spill] sm:$0xff] %v5854_v3  ;;  %v2211_v18 = vadd.f32 %v5724_v55, %v2210_v34  ;;  %v2499_v30 = vpop.f32.mrf.mxu1  ;;  %4241 = vmatmul.mubr.msk.bf16.gmra.mxu1 %vm3203_vm1, %v3169_v35  ;;  %2730 = vmatprep.mubr.bf16.mxu0 %v4631_v20  ;;  %v4629_v35 = vld [vmem:[%s6754_s0 + $0x518] ss:$28 sps:$4 sm:$0xff]   ;;  %v3172_v8 = vpack.c.bf16 %v3125_v11, %v3124_v26 }
 0x1f3   :  { %v2212_v16 = vpop.f32.mrf.mxu0  ;;  %4244 = vmatprep.mubr.msk.bf16.mxu1 %vm3203_vm1, %v3170_v59  ;;  %v3171_v59 = vpack.c.bf16 %v3123_v7, %v3122_v47  ;;  %v3126_v47 = vld [vmem:[%s6757_s3 + $0x110] sm:$0xff]  ;;  %v3127_v7 = vld [vmem:[%s6757_s3 + $0x118] sm:$0xff] }
 0x1f4   :  { %v5865_v10 = vadd.f32 %v2499_v30, %v2211_v18  ;;  %v2501_v41 = vpop.f32.mrf.mxu1  ;;  %v4634_v18 = vld [vmem:[%s6754_s0 + $0x554] ss:$28 sps:$4 sm:$0xff]  }
 0x1f5   :  { %v2213_v53 = vpop.f32.mrf.mxu0 }
 0x1f6   :  { %6785 = vst [vmem:[#allocation27_spill] sm:$0xff] %v5865_v10  ;;  %v2214_v20 = vadd.f32 %v5724_v55, %v2213_v53  ;;  %v2502_v37 = vpop.f32.mrf.mxu1 }
 0x1f7   :  { %v2215_v30 = vpop.f32.mrf.mxu0 }
 0x1f8   :  { %v5880_v34 = vadd.f32 %v2502_v37, %v2214_v20  ;;  %v2504_v16 = vpop.f32.mrf.mxu1  ;;  %v3129_v20 = vld [vmem:[%s6757_s3 + $0x128] sm:$0xff] }
 0x1f9   :  { %v2218_v41 = vpop.f32.mrf.mxu0  ;;  %2731 = vmatmul.mubr.bf16.gmra.mxu0 %v4629_v35  ;;  %v3128_v35 = vld [vmem:[%s6757_s3 + $0x120] sm:$0xff] }
 0x1fa   :  { %6786 = vst [vmem:[#allocation28_spill] sm:$0xff] %v5880_v34  ;;  %v2219_v10 = vadd.f32 %v5724_v55, %v2218_v41  ;;  %v2507_v3 = vpop.f32.mrf.mxu1  ;;  %4245 = vmatmul.mubr.msk.bf16.gmra.mxu1 %vm3203_vm1, %v3171_v59  ;;  %2738 = vmatprep.mubr.bf16.mxu0 %v4634_v18  ;;  %v4632_v59 = vld [vmem:[%s6754_s0 + $0x550] ss:$28 sps:$4 sm:$0xff]   ;;  %v3174_v16 = vpack.c.bf16 %v3129_v20, %v3128_v35 }
 0x1fb   :  { %v2220_v53 = vpop.f32.mrf.mxu0  ;;  %4248 = vmatprep.mubr.msk.bf16.mxu1 %vm3203_vm1, %v3172_v8  ;;  %v3173_v8 = vpack.c.bf16 %v3127_v7, %v3126_v47  ;;  %v3130_v47 = vld [vmem:[%s6757_s3 + $0x130] sm:$0xff]  ;;  %v3131_v7 = vld [vmem:[%s6757_s3 + $0x138] sm:$0xff]  ;;  %v3133_v20 = vld [vmem:[%s6757_s3 + $0x148] sm:$0xff] }
 0x1fc   :  { %v5891_v26 = vadd.f32 %v2507_v3, %v2219_v10  ;;  %v2509_v11 = vpop.f32.mrf.mxu1  ;;  %v4637_v3 = vld [vmem:[%s6754_s0 + $0x58c] ss:$28 sps:$4 sm:$0xff]  }
 0x1fd   :  { %v2221_v37 = vpop.f32.mrf.mxu0 }
 0x1fe   :  { %6787 = vst [vmem:[#allocation29_spill] sm:$0xff] %v5891_v26  ;;  %v2222_v18 = vadd.f32 %v5724_v55, %v2221_v37  ;;  %v2510_v30 = vpop.f32.mrf.mxu1 }
 0x1ff   :  { %v2223_v10 = vpop.f32.mrf.mxu0 }
 0x200   :  { %v5906_v41 = vadd.f32 %v2510_v30, %v2222_v18  ;;  %v2512_v53 = vpop.f32.mrf.mxu1  ;;  %v4635_v18 = vld [vmem:[%s6754_s0 + $0x588] ss:$28 sps:$4 sm:$0xff]  }
 0x201   :  { %v2548_v11 = vpop.f32.mrf.mxu0  ;;  %2739 = vmatmul.mubr.bf16.gmra.mxu0 %v4632_v59  ;;  %v4640_v10 = vld [vmem:[%s6754_s0 + $0x5c4] ss:$28 sps:$4 sm:$0xff]  }
 0x202   :  { %6788 = vst [vmem:[#allocation30_spill] sm:$0xff] %v5906_v41  ;;  %v2549_v34 = vadd.f32 %v2548_v11, %v5221_v36  ;;  %v4152_v26 = vpop.f32.mrf.mxu1  ;;  %4249 = vmatmul.mubr.msk.bf16.gmra.mxu1 %vm3203_vm1, %v3173_v8  ;;  %2746 = vmatprep.mubr.bf16.mxu0 %v4637_v3  ;;  %v3132_v36 = vld [vmem:[%s6757_s3 + $0x140] sm:$0xff]  ;;  %v3175_v3 = vpack.c.bf16 %v3131_v7, %v3130_v47  ;;  %v3134_v47 = vld [vmem:[%s6757_s3 + $0x150] sm:$0xff]  ;;  %v3135_v7 = vld [vmem:[%s6757_s3 + $0x158] sm:$0xff] }
 0x203   :  { %v2550_v55 = vpop.f32.mrf.mxu0  ;;  %4252 = vmatprep.mubr.msk.bf16.mxu1 %vm3203_vm1, %v3174_v16  ;;  %v3176_v53 = vpack.c.bf16 %v3133_v20, %v3132_v36 }
 0x204   :  { %v2837_v35 = vpop.f32.mrf.mxu1 }
 0x205   :  { %v5923_v37 = vadd.f32 %v2837_v35, %v2549_v34  ;;  %v2551_v59 = vpop.f32.mrf.mxu0 }
 0x206   :  { %v2552_v30 = vadd.f32 %v2551_v59, %v5236_v46  ;;  %v4153_v8 = vpop.f32.mrf.mxu1  ;;  %v3137_v59 = vld [vmem:[%s6757_s3 + $0x168] sm:$0xff] }
 0x207   :  { %v2553_v16 = vpop.f32.mrf.mxu0 }
 0x208   :  { %v2840_v11 = vpop.f32.mrf.mxu1  ;;  %v3177_v16 = vpack.c.bf16 %v3135_v7, %v3134_v47  ;;  %v3138_v47 = vld [vmem:[%s6757_s3 + $0x170] sm:$0xff] }
 0x209   :  { %v5932_v55 = vadd.f32 %v2840_v11, %v2552_v30  ;;  %v2556_v34 = vpop.f32.mrf.mxu0  ;;  %2747 = vmatmul.mubr.bf16.gmra.mxu0 %v4635_v18  ;;  %v4638_v30 = vld [vmem:[%s6754_s0 + $0x5c0] ss:$28 sps:$4 sm:$0xff]  }
 0x20a   :  { %v2557_v35 = vadd.f32 %v2556_v34, %v5239_v0  ;;  %v4156_v41 = vpop.f32.mrf.mxu1  ;;  %4253 = vmatmul.mubr.msk.bf16.gmra.mxu1 %vm3203_vm1, %v3175_v3  ;;  %2754 = vmatprep.mubr.bf16.mxu0 %v4640_v10  ;;  %v3136_v0 = vld [vmem:[%s6757_s3 + $0x160] sm:$0xff] }
 0x20b   :  { %v2558_v46 = vpop.f32.mrf.mxu0  ;;  %4256 = vmatprep.mubr.msk.bf16.mxu1 %vm3203_vm1, %v3176_v53  ;;  %v3178_v11 = vpack.c.bf16 %v3137_v59, %v3136_v0  ;;  %v3141_v59 = vld [vmem:[%s6757_s3 + $0x188] sm:$0xff] }
 0x20c   :  { %v5943_v36 = vadd.f32 %v4152_v26, %v2557_v35  ;;  %v2853_v20 = vpop.f32.mrf.mxu1  ;;  %v4643_v26 = vld [vmem:[%s6754_s0 + $0x5fc] ss:$28 sps:$4 sm:$0xff]  }
 0x20d   :  { %v2559_v18 = vpop.f32.mrf.mxu0 }
 0x20e   :  { %v2560_v3 = vadd.f32 %v2559_v18, %v5254_v61  ;;  %v4157_v10 = vpop.f32.mrf.mxu1 }
 0x20f   :  { %v2561_v53 = vpop.f32.mrf.mxu0 }
 0x210   :  { %v5958_v34 = vadd.f32 %v4153_v8, %v2560_v3  ;;  %v2856_v35 = vpop.f32.mrf.mxu1  ;;  %v3139_v8 = vld [vmem:[%s6757_s3 + $0x178] sm:$0xff] }
 0x211   :  { %v2564_v46 = vpop.f32.mrf.mxu0  ;;  %2755 = vmatmul.mubr.bf16.gmra.mxu0 %v4638_v30  ;;  %v4641_v30 = vld [vmem:[%s6754_s0 + $0x5f8] ss:$28 sps:$4 sm:$0xff]  }
 0x212   :  { %v2565_v43 = vadd.f32 %v2564_v46, %v5257_v5  ;;  %v5961_v48 = vpop.f32.mrf.mxu1  ;;  %4257 = vmatmul.mubr.msk.bf16.gmra.mxu1 %vm3203_vm1, %v3177_v16  ;;  %2762 = vmatprep.mubr.bf16.mxu0 %v4643_v26  ;;  %v3140_v5 = vld [vmem:[%s6757_s3 + $0x180] sm:$0xff] }
 0x213   :  { %v2566_v61 = vpop.f32.mrf.mxu0  ;;  %4260 = vmatprep.mubr.msk.bf16.mxu1 %vm3203_vm1, %v3178_v11  ;;  %v3180_v53 = vpack.c.bf16 %v3141_v59, %v3140_v5  ;;  %v3145_v59 = vld [vmem:[%s6757_s3 + $0x1a8] sm:$0xff] }
 0x214   :  { %v5971_v7 = vadd.f32 %v2853_v20, %v2565_v43  ;;  %v2869_v0 = vpop.f32.mrf.mxu1  ;;  %v3179_v43 = vpack.c.bf16 %v3139_v8, %v3138_v47  ;;  %v4646_v20 = vld [vmem:[%s6754_s0 + $0x634] ss:$28 sps:$4 sm:$0xff]  }
 0x215   :  { %v2567_v18 = vpop.f32.mrf.mxu0  ;;  %v3142_v47 = vld [vmem:[%s6757_s3 + $0x190] sm:$0xff] }
 0x216   :  { %v2568_v3 = vadd.f32 %v2567_v18, %v5272_v15  ;;  %v5983_v16 = vpop.f32.mrf.mxu1 }
 0x217   :  { %v2569_v26 = vpop.f32.mrf.mxu0 }
 0x218   :  { %v5988_v11 = vadd.f32 %v2856_v35, %v2568_v3  ;;  %v2872_v46 = vpop.f32.mrf.mxu1  ;;  %v3143_v35 = vld [vmem:[%s6757_s3 + $0x198] sm:$0xff] }
 0x219   :  { %v2572_v61 = vpop.f32.mrf.mxu0  ;;  %2763 = vmatmul.mubr.bf16.gmra.mxu0 %v4641_v30  ;;  %v4644_v30 = vld [vmem:[%s6754_s0 + $0x630] ss:$28 sps:$4 sm:$0xff]  }
 0x21a   :  { %v2573_v42 = vadd.f32 %v2572_v61, %v5275_v21  ;;  %v5991_v25 = vpop.f32.mrf.mxu1  ;;  %4261 = vmatmul.mubr.msk.bf16.gmra.mxu1 %vm3203_vm1, %v3179_v43  ;;  %2770 = vmatprep.mubr.bf16.mxu0 %v4646_v20  ;;  %v3144_v21 = vld [vmem:[%s6757_s3 + $0x1a0] sm:$0xff] }
 0x21b   :  { %v2574_v15 = vpop.f32.mrf.mxu0  ;;  %4264 = vmatprep.mubr.msk.bf16.mxu1 %vm3203_vm1, %v3180_v53  ;;  %v3182_v26 = vpack.c.bf16 %v3145_v59, %v3144_v21  ;;  %v3149_v59 = vld [vmem:[%s6757_s3 + $0x1c8] sm:$0xff] }
 0x21c   :  { %v6001_v8 = vadd.f32 %v4156_v41, %v2573_v42  ;;  %v6003_v5 = vpop.f32.mrf.mxu1  ;;  %v3181_v42 = vpack.c.bf16 %v3143_v35, %v3142_v47  ;;  %v4649_v41 = vld [vmem:[%s6754_s0 + $0x66c] ss:$28 sps:$4 sm:$0xff]   ;;  %v3146_v47 = vld [vmem:[%s6757_s3 + $0x1b0] sm:$0xff] }
 0x21d   :  { %v2575_v18 = vpop.f32.mrf.mxu0 }
 0x21e   :  { %v2576_v3 = vadd.f32 %v2575_v18, %v5290_v32  ;;  %v6015_v43 = vpop.f32.mrf.mxu1 }
 0x21f   :  { %v2577_v20 = vpop.f32.mrf.mxu0 }
 0x220   :  { %v6020_v53 = vadd.f32 %v4157_v10, %v2576_v3  ;;  %v6022_v61 = vpop.f32.mrf.mxu1  ;;  %v3147_v10 = vld [vmem:[%s6757_s3 + $0x1b8] sm:$0xff] }
 0x221   :  { %v2580_v15 = vpop.f32.mrf.mxu0  ;;  %2771 = vmatmul.mubr.bf16.gmra.mxu0 %v4644_v30  ;;  %v4647_v30 = vld [vmem:[%s6754_s0 + $0x668] ss:$28 sps:$4 sm:$0xff]  }
 0x222   :  { %v2581_v13 = vadd.f32 %v2580_v15, %v5293_v39  ;;  %v6025_v58 = vpop.f32.mrf.mxu1  ;;  %4265 = vmatmul.mubr.msk.bf16.gmra.mxu1 %vm3203_vm1, %v3181_v42  ;;  %2778 = vmatprep.mubr.bf16.mxu0 %v4649_v41  ;;  %v3148_v39 = vld [vmem:[%s6757_s3 + $0x1c0] sm:$0xff] }
 0x223   :  { %v2582_v32 = vpop.f32.mrf.mxu0  ;;  %4268 = vmatprep.mubr.msk.bf16.mxu1 %vm3203_vm1, %v3182_v26  ;;  %v3184_v20 = vpack.c.bf16 %v3149_v59, %v3148_v39  ;;  %v3152_v39 = vld [vmem:[%s6757_s3 + $0x1e0] sm:$0xff]  ;;  %v3153_v59 = vld [vmem:[%s6757_s3 + $0x1e8] sm:$0xff] }
 0x224   :  { %v6035_v35 = vadd.f32 %v2869_v0, %v2581_v13  ;;  %v6037_v21 = vpop.f32.mrf.mxu1  ;;  %v3183_v13 = vpack.c.bf16 %v3147_v10, %v3146_v47  ;;  %v4652_v0 = vld [vmem:[%s6754_s0 + $0x6a4] ss:$28 sps:$4 sm:$0xff]   ;;  %v3150_v47 = vld [vmem:[%s6757_s3 + $0x1d0] sm:$0xff] }
 0x225   :  { %v2583_v18 = vpop.f32.mrf.mxu0 }
 0x226   :  { %v2584_v3 = vadd.f32 %v2583_v18, %v5308_v50  ;;  %v6049_v42 = vpop.f32.mrf.mxu1 }
 0x227   :  { %v2585_v41 = vpop.f32.mrf.mxu0 }
 0x228   :  { %v6054_v26 = vadd.f32 %v2872_v46, %v2584_v3  ;;  %v6056_v15 = vpop.f32.mrf.mxu1  ;;  %v3151_v46 = vld [vmem:[%s6757_s3 + $0x1d8] sm:$0xff]  ;;  %v3186_v41 = vpack.c.bf16 %v3153_v59, %v3152_v39 }
 0x229   :  { %v2588_v32 = vpop.f32.mrf.mxu0  ;;  %2779 = vmatmul.mubr.bf16.gmra.mxu0 %v4647_v30  ;;  %v4650_v30 = vld [vmem:[%s6754_s0 + $0x6a0] ss:$28 sps:$4 sm:$0xff]   ;;  %v4653_v59 = vld [vmem:[%s6754_s0 + $0x6d8] ss:$28 sps:$4 sm:$0xff]  }
 0x22a   :  { %v2589_v23 = vadd.f32 %v2588_v32, %v5311_v56  ;;  %v6059_v60 = vpop.f32.mrf.mxu1  ;;  %4269 = vmatmul.mubr.msk.bf16.gmra.mxu1 %vm3203_vm1, %v3183_v13  ;;  %2786 = vmatprep.mubr.bf16.mxu0 %v4652_v0 }
 0x22b   :  { %v2590_v50 = vpop.f32.mrf.mxu0  ;;  %4272 = vmatprep.mubr.msk.bf16.mxu1 %vm3203_vm1, %v3184_v20 }
 0x22c   :  { %v6070_v10 = vadd.f32 %v5961_v48, %v2589_v23  ;;  %v6072_v56 = vpop.f32.mrf.mxu1  ;;  %v3185_v23 = vpack.c.bf16 %v3151_v46, %v3150_v47  ;;  %v4655_v48 = vld [vmem:[%s6754_s0 + $0x6dc] ss:$28 sps:$4 sm:$0xff]   ;;  %v3154_v47 = vld [vmem:[%s6757_s3 + $0x1f0] sm:$0xff] }
 0x22d   :  { %v2591_v18 = vpop.f32.mrf.mxu0 }
 0x22e   :  { %v2592_v3 = vadd.f32 %v2591_v18, %v5326_v6  ;;  %v6084_v13 = vpop.f32.mrf.mxu1 }
 0x22f   :  { %v2593_v0 = vpop.f32.mrf.mxu0 }
 0x230   :  { %v6090_v20 = vadd.f32 %v5983_v16, %v2592_v3  ;;  %v6092_v32 = vpop.f32.mrf.mxu1  ;;  %v3155_v16 = vld [vmem:[%s6757_s3 + $0x1f8] sm:$0xff] }
 0x231   :  { %v2596_v50 = vpop.f32.mrf.mxu0  ;;  %2787 = vmatmul.mubr.bf16.gmra.mxu0 %v4650_v30  ;;  %v3187_v3 = vpack.c.bf16 %v3155_v16, %v3154_v47 }
 0x232   :  { %v2597_v63 = vadd.f32 %v2596_v50, %v5329_v12  ;;  %v6095_v38 = vpop.f32.mrf.mxu1  ;;  %4273 = vmatmul.mubr.msk.bf16.gmra.mxu1 %vm3203_vm1, %v3185_v23  ;;  %2794 = vmatprep.mubr.bf16.mxu0 %v4655_v48 }
 0x233   :  { %v2598_v6 = vpop.f32.mrf.mxu0  ;;  %4276 = vmatprep.mubr.msk.bf16.mxu1 %vm3203_vm1, %v3186_v41 }
 0x234   :  { %v6106_v46 = vadd.f32 %v6003_v5, %v2597_v63  ;;  %v6108_v12 = vpop.f32.mrf.mxu1 }
 0x235   :  { %v2599_v39 = vpop.f32.mrf.mxu0 }
 0x236   :  { %v2600_v18 = vadd.f32 %v2599_v39, %v5344_v24  ;;  %v6114_v30 = vpop.f32.mrf.mxu1 }
 0x237   :  { %v2601_v23 = vpop.f32.mrf.mxu0 }
 0x238   :  { %v6117_v48 = vadd.f32 %v6022_v61, %v2600_v18  ;;  %v6119_v0 = vpop.f32.mrf.mxu1 }
 0x239   :  { %v2604_v63 = vpop.f32.mrf.mxu0  ;;  %2795 = vmatmul.mubr.bf16.gmra.mxu0 %v4653_v59 }
 0x23a   :  { %v2605_v5 = vadd.f32 %v2604_v63, %v5348_v31  ;;  %v6122_v41 = vpop.f32.mrf.mxu1  ;;  %4277 = vmatmul.mubr.msk.bf16.gmra.mxu1 %vm3203_vm1, %v3187_v3 }
 0x23b   :  { %v2606_v50 = vpop.f32.mrf.mxu0 }
 0x23c   :  { %v6126_v24 = vadd.f32 %v5991_v25, %v2605_v5  ;;  %v6128_v6 = vpop.f32.mrf.mxu1 }
 0x23d   :  { %v2607_v47 = vpop.f32.mrf.mxu0 }
 0x23e   :  { %v2608_v61 = vadd.f32 %v2607_v47, %v5363_v44  ;;  %v6131_v16 = vpop.f32.mrf.mxu1 }
 0x23f   :  { %v2609_v39 = vpop.f32.mrf.mxu0 }
 0x240   :  { %v6134_v59 = vadd.f32 %v6015_v43, %v2608_v61  ;;  %v6136_v31 = vpop.f32.mrf.mxu1 }
 0x241   :  { %v2612_v18 = vpop.f32.mrf.mxu0 }
 0x242   :  { %v2613_v3 = vadd.f32 %v2612_v18, %v5369_v52  ;;  %v6139_v23 = vpop.f32.mrf.mxu1 }
 0x243   :  { %v2614_v25 = vpop.f32.mrf.mxu0 }
 0x244   :  { %v6142_v63 = vadd.f32 %v6037_v21, %v2613_v3  ;;  %v6144_v5 = vpop.f32.mrf.mxu1 }
 0x245   :  { %v2615_v44 = vpop.f32.mrf.mxu0 }
 0x246   :  { %v2616_v50 = vadd.f32 %v2615_v44, %v5384_v1  ;;  %v6147_v47 = vpop.f32.mrf.mxu1 }
 0x247   :  { %6789 = vst [vmem:[#allocation31_spill] sm:$0xff] %v6147_v47  ;;  %v2617_v43 = vpop.f32.mrf.mxu0 }
 0x248   :  { %v6150_v61 = vadd.f32 %v6056_v15, %v2616_v50  ;;  %v6152_v39 = vpop.f32.mrf.mxu1 }
 0x249   :  { %v2620_v52 = vpop.f32.mrf.mxu0 }
 0x24a   :  { %v2621_v18 = vadd.f32 %v2620_v52, %v5389_v9  ;;  %v6155_v25 = vpop.f32.mrf.mxu1 }
 0x24b   :  { %v2622_v21 = vpop.f32.mrf.mxu0 }
 0x24c   :  { %v6158_v3 = vadd.f32 %v6025_v58, %v2621_v18  ;;  %v6160_v51 = vpop.f32.mrf.mxu1 }
 0x24d   :  { %6790 = vst [vmem:[#allocation32_spill] sm:$0xff] %v6160_v51  ;;  %v2623_v1 = vpop.f32.mrf.mxu0 }
 0x24e   :  { %v2624_v44 = vadd.f32 %v2623_v1, %v5404_v22  ;;  %v6163_v43 = vpop.f32.mrf.mxu1 }
 0x24f   :  { %v2625_v15 = vpop.f32.mrf.mxu0 }
 0x250   :  { %v6166_v50 = vadd.f32 %v6049_v42, %v2624_v44  ;;  %v6168_v47 = vpop.f32.mrf.mxu1 }
 0x251   :  { %6791 = vst [vmem:[#allocation33_spill] sm:$0xff] %v6168_v47  ;;  %v2628_v9 = vpop.f32.mrf.mxu0 }
 0x252   :  { %v2629_v52 = vadd.f32 %v2628_v9, %v5409_v29  ;;  %v6171_v21 = vpop.f32.mrf.mxu1 }
 0x253   :  { %v2630_v58 = vpop.f32.mrf.mxu0 }
 0x254   :  { %v6174_v18 = vadd.f32 %v6072_v56, %v2629_v52  ;;  %v6176_v51 = vpop.f32.mrf.mxu1 }
 0x255   :  { %6792 = vst [vmem:[#allocation34_spill] sm:$0xff] %v6176_v51  ;;  %v2631_v22 = vpop.f32.mrf.mxu0 }
 0x256   :  { %v2632_v1 = vadd.f32 %v2631_v22, %v5424_v45  ;;  %v6179_v15 = vpop.f32.mrf.mxu1 }
 0x257   :  { %v2633_v42 = vpop.f32.mrf.mxu0 }
 0x258   :  { %v6182_v44 = vadd.f32 %v6092_v32, %v2632_v1  ;;  %v6184_v47 = vpop.f32.mrf.mxu1 }
 0x259   :  { %6793 = vst [vmem:[#allocation35_spill] sm:$0xff] %v6184_v47  ;;  %v2636_v29 = vpop.f32.mrf.mxu0 }
 0x25a   :  { %v2637_v9 = vadd.f32 %v2636_v29, %v5429_v54  ;;  %v6187_v58 = vpop.f32.mrf.mxu1 }
 0x25b   :  { %v2638_v56 = vpop.f32.mrf.mxu0 }
 0x25c   :  { %v6190_v52 = vadd.f32 %v6059_v60, %v2637_v9  ;;  %v6192_v51 = vpop.f32.mrf.mxu1 }
 0x25d   :  { %6794 = vst [vmem:[#allocation36_spill] sm:$0xff] %v6192_v51  ;;  %v2639_v45 = vpop.f32.mrf.mxu0 }
 0x25e   :  { %v2640_v22 = vadd.f32 %v2639_v45, %v5444_v4  ;;  %v6195_v42 = vpop.f32.mrf.mxu1 }
 0x25f   :  { %v2641_v32 = vpop.f32.mrf.mxu0 }
 0x260   :  { %v6198_v1 = vadd.f32 %v6084_v13, %v2640_v22  ;;  %v6200_v47 = vpop.f32.mrf.mxu1 }
 0x261   :  { %6795 = vst [vmem:[#allocation37_spill] sm:$0xff] %v6200_v47  ;;  %v2644_v54 = vpop.f32.mrf.mxu0 }
 0x262   :  { %v2645_v29 = vadd.f32 %v2644_v54, %v5449_v14  ;;  %v6203_v56 = vpop.f32.mrf.mxu1 }
 0x263   :  { %v2646_v60 = vpop.f32.mrf.mxu0 }
 0x264   :  { %v6206_v9 = vadd.f32 %v6108_v12, %v2645_v29  ;;  %v6208_v51 = vpop.f32.mrf.mxu1 }
 0x265   :  { %6796 = vst [vmem:[#allocation38_spill] sm:$0xff] %v6208_v51  ;;  %v2647_v4 = vpop.f32.mrf.mxu0 }
 0x266   :  { %v2648_v45 = vadd.f32 %v2647_v4, %v5464_v28  ;;  %v6211_v32 = vpop.f32.mrf.mxu1 }
 0x267   :  { %v2649_v13 = vpop.f32.mrf.mxu0 }
 0x268   :  { %v6214_v22 = vadd.f32 %v6119_v0, %v2648_v45  ;;  %v6216_v47 = vpop.f32.mrf.mxu1 }
 0x269   :  { %6797 = vst [vmem:[#allocation39_spill] sm:$0xff] %v6216_v47  ;;  %v2652_v14 = vpop.f32.mrf.mxu0 }
 0x26a   :  { %v2653_v54 = vadd.f32 %v2652_v14, %v5469_v40  ;;  %v6219_v60 = vpop.f32.mrf.mxu1 }
 0x26b   :  { %v2654_v12 = vpop.f32.mrf.mxu0 }
 0x26c   :  { %v6222_v29 = vadd.f32 %v6095_v38, %v2653_v54  ;;  %v6224_v51 = vpop.f32.mrf.mxu1 }
 0x26d   :  { %6798 = vst [vmem:[#allocation40_spill] sm:$0xff] %v6224_v51  ;;  %v2655_v28 = vpop.f32.mrf.mxu0 }
 0x26e   :  { %v2656_v4 = vadd.f32 %v2655_v28, %v5484_v57  ;;  %v6227_v13 = vpop.f32.mrf.mxu1 }
 0x26f   :  { %v2657_v0 = vpop.f32.mrf.mxu0 }
 0x270   :  { %v6230_v45 = vadd.f32 %v6114_v30, %v2656_v4  ;;  %v6232_v47 = vpop.f32.mrf.mxu1 }
 0x271   :  { %6799 = vst [vmem:[#allocation41_spill] sm:$0xff] %v6232_v47  ;;  %v2660_v40 = vpop.f32.mrf.mxu0 }
 0x272   :  { %v2661_v14 = vadd.f32 %v2660_v40, %v5489_v2  ;;  %v6235_v12 = vpop.f32.mrf.mxu1 }
 0x273   :  { %v2662_v38 = vpop.f32.mrf.mxu0 }
 0x274   :  { %v6238_v54 = vadd.f32 %v6128_v6, %v2661_v14  ;;  %v6240_v51 = vpop.f32.mrf.mxu1 }
 0x275   :  { %6800 = vst [vmem:[#allocation42_spill] sm:$0xff] %v6240_v51  ;;  %v2663_v57 = vpop.f32.mrf.mxu0 }
 0x276   :  { %v2664_v28 = vadd.f32 %v2663_v57, %v5504_v19  ;;  %v6243_v0 = vpop.f32.mrf.mxu1 }
 0x277   :  { %v2665_v30 = vpop.f32.mrf.mxu0 }
 0x278   :  { %v6246_v4 = vadd.f32 %v6136_v31, %v2664_v28  ;;  %v6248_v47 = vpop.f32.mrf.mxu1 }
 0x279   :  { %6801 = vst [vmem:[#allocation43_spill] sm:$0xff] %v6248_v47  ;;  %v2668_v2 = vpop.f32.mrf.mxu0 }
 0x27a   :  { %v2669_v40 = vadd.f32 %v2668_v2, %v5509_v33  ;;  %v6251_v38 = vpop.f32.mrf.mxu1  ;;  %v6269_v33 = vld [vmem:[%s6758_s5] ss:$0 sm:$0xff] }
 0x27b   :  { %v2670_v6 = vpop.f32.mrf.mxu0 }
 0x27c   :  { %v6254_v14 = vadd.f32 %v6122_v41, %v2669_v40  ;;  %v6256_v51 = vpop.f32.mrf.mxu1 }
 0x27d   :  { %6802 = vst [vmem:[#allocation44_spill] sm:$0xff] %v6256_v51  ;;  %v2671_v19 = vpop.f32.mrf.mxu0 }
 0x27e   :  { %v2672_v57 = vadd.f32 %v2671_v19, %v5524_v49  ;;  %v6259_v30 = vpop.f32.mrf.mxu1 }
 0x27f   :  { %6803 = vst [vmem:[#allocation45_spill] sm:$0xff] %v6259_v30  ;;  %v2673_v31 = vpop.f32.mrf.mxu0 }
 0x280   :  { %v6262_v28 = vadd.f32 %v6131_v16, %v2672_v57  ;;  %v6264_v47 = vpop.f32.mrf.mxu1 }
 0x281   :  { %6804 = vst [vmem:[#allocation46_spill] sm:$0xff] %v6264_v47  ;;  %v2676_v41 = vpop.f32.mrf.mxu0 }
 0x282   :  { %v2677_v2 = vadd.f32 %v2676_v41, %v5529_v62  ;;  %v4218_v40 = vpop.f32.mrf.mxu1 }
 0x283   :  { %v3343_v6 = vadd.f32 %v4218_v40, %v6269_v33  ;;  %v2678_v49 = vpop.f32.mrf.mxu0 }
 0x284   :  { %v6274_v19 = vadd.f32 %v6144_v5, %v2677_v2  ;;  %v3334_v16 = vpop.f32.mrf.mxu1 }
 0x285   :  { %v3591_v57 = vadd.f32 %v3343_v6, %v5943_v36  ;;  %v3335_v31 = vadd.f32 %v6269_v33, %v3334_v16  ;;  %v2679_v47 = vpop.f32.mrf.mxu0 }
 0x286   :  { %v2680_v30 = vadd.f32 %v2679_v47, %v5544_v17  ;;  %v4219_v51 = vpop.f32.mrf.mxu1 }
 0x287   :  { %3656 = vst.msk [vmem:[%s6759_s6 + $0x10] sm:$0xff] %vm3653_vm2, %v3591_v57  ;;  %v3589_v62 = vadd.f32 %v3335_v31, %v5923_v37  ;;  %v3346_v5 = vadd.f32 %v4219_v51, %v6269_v33  ;;  %v2681_v41 = vpop.f32.mrf.mxu0 }
 0x288   :  { %v6286_v2 = vadd.f32 %v6152_v39, %v2680_v30  ;;  %v3337_v36 = vpop.f32.mrf.mxu1 }
 0x289   :  { %3654 = vst.msk [vmem:[%s6759_s6] sm:$0xff] %vm3653_vm2, %v3589_v62  ;;  %v3592_v17 = vadd.f32 %v3346_v5, %v5958_v34  ;;  %v3338_v47 = vadd.f32 %v6269_v33, %v3337_v36  ;;  %v6294_v40 = vpop.f32.mrf.mxu0 }
 0x28a   :  { %v4222_v6 = vpop.f32.mrf.mxu1 }
 0x28b   :  { %3657 = vst.msk [vmem:[%s6759_s6 + $0x18] sm:$0xff] %vm3653_vm2, %v3592_v17  ;;  %v3590_v51 = vadd.f32 %v3338_v47, %v5932_v55  ;;  %v3359_v37 = vadd.f32 %v4222_v6, %v6269_v33  ;;  %v2686_v39 = vpop.f32.mrf.mxu0 }
 0x28c   :  { %v3350_v30 = vpop.f32.mrf.mxu1 }
 0x28d   :  { %3655 = vst.msk [vmem:[%s6759_s6 + $0x8] sm:$0xff] %vm3653_vm2, %v3590_v51  ;;  %v3595_v34 = vadd.f32 %v3359_v37, %v6001_v8  ;;  %v3351_v49 = vadd.f32 %v6269_v33, %v3350_v30  ;;  %v6308_v16 = vpop.f32.mrf.mxu0 }
 0x28e   :  { %v4223_v57 = vpop.f32.mrf.mxu1 }
 0x28f   :  { %3660 = vst.msk [vmem:[%s6759_s6 + $0x30] sm:$0xff] %vm3653_vm2, %v3595_v34  ;;  %v3593_v55 = vadd.f32 %v3351_v49, %v5971_v7  ;;  %v3362_v31 = vadd.f32 %v4223_v57, %v6269_v33  ;;  %v2689_v62 = vpop.f32.mrf.mxu0 }
 0x290   :  { %v3353_v5 = vpop.f32.mrf.mxu1 }
 0x291   :  { %3658 = vst.msk [vmem:[%s6759_s6 + $0x20] sm:$0xff] %vm3653_vm2, %v3593_v55  ;;  %v3596_v8 = vadd.f32 %v3362_v31, %v6020_v53  ;;  %v3354_v41 = vadd.f32 %v6269_v33, %v3353_v5  ;;  %v6322_v36 = vpop.f32.mrf.mxu0 }
 0x292   :  { %v4226_v17 = vpop.f32.mrf.mxu1 }
 0x293   :  { %3661 = vst.msk [vmem:[%s6759_s6 + $0x38] sm:$0xff] %vm3653_vm2, %v3596_v8  ;;  %v3594_v7 = vadd.f32 %v3354_v41, %v5988_v11  ;;  %v3375_v47 = vadd.f32 %v4226_v17, %v6269_v33  ;;  %v2694_v6 = vpop.f32.mrf.mxu0 }
 0x294   :  { %v3366_v51 = vpop.f32.mrf.mxu1 }
 0x295   :  { %3659 = vst.msk [vmem:[%s6759_s6 + $0x28] sm:$0xff] %vm3653_vm2, %v3594_v7  ;;  %v3599_v53 = vadd.f32 %v3375_v47, %v6070_v10  ;;  %v3367_v37 = vadd.f32 %v6269_v33, %v3366_v51  ;;  %v6336_v39 = vpop.f32.mrf.mxu0 }
 0x296   :  { %v4227_v30 = vpop.f32.mrf.mxu1 }
 0x297   :  { %3664 = vst.msk [vmem:[%s6759_s6 + $0x50] sm:$0xff] %vm3653_vm2, %v3599_v53  ;;  %v3597_v11 = vadd.f32 %v3367_v37, %v6035_v35  ;;  %v3378_v34 = vadd.f32 %v4227_v30, %v6269_v33  ;;  %v2697_v49 = vpop.f32.mrf.mxu0 }
 0x298   :  { %v3369_v57 = vpop.f32.mrf.mxu1 }
 0x299   :  { %3662 = vst.msk [vmem:[%s6759_s6 + $0x40] sm:$0xff] %vm3653_vm2, %v3597_v11  ;;  %v3600_v10 = vadd.f32 %v3378_v34, %v6090_v20  ;;  %v3370_v55 = vadd.f32 %v6269_v33, %v3369_v57  ;;  %v6350_v31 = vpop.f32.mrf.mxu0 }
 0x29a   :  { %v4230_v62 = vpop.f32.mrf.mxu1 }
 0x29b   :  { %3665 = vst.msk [vmem:[%s6759_s6 + $0x58] sm:$0xff] %vm3653_vm2, %v3600_v10  ;;  %v3598_v35 = vadd.f32 %v3370_v55, %v6054_v26  ;;  %v3391_v5 = vadd.f32 %v4230_v62, %v6269_v33  ;;  %v2702_v8 = vpop.f32.mrf.mxu0 }
 0x29c   :  { %v3382_v41 = vpop.f32.mrf.mxu1 }
 0x29d   :  { %3663 = vst.msk [vmem:[%s6759_s6 + $0x48] sm:$0xff] %vm3653_vm2, %v3598_v35  ;;  %v3603_v20 = vadd.f32 %v3391_v5, %v6126_v24  ;;  %v3383_v17 = vadd.f32 %v6269_v33, %v3382_v41  ;;  %v6364_v7 = vpop.f32.mrf.mxu0 }
 0x29e   :  { %v4231_v47 = vpop.f32.mrf.mxu1 }
 0x29f   :  { %3668 = vst.msk [vmem:[%s6759_s6 + $0x70] sm:$0xff] %vm3653_vm2, %v3603_v20  ;;  %v3601_v26 = vadd.f32 %v3383_v17, %v6106_v46  ;;  %v3394_v6 = vadd.f32 %v4231_v47, %v6269_v33  ;;  %v2705_v51 = vpop.f32.mrf.mxu0 }
 0x2a0   :  { %v3385_v53 = vpop.f32.mrf.mxu1 }
 0x2a1   :  { %3666 = vst.msk [vmem:[%s6759_s6 + $0x60] sm:$0xff] %vm3653_vm2, %v3601_v26  ;;  %v3604_v24 = vadd.f32 %v3394_v6, %v6134_v59  ;;  %v3386_v37 = vadd.f32 %v6269_v33, %v3385_v53  ;;  %v6378_v30 = vpop.f32.mrf.mxu0 }
 0x2a2   :  { %v4234_v11 = vpop.f32.mrf.mxu1 }
 0x2a3   :  { %3669 = vst.msk [vmem:[%s6759_s6 + $0x78] sm:$0xff] %vm3653_vm2, %v3604_v24  ;;  %v3602_v46 = vadd.f32 %v3386_v37, %v6117_v48  ;;  %v3407_v34 = vadd.f32 %v4234_v11, %v6269_v33  ;;  %v2710_v49 = vpop.f32.mrf.mxu0 }
 0x2a4   :  { %v3398_v57 = vpop.f32.mrf.mxu1 }
 0x2a5   :  { %3667 = vst.msk [vmem:[%s6759_s6 + $0x68] sm:$0xff] %vm3653_vm2, %v3602_v46  ;;  %v3607_v59 = vadd.f32 %v3407_v34, %v6158_v3  ;;  %v3399_v10 = vadd.f32 %v6269_v33, %v3398_v57  ;;  %v6392_v55 = vpop.f32.mrf.mxu0 }
 0x2a6   :  { %v4235_v62 = vpop.f32.mrf.mxu1 }
 0x2a7   :  { %3672 = vst.msk [vmem:[%s6759_s6 + $0x90] sm:$0xff] %vm3653_vm2, %v3607_v59  ;;  %v3605_v48 = vadd.f32 %v3399_v10, %v6142_v63  ;;  %v3410_v35 = vadd.f32 %v4235_v62, %v6269_v33  ;;  %v2713_v5 = vpop.f32.mrf.mxu0 }
 0x2a8   :  { %v3401_v8 = vpop.f32.mrf.mxu1 }
 0x2a9   :  { %3670 = vst.msk [vmem:[%s6759_s6 + $0x80] sm:$0xff] %vm3653_vm2, %v3605_v48  ;;  %v3608_v3 = vadd.f32 %v3410_v35, %v6166_v50  ;;  %v3402_v41 = vadd.f32 %v6269_v33, %v3401_v8  ;;  %v6406_v20 = vpop.f32.mrf.mxu0 }
 0x2aa   :  { %v4238_v17 = vpop.f32.mrf.mxu1 }
 0x2ab   :  { %3673 = vst.msk [vmem:[%s6759_s6 + $0x98] sm:$0xff] %vm3653_vm2, %v3608_v3  ;;  %v3606_v63 = vadd.f32 %v3402_v41, %v6150_v61  ;;  %v3423_v47 = vadd.f32 %v4238_v17, %v6269_v33  ;;  %v2718_v26 = vpop.f32.mrf.mxu0 }
 0x2ac   :  { %v3414_v6 = vpop.f32.mrf.mxu1 }
 0x2ad   :  { %3671 = vst.msk [vmem:[%s6759_s6 + $0x88] sm:$0xff] %vm3653_vm2, %v3606_v63  ;;  %v3611_v50 = vadd.f32 %v3423_v47, %v6190_v52  ;;  %v3415_v51 = vadd.f32 %v6269_v33, %v3414_v6  ;;  %v6420_v53 = vpop.f32.mrf.mxu0 }
 0x2ae   :  { %v4239_v24 = vpop.f32.mrf.mxu1 }
 0x2af   :  { %3676 = vst.msk [vmem:[%s6759_s6 + $0xb0] sm:$0xff] %vm3653_vm2, %v3611_v50  ;;  %v3609_v61 = vadd.f32 %v3415_v51, %v6174_v18  ;;  %v3426_v37 = vadd.f32 %v4239_v24, %v6269_v33  ;;  %v2721_v11 = vpop.f32.mrf.mxu0 }
 0x2b0   :  { %v3417_v46 = vpop.f32.mrf.mxu1 }
 0x2b1   :  { %3674 = vst.msk [vmem:[%s6759_s6 + $0xa0] sm:$0xff] %vm3653_vm2, %v3609_v61  ;;  %v3612_v52 = vadd.f32 %v3426_v37, %v6198_v1  ;;  %v3418_v34 = vadd.f32 %v6269_v33, %v3417_v46  ;;  %v6434_v49 = vpop.f32.mrf.mxu0  ;;  %v2685_v37 = vadd.f32 %v6294_v40, %v5549_v27 }
 0x2b2   :  { %v4242_v57 = vpop.f32.mrf.mxu1 }
 0x2b3   :  { %3677 = vst.msk [vmem:[%s6759_s6 + $0xb8] sm:$0xff] %vm3653_vm2, %v3612_v52  ;;  %v3610_v18 = vadd.f32 %v3418_v34, %v6182_v44  ;;  %v3439_v59 = vadd.f32 %v4242_v57, %v6269_v33  ;;  %v2726_v10 = vpop.f32.mrf.mxu0  ;;  %v2974_v57 = vadd.f32 %v6139_v23, %v2685_v37 }
 0x2b4   :  { %v3430_v62 = vpop.f32.mrf.mxu1 }
 0x2b5   :  { %3675 = vst.msk [vmem:[%s6759_s6 + $0xa8] sm:$0xff] %vm3653_vm2, %v3610_v18  ;;  %v3615_v1 = vadd.f32 %v3439_v59, %v6222_v29  ;;  %v3431_v48 = vadd.f32 %v6269_v33, %v3430_v62  ;;  %v6448_v35 = vpop.f32.mrf.mxu0  ;;  %v6805_v18 = vld [vmem:[#allocation2_spill] sm:$0xff] }
 0x2b6   :  { %v4243_v5 = vpop.f32.mrf.mxu1 }
 0x2b7   :  { %3680 = vst.msk [vmem:[%s6759_s6 + $0xd0] sm:$0xff] %vm3653_vm2, %v3615_v1  ;;  %v3613_v44 = vadd.f32 %v3431_v48, %v6206_v9  ;;  %v3442_v8 = vadd.f32 %v4243_v5, %v6269_v33  ;;  %v2729_v3 = vpop.f32.mrf.mxu0  ;;  %v6806_v5 = vld [vmem:[#allocation31_spill] sm:$0xff] }
 0x2b8   :  { %v3433_v41 = vpop.f32.mrf.mxu1 }
 0x2b9   :  { %3678 = vst.msk [vmem:[%s6759_s6 + $0xc0] sm:$0xff] %vm3653_vm2, %v3613_v44  ;;  %v3616_v29 = vadd.f32 %v3442_v8, %v6230_v45  ;;  %v3434_v17 = vadd.f32 %v6269_v33, %v3433_v41  ;;  %v6462_v63 = vpop.f32.mrf.mxu0  ;;  %v6807_v8 = vld [vmem:[#allocation5_spill] sm:$0xff] }
 0x2ba   :  { %v4246_v47 = vpop.f32.mrf.mxu1 }
 0x2bb   :  { %3681 = vst.msk [vmem:[%s6759_s6 + $0xd8] sm:$0xff] %vm3653_vm2, %v3616_v29  ;;  %v3614_v9 = vadd.f32 %v3434_v17, %v6214_v22  ;;  %v3455_v26 = vadd.f32 %v4246_v47, %v6269_v33  ;;  %v2734_v6 = vpop.f32.mrf.mxu0  ;;  %v6808_v47 = vld [vmem:[#allocation3_spill] sm:$0xff] }
 0x2bc   :  { %v3446_v50 = vpop.f32.mrf.mxu1 }
 0x2bd   :  { %3679 = vst.msk [vmem:[%s6759_s6 + $0xc8] sm:$0xff] %vm3653_vm2, %v3614_v9  ;;  %v3619_v45 = vadd.f32 %v3455_v26, %v6254_v14  ;;  %v3447_v51 = vadd.f32 %v6269_v33, %v3446_v50  ;;  %v6476_v24 = vpop.f32.mrf.mxu0  ;;  %v2693_v9 = vadd.f32 %v6322_v36, %v6808_v47 }
 0x2be   :  { %v4247_v61 = vpop.f32.mrf.mxu1 }
 0x2bf   :  { %3684 = vst.msk [vmem:[%s6759_s6 + $0xf0] sm:$0xff] %vm3653_vm2, %v3619_v45  ;;  %v3617_v22 = vadd.f32 %v3447_v51, %v6238_v54  ;;  %v3458_v11 = vadd.f32 %v4247_v61, %v6269_v33  ;;  %v2737_v46 = vpop.f32.mrf.mxu0  ;;  %v2688_v54 = vadd.f32 %v6308_v16, %v6805_v18  ;;  %v6809_v45 = vld [vmem:[#allocation6_spill] sm:$0xff] }
 0x2c0   :  { %v3449_v52 = vpop.f32.mrf.mxu1  ;;  %v2704_v51 = vadd.f32 %v6364_v7, %v6809_v45  ;;  %v6818_v45 = vld [vmem:[#allocation13_spill] sm:$0xff] }
 0x2c1   :  { %3682 = vst.msk [vmem:[%s6759_s6 + $0xe0] sm:$0xff] %vm3653_vm2, %v3617_v22  ;;  %v3620_v14 = vadd.f32 %v3458_v11, %v6262_v28  ;;  %v3450_v27 = vadd.f32 %v6269_v33, %v3449_v52  ;;  %v6492_v40 = vpop.f32.mrf.mxu0  ;;  %v2977_v44 = vadd.f32 %v6806_v5, %v2688_v54  ;;  %v6810_v11 = vld [vmem:[#allocation32_spill] sm:$0xff] }
 0x2c2   :  { %v4250_v34 = vpop.f32.mrf.mxu1  ;;  %v2982_v46 = vadd.f32 %v6810_v11, %v2693_v9  ;;  %v6811_v52 = vld [vmem:[#allocation4_spill] sm:$0xff] }
 0x2c3   :  { %3685 = vst.msk [vmem:[%s6759_s6 + $0xf8] sm:$0xff] %vm3653_vm2, %v3620_v14  ;;  %v3618_v59 = vadd.f32 %v3450_v27, %v6246_v4  ;;  %v3471_v10 = vadd.f32 %v4250_v34, %v6269_v33  ;;  %v2742_v28 = vpop.f32.mrf.mxu0  ;;  %v2701_v4 = vadd.f32 %v6350_v31, %v6807_v8  ;;  %v2696_v14 = vadd.f32 %v6336_v39, %v6811_v52  ;;  %v6815_v8 = vld [vmem:[#allocation10_spill] sm:$0xff]  ;;  %v6817_v9 = vld [vmem:[#allocation8_spill] sm:$0xff] }
 0x2c4   :  { %v3462_v62 = vpop.f32.mrf.mxu1  ;;  %v2993_v34 = vadd.f32 %v6163_v43, %v2704_v51  ;;  %v6813_v28 = vld [vmem:[#allocation33_spill] sm:$0xff]  ;;  %v2733_v51 = vadd.f32 %v6462_v63, %v6818_v45 }
 0x2c5   :  { %3683 = vst.msk [vmem:[%s6759_s6 + $0xe8] sm:$0xff] %vm3653_vm2, %v3618_v59  ;;  %v3623_v23 = vadd.f32 %v3471_v10, %v2974_v57  ;;  %v3463_v1 = vadd.f32 %v6269_v33, %v3462_v62  ;;  %v6508_v16 = vpop.f32.mrf.mxu0  ;;  %v6812_v57 = vld [vmem:[#allocation9_spill] sm:$0xff]  ;;  %v2985_v62 = vadd.f32 %v6813_v28, %v2696_v14 }
 0x2c6   :  { %v4251_v48 = vpop.f32.mrf.mxu1  ;;  %v2717_v18 = vadd.f32 %v6406_v20, %v6812_v57 }
 0x2c7   :  { %3688 = vst.msk [vmem:[%s6759_s6 + $0x110] sm:$0xff] %vm3653_vm2, %v3623_v23  ;;  %v3621_v3 = vadd.f32 %v3463_v1, %v6274_v19  ;;  %v3474_v41 = vadd.f32 %v4251_v48, %v6269_v33  ;;  %v2745_v29 = vpop.f32.mrf.mxu0  ;;  %v2990_v19 = vadd.f32 %v6155_v25, %v2701_v4  ;;  %v6814_v23 = vld [vmem:[#allocation7_spill] sm:$0xff]  ;;  %v2720_v4 = vadd.f32 %v6420_v53, %v6815_v8 }
 0x2c8   :  { %v3465_v17 = vpop.f32.mrf.mxu1  ;;  %v2709_v1 = vadd.f32 %v6378_v30, %v6814_v23 }
 0x2c9   :  { %3686 = vst.msk [vmem:[%s6759_s6 + $0x100] sm:$0xff] %vm3653_vm2, %v3621_v3  ;;  %v3624_v31 = vadd.f32 %v3474_v41, %v2977_v44  ;;  %v3466_v26 = vadd.f32 %v6269_v33, %v3465_v17  ;;  %v6526_v6 = vpop.f32.mrf.mxu0  ;;  %v3006_v44 = vadd.f32 %v6171_v21, %v2717_v18  ;;  %v6816_v17 = vld [vmem:[#allocation34_spill] sm:$0xff] }
 0x2ca   :  { %v4254_v50 = vpop.f32.mrf.mxu1  ;;  %v2998_v47 = vadd.f32 %v6816_v17, %v2709_v1 }
 0x2cb   :  { %3689 = vst.msk [vmem:[%s6759_s6 + $0x118] sm:$0xff] %vm3653_vm2, %v3624_v31  ;;  %v3622_v36 = vadd.f32 %v3466_v26, %v6286_v2  ;;  %v3487_v61 = vadd.f32 %v4254_v50, %v6269_v33  ;;  %v2750_v37 = vpop.f32.mrf.mxu0  ;;  %v2712_v31 = vadd.f32 %v6392_v55, %v6817_v9  ;;  %v6827_v9 = vld [vmem:[#allocation18_spill] sm:$0xff] }
 0x2cc   :  { %v3478_v22 = vpop.f32.mrf.mxu1 }
 0x2cd   :  { %3687 = vst.msk [vmem:[%s6759_s6 + $0x108] sm:$0xff] %vm3653_vm2, %v3622_v36  ;;  %v3627_v25 = vadd.f32 %v3487_v61, %v2990_v19  ;;  %v3479_v7 = vadd.f32 %v6269_v33, %v3478_v22  ;;  %v6545_v27 = vpop.f32.mrf.mxu0  ;;  %v3009_v19 = vadd.f32 %v6179_v15, %v2720_v4  ;;  %v6819_v22 = vld [vmem:[#allocation35_spill] sm:$0xff]  ;;  %v6825_v4 = vld [vmem:[#allocation37_spill] sm:$0xff] }
 0x2ce   :  { %v4255_v2 = vpop.f32.mrf.mxu1  ;;  %v3001_v11 = vadd.f32 %v6819_v22, %v2712_v31  ;;  %v2752_v31 = vadd.f32 %v6545_v27, %v6827_v9  ;;  %v6830_v22 = vld [vmem:[#allocation21_spill] sm:$0xff] }
 0x2cf   :  { %3692 = vst.msk [vmem:[%s6759_s6 + $0x130] sm:$0xff] %vm3653_vm2, %v3627_v25  ;;  %v3625_v39 = vadd.f32 %v3479_v7, %v2982_v46  ;;  %v3490_v54 = vadd.f32 %v4255_v2, %v6269_v33  ;;  %v2753_v59 = vpop.f32.mrf.mxu0  ;;  %v6820_v46 = vld [vmem:[#allocation11_spill] sm:$0xff]  ;;  %v3022_v7 = vadd.f32 %v6187_v58, %v2733_v51  ;;  %v6821_v2 = vld [vmem:[#allocation14_spill] sm:$0xff]  ;;  %v6829_v51 = vld [vmem:[#allocation16_spill] sm:$0xff] }
 0x2d0   :  { %v3481_v10 = vpop.f32.mrf.mxu1  ;;  %v2725_v52 = vadd.f32 %v6434_v49, %v6820_v46 }
 0x2d1   :  { %3690 = vst.msk [vmem:[%s6759_s6 + $0x120] sm:$0xff] %vm3653_vm2, %v3625_v39  ;;  %v3628_v43 = vadd.f32 %v3490_v54, %v2993_v34  ;;  %v3482_v20 = vadd.f32 %v6269_v33, %v3481_v10  ;;  %v6563_v48 = vpop.f32.mrf.mxu0  ;;  %v2736_v34 = vadd.f32 %v6476_v24, %v6821_v2  ;;  %v6822_v54 = vld [vmem:[#allocation36_spill] sm:$0xff] }
 0x2d2   :  { %v4258_v5 = vpop.f32.mrf.mxu1  ;;  %v3014_v59 = vadd.f32 %v6822_v54, %v2725_v52  ;;  %v6823_v10 = vld [vmem:[#allocation12_spill] sm:$0xff] }
 0x2d3   :  { %3693 = vst.msk [vmem:[%s6759_s6 + $0x138] sm:$0xff] %vm3653_vm2, %v3628_v43  ;;  %v3626_v30 = vadd.f32 %v3482_v20, %v2985_v62  ;;  %v3503_v3 = vadd.f32 %v4258_v5, %v6269_v33  ;;  %v2758_v41 = vpop.f32.mrf.mxu0  ;;  %v2728_v28 = vadd.f32 %v6448_v35, %v6823_v10  ;;  %v3025_v1 = vadd.f32 %v6195_v42, %v2736_v34  ;;  %v6824_v43 = vld [vmem:[#allocation17_spill] sm:$0xff] }
 0x2d4   :  { %v3494_v29 = vpop.f32.mrf.mxu1  ;;  %v2749_v20 = vadd.f32 %v6526_v6, %v6824_v43 }
 0x2d5   :  { %3691 = vst.msk [vmem:[%s6759_s6 + $0x128] sm:$0xff] %vm3653_vm2, %v3626_v30  ;;  %v3631_v21 = vadd.f32 %v3503_v3, %v3006_v44  ;;  %v3495_v53 = vadd.f32 %v6269_v33, %v3494_v29  ;;  %v6581_v26 = vpop.f32.mrf.mxu0  ;;  %v3017_v30 = vadd.f32 %v6825_v4, %v2728_v28  ;;  %v6826_v3 = vld [vmem:[#allocation15_spill] sm:$0xff]  ;;  %v6834_v28 = vld [vmem:[#allocation40_spill] sm:$0xff] }
 0x2d6   :  { %v4259_v50 = vpop.f32.mrf.mxu1  ;;  %v2741_v41 = vadd.f32 %v6492_v40, %v6826_v3 }
 0x2d7   :  { %3696 = vst.msk [vmem:[%s6759_s6 + $0x150] sm:$0xff] %vm3653_vm2, %v3631_v21  ;;  %v3629_v55 = vadd.f32 %v3495_v53, %v2998_v47  ;;  %v3506_v36 = vadd.f32 %v4259_v50, %v6269_v33  ;;  %v2761_v61 = vpop.f32.mrf.mxu0  ;;  %v3038_v47 = vadd.f32 %v6203_v56, %v2749_v20 }
 0x2d8   :  { %v3497_v37 = vpop.f32.mrf.mxu1 }
 0x2d9   :  { %3694 = vst.msk [vmem:[%s6759_s6 + $0x140] sm:$0xff] %vm3653_vm2, %v3629_v55  ;;  %v3632_v15 = vadd.f32 %v3506_v36, %v3009_v19  ;;  %v3498_v63 = vadd.f32 %v6269_v33, %v3497_v37  ;;  %v2764_v14 = vpop.f32.mrf.mxu0  ;;  %v6828_v19 = vld [vmem:[#allocation38_spill] sm:$0xff]  ;;  %v2744_v55 = vadd.f32 %v6508_v16, %v6829_v51  ;;  %v3041_v37 = vadd.f32 %v6211_v32, %v2752_v31  ;;  %v6841_v51 = vld [vmem:[#allocation24_spill] sm:$0xff] }
 0x2da   :  { %v4262_v25 = vpop.f32.mrf.mxu1  ;;  %v3030_v45 = vadd.f32 %v6828_v19, %v2741_v41  ;;  %v6838_v41 = vld [vmem:[#allocation23_spill] sm:$0xff]  ;;  %v6839_v31 = vld [vmem:[#allocation26_spill] sm:$0xff] }
 0x2db   :  { %3697 = vst.msk [vmem:[%s6759_s6 + $0x158] sm:$0xff] %vm3653_vm2, %v3632_v15  ;;  %v3630_v49 = vadd.f32 %v3498_v63, %v3001_v11  ;;  %v3519_v57 = vadd.f32 %v4262_v25, %v6269_v33  ;;  %v2766_v18 = vpop.f32.mrf.mxu0  ;;  %v2765_v11 = vadd.f32 %v2764_v14, %v6830_v22  ;;  %v6831_v63 = vld [vmem:[#allocation39_spill] sm:$0xff]  ;;  %v6840_v19 = vld [vmem:[#allocation42_spill] sm:$0xff] }
 0x2dc   :  { %v3510_v39 = vpop.f32.mrf.mxu1  ;;  %v3033_v25 = vadd.f32 %v6831_v63, %v2744_v55  ;;  %v6833_v18 = vld [vmem:[#allocation22_spill] sm:$0xff] }
 0x2dd   :  { %3695 = vst.msk [vmem:[%s6759_s6 + $0x148] sm:$0xff] %vm3653_vm2, %v3630_v49  ;;  %v3635_v58 = vadd.f32 %v3519_v57, %v3022_v7  ;;  %v3511_v24 = vadd.f32 %v6269_v33, %v3510_v39  ;;  %v2767_v62 = vpop.f32.mrf.mxu0  ;;  %v6832_v7 = vld [vmem:[#allocation19_spill] sm:$0xff]  ;;  %v3054_v57 = vadd.f32 %v6219_v60, %v2765_v11 }
 0x2de   :  { %v4263_v23 = vpop.f32.mrf.mxu1  ;;  %v2757_v2 = vadd.f32 %v6563_v48, %v6832_v7  ;;  %v2768_v39 = vadd.f32 %v2767_v62, %v6833_v18 }
 0x2df   :  { %3700 = vst.msk [vmem:[%s6759_s6 + $0x170] sm:$0xff] %vm3653_vm2, %v3635_v58  ;;  %v3633_v35 = vadd.f32 %v3511_v24, %v3014_v59  ;;  %v3522_v5 = vadd.f32 %v4263_v23, %v6269_v33  ;;  %v2769_v44 = vpop.f32.mrf.mxu0  ;;  %v6835_v24 = vld [vmem:[#allocation20_spill] sm:$0xff] }
 0x2e0   :  { %v3513_v8 = vpop.f32.mrf.mxu1  ;;  %v3046_v58 = vadd.f32 %v6834_v28, %v2757_v2  ;;  %v2760_v23 = vadd.f32 %v6581_v26, %v6835_v24  ;;  %v3057_v20 = vadd.f32 %v6227_v13, %v2768_v39  ;;  %v6844_v2 = vld [vmem:[#allocation29_spill] sm:$0xff] }
 0x2e1   :  { %3698 = vst.msk [vmem:[%s6759_s6 + $0x160] sm:$0xff] %vm3653_vm2, %v3633_v35  ;;  %v3636_v42 = vadd.f32 %v3522_v5, %v3025_v1  ;;  %v3514_v6 = vadd.f32 %v6269_v33, %v3513_v8  ;;  %v2772_v29 = vpop.f32.mrf.mxu0  ;;  %v6836_v35 = vld [vmem:[#allocation25_spill] sm:$0xff] }
 0x2e2   :  { %v4266_v17 = vpop.f32.mrf.mxu1 }
 0x2e3   :  { %3701 = vst.msk [vmem:[%s6759_s6 + $0x178] sm:$0xff] %vm3653_vm2, %v3636_v42  ;;  %v3634_v40 = vadd.f32 %v3514_v6, %v3017_v30  ;;  %v3535_v21 = vadd.f32 %v4266_v17, %v6269_v33  ;;  %v2774_v53 = vpop.f32.mrf.mxu0  ;;  %v6837_v30 = vld [vmem:[#allocation41_spill] sm:$0xff]  ;;  %v2773_v42 = vadd.f32 %v2772_v29, %v6838_v41 }
 0x2e4   :  { %v3526_v50 = vpop.f32.mrf.mxu1  ;;  %v3049_v3 = vadd.f32 %v6837_v30, %v2760_v23  ;;  %v6847_v23 = vld [vmem:[#allocation30_spill] sm:$0xff] }
 0x2e5   :  { %3699 = vst.msk [vmem:[%s6759_s6 + $0x168] sm:$0xff] %vm3653_vm2, %v3634_v40  ;;  %v3639_v56 = vadd.f32 %v3535_v21, %v3038_v47  ;;  %v3527_v27 = vadd.f32 %v6269_v33, %v3526_v50  ;;  %v2775_v36 = vpop.f32.mrf.mxu0 }
 0x2e6   :  { %v4267_v61 = vpop.f32.mrf.mxu1  ;;  %v2776_v55 = vadd.f32 %v2775_v36, %v6841_v51 }
 0x2e7   :  { %3704 = vst.msk [vmem:[%s6759_s6 + $0x190] sm:$0xff] %vm3653_vm2, %v3639_v56  ;;  %v3637_v16 = vadd.f32 %v3527_v27, %v3030_v45  ;;  %v3538_v46 = vadd.f32 %v4267_v61, %v6269_v33  ;;  %v2777_v52 = vpop.f32.mrf.mxu0  ;;  %v3062_v45 = vadd.f32 %v6840_v19, %v2773_v42 }
 0x2e8   :  { %v3529_v15 = vpop.f32.mrf.mxu1 }
 0x2e9   :  { %3702 = vst.msk [vmem:[%s6759_s6 + $0x180] sm:$0xff] %vm3653_vm2, %v3637_v16  ;;  %v3640_v32 = vadd.f32 %v3538_v46, %v3041_v37  ;;  %v3530_v14 = vadd.f32 %v6269_v33, %v3529_v15  ;;  %v2780_v34 = vpop.f32.mrf.mxu0  ;;  %v6842_v46 = vld [vmem:[#allocation43_spill] sm:$0xff] }
 0x2ea   :  { %v4270_v49 = vpop.f32.mrf.mxu1  ;;  %v2781_v5 = vadd.f32 %v2780_v34, %v6836_v35  ;;  %v3065_v52 = vadd.f32 %v6842_v46, %v2776_v55  ;;  %v6843_v15 = vld [vmem:[#allocation27_spill] sm:$0xff] }
 0x2eb   :  { %3705 = vst.msk [vmem:[%s6759_s6 + $0x198] sm:$0xff] %vm3653_vm2, %v3640_v32  ;;  %v3638_v48 = vadd.f32 %v3530_v14, %v3033_v25  ;;  %v3551_v54 = vadd.f32 %v4270_v49, %v6269_v33  ;;  %v2782_v59 = vpop.f32.mrf.mxu0 }
 0x2ec   :  { %v3542_v10 = vpop.f32.mrf.mxu1  ;;  %v3070_v9 = vadd.f32 %v6235_v12, %v2781_v5  ;;  %v6846_v59 = vld [vmem:[#allocation28_spill] sm:$0xff] }
 0x2ed   :  { %3703 = vst.msk [vmem:[%s6759_s6 + $0x188] sm:$0xff] %vm3653_vm2, %v3638_v48  ;;  %v3643_v60 = vadd.f32 %v3551_v54, %v3054_v57  ;;  %v3543_v62 = vadd.f32 %v6269_v33, %v3542_v10  ;;  %v2783_v1 = vpop.f32.mrf.mxu0  ;;  %v6845_v48 = vld [vmem:[#allocation44_spill] sm:$0xff] }
 0x2ee   :  { %v4271_v43 = vpop.f32.mrf.mxu1  ;;  %v2784_v40 = vadd.f32 %v2783_v1, %v6839_v31 }
 0x2ef   :  { %3708 = vst.msk [vmem:[%s6759_s6 + $0x1b0] sm:$0xff] %vm3653_vm2, %v3643_v60  ;;  %v3641_v26 = vadd.f32 %v3543_v62, %v3046_v58  ;;  %v3554_v44 = vadd.f32 %v4271_v43, %v6269_v33  ;;  %v2785_v8 = vpop.f32.mrf.mxu0  ;;  %v6848_v43 = vld [vmem:[#allocation45_spill] sm:$0xff] }
 0x2f0   :  { %v3545_v4 = vpop.f32.mrf.mxu1  ;;  %v3073_v37 = vadd.f32 %v6243_v0, %v2784_v40 }
 0x2f1   :  { %3706 = vst.msk [vmem:[%s6759_s6 + $0x1a0] sm:$0xff] %vm3653_vm2, %v3641_v26  ;;  %v3644_v13 = vadd.f32 %v3554_v44, %v3057_v20  ;;  %v3546_v6 = vadd.f32 %v6269_v33, %v3545_v4  ;;  %v2788_v17 = vpop.f32.mrf.mxu0  ;;  %v6849_v26 = vld [vmem:[#allocation46_spill] sm:$0xff] }
 0x2f2   :  { %v4274_v47 = vpop.f32.mrf.mxu1  ;;  %v2789_v63 = vadd.f32 %v2788_v17, %v6843_v15 }
 0x2f3   :  { %3709 = vst.msk [vmem:[%s6759_s6 + $0x1b8] sm:$0xff] %vm3653_vm2, %v3644_v13  ;;  %v3642_v29 = vadd.f32 %v3546_v6, %v3049_v3  ;;  %v3567_v21 = vadd.f32 %v4274_v47, %v6269_v33  ;;  %v2790_v53 = vpop.f32.mrf.mxu0 }
 0x2f4   :  { %v3558_v50 = vpop.f32.mrf.mxu1  ;;  %v3078_v54 = vadd.f32 %v6845_v48, %v2789_v63 }
 0x2f5   :  { %3707 = vst.msk [vmem:[%s6759_s6 + $0x1a8] sm:$0xff] %vm3653_vm2, %v3642_v29  ;;  %v3647_v12 = vadd.f32 %v3567_v21, %v3070_v9  ;;  %v3559_v56 = vadd.f32 %v6269_v33, %v3558_v50  ;;  %v2791_v27 = vpop.f32.mrf.mxu0 }
 0x2f6   :  { %v4275_v61 = vpop.f32.mrf.mxu1  ;;  %v2792_v10 = vadd.f32 %v2791_v27, %v6846_v59 }
 0x2f7   :  { %3712 = vst.msk [vmem:[%s6759_s6 + $0x1d0] sm:$0xff] %vm3653_vm2, %v3647_v12  ;;  %v3645_v22 = vadd.f32 %v3559_v56, %v3062_v45  ;;  %v3570_v36 = vadd.f32 %v4275_v61, %v6269_v33  ;;  %v2793_v11 = vpop.f32.mrf.mxu0 }
 0x2f8   :  { %v3561_v16 = vpop.f32.mrf.mxu1  ;;  %v3081_v44 = vadd.f32 %v6849_v26, %v2792_v10 }
 0x2f9   :  { %3710 = vst.msk [vmem:[%s6759_s6 + $0x1c0] sm:$0xff] %vm3653_vm2, %v3645_v22  ;;  %v3648_v0 = vadd.f32 %v3570_v36, %v3073_v37  ;;  %v3562_v25 = vadd.f32 %v6269_v33, %v3561_v16  ;;  %v2796_v7 = vpop.f32.mrf.mxu0 }
 0x2fa   :  { %v2797_v32 = vadd.f32 %v2796_v7, %v6844_v2  ;;  %v4278_v14 = vpop.f32.mrf.mxu1 }
 0x2fb   :  { %3713 = vst.msk [vmem:[%s6759_s6 + $0x1d8] sm:$0xff] %vm3653_vm2, %v3648_v0  ;;  %v3646_v34 = vadd.f32 %v3562_v25, %v3065_v52  ;;  %v2798_v49 = vpop.f32.mrf.mxu0  ;;  %v3583_v18 = vadd.f32 %v4278_v14, %v6269_v33 }
 0x2fc   :  { %v3086_v57 = vadd.f32 %v6251_v38, %v2797_v32  ;;  %v3574_v39 = vpop.f32.mrf.mxu1 }
 0x2fd   :  { %3711 = vst.msk [vmem:[%s6759_s6 + $0x1c8] sm:$0xff] %vm3653_vm2, %v3646_v34  ;;  %v3575_v28 = vadd.f32 %v6269_v33, %v3574_v39  ;;  %v2799_v58 = vpop.f32.mrf.mxu0 }
 0x2fe   :  { %v3651_v24 = vadd.f32 %v3583_v18, %v3086_v57  ;;  %v2800_v60 = vadd.f32 %v2799_v58, %v6847_v23  ;;  %v4279_v62 = vpop.f32.mrf.mxu1 }
 0x2ff   :  { %v3649_v38 = vadd.f32 %v3575_v28, %v3078_v54  ;;  %v2801_v1 = vpop.f32.mrf.mxu0  ;;  %v3586_v35 = vadd.f32 %v4279_v62, %v6269_v33 }
 0x300   :  { %3716 = vst.msk [vmem:[%s6759_s6 + $0x1f0] sm:$0xff] %vm3653_vm2, %v3651_v24  ;;  %v3089_v20 = vadd.f32 %v6848_v43, %v2800_v60  ;;  %v3577_v5 = vpop.f32.mrf.mxu1 }
 0x301   :  { %3714 = vst.msk [vmem:[%s6759_s6 + $0x1e0] sm:$0xff] %vm3653_vm2, %v3649_v38  ;;  %v3578_v8 = vadd.f32 %v6269_v33, %v3577_v5 }
 0x302   :  { %v3652_v4 = vadd.f32 %v3586_v35, %v3089_v20 }
 0x303   :  { %v3650_v30 = vadd.f32 %v3578_v8, %v3081_v44 }
 0x304   :  { %3717 = vst.msk [vmem:[%s6759_s6 + $0x1f8] sm:$0xff] %vm3653_vm2, %v3652_v4 }
 0x305   :  { %3715 = vst.msk [vmem:[%s6759_s6 + $0x1e8] sm:$0xff] %vm3653_vm2, %v3650_v30 }

</bundles_post_ra>
